<compile_context>
chip_gen: v7x
topology: tpu7x:2x2x1
jax: 0.10.0
libtpu: 0.0.40
codegen_flags: <defaults>
</compile_context>

<pallas_src>
import functools

import jax
import jax.numpy as jnp
from jax import lax
from jax.experimental import pallas as pl
from jax.experimental.pallas import tpu as pltpu


ACT_DTYPE = jnp.bfloat16
_VMEM_LIMIT = 32 * 1024 * 1024   # safe scoped-VMEM request on v5e/v6e/v7x


# ------------------------------ small helpers ------------------------------

def _round_up(x, m):
    return -(-x // m) * m


def _pick_tile(dim, target, unit):
    # dim is a multiple of `unit`; return the largest multiple of `unit` that is
    # <= target and divides dim (falls back to `unit`).
    t = min(target, dim)
    t -= t % unit
    while dim % t:
        t -= unit
    return t


def _choose_row_tile(n, unit, target):
    # Choose (tile, padded_n): prefer a divisor-friendly tile; otherwise pad the
    # row dim up to a multiple of `target` (padded rows are zero -> harmless).
    n_up = _round_up(n, unit)
    if n_up <= target:
        return n_up, n_up
    t = _pick_tile(n_up, target, unit)
    if t >= max(unit, target // 4):
        return t, n_up
    return target, _round_up(n_up, target)


def _pad_to(x, shape):
    pads = [(0, s - d) for d, s in zip(x.shape, shape)]
    if all(p == (0, 0) for p in pads):
        return x
    return jnp.pad(x, pads)


def _standardize_weight(w):
    # w: (cout, cin, kh, kw) f32; full-filter stats, unbiased=False, eps=1e-5.
    m = jnp.mean(w, axis=(1, 2, 3), keepdims=True)
    v = jnp.mean(jnp.square(w - m), axis=(1, 2, 3), keepdims=True)
    return (w - m) / jnp.sqrt(v + 1e-5)


# --------------------------- tiled conv matmul ------------------------------

def _matmul_kernel(p_ref, w_ref, o_ref, acc_ref):
    @pl.when(pl.program_id(2) == 0)
    def _init():
        acc_ref[...] = jnp.zeros_like(acc_ref)

    acc_ref[...] += jnp.dot(p_ref[...], w_ref[...],
                            preferred_element_type=jnp.float32)

    @pl.when(pl.program_id(2) == pl.num_programs(2) - 1)
    def _store():
        o_ref[...] = acc_ref[...].astype(o_ref.dtype)


def _tiled_matmul(p, w):
    # p: (M, K) bf16, w: (K, N) bf16 with K % 128 == 0, N % 128 == 0.
    # Returns (M, N) bf16 (f32 accumulation in VMEM scratch).
    M, K = p.shape
    _, N = w.shape
    tm, Mp = _choose_row_tile(M, 16, 1024)
    tk = _pick_tile(K, 512, 128)
    tn = _pick_tile(N, 512, 128)
    p = _pad_to(p, (Mp, K))
    grid = (Mp // tm, N // tn, K // tk)
    out = pl.pallas_call(
        _matmul_kernel,
        out_shape=jax.ShapeDtypeStruct((Mp, N), ACT_DTYPE),
        grid=grid,
        in_specs=[pl.BlockSpec((tm, tk), lambda i, j, k: (i, k)),
                  pl.BlockSpec((tk, tn), lambda i, j, k: (k, j))],
        out_specs=pl.BlockSpec((tm, tn), lambda i, j, k: (i, j)),
        scratch_shapes=[pltpu.VMEM((tm, tn), jnp.float32)],
        compiler_params=pltpu.CompilerParams(
            dimension_semantics=("parallel", "parallel", "arbitrary"),
            vmem_limit_bytes=_VMEM_LIMIT),
        cost_estimate=pl.CostEstimate(
            flops=2 * Mp * N * K,
            transcendentals=0,
            bytes_accessed=(Mp * K * 2) * (N // tn)
                           + (K * N * 2) * (Mp // tm)
                           + Mp * N * 2),
    )(p, w)
    return out[:M]


# ------------------------------ conv wrappers -------------------------------

def _conv1x1(x_nhwc, w_ochw, stride=1):
    # 1x1 conv: pure matmul, no patch duplication.  x carries zero-padded lanes;
    # the weight gets zero rows for those lanes.
    cout, cin = w_ochw.shape[:2]
    if stride != 1:
        x_nhwc = x_nhwc[:, ::stride, ::stride, :]
    B, H, W, Cp = x_nhwc.shape
    Np = _round_up(cout, 128)
    ws = _standardize_weight(w_ochw)[:, :, 0, 0]          # (cout, cin)
    w2d = _pad_to(ws.T, (Cp, Np)).astype(ACT_DTYPE)       # zero rows/cols for padding
    M = B * H * W
    p = x_nhwc.reshape(M, Cp).astype(ACT_DTYPE)
    out = _tiled_matmul(p, w2d)
    return out.reshape(B, H, W, Np)


def _conv_im2col(x_nhwc, w_ochw, stride, pad):
    # TODO(synk): strided spatial convs (root 7x7/s2 and the two 3x3/s2 stage
    # transitions) still materialize im2col patches in HBM; fold the taps into
    # the K axis as done for the stride-1 3x3 kernel below.
    cout, cin, kh, kw = w_ochw.shape
    B, H, W, Cx = x_nhwc.shape                            # Cx >= cin, padding is zero
    ws = _standardize_weight(w_ochw)
    ws = jnp.pad(ws, ((0, 0), (0, Cx - cin), (0, 0), (0, 0)))
    if pad > 0:
        x_nhwc = jnp.pad(x_nhwc, ((0, 0), (pad, pad), (pad, pad), (0, 0)))
    Hp, Wp = x_nhwc.shape[1], x_nhwc.shape[2]
    Ho = (Hp - kh) // stride + 1
    Wo = (Wp - kw) // stride + 1
    cols = []
    for i in range(kh):
        for j in range(kw):
            cols.append(x_nhwc[:, i:i + stride * (Ho - 1) + 1:stride,
                               j:j + stride * (Wo - 1) + 1:stride, :])
    patches = jnp.concatenate(cols, axis=-1).reshape(B * Ho * Wo, kh * kw * Cx)
    w2d = jnp.transpose(ws, (2, 3, 1, 0)).reshape(kh * kw * Cx, cout)
    K = patches.shape[1]
    Kp = _round_up(K, 128)
    Np = _round_up(cout, 128)
    p_pad = _pad_to(patches, (patches.shape[0], Kp)).astype(ACT_DTYPE)
    w_pad = _pad_to(w2d, (Kp, Np)).astype(ACT_DTYPE)
    out = _tiled_matmul(p_pad, w_pad)
    return out.reshape(B, Ho, Wo, Np)


# ---------------- 3x3 / stride-1 conv: no im2col, taps in-kernel ------------

def _conv3x3_kernel(x_ref, w_ref, o_ref, *, ho, wo):
    # x_ref: (Hp, Wp, Cp) bf16 (spatially padded image, one batch element)
    # w_ref: (9, Cp, Np) bf16 (tap-major, zero rows/cols for channel padding)
    # o_ref: (Ho, Wo, Np) bf16
    np_ = o_ref.shape[-1]

    def body(oy, carry):
        acc = jnp.zeros((wo, np_), jnp.float32)
        for dy in range(3):
            row = x_ref[oy + dy]                          # (Wp, Cp)
            for dx in range(3):
                acc += jnp.dot(row[dx:dx + wo, :], w_ref[dy * 3 + dx],
                               preferred_element_type=jnp.float32)
        o_ref[oy] = acc.astype(o_ref.dtype)
        return carry

    lax.fori_loop(0, ho, body, 0)


def _conv3x3_s1(x_nhwc, w_ochw):
    cout, cin = w_ochw.shape[:2]
    B, H, W, Cp = x_nhwc.shape
    Np = _round_up(cout, 128)
    ws = _standardize_weight(w_ochw)                      # (cout, cin, 3, 3)
    ws = jnp.pad(ws, ((0, Np - cout), (0, Cp - cin), (0, 0), (0, 0)))
    w9 = jnp.transpose(ws, (2, 3, 1, 0)).reshape(9, Cp, Np).astype(ACT_DTYPE)
    xp = jnp.pad(x_nhwc, ((0, 0), (1, 1), (1, 1), (0, 0)))
    Hp, Wp = H + 2, W + 2
    return pl.pallas_call(
        functools.partial(_conv3x3_kernel, ho=H, wo=W),
        out_shape=jax.ShapeDtypeStruct((B, H, W, Np), ACT_DTYPE),
        grid=(B,),
        in_specs=[pl.BlockSpec((None, Hp, Wp, Cp), lambda b: (b, 0, 0, 0)),
                  pl.BlockSpec((9, Cp, Np), lambda b: (0, 0, 0))],
        out_specs=pl.BlockSpec((None, H, W, Np), lambda b: (b, 0, 0, 0)),
        compiler_params=pltpu.CompilerParams(
            dimension_semantics=("parallel",),
            vmem_limit_bytes=_VMEM_LIMIT),
        cost_estimate=pl.CostEstimate(
            flops=2 * B * H * W * 9 * Cp * Np,
            transcendentals=0,
            bytes_accessed=(B * Hp * Wp * Cp + 9 * Cp * Np + B * H * W * Np) * 2),
    )(xp, w9)


def _conv3x3(x_nhwc, w_ochw, stride):
    if stride == 1:
        B, H, W, Cp = x_nhwc.shape
        Np = _round_up(w_ochw.shape[0], 128)
        # whole-image-per-batch footprint (inputs/outputs double buffered)
        footprint = (2 * (H + 2) * (W + 2) * Cp + 2 * 9 * Cp * Np
                     + 2 * H * W * Np) * 2
        if footprint <= 24 * 1024 * 1024:
            return _conv3x3_s1(x_nhwc, w_ochw)
    return _conv_im2col(x_nhwc, w_ochw, stride=stride, pad=1)


# ------------------------------ GroupNorm ----------------------------------

def _gn_stats_kernel(x_ref, s1_ref, s2_ref):
    @pl.when(pl.program_id(1) == 0)
    def _init():
        s1_ref[...] = jnp.zeros_like(s1_ref)
        s2_ref[...] = jnp.zeros_like(s2_ref)
    x = x_ref[...].astype(jnp.float32)                    # (1, tr, Cp)
    s1_ref[...] += jnp.sum(x, axis=1, keepdims=True)
    s2_ref[...] += jnp.sum(x * x, axis=1, keepdims=True)


def _gn_fold(x_nhwc, gamma, beta, groups, eps):
    # Pass 1 (per-(batch, channel) sums) + tiny group fold in plain JAX.
    # Returns folded (scale, bias) of shape (B, 1, Cp) f32 so that
    # GN(x)*gamma + beta == x * scale + bias.
    B, H, W, Cp = x_nhwc.shape
    C = gamma.shape[0]
    cg = C // groups
    HW = H * W
    tr, HWp = _choose_row_tile(HW, 8, 1024)
    x3 = _pad_to(x_nhwc.reshape(B, HW, Cp), (B, HWp, Cp))
    s1, s2 = pl.pallas_call(
        _gn_stats_kernel,
        out_shape=(jax.ShapeDtypeStruct((B, 1, Cp), jnp.float32),
                   jax.ShapeDtypeStruct((B, 1, Cp), jnp.float32)),
        grid=(B, HWp // tr),
        in_specs=[pl.BlockSpec((1, tr, Cp), lambda b, r: (b, r, 0))],
        out_specs=[pl.BlockSpec((1, 1, Cp), lambda b, r: (b, 0, 0)),
                   pl.BlockSpec((1, 1, Cp), lambda b, r: (b, 0, 0))],
        compiler_params=pltpu.CompilerParams(
            dimension_semantics=("parallel", "arbitrary")),
    )(x3)

    s1c = s1[:, 0, :C]
    s2c = s2[:, 0, :C]
    count = float(HW * cg)
    g1 = jnp.sum(s1c.reshape(B, groups, cg), axis=-1)
    g2 = jnp.sum(s2c.reshape(B, groups, cg), axis=-1)
    mean = g1 / count
    var = jnp.maximum(g2 / count - mean * mean, 0.0)
    inv = 1.0 / jnp.sqrt(var + eps)
    mean_c = jnp.repeat(mean, cg, axis=1)                 # (B, C)
    inv_c = jnp.repeat(inv, cg, axis=1)
    scale = inv_c * gamma[None, :]
    bias = beta[None, :] - mean_c * scale
    scale = _pad_to(scale, (B, Cp)).reshape(B, 1, Cp)     # padded channels -> 0
    bias = _pad_to(bias, (B, Cp)).reshape(B, 1, Cp)
    return scale, bias


def _affine_kernel(x_ref, sc_ref, bi_ref, o_ref, *, relu):
    y = x_ref[...].astype(jnp.float32) * sc_ref[...] + bi_ref[...]
    if relu:
        y = jnp.maximum(y, 0.0)
    o_ref[...] = y.astype(o_ref.dtype)


def _affine_res_kernel(x_ref, sc_ref, bi_ref, r_ref, rs_ref, rb_ref, o_ref):
    y = x_ref[...].astype(jnp.float32) * sc_ref[...] + bi_ref[...]
    r = r_ref[...].astype(jnp.float32) * rs_ref[...] + rb_ref[...]
    o_ref[...] = jnp.maximum(y + r, 0.0).astype(o_ref.dtype)


def _gn_apply(x_nhwc, scale, bias, *, relu):
    B, H, W, Cp = x_nhwc.shape
    HW = H * W
    tr, HWp = _choose_row_tile(HW, 8, 1024)
    x3 = _pad_to(x_nhwc.reshape(B, HW, Cp), (B, HWp, Cp))
    y = pl.pallas_call(
        functools.partial(_affine_kernel, relu=bool(relu)),
        out_shape=jax.ShapeDtypeStruct((B, HWp, Cp), ACT_DTYPE),
        grid=(B, HWp // tr),
        in_specs=[pl.BlockSpec((1, tr, Cp), lambda b, r: (b, r, 0)),
                  pl.BlockSpec((1, 1, Cp), lambda b, r: (b, 0, 0)),
                  pl.BlockSpec((1, 1, Cp), lambda b, r: (b, 0, 0))],
        out_specs=pl.BlockSpec((1, tr, Cp), lambda b, r: (b, r, 0)),
        compiler_params=pltpu.CompilerParams(
            dimension_semantics=("parallel", "parallel")),
    )(x3, scale, bias)
    return y[:, :HW, :].reshape(B, H, W, Cp)


def _gn_apply_add_relu(y_nhwc, s_y, b_y, r_nhwc, s_r, b_r):
    # Fused: relu( (y*s_y + b_y) + (r*s_r + b_r) )
    B, H, W, Cp = y_nhwc.shape
    HW = H * W
    tr, HWp = _choose_row_tile(HW, 8, 1024)
    y3 = _pad_to(y_nhwc.reshape(B, HW, Cp), (B, HWp, Cp))
    r3 = _pad_to(r_nhwc.reshape(B, HW, Cp), (B, HWp, Cp))
    out = pl.pallas_call(
        _affine_res_kernel,
        out_shape=jax.ShapeDtypeStruct((B, HWp, Cp), ACT_DTYPE),
        grid=(B, HWp // tr),
        in_specs=[pl.BlockSpec((1, tr, Cp), lambda b, r: (b, r, 0)),
                  pl.BlockSpec((1, 1, Cp), lambda b, r: (b, 0, 0)),
                  pl.BlockSpec((1, 1, Cp), lambda b, r: (b, 0, 0)),
                  pl.BlockSpec((1, tr, Cp), lambda b, r: (b, r, 0)),
                  pl.BlockSpec((1, 1, Cp), lambda b, r: (b, 0, 0)),
                  pl.BlockSpec((1, 1, Cp), lambda b, r: (b, 0, 0))],
        out_specs=pl.BlockSpec((1, tr, Cp), lambda b, r: (b, r, 0)),
        compiler_params=pltpu.CompilerParams(
            dimension_semantics=("parallel", "parallel")),
    )(y3, s_y, b_y, r3, s_r, b_r)
    return out[:, :HW, :].reshape(B, H, W, Cp)


# ------------------------------ 3x3/s2 max-pool ------------------------------

def _maxpool_kernel(p_ref, o_ref):
    m = p_ref[0]
    for t in range(1, 9):
        m = jnp.maximum(m, p_ref[t])
    o_ref[...] = m


def _max_pool_3x3_s2(x_nhwc):
    # TODO(synk): read the 9 taps in-kernel from the NHWC tensor instead of
    # materializing 9 strided copies (kept, but now bf16, so traffic is halved).
    B, H, W, Cp = x_nhwc.shape
    Ho = (H - 3) // 2 + 1
    Wo = (W - 3) // 2 + 1
    R = B * Ho * Wo
    cols = [x_nhwc[:, i:i + 2 * (Ho - 1) + 1:2,
                   j:j + 2 * (Wo - 1) + 1:2, :].reshape(R, Cp)
            for i in range(3) for j in range(3)]
    p = jnp.stack(cols, axis=0)                           # (9, R, Cp) bf16
    tr, Rp = _choose_row_tile(R, 8, 1024)
    p = _pad_to(p, (9, Rp, Cp))
    y = pl.pallas_call(
        _maxpool_kernel,
        out_shape=jax.ShapeDtypeStruct((Rp, Cp), ACT_DTYPE),
        grid=(Rp // tr,),
        in_specs=[pl.BlockSpec((9, tr, Cp), lambda i: (0, i, 0))],
        out_specs=pl.BlockSpec((tr, Cp), lambda i: (i, 0)),
        compiler_params=pltpu.CompilerParams(dimension_semantics=("parallel",)),
    )(p)
    return y[:R].reshape(B, Ho, Wo, Cp)


# --------------------------- model config / params --------------------------

def _make_config(block_units, width_factor):
    width = int(64 * width_factor)
    cins = [width, width * 4, width * 8]
    couts = [width * 4, width * 8, width * 16]
    strides = [1, 2, 2]
    stages = []
    for s in range(3):
        blocks = []
        for bidx in range(block_units[s]):
            cin = cins[s] if bidx == 0 else couts[s]
            stride = strides[s] if bidx == 0 else 1
            cout = couts[s]
            cmid = cout // 4
            blocks.append((cin, cout, cmid, stride))
        stages.append(blocks)
    return width, stages


def init_params(key, n_in, block_units, width_factor):
    width, stages = _make_config(block_units, width_factor)
    counter = [0]

    def nxt():
        counter[0] += 1
        return jax.random.fold_in(key, counter[0])

    def conv_w(cout, cin, k):
        return jax.random.normal(nxt(), (cout, cin, k, k), jnp.float32) * 0.05

    def gn(c):
        return {"gamma": jnp.ones((c,), jnp.float32),
                "beta": jnp.zeros((c,), jnp.float32)}

    params = {"root_w": conv_w(width, n_in, 7), "root_gn": gn(width), "body": []}
    for blocks in stages:
        stage_params = []
        for (cin, cout, cmid, stride) in blocks:
            bp = {
                "w1": conv_w(cmid, cin, 1), "gn1": gn(cmid),
                "w2": conv_w(cmid, cmid, 3), "gn2": gn(cmid),
                "w3": conv_w(cout, cmid, 1), "gn3": gn(cout),
            }
            if stride != 1 or cin != cout:
                bp["down_w"] = conv_w(cout, cin, 1)
                bp["gn_proj"] = gn(cout)
            stage_params.append(bp)
        params["body"].append(stage_params)
    return params


# -------------------------------- forward ----------------------------------

def _bottleneck(bp, x, cout, stride):
    B, _, _, Cp_in = x.shape
    # residual branch (projection: downsample conv + gn_proj folded into the
    # final fused add; identity: scale=1 / bias=0)
    if "down_w" in bp:
        r = _conv1x1(x, bp["down_w"], stride=stride)
        rs, rb = _gn_fold(r, bp["gn_proj"]["gamma"], bp["gn_proj"]["beta"],
                          groups=cout, eps=1e-5)
    else:
        r = x
        rs = jnp.ones((B, 1, Cp_in), jnp.float32)
        rb = jnp.zeros((B, 1, Cp_in), jnp.float32)

    y = _conv1x1(x, bp["w1"])
    s, b = _gn_fold(y, bp["gn1"]["gamma"], bp["gn1"]["beta"], groups=32, eps=1e-6)
    y = _gn_apply(y, s, b, relu=True)

    y = _conv3x3(y, bp["w2"], stride=stride)
    s, b = _gn_fold(y, bp["gn2"]["gamma"], bp["gn2"]["beta"], groups=32, eps=1e-6)
    y = _gn_apply(y, s, b, relu=True)

    y = _conv1x1(y, bp["w3"])
    s3, b3 = _gn_fold(y, bp["gn3"]["gamma"], bp["gn3"]["beta"], groups=32, eps=1e-6)

    # fused: relu(gn3(y) + gn_proj(residual)) in one row-tiled kernel
    return _gn_apply_add_relu(y, s3, b3, r, rs, rb)


def resnetv2_forward(params, x_nchw, *, block_units, width_factor):
    width, stages = _make_config(block_units, width_factor)
    b, c, in_size, _ = x_nchw.shape
    x = jnp.transpose(x_nchw, (0, 2, 3, 1)).astype(jnp.float32)   # -> NHWC
    features = []
    true_c = []

    # root: StdConv2d(7x7, s2, p3) + GroupNorm(32, eps=1e-6) + ReLU
    x = _conv_im2col(x, params["root_w"], stride=2, pad=3)
    s, bb = _gn_fold(x, params["root_gn"]["gamma"], params["root_gn"]["beta"],
                     groups=32, eps=1e-6)
    x = _gn_apply(x, s, bb, relu=True)
    features.append(x)
    true_c.append(width)

    x = _max_pool_3x3_s2(x)

    for i in range(len(stages) - 1):
        for bidx, (cin, cout, cmid, stride) in enumerate(stages[i]):
            x = _bottleneck(params["body"][i][bidx], x, cout, stride)
        right_size = int(in_size / 4 / (i + 1))
        if x.shape[1] != right_size:
            pad = right_size - x.shape[1]
            assert 0 < pad < 3, f"x {x.shape} should {right_size}"
            feat = jnp.pad(x, ((0, 0), (0, pad), (0, pad), (0, 0)))
        else:
            feat = x
        features.append(feat)
        true_c.append(stages[i][-1][1])

    for bidx, (cin, cout, cmid, stride) in enumerate(stages[-1]):
        x = _bottleneck(params["body"][-1][bidx], x, cout, stride)
    final_c = stages[-1][-1][1]

    def to_nchw(a, ct):
        # strip lane padding, back to NCHW f32
        return jnp.transpose(a[..., :ct], (0, 3, 1, 2)).astype(jnp.float32)

    out = to_nchw(x, final_c)
    feats = [to_nchw(f, ct) for f, ct in zip(features, true_c)]
    return out, feats[::-1]


if __name__ == "__main__":
    key = jax.random.PRNGKey(0)
    n_in, block_units, width_factor = 3, (1, 1, 1), 0.5   # width=32 (min for GroupNorm(32, .))
    params = init_params(key, n_in, block_units, width_factor)
    x = jax.random.normal(jax.random.fold_in(key, 12345), (2, 3, 32, 32), jnp.float32)

    fwd = jax.jit(functools.partial(resnetv2_forward,
                                    block_units=block_units, width_factor=width_factor))
    out, feats = fwd(params, x)
    jax.block_until_ready(out)
    jax.block_until_ready(feats)
    print("KERNEL_OK")
</pallas_src>

<mosaic_0001>
module attributes {stable_mosaic.version = 11 : i64} {
  func.func @_matmul_kernel(%arg0: i32, %arg1: i32, %arg2: i32, %arg3: memref<512x256xbf16, #tpu.memory_space<vmem>>, %arg4: memref<256x128xbf16, #tpu.memory_space<vmem>>, %arg5: memref<512x128xbf16, #tpu.memory_space<vmem>>, %arg6: memref<512x128xf32, #tpu.memory_space<vmem>>) attributes {dimension_semantics = [#tpu.dimension_semantics<parallel>, #tpu.dimension_semantics<parallel>, #tpu.dimension_semantics<arbitrary>], iteration_bounds = array<i64: 1, 1, 1>, scalar_prefetch = 0 : i64, scratch_operands = 1 : i64, tpu.core_type = #tpu.core_type<tc>, window_params = [{transform_indices = @transform_0, window_bounds = array<i64: 512, 256>}, {transform_indices = @transform_1, window_bounds = array<i64: 256, 128>}, {transform_indices = @transform_2, window_bounds = array<i64: 512, 128>}]} {
    %c0_i32 = arith.constant 0 : i32
    %0 = arith.cmpi eq, %arg2, %c0_i32 : i32
    %1 = arith.extui %0 : i1 to i32
    %c0_i32_0 = arith.constant 0 : i32
    %2 = arith.cmpi ne, %1, %c0_i32_0 : i32
    scf.if %2 {
      %cst_10 = arith.constant 0.000000e+00 : f32
      %12 = vector.broadcast %cst_10 : f32 to vector<512x128xf32>
      %c0_11 = arith.constant 0 : index
      %c0_12 = arith.constant 0 : index
      %13 = vector.load %arg6[%c0_11, %c0_12] : memref<512x128xf32, #tpu.memory_space<vmem>>, vector<512x128xf32>
      tpu.vector_store %arg6[%c0_11, %c0_12], %12 {strides = array<i32>} : memref<512x128xf32, #tpu.memory_space<vmem>>, vector<512x128xf32>,
    } else {
    }
    %c0 = arith.constant 0 : index
    %c0_1 = arith.constant 0 : index
    %3 = vector.load %arg6[%c0, %c0_1] : memref<512x128xf32, #tpu.memory_space<vmem>>, vector<512x128xf32>
    %c0_2 = arith.constant 0 : index
    %c0_3 = arith.constant 0 : index
    %4 = vector.load %arg3[%c0_2, %c0_3] : memref<512x256xbf16, #tpu.memory_space<vmem>>, vector<512x256xbf16>
    %c0_4 = arith.constant 0 : index
    %c0_5 = arith.constant 0 : index
    %5 = vector.load %arg4[%c0_4, %c0_5] : memref<256x128xbf16, #tpu.memory_space<vmem>>, vector<256x128xbf16>
    %cst = arith.constant dense<0.000000e+00> : vector<512x128xf32>
    %6 = tpu.matmul %4, %5, %cst {dimension_numbers = #tpu.dot_dimension_numbers<[1], [0], [0], [1], [0, 0, 1, 1], [], []>} : vector<512x256xbf16>, vector<256x128xbf16>, vector<512x128xf32> -> vector<512x128xf32>
    %7 = arith.addf %3, %6 : vector<512x128xf32>
    %c0_6 = arith.constant 0 : index
    %c0_7 = arith.constant 0 : index
    %8 = vector.load %arg6[%c0_6, %c0_7] : memref<512x128xf32, #tpu.memory_space<vmem>>, vector<512x128xf32>
    tpu.vector_store %arg6[%c0_6, %c0_7], %7 {strides = array<i32>} : memref<512x128xf32, #tpu.memory_space<vmem>>, vector<512x128xf32>,
    %c0_i32_8 = arith.constant 0 : i32
    %9 = arith.cmpi eq, %arg2, %c0_i32_8 : i32
    %10 = arith.extui %9 : i1 to i32
    %c0_i32_9 = arith.constant 0 : i32
    %11 = arith.cmpi ne, %10, %c0_i32_9 : i32
    scf.if %11 {
      %c0_10 = arith.constant 0 : index
      %c0_11 = arith.constant 0 : index
      %12 = vector.load %arg6[%c0_10, %c0_11] : memref<512x128xf32, #tpu.memory_space<vmem>>, vector<512x128xf32>
      %13 = arith.truncf %12 : vector<512x128xf32> to vector<512x128xbf16>
      %c0_12 = arith.constant 0 : index
      %c0_13 = arith.constant 0 : index
      %14 = vector.load %arg5[%c0_12, %c0_13] : memref<512x128xbf16, #tpu.memory_space<vmem>>, vector<512x128xbf16>
      tpu.vector_store %arg5[%c0_12, %c0_13], %13 {strides = array<i32>} : memref<512x128xbf16, #tpu.memory_space<vmem>>, vector<512x128xbf16>,
    } else {
    }
    return
  }
  func.func @transform_0(%arg0: i32, %arg1: i32, %arg2: i32) -> (i32, i32) {
    %c0_i32 = arith.constant 0 : i32
    return %arg0, %arg2 : i32, i32
  }
  func.func @transform_1(%arg0: i32, %arg1: i32, %arg2: i32) -> (i32, i32) {
    %c0_i32 = arith.constant 0 : i32
    return %arg2, %arg1 : i32, i32
  }
  func.func @transform_2(%arg0: i32, %arg1: i32, %arg2: i32) -> (i32, i32) {
    %c0_i32 = arith.constant 0 : i32
    return %arg0, %arg1 : i32, i32
  }
}

module attributes {stable_mosaic.version = 11 : i64} {
  func.func @_gn_stats_kernel(%arg0: i32, %arg1: i32, %arg2: memref<1x256x128xbf16, #tpu.memory_space<vmem>>, %arg3: memref<1x1x128xf32, #tpu.memory_space<vmem>>, %arg4: memref<1x1x128xf32, #tpu.memory_space<vmem>>) attributes {dimension_semantics = [#tpu.dimension_semantics<parallel>, #tpu.dimension_semantics<arbitrary>], iteration_bounds = array<i64: 2, 1>, scalar_prefetch = 0 : i64, scratch_operands = 0 : i64, tpu.core_type = #tpu.core_type<tc>, window_params = [{transform_indices = @transform_0, window_bounds = array<i64: 1, 256, 128>}, {transform_indices = @transform_1, window_bounds = array<i64: 1, 1, 128>}, {transform_indices = @transform_2, window_bounds = array<i64: 1, 1, 128>}]} {
    %c0_i32 = arith.constant 0 : i32
    %0 = arith.cmpi eq, %arg1, %c0_i32 : i32
    %1 = arith.extui %0 : i1 to i32
    %c0_i32_0 = arith.constant 0 : i32
    %2 = arith.cmpi ne, %1, %c0_i32_0 : i32
    scf.if %2 {
      %cst_16 = arith.constant 0.000000e+00 : f32
      %16 = vector.broadcast %cst_16 : f32 to vector<1x1x128xf32>
      %c0_17 = arith.constant 0 : index
      %c0_18 = arith.constant 0 : index
      %c0_19 = arith.constant 0 : index
      %17 = vector.load %arg3[%c0_17, %c0_18, %c0_19] : memref<1x1x128xf32, #tpu.memory_space<vmem>>, vector<1x1x128xf32>
      tpu.vector_store %arg3[%c0_17, %c0_18, %c0_19], %16 {strides = array<i32>} : memref<1x1x128xf32, #tpu.memory_space<vmem>>, vector<1x1x128xf32>,
      %cst_20 = arith.constant 0.000000e+00 : f32
      %18 = vector.broadcast %cst_20 : f32 to vector<1x1x128xf32>
      %c0_21 = arith.constant 0 : index
      %c0_22 = arith.constant 0 : index
      %c0_23 = arith.constant 0 : index
      %19 = vector.load %arg4[%c0_21, %c0_22, %c0_23] : memref<1x1x128xf32, #tpu.memory_space<vmem>>, vector<1x1x128xf32>
      tpu.vector_store %arg4[%c0_21, %c0_22, %c0_23], %18 {strides = array<i32>} : memref<1x1x128xf32, #tpu.memory_space<vmem>>, vector<1x1x128xf32>,
    } else {
    }
    %c0 = arith.constant 0 : index
    %c0_1 = arith.constant 0 : index
    %c0_2 = arith.constant 0 : index
    %3 = vector.load %arg2[%c0, %c0_1, %c0_2] : memref<1x256x128xbf16, #tpu.memory_space<vmem>>, vector<1x256x128xbf16>
    %4 = arith.extf %3 : vector<1x256x128xbf16> to vector<1x256x128xf32>
    %c0_3 = arith.constant 0 : index
    %c0_4 = arith.constant 0 : index
    %c0_5 = arith.constant 0 : index
    %5 = vector.load %arg3[%c0_3, %c0_4, %c0_5] : memref<1x1x128xf32, #tpu.memory_space<vmem>>, vector<1x1x128xf32>
    %cst = arith.constant dense<0.000000e+00> : vector<1x128xf32>
    %6 = vector.multi_reduction <add>, %4, %cst [1] : vector<1x256x128xf32> to vector<1x128xf32>
    %7 = vector.shape_cast %6 : vector<1x128xf32> to vector<1x1x128xf32>
    %8 = arith.addf %5, %7 : vector<1x1x128xf32>
    %c0_6 = arith.constant 0 : index
    %c0_7 = arith.constant 0 : index
    %c0_8 = arith.constant 0 : index
    %9 = vector.load %arg3[%c0_6, %c0_7, %c0_8] : memref<1x1x128xf32, #tpu.memory_space<vmem>>, vector<1x1x128xf32>
    tpu.vector_store %arg3[%c0_6, %c0_7, %c0_8], %8 {strides = array<i32>} : memref<1x1x128xf32, #tpu.memory_space<vmem>>, vector<1x1x128xf32>,
    %c0_9 = arith.constant 0 : index
    %c0_10 = arith.constant 0 : index
    %c0_11 = arith.constant 0 : index
    %10 = vector.load %arg4[%c0_9, %c0_10, %c0_11] : memref<1x1x128xf32, #tpu.memory_space<vmem>>, vector<1x1x128xf32>
    %11 = arith.mulf %4, %4 : vector<1x256x128xf32>
    %cst_12 = arith.constant dense<0.000000e+00> : vector<1x128xf32>
    %12 = vector.multi_reduction <add>, %11, %cst_12 [1] : vector<1x256x128xf32> to vector<1x128xf32>
    %13 = vector.shape_cast %12 : vector<1x128xf32> to vector<1x1x128xf32>
    %14 = arith.addf %10, %13 : vector<1x1x128xf32>
    %c0_13 = arith.constant 0 : index
    %c0_14 = arith.constant 0 : index
    %c0_15 = arith.constant 0 : index
    %15 = vector.load %arg4[%c0_13, %c0_14, %c0_15] : memref<1x1x128xf32, #tpu.memory_space<vmem>>, vector<1x1x128xf32>
    tpu.vector_store %arg4[%c0_13, %c0_14, %c0_15], %14 {strides = array<i32>} : memref<1x1x128xf32, #tpu.memory_space<vmem>>, vector<1x1x128xf32>,
    return
  }
  func.func @transform_0(%arg0: i32, %arg1: i32) -> (i32, i32, i32) {
    %c0_i32 = arith.constant 0 : i32
    %c0_i32_0 = arith.constant 0 : i32
    return %arg0, %arg1, %c0_i32 : i32, i32, i32
  }
  func.func @transform_1(%arg0: i32, %arg1: i32) -> (i32, i32, i32) {
    %c0_i32 = arith.constant 0 : i32
    %c0_i32_0 = arith.constant 0 : i32
    %c0_i32_1 = arith.constant 0 : i32
    return %arg0, %c0_i32, %c0_i32_0 : i32, i32, i32
  }
  func.func @transform_2(%arg0: i32, %arg1: i32) -> (i32, i32, i32) {
    %c0_i32 = arith.constant 0 : i32
    %c0_i32_0 = arith.constant 0 : i32
    %c0_i32_1 = arith.constant 0 : i32
    return %arg0, %c0_i32, %c0_i32_0 : i32, i32, i32
  }
}

module attributes {stable_mosaic.version = 11 : i64} {
  func.func @_affine_kernel(%arg0: i32, %arg1: i32, %arg2: memref<1x256x128xbf16, #tpu.memory_space<vmem>>, %arg3: memref<1x1x128xf32, #tpu.memory_space<vmem>>, %arg4: memref<1x1x128xf32, #tpu.memory_space<vmem>>, %arg5: memref<1x256x128xbf16, #tpu.memory_space<vmem>>) attributes {dimension_semantics = [#tpu.dimension_semantics<parallel>, #tpu.dimension_semantics<parallel>], iteration_bounds = array<i64: 2, 1>, scalar_prefetch = 0 : i64, scratch_operands = 0 : i64, tpu.core_type = #tpu.core_type<tc>, window_params = [{transform_indices = @transform_0, window_bounds = array<i64: 1, 256, 128>}, {transform_indices = @transform_1, window_bounds = array<i64: 1, 1, 128>}, {transform_indices = @transform_2, window_bounds = array<i64: 1, 1, 128>}, {transform_indices = @transform_3, window_bounds = array<i64: 1, 256, 128>}]} {
    %c0 = arith.constant 0 : index
    %c0_0 = arith.constant 0 : index
    %c0_1 = arith.constant 0 : index
    %0 = vector.load %arg2[%c0, %c0_0, %c0_1] : memref<1x256x128xbf16, #tpu.memory_space<vmem>>, vector<1x256x128xbf16>
    %1 = arith.extf %0 : vector<1x256x128xbf16> to vector<1x256x128xf32>
    %c0_2 = arith.constant 0 : index
    %c0_3 = arith.constant 0 : index
    %c0_4 = arith.constant 0 : index
    %2 = vector.load %arg3[%c0_2, %c0_3, %c0_4] : memref<1x1x128xf32, #tpu.memory_space<vmem>>, vector<1x1x128xf32>
    %3 = vector.broadcast %2 : vector<1x1x128xf32> to vector<1x256x128xf32>
    %4 = arith.mulf %1, %3 : vector<1x256x128xf32>
    %c0_5 = arith.constant 0 : index
    %c0_6 = arith.constant 0 : index
    %c0_7 = arith.constant 0 : index
    %5 = vector.load %arg4[%c0_5, %c0_6, %c0_7] : memref<1x1x128xf32, #tpu.memory_space<vmem>>, vector<1x1x128xf32>
    %6 = vector.broadcast %5 : vector<1x1x128xf32> to vector<1x256x128xf32>
    %7 = arith.addf %4, %6 : vector<1x256x128xf32>
    %cst = arith.constant 0.000000e+00 : f32
    %8 = vector.broadcast %cst : f32 to vector<1x256x128xf32>
    %9 = arith.maximumf %7, %8 : vector<1x256x128xf32>
    %10 = arith.truncf %9 : vector<1x256x128xf32> to vector<1x256x128xbf16>
    %c0_8 = arith.constant 0 : index
    %c0_9 = arith.constant 0 : index
    %c0_10 = arith.constant 0 : index
    %11 = vector.load %arg5[%c0_8, %c0_9, %c0_10] : memref<1x256x128xbf16, #tpu.memory_space<vmem>>, vector<1x256x128xbf16>
    tpu.vector_store %arg5[%c0_8, %c0_9, %c0_10], %10 {strides = array<i32>} : memref<1x256x128xbf16, #tpu.memory_space<vmem>>, vector<1x256x128xbf16>,
    return
  }
  func.func @transform_0(%arg0: i32, %arg1: i32) -> (i32, i32, i32) {
    %c0_i32 = arith.constant 0 : i32
    %c0_i32_0 = arith.constant 0 : i32
    return %arg0, %arg1, %c0_i32 : i32, i32, i32
  }
  func.func @transform_1(%arg0: i32, %arg1: i32) -> (i32, i32, i32) {
    %c0_i32 = arith.constant 0 : i32
    %c0_i32_0 = arith.constant 0 : i32
    %c0_i32_1 = arith.constant 0 : i32
    return %arg0, %c0_i32, %c0_i32_0 : i32, i32, i32
  }
  func.func @transform_2(%arg0: i32, %arg1: i32) -> (i32, i32, i32) {
    %c0_i32 = arith.constant 0 : i32
    %c0_i32_0 = arith.constant 0 : i32
    %c0_i32_1 = arith.constant 0 : i32
    return %arg0, %c0_i32, %c0_i32_0 : i32, i32, i32
  }
  func.func @transform_3(%arg0: i32, %arg1: i32) -> (i32, i32, i32) {
    %c0_i32 = arith.constant 0 : i32
    %c0_i32_0 = arith.constant 0 : i32
    return %arg0, %arg1, %c0_i32 : i32, i32, i32
  }
}

module attributes {stable_mosaic.version = 11 : i64} {
  func.func @_maxpool_kernel(%arg0: i32, %arg1: memref<9x104x128xbf16, #tpu.memory_space<vmem>>, %arg2: memref<104x128xbf16, #tpu.memory_space<vmem>>) attributes {dimension_semantics = [#tpu.dimension_semantics<parallel>], iteration_bounds = array<i64: 1>, scalar_prefetch = 0 : i64, scratch_operands = 0 : i64, tpu.core_type = #tpu.core_type<tc>, window_params = [{transform_indices = @transform_0, window_bounds = array<i64: 9, 104, 128>}, {transform_indices = @transform_1, window_bounds = array<i64: 104, 128>}]} {
    %c0 = arith.constant 0 : index
    %c0_0 = arith.constant 0 : index
    %c0_1 = arith.constant 0 : index
    %0 = vector.load %arg1[%c0, %c0_0, %c0_1] : memref<9x104x128xbf16, #tpu.memory_space<vmem>>, vector<1x104x128xbf16>
    %1 = vector.shape_cast %0 : vector<1x104x128xbf16> to vector<104x128xbf16>
    %c1 = arith.constant 1 : index
    %c0_2 = arith.constant 0 : index
    %c0_3 = arith.constant 0 : index
    %2 = vector.load %arg1[%c1, %c0_2, %c0_3] : memref<9x104x128xbf16, #tpu.memory_space<vmem>>, vector<1x104x128xbf16>
    %3 = vector.shape_cast %2 : vector<1x104x128xbf16> to vector<104x128xbf16>
    %4 = arith.maximumf %1, %3 : vector<104x128xbf16>
    %c2 = arith.constant 2 : index
    %c0_4 = arith.constant 0 : index
    %c0_5 = arith.constant 0 : index
    %5 = vector.load %arg1[%c2, %c0_4, %c0_5] : memref<9x104x128xbf16, #tpu.memory_space<vmem>>, vector<1x104x128xbf16>
    %6 = vector.shape_cast %5 : vector<1x104x128xbf16> to vector<104x128xbf16>
    %7 = arith.maximumf %4, %6 : vector<104x128xbf16>
    %c3 = arith.constant 3 : index
    %c0_6 = arith.constant 0 : index
    %c0_7 = arith.constant 0 : index
    %8 = vector.load %arg1[%c3, %c0_6, %c0_7] : memref<9x104x128xbf16, #tpu.memory_space<vmem>>, vector<1x104x128xbf16>
    %9 = vector.shape_cast %8 : vector<1x104x128xbf16> to vector<104x128xbf16>
    %10 = arith.maximumf %7, %9 : vector<104x128xbf16>
    %c4 = arith.constant 4 : index
    %c0_8 = arith.constant 0 : index
    %c0_9 = arith.constant 0 : index
    %11 = vector.load %arg1[%c4, %c0_8, %c0_9] : memref<9x104x128xbf16, #tpu.memory_space<vmem>>, vector<1x104x128xbf16>
    %12 = vector.shape_cast %11 : vector<1x104x128xbf16> to vector<104x128xbf16>
    %13 = arith.maximumf %10, %12 : vector<104x128xbf16>
    %c5 = arith.constant 5 : index
    %c0_10 = arith.constant 0 : index
    %c0_11 = arith.constant 0 : index
    %14 = vector.load %arg1[%c5, %c0_10, %c0_11] : memref<9x104x128xbf16, #tpu.memory_space<vmem>>, vector<1x104x128xbf16>
    %15 = vector.shape_cast %14 : vector<1x104x128xbf16> to vector<104x128xbf16>
    %16 = arith.maximumf %13, %15 : vector<104x128xbf16>
    %c6 = arith.constant 6 : index
    %c0_12 = arith.constant 0 : index
    %c0_13 = arith.constant 0 : index
    %17 = vector.load %arg1[%c6, %c0_12, %c0_13] : memref<9x104x128xbf16, #tpu.memory_space<vmem>>, vector<1x104x128xbf16>
    %18 = vector.shape_cast %17 : vector<1x104x128xbf16> to vector<104x128xbf16>
    %19 = arith.maximumf %16, %18 : vector<104x128xbf16>
    %c7 = arith.constant 7 : index
    %c0_14 = arith.constant 0 : index
    %c0_15 = arith.constant 0 : index
    %20 = vector.load %arg1[%c7, %c0_14, %c0_15] : memref<9x104x128xbf16, #tpu.memory_space<vmem>>, vector<1x104x128xbf16>
    %21 = vector.shape_cast %20 : vector<1x104x128xbf16> to vector<104x128xbf16>
    %22 = arith.maximumf %19, %21 : vector<104x128xbf16>
    %c8 = arith.constant 8 : index
    %c0_16 = arith.constant 0 : index
    %c0_17 = arith.constant 0 : index
    %23 = vector.load %arg1[%c8, %c0_16, %c0_17] : memref<9x104x128xbf16, #tpu.memory_space<vmem>>, vector<1x104x128xbf16>
    %24 = vector.shape_cast %23 : vector<1x104x128xbf16> to vector<104x128xbf16>
    %25 = arith.maximumf %22, %24 : vector<104x128xbf16>
    %c0_18 = arith.constant 0 : index
    %c0_19 = arith.constant 0 : index
    %26 = vector.load %arg2[%c0_18, %c0_19] : memref<104x128xbf16, #tpu.memory_space<vmem>>, vector<104x128xbf16>
    tpu.vector_store %arg2[%c0_18, %c0_19], %25 {strides = array<i32>} : memref<104x128xbf16, #tpu.memory_space<vmem>>, vector<104x128xbf16>,
    return
  }
  func.func @transform_0(%arg0: i32) -> (i32, i32, i32) {
    %c0_i32 = arith.constant 0 : i32
    %c0_i32_0 = arith.constant 0 : i32
    %c0_i32_1 = arith.constant 0 : i32
    return %c0_i32, %arg0, %c0_i32_0 : i32, i32, i32
  }
  func.func @transform_1(%arg0: i32) -> (i32, i32) {
    %c0_i32 = arith.constant 0 : i32
    %c0_i32_0 = arith.constant 0 : i32
    return %arg0, %c0_i32 : i32, i32
  }
}

module attributes {stable_mosaic.version = 11 : i64} {
  func.func @_matmul_kernel(%arg0: i32, %arg1: i32, %arg2: i32, %arg3: memref<112x128xbf16, #tpu.memory_space<vmem>>, %arg4: memref<128x128xbf16, #tpu.memory_space<vmem>>, %arg5: memref<112x128xbf16, #tpu.memory_space<vmem>>, %arg6: memref<112x128xf32, #tpu.memory_space<vmem>>) attributes {dimension_semantics = [#tpu.dimension_semantics<parallel>, #tpu.dimension_semantics<parallel>, #tpu.dimension_semantics<arbitrary>], iteration_bounds = array<i64: 1, 1, 1>, scalar_prefetch = 0 : i64, scratch_operands = 1 : i64, tpu.core_type = #tpu.core_type<tc>, window_params = [{transform_indices = @transform_0, window_bounds = array<i64: 112, 128>}, {transform_indices = @transform_1, window_bounds = array<i64: 128, 128>}, {transform_indices = @transform_2, window_bounds = array<i64: 112, 128>}]} {
    %c0_i32 = arith.constant 0 : i32
    %0 = arith.cmpi eq, %arg2, %c0_i32 : i32
    %1 = arith.extui %0 : i1 to i32
    %c0_i32_0 = arith.constant 0 : i32
    %2 = arith.cmpi ne, %1, %c0_i32_0 : i32
    scf.if %2 {
      %cst_10 = arith.constant 0.000000e+00 : f32
      %12 = vector.broadcast %cst_10 : f32 to vector<112x128xf32>
      %c0_11 = arith.constant 0 : index
      %c0_12 = arith.constant 0 : index
      %13 = vector.load %arg6[%c0_11, %c0_12] : memref<112x128xf32, #tpu.memory_space<vmem>>, vector<112x128xf32>
      tpu.vector_store %arg6[%c0_11, %c0_12], %12 {strides = array<i32>} : memref<112x128xf32, #tpu.memory_space<vmem>>, vector<112x128xf32>,
    } else {
    }
    %c0 = arith.constant 0 : index
    %c0_1 = arith.constant 0 : index
    %3 = vector.load %arg6[%c0, %c0_1] : memref<112x128xf32, #tpu.memory_space<vmem>>, vector<112x128xf32>
    %c0_2 = arith.constant 0 : index
    %c0_3 = arith.constant 0 : index
    %4 = vector.load %arg3[%c0_2, %c0_3] : memref<112x128xbf16, #tpu.memory_space<vmem>>, vector<112x128xbf16>
    %c0_4 = arith.constant 0 : index
    %c0_5 = arith.constant 0 : index
    %5 = vector.load %arg4[%c0_4, %c0_5] : memref<128x128xbf16, #tpu.memory_space<vmem>>, vector<128x128xbf16>
    %cst = arith.constant dense<0.000000e+00> : vector<112x128xf32>
    %6 = tpu.matmul %4, %5, %cst {dimension_numbers = #tpu.dot_dimension_numbers<[1], [0], [0], [1], [0, 0, 1, 1], [], []>} : vector<112x128xbf16>, vector<128x128xbf16>, vector<112x128xf32> -> vector<112x128xf32>
    %7 = arith.addf %3, %6 : vector<112x128xf32>
    %c0_6 = arith.constant 0 : index
    %c0_7 = arith.constant 0 : index
    %8 = vector.load %arg6[%c0_6, %c0_7] : memref<112x128xf32, #tpu.memory_space<vmem>>, vector<112x128xf32>
    tpu.vector_store %arg6[%c0_6, %c0_7], %7 {strides = array<i32>} : memref<112x128xf32, #tpu.memory_space<vmem>>, vector<112x128xf32>,
    %c0_i32_8 = arith.constant 0 : i32
    %9 = arith.cmpi eq, %arg2, %c0_i32_8 : i32
    %10 = arith.extui %9 : i1 to i32
    %c0_i32_9 = arith.constant 0 : i32
    %11 = arith.cmpi ne, %10, %c0_i32_9 : i32
    scf.if %11 {
      %c0_10 = arith.constant 0 : index
      %c0_11 = arith.constant 0 : index
      %12 = vector.load %arg6[%c0_10, %c0_11] : memref<112x128xf32, #tpu.memory_space<vmem>>, vector<112x128xf32>
      %13 = arith.truncf %12 : vector<112x128xf32> to vector<112x128xbf16>
      %c0_12 = arith.constant 0 : index
      %c0_13 = arith.constant 0 : index
      %14 = vector.load %arg5[%c0_12, %c0_13] : memref<112x128xbf16, #tpu.memory_space<vmem>>, vector<112x128xbf16>
      tpu.vector_store %arg5[%c0_12, %c0_13], %13 {strides = array<i32>} : memref<112x128xbf16, #tpu.memory_space<vmem>>, vector<112x128xbf16>,
    } else {
    }
    return
  }
  func.func @transform_0(%arg0: i32, %arg1: i32, %arg2: i32) -> (i32, i32) {
    %c0_i32 = arith.constant 0 : i32
    return %arg0, %arg2 : i32, i32
  }
  func.func @transform_1(%arg0: i32, %arg1: i32, %arg2: i32) -> (i32, i32) {
    %c0_i32 = arith.constant 0 : i32
    return %arg2, %arg1 : i32, i32
  }
  func.func @transform_2(%arg0: i32, %arg1: i32, %arg2: i32) -> (i32, i32) {
    %c0_i32 = arith.constant 0 : i32
    return %arg0, %arg1 : i32, i32
  }
}

module attributes {stable_mosaic.version = 11 : i64} {
  func.func @_gn_stats_kernel(%arg0: i32, %arg1: i32, %arg2: memref<1x56x128xbf16, #tpu.memory_space<vmem>>, %arg3: memref<1x1x128xf32, #tpu.memory_space<vmem>>, %arg4: memref<1x1x128xf32, #tpu.memory_space<vmem>>) attributes {dimension_semantics = [#tpu.dimension_semantics<parallel>, #tpu.dimension_semantics<arbitrary>], iteration_bounds = array<i64: 2, 1>, scalar_prefetch = 0 : i64, scratch_operands = 0 : i64, tpu.core_type = #tpu.core_type<tc>, window_params = [{transform_indices = @transform_0, window_bounds = array<i64: 1, 56, 128>}, {transform_indices = @transform_1, window_bounds = array<i64: 1, 1, 128>}, {transform_indices = @transform_2, window_bounds = array<i64: 1, 1, 128>}]} {
    %c0_i32 = arith.constant 0 : i32
    %0 = arith.cmpi eq, %arg1, %c0_i32 : i32
    %1 = arith.extui %0 : i1 to i32
    %c0_i32_0 = arith.constant 0 : i32
    %2 = arith.cmpi ne, %1, %c0_i32_0 : i32
    scf.if %2 {
      %cst_16 = arith.constant 0.000000e+00 : f32
      %16 = vector.broadcast %cst_16 : f32 to vector<1x1x128xf32>
      %c0_17 = arith.constant 0 : index
      %c0_18 = arith.constant 0 : index
      %c0_19 = arith.constant 0 : index
      %17 = vector.load %arg3[%c0_17, %c0_18, %c0_19] : memref<1x1x128xf32, #tpu.memory_space<vmem>>, vector<1x1x128xf32>
      tpu.vector_store %arg3[%c0_17, %c0_18, %c0_19], %16 {strides = array<i32>} : memref<1x1x128xf32, #tpu.memory_space<vmem>>, vector<1x1x128xf32>,
      %cst_20 = arith.constant 0.000000e+00 : f32
      %18 = vector.broadcast %cst_20 : f32 to vector<1x1x128xf32>
      %c0_21 = arith.constant 0 : index
      %c0_22 = arith.constant 0 : index
      %c0_23 = arith.constant 0 : index
      %19 = vector.load %arg4[%c0_21, %c0_22, %c0_23] : memref<1x1x128xf32, #tpu.memory_space<vmem>>, vector<1x1x128xf32>
      tpu.vector_store %arg4[%c0_21, %c0_22, %c0_23], %18 {strides = array<i32>} : memref<1x1x128xf32, #tpu.memory_space<vmem>>, vector<1x1x128xf32>,
    } else {
    }
    %c0 = arith.constant 0 : index
    %c0_1 = arith.constant 0 : index
    %c0_2 = arith.constant 0 : index
    %3 = vector.load %arg2[%c0, %c0_1, %c0_2] : memref<1x56x128xbf16, #tpu.memory_space<vmem>>, vector<1x56x128xbf16>
    %4 = arith.extf %3 : vector<1x56x128xbf16> to vector<1x56x128xf32>
    %c0_3 = arith.constant 0 : index
    %c0_4 = arith.constant 0 : index
    %c0_5 = arith.constant 0 : index
    %5 = vector.load %arg3[%c0_3, %c0_4, %c0_5] : memref<1x1x128xf32, #tpu.memory_space<vmem>>, vector<1x1x128xf32>
    %cst = arith.constant dense<0.000000e+00> : vector<1x128xf32>
    %6 = vector.multi_reduction <add>, %4, %cst [1] : vector<1x56x128xf32> to vector<1x128xf32>
    %7 = vector.shape_cast %6 : vector<1x128xf32> to vector<1x1x128xf32>
    %8 = arith.addf %5, %7 : vector<1x1x128xf32>
    %c0_6 = arith.constant 0 : index
    %c0_7 = arith.constant 0 : index
    %c0_8 = arith.constant 0 : index
    %9 = vector.load %arg3[%c0_6, %c0_7, %c0_8] : memref<1x1x128xf32, #tpu.memory_space<vmem>>, vector<1x1x128xf32>
    tpu.vector_store %arg3[%c0_6, %c0_7, %c0_8], %8 {strides = array<i32>} : memref<1x1x128xf32, #tpu.memory_space<vmem>>, vector<1x1x128xf32>,
    %c0_9 = arith.constant 0 : index
    %c0_10 = arith.constant 0 : index
    %c0_11 = arith.constant 0 : index
    %10 = vector.load %arg4[%c0_9, %c0_10, %c0_11] : memref<1x1x128xf32, #tpu.memory_space<vmem>>, vector<1x1x128xf32>
    %11 = arith.mulf %4, %4 : vector<1x56x128xf32>
    %cst_12 = arith.constant dense<0.000000e+00> : vector<1x128xf32>
    %12 = vector.multi_reduction <add>, %11, %cst_12 [1] : vector<1x56x128xf32> to vector<1x128xf32>
    %13 = vector.shape_cast %12 : vector<1x128xf32> to vector<1x1x128xf32>
    %14 = arith.addf %10, %13 : vector<1x1x128xf32>
    %c0_13 = arith.constant 0 : index
    %c0_14 = arith.constant 0 : index
    %c0_15 = arith.constant 0 : index
    %15 = vector.load %arg4[%c0_13, %c0_14, %c0_15] : memref<1x1x128xf32, #tpu.memory_space<vmem>>, vector<1x1x128xf32>
    tpu.vector_store %arg4[%c0_13, %c0_14, %c0_15], %14 {strides = array<i32>} : memref<1x1x128xf32, #tpu.memory_space<vmem>>, vector<1x1x128xf32>,
    return
  }
  func.func @transform_0(%arg0: i32, %arg1: i32) -> (i32, i32, i32) {
    %c0_i32 = arith.constant 0 : i32
    %c0_i32_0 = arith.constant 0 : i32
    return %arg0, %arg1, %c0_i32 : i32, i32, i32
  }
  func.func @transform_1(%arg0: i32, %arg1: i32) -> (i32, i32, i32) {
    %c0_i32 = arith.constant 0 : i32
    %c0_i32_0 = arith.constant 0 : i32
    %c0_i32_1 = arith.constant 0 : i32
    return %arg0, %c0_i32, %c0_i32_0 : i32, i32, i32
  }
  func.func @transform_2(%arg0: i32, %arg1: i32) -> (i32, i32, i32) {
    %c0_i32 = arith.constant 0 : i32
    %c0_i32_0 = arith.constant 0 : i32
    %c0_i32_1 = arith.constant 0 : i32
    return %arg0, %c0_i32, %c0_i32_0 : i32, i32, i32
  }
}

module attributes {stable_mosaic.version = 11 : i64} {
  func.func @_affine_kernel(%arg0: i32, %arg1: i32, %arg2: memref<1x56x128xbf16, #tpu.memory_space<vmem>>, %arg3: memref<1x1x128xf32, #tpu.memory_space<vmem>>, %arg4: memref<1x1x128xf32, #tpu.memory_space<vmem>>, %arg5: memref<1x56x128xbf16, #tpu.memory_space<vmem>>) attributes {dimension_semantics = [#tpu.dimension_semantics<parallel>, #tpu.dimension_semantics<parallel>], iteration_bounds = array<i64: 2, 1>, scalar_prefetch = 0 : i64, scratch_operands = 0 : i64, tpu.core_type = #tpu.core_type<tc>, window_params = [{transform_indices = @transform_0, window_bounds = array<i64: 1, 56, 128>}, {transform_indices = @transform_1, window_bounds = array<i64: 1, 1, 128>}, {transform_indices = @transform_2, window_bounds = array<i64: 1, 1, 128>}, {transform_indices = @transform_3, window_bounds = array<i64: 1, 56, 128>}]} {
    %c0 = arith.constant 0 : index
    %c0_0 = arith.constant 0 : index
    %c0_1 = arith.constant 0 : index
    %0 = vector.load %arg2[%c0, %c0_0, %c0_1] : memref<1x56x128xbf16, #tpu.memory_space<vmem>>, vector<1x56x128xbf16>
    %1 = arith.extf %0 : vector<1x56x128xbf16> to vector<1x56x128xf32>
    %c0_2 = arith.constant 0 : index
    %c0_3 = arith.constant 0 : index
    %c0_4 = arith.constant 0 : index
    %2 = vector.load %arg3[%c0_2, %c0_3, %c0_4] : memref<1x1x128xf32, #tpu.memory_space<vmem>>, vector<1x1x128xf32>
    %3 = vector.broadcast %2 : vector<1x1x128xf32> to vector<1x56x128xf32>
    %4 = arith.mulf %1, %3 : vector<1x56x128xf32>
    %c0_5 = arith.constant 0 : index
    %c0_6 = arith.constant 0 : index
    %c0_7 = arith.constant 0 : index
    %5 = vector.load %arg4[%c0_5, %c0_6, %c0_7] : memref<1x1x128xf32, #tpu.memory_space<vmem>>, vector<1x1x128xf32>
    %6 = vector.broadcast %5 : vector<1x1x128xf32> to vector<1x56x128xf32>
    %7 = arith.addf %4, %6 : vector<1x56x128xf32>
    %cst = arith.constant 0.000000e+00 : f32
    %8 = vector.broadcast %cst : f32 to vector<1x56x128xf32>
    %9 = arith.maximumf %7, %8 : vector<1x56x128xf32>
    %10 = arith.truncf %9 : vector<1x56x128xf32> to vector<1x56x128xbf16>
    %c0_8 = arith.constant 0 : index
    %c0_9 = arith.constant 0 : index
    %c0_10 = arith.constant 0 : index
    %11 = vector.load %arg5[%c0_8, %c0_9, %c0_10] : memref<1x56x128xbf16, #tpu.memory_space<vmem>>, vector<1x56x128xbf16>
    tpu.vector_store %arg5[%c0_8, %c0_9, %c0_10], %10 {strides = array<i32>} : memref<1x56x128xbf16, #tpu.memory_space<vmem>>, vector<1x56x128xbf16>,
    return
  }
  func.func @transform_0(%arg0: i32, %arg1: i32) -> (i32, i32, i32) {
    %c0_i32 = arith.constant 0 : i32
    %c0_i32_0 = arith.constant 0 : i32
    return %arg0, %arg1, %c0_i32 : i32, i32, i32
  }
  func.func @transform_1(%arg0: i32, %arg1: i32) -> (i32, i32, i32) {
    %c0_i32 = arith.constant 0 : i32
    %c0_i32_0 = arith.constant 0 : i32
    %c0_i32_1 = arith.constant 0 : i32
    return %arg0, %c0_i32, %c0_i32_0 : i32, i32, i32
  }
  func.func @transform_2(%arg0: i32, %arg1: i32) -> (i32, i32, i32) {
    %c0_i32 = arith.constant 0 : i32
    %c0_i32_0 = arith.constant 0 : i32
    %c0_i32_1 = arith.constant 0 : i32
    return %arg0, %c0_i32, %c0_i32_0 : i32, i32, i32
  }
  func.func @transform_3(%arg0: i32, %arg1: i32) -> (i32, i32, i32) {
    %c0_i32 = arith.constant 0 : i32
    %c0_i32_0 = arith.constant 0 : i32
    return %arg0, %arg1, %c0_i32 : i32, i32, i32
  }
}

module attributes {stable_mosaic.version = 11 : i64} {
  func.func @_conv3x3_kernel(%arg0: i32, %arg1: memref<1x9x9x128xbf16, #tpu.memory_space<vmem>>, %arg2: memref<9x128x128xbf16, #tpu.memory_space<vmem>>, %arg3: memref<1x7x7x128xbf16, #tpu.memory_space<vmem>>) attributes {dimension_semantics = [#tpu.dimension_semantics<parallel>], iteration_bounds = array<i64: 2>, scalar_prefetch = 0 : i64, scratch_operands = 0 : i64, tpu.core_type = #tpu.core_type<tc>, window_params = [{transform_indices = @transform_0, window_bounds = array<i64: 1, 9, 9, 128>}, {pipeline_mode = #tpu.pipeline_mode<synchronous>, transform_indices = @transform_1, window_bounds = array<i64: 9, 128, 128>}, {transform_indices = @transform_2, window_bounds = array<i64: 1, 7, 7, 128>}]} {
    %c0_i32 = arith.constant 0 : i32
    %c7_i32 = arith.constant 7 : i32
    %0 = arith.addi %c0_i32, %c7_i32 : i32
    %c1_i32 = arith.constant 1 : i32
    scf.for %arg4 = %c0_i32 to %0 step %c1_i32  : i32 {
      %cst = arith.constant 0.000000e+00 : f32
      %1 = vector.broadcast %cst : f32 to vector<7x128xf32>
      %c0_i32_1 = arith.constant 0 : i32
      %2 = arith.addi %arg4, %c0_i32_1 : i32
      %c0 = arith.constant 0 : index
      %3 = arith.index_cast %2 : i32 to index
      %c0_2 = arith.constant 0 : index
      %c0_3 = arith.constant 0 : index
      %4 = vector.load %arg1[%c0, %3, %c0_2, %c0_3] : memref<1x9x9x128xbf16, #tpu.memory_space<vmem>>, vector<1x1x9x128xbf16>
      %5 = vector.shape_cast %4 : vector<1x1x9x128xbf16> to vector<9x128xbf16>
      %6 = vector.extract_strided_slice %5 {offsets = [0, 0], sizes = [7, 128], strides = [1, 1]} : vector<9x128xbf16> to vector<7x128xbf16>
      %c0_4 = arith.constant 0 : index
      %c0_5 = arith.constant 0 : index
      %c0_6 = arith.constant 0 : index
      %7 = vector.load %arg2[%c0_4, %c0_5, %c0_6] : memref<9x128x128xbf16, #tpu.memory_space<vmem>>, vector<1x128x128xbf16>
      %8 = vector.shape_cast %7 : vector<1x128x128xbf16> to vector<128x128xbf16>
      %cst_7 = arith.constant dense<0.000000e+00> : vector<7x128xf32>
      %9 = tpu.matmul %6, %8, %cst_7 {dimension_numbers = #tpu.dot_dimension_numbers<[1], [0], [0], [1], [0, 0, 1, 1], [], []>} : vector<7x128xbf16>, vector<128x128xbf16>, vector<7x128xf32> -> vector<7x128xf32>
      %10 = arith.addf %1, %9 : vector<7x128xf32>
      %11 = vector.extract_strided_slice %5 {offsets = [1, 0], sizes = [7, 128], strides = [1, 1]} : vector<9x128xbf16> to vector<7x128xbf16>
      %c1 = arith.constant 1 : index
      %c0_8 = arith.constant 0 : index
      %c0_9 = arith.constant 0 : index
      %12 = vector.load %arg2[%c1, %c0_8, %c0_9] : memref<9x128x128xbf16, #tpu.memory_space<vmem>>, vector<1x128x128xbf16>
      %13 = vector.shape_cast %12 : vector<1x128x128xbf16> to vector<128x128xbf16>
      %cst_10 = arith.constant dense<0.000000e+00> : vector<7x128xf32>
      %14 = tpu.matmul %11, %13, %cst_10 {dimension_numbers = #tpu.dot_dimension_numbers<[1], [0], [0], [1], [0, 0, 1, 1], [], []>} : vector<7x128xbf16>, vector<128x128xbf16>, vector<7x128xf32> -> vector<7x128xf32>
      %15 = arith.addf %10, %14 : vector<7x128xf32>
      %16 = vector.extract_strided_slice %5 {offsets = [2, 0], sizes = [7, 128], strides = [1, 1]} : vector<9x128xbf16> to vector<7x128xbf16>
      %c2 = arith.constant 2 : index
      %c0_11 = arith.constant 0 : index
      %c0_12 = arith.constant 0 : index
      %17 = vector.load %arg2[%c2, %c0_11, %c0_12] : memref<9x128x128xbf16, #tpu.memory_space<vmem>>, vector<1x128x128xbf16>
      %18 = vector.shape_cast %17 : vector<1x128x128xbf16> to vector<128x128xbf16>
      %cst_13 = arith.constant dense<0.000000e+00> : vector<7x128xf32>
      %19 = tpu.matmul %16, %18, %cst_13 {dimension_numbers = #tpu.dot_dimension_numbers<[1], [0], [0], [1], [0, 0, 1, 1], [], []>} : vector<7x128xbf16>, vector<128x128xbf16>, vector<7x128xf32> -> vector<7x128xf32>
      %20 = arith.addf %15, %19 : vector<7x128xf32>
      %c1_i32_14 = arith.constant 1 : i32
      %21 = arith.addi %arg4, %c1_i32_14 : i32
      %c0_15 = arith.constant 0 : index
      %22 = arith.index_cast %21 : i32 to index
      %c0_16 = arith.constant 0 : index
      %c0_17 = arith.constant 0 : index
      %23 = vector.load %arg1[%c0_15, %22, %c0_16, %c0_17] : memref<1x9x9x128xbf16, #tpu.memory_space<vmem>>, vector<1x1x9x128xbf16>
      %24 = vector.shape_cast %23 : vector<1x1x9x128xbf16> to vector<9x128xbf16>
      %25 = vector.extract_strided_slice %24 {offsets = [0, 0], sizes = [7, 128], strides = [1, 1]} : vector<9x128xbf16> to vector<7x128xbf16>
      %c3 = arith.constant 3 : index
      %c0_18 = arith.constant 0 : index
      %c0_19 = arith.constant 0 : index
      %26 = vector.load %arg2[%c3, %c0_18, %c0_19] : memref<9x128x128xbf16, #tpu.memory_space<vmem>>, vector<1x128x128xbf16>
      %27 = vector.shape_cast %26 : vector<1x128x128xbf16> to vector<128x128xbf16>
      %cst_20 = arith.constant dense<0.000000e+00> : vector<7x128xf32>
      %28 = tpu.matmul %25, %27, %cst_20 {dimension_numbers = #tpu.dot_dimension_numbers<[1], [0], [0], [1], [0, 0, 1, 1], [], []>} : vector<7x128xbf16>, vector<128x128xbf16>, vector<7x128xf32> -> vector<7x128xf32>
      %29 = arith.addf %20, %28 : vector<7x128xf32>
      %30 = vector.extract_strided_slice %24 {offsets = [1, 0], sizes = [7, 128], strides = [1, 1]} : vector<9x128xbf16> to vector<7x128xbf16>
      %c4 = arith.constant 4 : index
      %c0_21 = arith.constant 0 : index
      %c0_22 = arith.constant 0 : index
      %31 = vector.load %arg2[%c4, %c0_21, %c0_22] : memref<9x128x128xbf16, #tpu.memory_space<vmem>>, vector<1x128x128xbf16>
      %32 = vector.shape_cast %31 : vector<1x128x128xbf16> to vector<128x128xbf16>
      %cst_23 = arith.constant dense<0.000000e+00> : vector<7x128xf32>
      %33 = tpu.matmul %30, %32, %cst_23 {dimension_numbers = #tpu.dot_dimension_numbers<[1], [0], [0], [1], [0, 0, 1, 1], [], []>} : vector<7x128xbf16>, vector<128x128xbf16>, vector<7x128xf32> -> vector<7x128xf32>
      %34 = arith.addf %29, %33 : vector<7x128xf32>
      %35 = vector.extract_strided_slice %24 {offsets = [2, 0], sizes = [7, 128], strides = [1, 1]} : vector<9x128xbf16> to vector<7x128xbf16>
      %c5 = arith.constant 5 : index
      %c0_24 = arith.constant 0 : index
      %c0_25 = arith.constant 0 : index
      %36 = vector.load %arg2[%c5, %c0_24, %c0_25] : memref<9x128x128xbf16, #tpu.memory_space<vmem>>, vector<1x128x128xbf16>
      %37 = vector.shape_cast %36 : vector<1x128x128xbf16> to vector<128x128xbf16>
      %cst_26 = arith.constant dense<0.000000e+00> : vector<7x128xf32>
      %38 = tpu.matmul %35, %37, %cst_26 {dimension_numbers = #tpu.dot_dimension_numbers<[1], [0], [0], [1], [0, 0, 1, 1], [], []>} : vector<7x128xbf16>, vector<128x128xbf16>, vector<7x128xf32> -> vector<7x128xf32>
      %39 = arith.addf %34, %38 : vector<7x128xf32>
      %c2_i32 = arith.constant 2 : i32
      %40 = arith.addi %arg4, %c2_i32 : i32
      %c0_27 = arith.constant 0 : index
      %41 = arith.index_cast %40 : i32 to index
      %c0_28 = arith.constant 0 : index
      %c0_29 = arith.constant 0 : index
      %42 = vector.load %arg1[%c0_27, %41, %c0_28, %c0_29] : memref<1x9x9x128xbf16, #tpu.memory_space<vmem>>, vector<1x1x9x128xbf16>
      %43 = vector.shape_cast %42 : vector<1x1x9x128xbf16> to vector<9x128xbf16>
      %44 = vector.extract_strided_slice %43 {offsets = [0, 0], sizes = [7, 128], strides = [1, 1]} : vector<9x128xbf16> to vector<7x128xbf16>
      %c6 = arith.constant 6 : index
      %c0_30 = arith.constant 0 : index
      %c0_31 = arith.constant 0 : index
      %45 = vector.load %arg2[%c6, %c0_30, %c0_31] : memref<9x128x128xbf16, #tpu.memory_space<vmem>>, vector<1x128x128xbf16>
      %46 = vector.shape_cast %45 : vector<1x128x128xbf16> to vector<128x128xbf16>
      %cst_32 = arith.constant dense<0.000000e+00> : vector<7x128xf32>
      %47 = tpu.matmul %44, %46, %cst_32 {dimension_numbers = #tpu.dot_dimension_numbers<[1], [0], [0], [1], [0, 0, 1, 1], [], []>} : vector<7x128xbf16>, vector<128x128xbf16>, vector<7x128xf32> -> vector<7x128xf32>
      %48 = arith.addf %39, %47 : vector<7x128xf32>
      %49 = vector.extract_strided_slice %43 {offsets = [1, 0], sizes = [7, 128], strides = [1, 1]} : vector<9x128xbf16> to vector<7x128xbf16>
      %c7 = arith.constant 7 : index
      %c0_33 = arith.constant 0 : index
      %c0_34 = arith.constant 0 : index
      %50 = vector.load %arg2[%c7, %c0_33, %c0_34] : memref<9x128x128xbf16, #tpu.memory_space<vmem>>, vector<1x128x128xbf16>
      %51 = vector.shape_cast %50 : vector<1x128x128xbf16> to vector<128x128xbf16>
      %cst_35 = arith.constant dense<0.000000e+00> : vector<7x128xf32>
      %52 = tpu.matmul %49, %51, %cst_35 {dimension_numbers = #tpu.dot_dimension_numbers<[1], [0], [0], [1], [0, 0, 1, 1], [], []>} : vector<7x128xbf16>, vector<128x128xbf16>, vector<7x128xf32> -> vector<7x128xf32>
      %53 = arith.addf %48, %52 : vector<7x128xf32>
      %54 = vector.extract_strided_slice %43 {offsets = [2, 0], sizes = [7, 128], strides = [1, 1]} : vector<9x128xbf16> to vector<7x128xbf16>
      %c8 = arith.constant 8 : index
      %c0_36 = arith.constant 0 : index
      %c0_37 = arith.constant 0 : index
      %55 = vector.load %arg2[%c8, %c0_36, %c0_37] : memref<9x128x128xbf16, #tpu.memory_space<vmem>>, vector<1x128x128xbf16>
      %56 = vector.shape_cast %55 : vector<1x128x128xbf16> to vector<128x128xbf16>
      %cst_38 = arith.constant dense<0.000000e+00> : vector<7x128xf32>
      %57 = tpu.matmul %54, %56, %cst_38 {dimension_numbers = #tpu.dot_dimension_numbers<[1], [0], [0], [1], [0, 0, 1, 1], [], []>} : vector<7x128xbf16>, vector<128x128xbf16>, vector<7x128xf32> -> vector<7x128xf32>
      %58 = arith.addf %53, %57 : vector<7x128xf32>
      %59 = arith.truncf %58 : vector<7x128xf32> to vector<7x128xbf16>
      %c0_39 = arith.constant 0 : index
      %60 = arith.index_cast %arg4 : i32 to index
      %c0_40 = arith.constant 0 : index
      %c0_41 = arith.constant 0 : index
      %61 = vector.load %arg3[%c0_39, %60, %c0_40, %c0_41] : memref<1x7x7x128xbf16, #tpu.memory_space<vmem>>, vector<1x1x7x128xbf16>
      %62 = vector.shape_cast %61 : vector<1x1x7x128xbf16> to vector<7x128xbf16>
      %63 = vector.shape_cast %59 : vector<7x128xbf16> to vector<1x1x7x128xbf16>
      tpu.vector_store %arg3[%c0_39, %60, %c0_40, %c0_41], %63 {strides = array<i32>} : memref<1x7x7x128xbf16, #tpu.memory_space<vmem>>, vector<1x1x7x128xbf16>,
    }
    %c7_i32_0 = arith.constant 7 : i32
    return
  }
  func.func @transform_0(%arg0: i32) -> (i32, i32, i32, i32) {
    %c0_i32 = arith.constant 0 : i32
    %c0_i32_0 = arith.constant 0 : i32
    %c0_i32_1 = arith.constant 0 : i32
    %c0_i32_2 = arith.constant 0 : i32
    return %arg0, %c0_i32, %c0_i32_0, %c0_i32_1 : i32, i32, i32, i32
  }
  func.func @transform_1(%arg0: i32) -> (i32, i32, i32) {
    %c0_i32 = arith.constant 0 : i32
    %c0_i32_0 = arith.constant 0 : i32
    %c0_i32_1 = arith.constant 0 : i32
    %c0_i32_2 = arith.constant 0 : i32
    return %c0_i32, %c0_i32_0, %c0_i32_1 : i32, i32, i32
  }
  func.func @transform_2(%arg0: i32) -> (i32, i32, i32, i32) {
    %c0_i32 = arith.constant 0 : i32
    %c0_i32_0 = arith.constant 0 : i32
    %c0_i32_1 = arith.constant 0 : i32
    %c0_i32_2 = arith.constant 0 : i32
    return %arg0, %c0_i32, %c0_i32_0, %c0_i32_1 : i32, i32, i32, i32
  }
}

module attributes {stable_mosaic.version = 11 : i64} {
  func.func @_affine_res_kernel(%arg0: i32, %arg1: i32, %arg2: memref<1x56x128xbf16, #tpu.memory_space<vmem>>, %arg3: memref<1x1x128xf32, #tpu.memory_space<vmem>>, %arg4: memref<1x1x128xf32, #tpu.memory_space<vmem>>, %arg5: memref<1x56x128xbf16, #tpu.memory_space<vmem>>, %arg6: memref<1x1x128xf32, #tpu.memory_space<vmem>>, %arg7: memref<1x1x128xf32, #tpu.memory_space<vmem>>, %arg8: memref<1x56x128xbf16, #tpu.memory_space<vmem>>) attributes {dimension_semantics = [#tpu.dimension_semantics<parallel>, #tpu.dimension_semantics<parallel>], iteration_bounds = array<i64: 2, 1>, scalar_prefetch = 0 : i64, scratch_operands = 0 : i64, tpu.core_type = #tpu.core_type<tc>, window_params = [{transform_indices = @transform_0, window_bounds = array<i64: 1, 56, 128>}, {transform_indices = @transform_1, window_bounds = array<i64: 1, 1, 128>}, {transform_indices = @transform_2, window_bounds = array<i64: 1, 1, 128>}, {transform_indices = @transform_3, window_bounds = array<i64: 1, 56, 128>}, {transform_indices = @transform_4, window_bounds = array<i64: 1, 1, 128>}, {transform_indices = @transform_5, window_bounds = array<i64: 1, 1, 128>}, {transform_indices = @transform_6, window_bounds = array<i64: 1, 56, 128>}]} {
    %c0 = arith.constant 0 : index
    %c0_0 = arith.constant 0 : index
    %c0_1 = arith.constant 0 : index
    %0 = vector.load %arg2[%c0, %c0_0, %c0_1] : memref<1x56x128xbf16, #tpu.memory_space<vmem>>, vector<1x56x128xbf16>
    %1 = arith.extf %0 : vector<1x56x128xbf16> to vector<1x56x128xf32>
    %c0_2 = arith.constant 0 : index
    %c0_3 = arith.constant 0 : index
    %c0_4 = arith.constant 0 : index
    %2 = vector.load %arg3[%c0_2, %c0_3, %c0_4] : memref<1x1x128xf32, #tpu.memory_space<vmem>>, vector<1x1x128xf32>
    %3 = vector.broadcast %2 : vector<1x1x128xf32> to vector<1x56x128xf32>
    %4 = arith.mulf %1, %3 : vector<1x56x128xf32>
    %c0_5 = arith.constant 0 : index
    %c0_6 = arith.constant 0 : index
    %c0_7 = arith.constant 0 : index
    %5 = vector.load %arg4[%c0_5, %c0_6, %c0_7] : memref<1x1x128xf32, #tpu.memory_space<vmem>>, vector<1x1x128xf32>
    %6 = vector.broadcast %5 : vector<1x1x128xf32> to vector<1x56x128xf32>
    %7 = arith.addf %4, %6 : vector<1x56x128xf32>
    %c0_8 = arith.constant 0 : index
    %c0_9 = arith.constant 0 : index
    %c0_10 = arith.constant 0 : index
    %8 = vector.load %arg5[%c0_8, %c0_9, %c0_10] : memref<1x56x128xbf16, #tpu.memory_space<vmem>>, vector<1x56x128xbf16>
    %9 = arith.extf %8 : vector<1x56x128xbf16> to vector<1x56x128xf32>
    %c0_11 = arith.constant 0 : index
    %c0_12 = arith.constant 0 : index
    %c0_13 = arith.constant 0 : index
    %10 = vector.load %arg6[%c0_11, %c0_12, %c0_13] : memref<1x1x128xf32, #tpu.memory_space<vmem>>, vector<1x1x128xf32>
    %11 = vector.broadcast %10 : vector<1x1x128xf32> to vector<1x56x128xf32>
    %12 = arith.mulf %9, %11 : vector<1x56x128xf32>
    %c0_14 = arith.constant 0 : index
    %c0_15 = arith.constant 0 : index
    %c0_16 = arith.constant 0 : index
    %13 = vector.load %arg7[%c0_14, %c0_15, %c0_16] : memref<1x1x128xf32, #tpu.memory_space<vmem>>, vector<1x1x128xf32>
    %14 = vector.broadcast %13 : vector<1x1x128xf32> to vector<1x56x128xf32>
    %15 = arith.addf %12, %14 : vector<1x56x128xf32>
    %16 = arith.addf %7, %15 : vector<1x56x128xf32>
    %cst = arith.constant 0.000000e+00 : f32
    %17 = vector.broadcast %cst : f32 to vector<1x56x128xf32>
    %18 = arith.maximumf %16, %17 : vector<1x56x128xf32>
    %19 = arith.truncf %18 : vector<1x56x128xf32> to vector<1x56x128xbf16>
    %c0_17 = arith.constant 0 : index
    %c0_18 = arith.constant 0 : index
    %c0_19 = arith.constant 0 : index
    %20 = vector.load %arg8[%c0_17, %c0_18, %c0_19] : memref<1x56x128xbf16, #tpu.memory_space<vmem>>, vector<1x56x128xbf16>
    tpu.vector_store %arg8[%c0_17, %c0_18, %c0_19], %19 {strides = array<i32>} : memref<1x56x128xbf16, #tpu.memory_space<vmem>>, vector<1x56x128xbf16>,
    return
  }
  func.func @transform_0(%arg0: i32, %arg1: i32) -> (i32, i32, i32) {
    %c0_i32 = arith.constant 0 : i32
    %c0_i32_0 = arith.constant 0 : i32
    return %arg0, %arg1, %c0_i32 : i32, i32, i32
  }
  func.func @transform_1(%arg0: i32, %arg1: i32) -> (i32, i32, i32) {
    %c0_i32 = arith.constant 0 : i32
    %c0_i32_0 = arith.constant 0 : i32
    %c0_i32_1 = arith.constant 0 : i32
    return %arg0, %c0_i32, %c0_i32_0 : i32, i32, i32
  }
  func.func @transform_2(%arg0: i32, %arg1: i32) -> (i32, i32, i32) {
    %c0_i32 = arith.constant 0 : i32
    %c0_i32_0 = arith.constant 0 : i32
    %c0_i32_1 = arith.constant 0 : i32
    return %arg0, %c0_i32, %c0_i32_0 : i32, i32, i32
  }
  func.func @transform_3(%arg0: i32, %arg1: i32) -> (i32, i32, i32) {
    %c0_i32 = arith.constant 0 : i32
    %c0_i32_0 = arith.constant 0 : i32
    return %arg0, %arg1, %c0_i32 : i32, i32, i32
  }
  func.func @transform_4(%arg0: i32, %arg1: i32) -> (i32, i32, i32) {
    %c0_i32 = arith.constant 0 : i32
    %c0_i32_0 = arith.constant 0 : i32
    %c0_i32_1 = arith.constant 0 : i32
    return %arg0, %c0_i32, %c0_i32_0 : i32, i32, i32
  }
  func.func @transform_5(%arg0: i32, %arg1: i32) -> (i32, i32, i32) {
    %c0_i32 = arith.constant 0 : i32
    %c0_i32_0 = arith.constant 0 : i32
    %c0_i32_1 = arith.constant 0 : i32
    return %arg0, %c0_i32, %c0_i32_0 : i32, i32, i32
  }
  func.func @transform_6(%arg0: i32, %arg1: i32) -> (i32, i32, i32) {
    %c0_i32 = arith.constant 0 : i32
    %c0_i32_0 = arith.constant 0 : i32
    return %arg0, %arg1, %c0_i32 : i32, i32, i32
  }
}

module attributes {stable_mosaic.version = 11 : i64} {
  func.func @_matmul_kernel(%arg0: i32, %arg1: i32, %arg2: i32, %arg3: memref<32x128xbf16, #tpu.memory_space<vmem>>, %arg4: memref<128x256xbf16, #tpu.memory_space<vmem>>, %arg5: memref<32x256xbf16, #tpu.memory_space<vmem>>, %arg6: memref<32x256xf32, #tpu.memory_space<vmem>>) attributes {dimension_semantics = [#tpu.dimension_semantics<parallel>, #tpu.dimension_semantics<parallel>, #tpu.dimension_semantics<arbitrary>], iteration_bounds = array<i64: 1, 1, 1>, scalar_prefetch = 0 : i64, scratch_operands = 1 : i64, tpu.core_type = #tpu.core_type<tc>, window_params = [{transform_indices = @transform_0, window_bounds = array<i64: 32, 128>}, {transform_indices = @transform_1, window_bounds = array<i64: 128, 256>}, {transform_indices = @transform_2, window_bounds = array<i64: 32, 256>}]} {
    %c0_i32 = arith.constant 0 : i32
    %0 = arith.cmpi eq, %arg2, %c0_i32 : i32
    %1 = arith.extui %0 : i1 to i32
    %c0_i32_0 = arith.constant 0 : i32
    %2 = arith.cmpi ne, %1, %c0_i32_0 : i32
    scf.if %2 {
      %cst_10 = arith.constant 0.000000e+00 : f32
      %12 = vector.broadcast %cst_10 : f32 to vector<32x256xf32>
      %c0_11 = arith.constant 0 : index
      %c0_12 = arith.constant 0 : index
      %13 = vector.load %arg6[%c0_11, %c0_12] : memref<32x256xf32, #tpu.memory_space<vmem>>, vector<32x256xf32>
      tpu.vector_store %arg6[%c0_11, %c0_12], %12 {strides = array<i32>} : memref<32x256xf32, #tpu.memory_space<vmem>>, vector<32x256xf32>,
    } else {
    }
    %c0 = arith.constant 0 : index
    %c0_1 = arith.constant 0 : index
    %3 = vector.load %arg6[%c0, %c0_1] : memref<32x256xf32, #tpu.memory_space<vmem>>, vector<32x256xf32>
    %c0_2 = arith.constant 0 : index
    %c0_3 = arith.constant 0 : index
    %4 = vector.load %arg3[%c0_2, %c0_3] : memref<32x128xbf16, #tpu.memory_space<vmem>>, vector<32x128xbf16>
    %c0_4 = arith.constant 0 : index
    %c0_5 = arith.constant 0 : index
    %5 = vector.load %arg4[%c0_4, %c0_5] : memref<128x256xbf16, #tpu.memory_space<vmem>>, vector<128x256xbf16>
    %cst = arith.constant dense<0.000000e+00> : vector<32x256xf32>
    %6 = tpu.matmul %4, %5, %cst {dimension_numbers = #tpu.dot_dimension_numbers<[1], [0], [0], [1], [0, 0, 1, 1], [], []>} : vector<32x128xbf16>, vector<128x256xbf16>, vector<32x256xf32> -> vector<32x256xf32>
    %7 = arith.addf %3, %6 : vector<32x256xf32>
    %c0_6 = arith.constant 0 : index
    %c0_7 = arith.constant 0 : index
    %8 = vector.load %arg6[%c0_6, %c0_7] : memref<32x256xf32, #tpu.memory_space<vmem>>, vector<32x256xf32>
    tpu.vector_store %arg6[%c0_6, %c0_7], %7 {strides = array<i32>} : memref<32x256xf32, #tpu.memory_space<vmem>>, vector<32x256xf32>,
    %c0_i32_8 = arith.constant 0 : i32
    %9 = arith.cmpi eq, %arg2, %c0_i32_8 : i32
    %10 = arith.extui %9 : i1 to i32
    %c0_i32_9 = arith.constant 0 : i32
    %11 = arith.cmpi ne, %10, %c0_i32_9 : i32
    scf.if %11 {
      %c0_10 = arith.constant 0 : index
      %c0_11 = arith.constant 0 : index
      %12 = vector.load %arg6[%c0_10, %c0_11] : memref<32x256xf32, #tpu.memory_space<vmem>>, vector<32x256xf32>
      %13 = arith.truncf %12 : vector<32x256xf32> to vector<32x256xbf16>
      %c0_12 = arith.constant 0 : index
      %c0_13 = arith.constant 0 : index
      %14 = vector.load %arg5[%c0_12, %c0_13] : memref<32x256xbf16, #tpu.memory_space<vmem>>, vector<32x256xbf16>
      tpu.vector_store %arg5[%c0_12, %c0_13], %13 {strides = array<i32>} : memref<32x256xbf16, #tpu.memory_space<vmem>>, vector<32x256xbf16>,
    } else {
    }
    return
  }
  func.func @transform_0(%arg0: i32, %arg1: i32, %arg2: i32) -> (i32, i32) {
    %c0_i32 = arith.constant 0 : i32
    return %arg0, %arg2 : i32, i32
  }
  func.func @transform_1(%arg0: i32, %arg1: i32, %arg2: i32) -> (i32, i32) {
    %c0_i32 = arith.constant 0 : i32
    return %arg2, %arg1 : i32, i32
  }
  func.func @transform_2(%arg0: i32, %arg1: i32, %arg2: i32) -> (i32, i32) {
    %c0_i32 = arith.constant 0 : i32
    return %arg0, %arg1 : i32, i32
  }
}

module attributes {stable_mosaic.version = 11 : i64} {
  func.func @_gn_stats_kernel(%arg0: i32, %arg1: i32, %arg2: memref<1x16x256xbf16, #tpu.memory_space<vmem>>, %arg3: memref<1x1x256xf32, #tpu.memory_space<vmem>>, %arg4: memref<1x1x256xf32, #tpu.memory_space<vmem>>) attributes {dimension_semantics = [#tpu.dimension_semantics<parallel>, #tpu.dimension_semantics<arbitrary>], iteration_bounds = array<i64: 2, 1>, scalar_prefetch = 0 : i64, scratch_operands = 0 : i64, tpu.core_type = #tpu.core_type<tc>, window_params = [{transform_indices = @transform_0, window_bounds = array<i64: 1, 16, 256>}, {transform_indices = @transform_1, window_bounds = array<i64: 1, 1, 256>}, {transform_indices = @transform_2, window_bounds = array<i64: 1, 1, 256>}]} {
    %c0_i32 = arith.constant 0 : i32
    %0 = arith.cmpi eq, %arg1, %c0_i32 : i32
    %1 = arith.extui %0 : i1 to i32
    %c0_i32_0 = arith.constant 0 : i32
    %2 = arith.cmpi ne, %1, %c0_i32_0 : i32
    scf.if %2 {
      %cst_16 = arith.constant 0.000000e+00 : f32
      %16 = vector.broadcast %cst_16 : f32 to vector<1x1x256xf32>
      %c0_17 = arith.constant 0 : index
      %c0_18 = arith.constant 0 : index
      %c0_19 = arith.constant 0 : index
      %17 = vector.load %arg3[%c0_17, %c0_18, %c0_19] : memref<1x1x256xf32, #tpu.memory_space<vmem>>, vector<1x1x256xf32>
      tpu.vector_store %arg3[%c0_17, %c0_18, %c0_19], %16 {strides = array<i32>} : memref<1x1x256xf32, #tpu.memory_space<vmem>>, vector<1x1x256xf32>,
      %cst_20 = arith.constant 0.000000e+00 : f32
      %18 = vector.broadcast %cst_20 : f32 to vector<1x1x256xf32>
      %c0_21 = arith.constant 0 : index
      %c0_22 = arith.constant 0 : index
      %c0_23 = arith.constant 0 : index
      %19 = vector.load %arg4[%c0_21, %c0_22, %c0_23] : memref<1x1x256xf32, #tpu.memory_space<vmem>>, vector<1x1x256xf32>
      tpu.vector_store %arg4[%c0_21, %c0_22, %c0_23], %18 {strides = array<i32>} : memref<1x1x256xf32, #tpu.memory_space<vmem>>, vector<1x1x256xf32>,
    } else {
    }
    %c0 = arith.constant 0 : index
    %c0_1 = arith.constant 0 : index
    %c0_2 = arith.constant 0 : index
    %3 = vector.load %arg2[%c0, %c0_1, %c0_2] : memref<1x16x256xbf16, #tpu.memory_space<vmem>>, vector<1x16x256xbf16>
    %4 = arith.extf %3 : vector<1x16x256xbf16> to vector<1x16x256xf32>
    %c0_3 = arith.constant 0 : index
    %c0_4 = arith.constant 0 : index
    %c0_5 = arith.constant 0 : index
    %5 = vector.load %arg3[%c0_3, %c0_4, %c0_5] : memref<1x1x256xf32, #tpu.memory_space<vmem>>, vector<1x1x256xf32>
    %cst = arith.constant dense<0.000000e+00> : vector<1x256xf32>
    %6 = vector.multi_reduction <add>, %4, %cst [1] : vector<1x16x256xf32> to vector<1x256xf32>
    %7 = vector.shape_cast %6 : vector<1x256xf32> to vector<1x1x256xf32>
    %8 = arith.addf %5, %7 : vector<1x1x256xf32>
    %c0_6 = arith.constant 0 : index
    %c0_7 = arith.constant 0 : index
    %c0_8 = arith.constant 0 : index
    %9 = vector.load %arg3[%c0_6, %c0_7, %c0_8] : memref<1x1x256xf32, #tpu.memory_space<vmem>>, vector<1x1x256xf32>
    tpu.vector_store %arg3[%c0_6, %c0_7, %c0_8], %8 {strides = array<i32>} : memref<1x1x256xf32, #tpu.memory_space<vmem>>, vector<1x1x256xf32>,
    %c0_9 = arith.constant 0 : index
    %c0_10 = arith.constant 0 : index
    %c0_11 = arith.constant 0 : index
    %10 = vector.load %arg4[%c0_9, %c0_10, %c0_11] : memref<1x1x256xf32, #tpu.memory_space<vmem>>, vector<1x1x256xf32>
    %11 = arith.mulf %4, %4 : vector<1x16x256xf32>
    %cst_12 = arith.constant dense<0.000000e+00> : vector<1x256xf32>
    %12 = vector.multi_reduction <add>, %11, %cst_12 [1] : vector<1x16x256xf32> to vector<1x256xf32>
    %13 = vector.shape_cast %12 : vector<1x256xf32> to vector<1x1x256xf32>
    %14 = arith.addf %10, %13 : vector<1x1x256xf32>
    %c0_13 = arith.constant 0 : index
    %c0_14 = arith.constant 0 : index
    %c0_15 = arith.constant 0 : index
    %15 = vector.load %arg4[%c0_13, %c0_14, %c0_15] : memref<1x1x256xf32, #tpu.memory_space<vmem>>, vector<1x1x256xf32>
    tpu.vector_store %arg4[%c0_13, %c0_14, %c0_15], %14 {strides = array<i32>} : memref<1x1x256xf32, #tpu.memory_space<vmem>>, vector<1x1x256xf32>,
    return
  }
  func.func @transform_0(%arg0: i32, %arg1: i32) -> (i32, i32, i32) {
    %c0_i32 = arith.constant 0 : i32
    %c0_i32_0 = arith.constant 0 : i32
    return %arg0, %arg1, %c0_i32 : i32, i32, i32
  }
  func.func @transform_1(%arg0: i32, %arg1: i32) -> (i32, i32, i32) {
    %c0_i32 = arith.constant 0 : i32
    %c0_i32_0 = arith.constant 0 : i32
    %c0_i32_1 = arith.constant 0 : i32
    return %arg0, %c0_i32, %c0_i32_0 : i32, i32, i32
  }
  func.func @transform_2(%arg0: i32, %arg1: i32) -> (i32, i32, i32) {
    %c0_i32 = arith.constant 0 : i32
    %c0_i32_0 = arith.constant 0 : i32
    %c0_i32_1 = arith.constant 0 : i32
    return %arg0, %c0_i32, %c0_i32_0 : i32, i32, i32
  }
}

module attributes {stable_mosaic.version = 11 : i64} {
  func.func @_matmul_kernel(%arg0: i32, %arg1: i32, %arg2: i32, %arg3: memref<32x384xbf16, #tpu.memory_space<vmem>>, %arg4: memref<384x128xbf16, #tpu.memory_space<vmem>>, %arg5: memref<32x128xbf16, #tpu.memory_space<vmem>>, %arg6: memref<32x128xf32, #tpu.memory_space<vmem>>) attributes {dimension_semantics = [#tpu.dimension_semantics<parallel>, #tpu.dimension_semantics<parallel>, #tpu.dimension_semantics<arbitrary>], iteration_bounds = array<i64: 1, 1, 3>, scalar_prefetch = 0 : i64, scratch_operands = 1 : i64, tpu.core_type = #tpu.core_type<tc>, window_params = [{transform_indices = @transform_0, window_bounds = array<i64: 32, 384>}, {transform_indices = @transform_1, window_bounds = array<i64: 384, 128>}, {transform_indices = @transform_2, window_bounds = array<i64: 32, 128>}]} {
    %c0_i32 = arith.constant 0 : i32
    %0 = arith.cmpi eq, %arg2, %c0_i32 : i32
    %1 = arith.extui %0 : i1 to i32
    %c0_i32_0 = arith.constant 0 : i32
    %2 = arith.cmpi ne, %1, %c0_i32_0 : i32
    scf.if %2 {
      %cst_9 = arith.constant 0.000000e+00 : f32
      %12 = vector.broadcast %cst_9 : f32 to vector<32x128xf32>
      %c0_10 = arith.constant 0 : index
      %c0_11 = arith.constant 0 : index
      %13 = vector.load %arg6[%c0_10, %c0_11] : memref<32x128xf32, #tpu.memory_space<vmem>>, vector<32x128xf32>
      tpu.vector_store %arg6[%c0_10, %c0_11], %12 {strides = array<i32>} : memref<32x128xf32, #tpu.memory_space<vmem>>, vector<32x128xf32>,
    } else {
    }
    %c0 = arith.constant 0 : index
    %c0_1 = arith.constant 0 : index
    %3 = vector.load %arg6[%c0, %c0_1] : memref<32x128xf32, #tpu.memory_space<vmem>>, vector<32x128xf32>
    %c0_2 = arith.constant 0 : index
    %c0_3 = arith.constant 0 : index
    %4 = vector.load %arg3[%c0_2, %c0_3] : memref<32x384xbf16, #tpu.memory_space<vmem>>, vector<32x384xbf16>
    %c0_4 = arith.constant 0 : index
    %c0_5 = arith.constant 0 : index
    %5 = vector.load %arg4[%c0_4, %c0_5] : memref<384x128xbf16, #tpu.memory_space<vmem>>, vector<384x128xbf16>
    %cst = arith.constant dense<0.000000e+00> : vector<32x128xf32>
    %6 = tpu.matmul %4, %5, %cst {dimension_numbers = #tpu.dot_dimension_numbers<[1], [0], [0], [1], [0, 0, 1, 1], [], []>} : vector<32x384xbf16>, vector<384x128xbf16>, vector<32x128xf32> -> vector<32x128xf32>
    %7 = arith.addf %3, %6 : vector<32x128xf32>
    %c0_6 = arith.constant 0 : index
    %c0_7 = arith.constant 0 : index
    %8 = vector.load %arg6[%c0_6, %c0_7] : memref<32x128xf32, #tpu.memory_space<vmem>>, vector<32x128xf32>
    tpu.vector_store %arg6[%c0_6, %c0_7], %7 {strides = array<i32>} : memref<32x128xf32, #tpu.memory_space<vmem>>, vector<32x128xf32>,
    %c2_i32 = arith.constant 2 : i32
    %9 = arith.cmpi eq, %arg2, %c2_i32 : i32
    %10 = arith.extui %9 : i1 to i32
    %c0_i32_8 = arith.constant 0 : i32
    %11 = arith.cmpi ne, %10, %c0_i32_8 : i32
    scf.if %11 {
      %c0_9 = arith.constant 0 : index
      %c0_10 = arith.constant 0 : index
      %12 = vector.load %arg6[%c0_9, %c0_10] : memref<32x128xf32, #tpu.memory_space<vmem>>, vector<32x128xf32>
      %13 = arith.truncf %12 : vector<32x128xf32> to vector<32x128xbf16>
      %c0_11 = arith.constant 0 : index
      %c0_12 = arith.constant 0 : index
      %14 = vector.load %arg5[%c0_11, %c0_12] : memref<32x128xbf16, #tpu.memory_space<vmem>>, vector<32x128xbf16>
      tpu.vector_store %arg5[%c0_11, %c0_12], %13 {strides = array<i32>} : memref<32x128xbf16, #tpu.memory_space<vmem>>, vector<32x128xbf16>,
    } else {
    }
    return
  }
  func.func @transform_0(%arg0: i32, %arg1: i32, %arg2: i32) -> (i32, i32) {
    %c0_i32 = arith.constant 0 : i32
    return %arg0, %arg2 : i32, i32
  }
  func.func @transform_1(%arg0: i32, %arg1: i32, %arg2: i32) -> (i32, i32) {
    %c0_i32 = arith.constant 0 : i32
    return %arg2, %arg1 : i32, i32
  }
  func.func @transform_2(%arg0: i32, %arg1: i32, %arg2: i32) -> (i32, i32) {
    %c0_i32 = arith.constant 0 : i32
    return %arg0, %arg1 : i32, i32
  }
}

module attributes {stable_mosaic.version = 11 : i64} {
  func.func @_gn_stats_kernel(%arg0: i32, %arg1: i32, %arg2: memref<1x16x128xbf16, #tpu.memory_space<vmem>>, %arg3: memref<1x1x128xf32, #tpu.memory_space<vmem>>, %arg4: memref<1x1x128xf32, #tpu.memory_space<vmem>>) attributes {dimension_semantics = [#tpu.dimension_semantics<parallel>, #tpu.dimension_semantics<arbitrary>], iteration_bounds = array<i64: 2, 1>, scalar_prefetch = 0 : i64, scratch_operands = 0 : i64, tpu.core_type = #tpu.core_type<tc>, window_params = [{transform_indices = @transform_0, window_bounds = array<i64: 1, 16, 128>}, {transform_indices = @transform_1, window_bounds = array<i64: 1, 1, 128>}, {transform_indices = @transform_2, window_bounds = array<i64: 1, 1, 128>}]} {
    %c0_i32 = arith.constant 0 : i32
    %0 = arith.cmpi eq, %arg1, %c0_i32 : i32
    %1 = arith.extui %0 : i1 to i32
    %c0_i32_0 = arith.constant 0 : i32
    %2 = arith.cmpi ne, %1, %c0_i32_0 : i32
    scf.if %2 {
      %cst_16 = arith.constant 0.000000e+00 : f32
      %16 = vector.broadcast %cst_16 : f32 to vector<1x1x128xf32>
      %c0_17 = arith.constant 0 : index
      %c0_18 = arith.constant 0 : index
      %c0_19 = arith.constant 0 : index
      %17 = vector.load %arg3[%c0_17, %c0_18, %c0_19] : memref<1x1x128xf32, #tpu.memory_space<vmem>>, vector<1x1x128xf32>
      tpu.vector_store %arg3[%c0_17, %c0_18, %c0_19], %16 {strides = array<i32>} : memref<1x1x128xf32, #tpu.memory_space<vmem>>, vector<1x1x128xf32>,
      %cst_20 = arith.constant 0.000000e+00 : f32
      %18 = vector.broadcast %cst_20 : f32 to vector<1x1x128xf32>
      %c0_21 = arith.constant 0 : index
      %c0_22 = arith.constant 0 : index
      %c0_23 = arith.constant 0 : index
      %19 = vector.load %arg4[%c0_21, %c0_22, %c0_23] : memref<1x1x128xf32, #tpu.memory_space<vmem>>, vector<1x1x128xf32>
      tpu.vector_store %arg4[%c0_21, %c0_22, %c0_23], %18 {strides = array<i32>} : memref<1x1x128xf32, #tpu.memory_space<vmem>>, vector<1x1x128xf32>,
    } else {
    }
    %c0 = arith.constant 0 : index
    %c0_1 = arith.constant 0 : index
    %c0_2 = arith.constant 0 : index
    %3 = vector.load %arg2[%c0, %c0_1, %c0_2] : memref<1x16x128xbf16, #tpu.memory_space<vmem>>, vector<1x16x128xbf16>
    %4 = arith.extf %3 : vector<1x16x128xbf16> to vector<1x16x128xf32>
    %c0_3 = arith.constant 0 : index
    %c0_4 = arith.constant 0 : index
    %c0_5 = arith.constant 0 : index
    %5 = vector.load %arg3[%c0_3, %c0_4, %c0_5] : memref<1x1x128xf32, #tpu.memory_space<vmem>>, vector<1x1x128xf32>
    %cst = arith.constant dense<0.000000e+00> : vector<1x128xf32>
    %6 = vector.multi_reduction <add>, %4, %cst [1] : vector<1x16x128xf32> to vector<1x128xf32>
    %7 = vector.shape_cast %6 : vector<1x128xf32> to vector<1x1x128xf32>
    %8 = arith.addf %5, %7 : vector<1x1x128xf32>
    %c0_6 = arith.constant 0 : index
    %c0_7 = arith.constant 0 : index
    %c0_8 = arith.constant 0 : index
    %9 = vector.load %arg3[%c0_6, %c0_7, %c0_8] : memref<1x1x128xf32, #tpu.memory_space<vmem>>, vector<1x1x128xf32>
    tpu.vector_store %arg3[%c0_6, %c0_7, %c0_8], %8 {strides = array<i32>} : memref<1x1x128xf32, #tpu.memory_space<vmem>>, vector<1x1x128xf32>,
    %c0_9 = arith.constant 0 : index
    %c0_10 = arith.constant 0 : index
    %c0_11 = arith.constant 0 : index
    %10 = vector.load %arg4[%c0_9, %c0_10, %c0_11] : memref<1x1x128xf32, #tpu.memory_space<vmem>>, vector<1x1x128xf32>
    %11 = arith.mulf %4, %4 : vector<1x16x128xf32>
    %cst_12 = arith.constant dense<0.000000e+00> : vector<1x128xf32>
    %12 = vector.multi_reduction <add>, %11, %cst_12 [1] : vector<1x16x128xf32> to vector<1x128xf32>
    %13 = vector.shape_cast %12 : vector<1x128xf32> to vector<1x1x128xf32>
    %14 = arith.addf %10, %13 : vector<1x1x128xf32>
    %c0_13 = arith.constant 0 : index
    %c0_14 = arith.constant 0 : index
    %c0_15 = arith.constant 0 : index
    %15 = vector.load %arg4[%c0_13, %c0_14, %c0_15] : memref<1x1x128xf32, #tpu.memory_space<vmem>>, vector<1x1x128xf32>
    tpu.vector_store %arg4[%c0_13, %c0_14, %c0_15], %14 {strides = array<i32>} : memref<1x1x128xf32, #tpu.memory_space<vmem>>, vector<1x1x128xf32>,
    return
  }
  func.func @transform_0(%arg0: i32, %arg1: i32) -> (i32, i32, i32) {
    %c0_i32 = arith.constant 0 : i32
    %c0_i32_0 = arith.constant 0 : i32
    return %arg0, %arg1, %c0_i32 : i32, i32, i32
  }
  func.func @transform_1(%arg0: i32, %arg1: i32) -> (i32, i32, i32) {
    %c0_i32 = arith.constant 0 : i32
    %c0_i32_0 = arith.constant 0 : i32
    %c0_i32_1 = arith.constant 0 : i32
    return %arg0, %c0_i32, %c0_i32_0 : i32, i32, i32
  }
  func.func @transform_2(%arg0: i32, %arg1: i32) -> (i32, i32, i32) {
    %c0_i32 = arith.constant 0 : i32
    %c0_i32_0 = arith.constant 0 : i32
    %c0_i32_1 = arith.constant 0 : i32
    return %arg0, %c0_i32, %c0_i32_0 : i32, i32, i32
  }
}

module attributes {stable_mosaic.version = 11 : i64} {
  func.func @_affine_kernel(%arg0: i32, %arg1: i32, %arg2: memref<1x16x128xbf16, #tpu.memory_space<vmem>>, %arg3: memref<1x1x128xf32, #tpu.memory_space<vmem>>, %arg4: memref<1x1x128xf32, #tpu.memory_space<vmem>>, %arg5: memref<1x16x128xbf16, #tpu.memory_space<vmem>>) attributes {dimension_semantics = [#tpu.dimension_semantics<parallel>, #tpu.dimension_semantics<parallel>], iteration_bounds = array<i64: 2, 1>, scalar_prefetch = 0 : i64, scratch_operands = 0 : i64, tpu.core_type = #tpu.core_type<tc>, window_params = [{transform_indices = @transform_0, window_bounds = array<i64: 1, 16, 128>}, {transform_indices = @transform_1, window_bounds = array<i64: 1, 1, 128>}, {transform_indices = @transform_2, window_bounds = array<i64: 1, 1, 128>}, {transform_indices = @transform_3, window_bounds = array<i64: 1, 16, 128>}]} {
    %c0 = arith.constant 0 : index
    %c0_0 = arith.constant 0 : index
    %c0_1 = arith.constant 0 : index
    %0 = vector.load %arg2[%c0, %c0_0, %c0_1] : memref<1x16x128xbf16, #tpu.memory_space<vmem>>, vector<1x16x128xbf16>
    %1 = arith.extf %0 : vector<1x16x128xbf16> to vector<1x16x128xf32>
    %c0_2 = arith.constant 0 : index
    %c0_3 = arith.constant 0 : index
    %c0_4 = arith.constant 0 : index
    %2 = vector.load %arg3[%c0_2, %c0_3, %c0_4] : memref<1x1x128xf32, #tpu.memory_space<vmem>>, vector<1x1x128xf32>
    %3 = vector.broadcast %2 : vector<1x1x128xf32> to vector<1x16x128xf32>
    %4 = arith.mulf %1, %3 : vector<1x16x128xf32>
    %c0_5 = arith.constant 0 : index
    %c0_6 = arith.constant 0 : index
    %c0_7 = arith.constant 0 : index
    %5 = vector.load %arg4[%c0_5, %c0_6, %c0_7] : memref<1x1x128xf32, #tpu.memory_space<vmem>>, vector<1x1x128xf32>
    %6 = vector.broadcast %5 : vector<1x1x128xf32> to vector<1x16x128xf32>
    %7 = arith.addf %4, %6 : vector<1x16x128xf32>
    %cst = arith.constant 0.000000e+00 : f32
    %8 = vector.broadcast %cst : f32 to vector<1x16x128xf32>
    %9 = arith.maximumf %7, %8 : vector<1x16x128xf32>
    %10 = arith.truncf %9 : vector<1x16x128xf32> to vector<1x16x128xbf16>
    %c0_8 = arith.constant 0 : index
    %c0_9 = arith.constant 0 : index
    %c0_10 = arith.constant 0 : index
    %11 = vector.load %arg5[%c0_8, %c0_9, %c0_10] : memref<1x16x128xbf16, #tpu.memory_space<vmem>>, vector<1x16x128xbf16>
    tpu.vector_store %arg5[%c0_8, %c0_9, %c0_10], %10 {strides = array<i32>} : memref<1x16x128xbf16, #tpu.memory_space<vmem>>, vector<1x16x128xbf16>,
    return
  }
  func.func @transform_0(%arg0: i32, %arg1: i32) -> (i32, i32, i32) {
    %c0_i32 = arith.constant 0 : i32
    %c0_i32_0 = arith.constant 0 : i32
    return %arg0, %arg1, %c0_i32 : i32, i32, i32
  }
  func.func @transform_1(%arg0: i32, %arg1: i32) -> (i32, i32, i32) {
    %c0_i32 = arith.constant 0 : i32
    %c0_i32_0 = arith.constant 0 : i32
    %c0_i32_1 = arith.constant 0 : i32
    return %arg0, %c0_i32, %c0_i32_0 : i32, i32, i32
  }
  func.func @transform_2(%arg0: i32, %arg1: i32) -> (i32, i32, i32) {
    %c0_i32 = arith.constant 0 : i32
    %c0_i32_0 = arith.constant 0 : i32
    %c0_i32_1 = arith.constant 0 : i32
    return %arg0, %c0_i32, %c0_i32_0 : i32, i32, i32
  }
  func.func @transform_3(%arg0: i32, %arg1: i32) -> (i32, i32, i32) {
    %c0_i32 = arith.constant 0 : i32
    %c0_i32_0 = arith.constant 0 : i32
    return %arg0, %arg1, %c0_i32 : i32, i32, i32
  }
}

module attributes {stable_mosaic.version = 11 : i64} {
  func.func @_affine_res_kernel(%arg0: i32, %arg1: i32, %arg2: memref<1x16x256xbf16, #tpu.memory_space<vmem>>, %arg3: memref<1x1x256xf32, #tpu.memory_space<vmem>>, %arg4: memref<1x1x256xf32, #tpu.memory_space<vmem>>, %arg5: memref<1x16x256xbf16, #tpu.memory_space<vmem>>, %arg6: memref<1x1x256xf32, #tpu.memory_space<vmem>>, %arg7: memref<1x1x256xf32, #tpu.memory_space<vmem>>, %arg8: memref<1x16x256xbf16, #tpu.memory_space<vmem>>) attributes {dimension_semantics = [#tpu.dimension_semantics<parallel>, #tpu.dimension_semantics<parallel>], iteration_bounds = array<i64: 2, 1>, scalar_prefetch = 0 : i64, scratch_operands = 0 : i64, tpu.core_type = #tpu.core_type<tc>, window_params = [{transform_indices = @transform_0, window_bounds = array<i64: 1, 16, 256>}, {transform_indices = @transform_1, window_bounds = array<i64: 1, 1, 256>}, {transform_indices = @transform_2, window_bounds = array<i64: 1, 1, 256>}, {transform_indices = @transform_3, window_bounds = array<i64: 1, 16, 256>}, {transform_indices = @transform_4, window_bounds = array<i64: 1, 1, 256>}, {transform_indices = @transform_5, window_bounds = array<i64: 1, 1, 256>}, {transform_indices = @transform_6, window_bounds = array<i64: 1, 16, 256>}]} {
    %c0 = arith.constant 0 : index
    %c0_0 = arith.constant 0 : index
    %c0_1 = arith.constant 0 : index
    %0 = vector.load %arg2[%c0, %c0_0, %c0_1] : memref<1x16x256xbf16, #tpu.memory_space<vmem>>, vector<1x16x256xbf16>
    %1 = arith.extf %0 : vector<1x16x256xbf16> to vector<1x16x256xf32>
    %c0_2 = arith.constant 0 : index
    %c0_3 = arith.constant 0 : index
    %c0_4 = arith.constant 0 : index
    %2 = vector.load %arg3[%c0_2, %c0_3, %c0_4] : memref<1x1x256xf32, #tpu.memory_space<vmem>>, vector<1x1x256xf32>
    %3 = vector.broadcast %2 : vector<1x1x256xf32> to vector<1x16x256xf32>
    %4 = arith.mulf %1, %3 : vector<1x16x256xf32>
    %c0_5 = arith.constant 0 : index
    %c0_6 = arith.constant 0 : index
    %c0_7 = arith.constant 0 : index
    %5 = vector.load %arg4[%c0_5, %c0_6, %c0_7] : memref<1x1x256xf32, #tpu.memory_space<vmem>>, vector<1x1x256xf32>
    %6 = vector.broadcast %5 : vector<1x1x256xf32> to vector<1x16x256xf32>
    %7 = arith.addf %4, %6 : vector<1x16x256xf32>
    %c0_8 = arith.constant 0 : index
    %c0_9 = arith.constant 0 : index
    %c0_10 = arith.constant 0 : index
    %8 = vector.load %arg5[%c0_8, %c0_9, %c0_10] : memref<1x16x256xbf16, #tpu.memory_space<vmem>>, vector<1x16x256xbf16>
    %9 = arith.extf %8 : vector<1x16x256xbf16> to vector<1x16x256xf32>
    %c0_11 = arith.constant 0 : index
    %c0_12 = arith.constant 0 : index
    %c0_13 = arith.constant 0 : index
    %10 = vector.load %arg6[%c0_11, %c0_12, %c0_13] : memref<1x1x256xf32, #tpu.memory_space<vmem>>, vector<1x1x256xf32>
    %11 = vector.broadcast %10 : vector<1x1x256xf32> to vector<1x16x256xf32>
    %12 = arith.mulf %9, %11 : vector<1x16x256xf32>
    %c0_14 = arith.constant 0 : index
    %c0_15 = arith.constant 0 : index
    %c0_16 = arith.constant 0 : index
    %13 = vector.load %arg7[%c0_14, %c0_15, %c0_16] : memref<1x1x256xf32, #tpu.memory_space<vmem>>, vector<1x1x256xf32>
    %14 = vector.broadcast %13 : vector<1x1x256xf32> to vector<1x16x256xf32>
    %15 = arith.addf %12, %14 : vector<1x16x256xf32>
    %16 = arith.addf %7, %15 : vector<1x16x256xf32>
    %cst = arith.constant 0.000000e+00 : f32
    %17 = vector.broadcast %cst : f32 to vector<1x16x256xf32>
    %18 = arith.maximumf %16, %17 : vector<1x16x256xf32>
    %19 = arith.truncf %18 : vector<1x16x256xf32> to vector<1x16x256xbf16>
    %c0_17 = arith.constant 0 : index
    %c0_18 = arith.constant 0 : index
    %c0_19 = arith.constant 0 : index
    %20 = vector.load %arg8[%c0_17, %c0_18, %c0_19] : memref<1x16x256xbf16, #tpu.memory_space<vmem>>, vector<1x16x256xbf16>
    tpu.vector_store %arg8[%c0_17, %c0_18, %c0_19], %19 {strides = array<i32>} : memref<1x16x256xbf16, #tpu.memory_space<vmem>>, vector<1x16x256xbf16>,
    return
  }
  func.func @transform_0(%arg0: i32, %arg1: i32) -> (i32, i32, i32) {
    %c0_i32 = arith.constant 0 : i32
    %c0_i32_0 = arith.constant 0 : i32
    return %arg0, %arg1, %c0_i32 : i32, i32, i32
  }
  func.func @transform_1(%arg0: i32, %arg1: i32) -> (i32, i32, i32) {
    %c0_i32 = arith.constant 0 : i32
    %c0_i32_0 = arith.constant 0 : i32
    %c0_i32_1 = arith.constant 0 : i32
    return %arg0, %c0_i32, %c0_i32_0 : i32, i32, i32
  }
  func.func @transform_2(%arg0: i32, %arg1: i32) -> (i32, i32, i32) {
    %c0_i32 = arith.constant 0 : i32
    %c0_i32_0 = arith.constant 0 : i32
    %c0_i32_1 = arith.constant 0 : i32
    return %arg0, %c0_i32, %c0_i32_0 : i32, i32, i32
  }
  func.func @transform_3(%arg0: i32, %arg1: i32) -> (i32, i32, i32) {
    %c0_i32 = arith.constant 0 : i32
    %c0_i32_0 = arith.constant 0 : i32
    return %arg0, %arg1, %c0_i32 : i32, i32, i32
  }
  func.func @transform_4(%arg0: i32, %arg1: i32) -> (i32, i32, i32) {
    %c0_i32 = arith.constant 0 : i32
    %c0_i32_0 = arith.constant 0 : i32
    %c0_i32_1 = arith.constant 0 : i32
    return %arg0, %c0_i32, %c0_i32_0 : i32, i32, i32
  }
  func.func @transform_5(%arg0: i32, %arg1: i32) -> (i32, i32, i32) {
    %c0_i32 = arith.constant 0 : i32
    %c0_i32_0 = arith.constant 0 : i32
    %c0_i32_1 = arith.constant 0 : i32
    return %arg0, %c0_i32, %c0_i32_0 : i32, i32, i32
  }
  func.func @transform_6(%arg0: i32, %arg1: i32) -> (i32, i32, i32) {
    %c0_i32 = arith.constant 0 : i32
    %c0_i32_0 = arith.constant 0 : i32
    return %arg0, %arg1, %c0_i32 : i32, i32, i32
  }
}

module attributes {stable_mosaic.version = 11 : i64} {
  func.func @_matmul_kernel(%arg0: i32, %arg1: i32, %arg2: i32, %arg3: memref<16x256xbf16, #tpu.memory_space<vmem>>, %arg4: memref<256x512xbf16, #tpu.memory_space<vmem>>, %arg5: memref<16x512xbf16, #tpu.memory_space<vmem>>, %arg6: memref<16x512xf32, #tpu.memory_space<vmem>>) attributes {dimension_semantics = [#tpu.dimension_semantics<parallel>, #tpu.dimension_semantics<parallel>, #tpu.dimension_semantics<arbitrary>], iteration_bounds = array<i64: 1, 1, 1>, scalar_prefetch = 0 : i64, scratch_operands = 1 : i64, tpu.core_type = #tpu.core_type<tc>, window_params = [{transform_indices = @transform_0, window_bounds = array<i64: 16, 256>}, {transform_indices = @transform_1, window_bounds = array<i64: 256, 512>}, {transform_indices = @transform_2, window_bounds = array<i64: 16, 512>}]} {
    %c0_i32 = arith.constant 0 : i32
    %0 = arith.cmpi eq, %arg2, %c0_i32 : i32
    %1 = arith.extui %0 : i1 to i32
    %c0_i32_0 = arith.constant 0 : i32
    %2 = arith.cmpi ne, %1, %c0_i32_0 : i32
    scf.if %2 {
      %cst_10 = arith.constant 0.000000e+00 : f32
      %12 = vector.broadcast %cst_10 : f32 to vector<16x512xf32>
      %c0_11 = arith.constant 0 : index
      %c0_12 = arith.constant 0 : index
      %13 = vector.load %arg6[%c0_11, %c0_12] : memref<16x512xf32, #tpu.memory_space<vmem>>, vector<16x512xf32>
      tpu.vector_store %arg6[%c0_11, %c0_12], %12 {strides = array<i32>} : memref<16x512xf32, #tpu.memory_space<vmem>>, vector<16x512xf32>,
    } else {
    }
    %c0 = arith.constant 0 : index
    %c0_1 = arith.constant 0 : index
    %3 = vector.load %arg6[%c0, %c0_1] : memref<16x512xf32, #tpu.memory_space<vmem>>, vector<16x512xf32>
    %c0_2 = arith.constant 0 : index
    %c0_3 = arith.constant 0 : index
    %4 = vector.load %arg3[%c0_2, %c0_3] : memref<16x256xbf16, #tpu.memory_space<vmem>>, vector<16x256xbf16>
    %c0_4 = arith.constant 0 : index
    %c0_5 = arith.constant 0 : index
    %5 = vector.load %arg4[%c0_4, %c0_5] : memref<256x512xbf16, #tpu.memory_space<vmem>>, vector<256x512xbf16>
    %cst = arith.constant dense<0.000000e+00> : vector<16x512xf32>
    %6 = tpu.matmul %4, %5, %cst {dimension_numbers = #tpu.dot_dimension_numbers<[1], [0], [0], [1], [0, 0, 1, 1], [], []>} : vector<16x256xbf16>, vector<256x512xbf16>, vector<16x512xf32> -> vector<16x512xf32>
    %7 = arith.addf %3, %6 : vector<16x512xf32>
    %c0_6 = arith.constant 0 : index
    %c0_7 = arith.constant 0 : index
    %8 = vector.load %arg6[%c0_6, %c0_7] : memref<16x512xf32, #tpu.memory_space<vmem>>, vector<16x512xf32>
    tpu.vector_store %arg6[%c0_6, %c0_7], %7 {strides = array<i32>} : memref<16x512xf32, #tpu.memory_space<vmem>>, vector<16x512xf32>,
    %c0_i32_8 = arith.constant 0 : i32
    %9 = arith.cmpi eq, %arg2, %c0_i32_8 : i32
    %10 = arith.extui %9 : i1 to i32
    %c0_i32_9 = arith.constant 0 : i32
    %11 = arith.cmpi ne, %10, %c0_i32_9 : i32
    scf.if %11 {
      %c0_10 = arith.constant 0 : index
      %c0_11 = arith.constant 0 : index
      %12 = vector.load %arg6[%c0_10, %c0_11] : memref<16x512xf32, #tpu.memory_space<vmem>>, vector<16x512xf32>
      %13 = arith.truncf %12 : vector<16x512xf32> to vector<16x512xbf16>
      %c0_12 = arith.constant 0 : index
      %c0_13 = arith.constant 0 : index
      %14 = vector.load %arg5[%c0_12, %c0_13] : memref<16x512xbf16, #tpu.memory_space<vmem>>, vector<16x512xbf16>
      tpu.vector_store %arg5[%c0_12, %c0_13], %13 {strides = array<i32>} : memref<16x512xbf16, #tpu.memory_space<vmem>>, vector<16x512xbf16>,
    } else {
    }
    return
  }
  func.func @transform_0(%arg0: i32, %arg1: i32, %arg2: i32) -> (i32, i32) {
    %c0_i32 = arith.constant 0 : i32
    return %arg0, %arg2 : i32, i32
  }
  func.func @transform_1(%arg0: i32, %arg1: i32, %arg2: i32) -> (i32, i32) {
    %c0_i32 = arith.constant 0 : i32
    return %arg2, %arg1 : i32, i32
  }
  func.func @transform_2(%arg0: i32, %arg1: i32, %arg2: i32) -> (i32, i32) {
    %c0_i32 = arith.constant 0 : i32
    return %arg0, %arg1 : i32, i32
  }
}

module attributes {stable_mosaic.version = 11 : i64} {
  func.func @_gn_stats_kernel(%arg0: i32, %arg1: i32, %arg2: memref<1x8x512xbf16, #tpu.memory_space<vmem>>, %arg3: memref<1x1x512xf32, #tpu.memory_space<vmem>>, %arg4: memref<1x1x512xf32, #tpu.memory_space<vmem>>) attributes {dimension_semantics = [#tpu.dimension_semantics<parallel>, #tpu.dimension_semantics<arbitrary>], iteration_bounds = array<i64: 2, 1>, scalar_prefetch = 0 : i64, scratch_operands = 0 : i64, tpu.core_type = #tpu.core_type<tc>, window_params = [{transform_indices = @transform_0, window_bounds = array<i64: 1, 8, 512>}, {transform_indices = @transform_1, window_bounds = array<i64: 1, 1, 512>}, {transform_indices = @transform_2, window_bounds = array<i64: 1, 1, 512>}]} {
    %c0_i32 = arith.constant 0 : i32
    %0 = arith.cmpi eq, %arg1, %c0_i32 : i32
    %1 = arith.extui %0 : i1 to i32
    %c0_i32_0 = arith.constant 0 : i32
    %2 = arith.cmpi ne, %1, %c0_i32_0 : i32
    scf.if %2 {
      %cst_16 = arith.constant 0.000000e+00 : f32
      %16 = vector.broadcast %cst_16 : f32 to vector<1x1x512xf32>
      %c0_17 = arith.constant 0 : index
      %c0_18 = arith.constant 0 : index
      %c0_19 = arith.constant 0 : index
      %17 = vector.load %arg3[%c0_17, %c0_18, %c0_19] : memref<1x1x512xf32, #tpu.memory_space<vmem>>, vector<1x1x512xf32>
      tpu.vector_store %arg3[%c0_17, %c0_18, %c0_19], %16 {strides = array<i32>} : memref<1x1x512xf32, #tpu.memory_space<vmem>>, vector<1x1x512xf32>,
      %cst_20 = arith.constant 0.000000e+00 : f32
      %18 = vector.broadcast %cst_20 : f32 to vector<1x1x512xf32>
      %c0_21 = arith.constant 0 : index
      %c0_22 = arith.constant 0 : index
      %c0_23 = arith.constant 0 : index
      %19 = vector.load %arg4[%c0_21, %c0_22, %c0_23] : memref<1x1x512xf32, #tpu.memory_space<vmem>>, vector<1x1x512xf32>
      tpu.vector_store %arg4[%c0_21, %c0_22, %c0_23], %18 {strides = array<i32>} : memref<1x1x512xf32, #tpu.memory_space<vmem>>, vector<1x1x512xf32>,
    } else {
    }
    %c0 = arith.constant 0 : index
    %c0_1 = arith.constant 0 : index
    %c0_2 = arith.constant 0 : index
    %3 = vector.load %arg2[%c0, %c0_1, %c0_2] : memref<1x8x512xbf16, #tpu.memory_space<vmem>>, vector<1x8x512xbf16>
    %4 = arith.extf %3 : vector<1x8x512xbf16> to vector<1x8x512xf32>
    %c0_3 = arith.constant 0 : index
    %c0_4 = arith.constant 0 : index
    %c0_5 = arith.constant 0 : index
    %5 = vector.load %arg3[%c0_3, %c0_4, %c0_5] : memref<1x1x512xf32, #tpu.memory_space<vmem>>, vector<1x1x512xf32>
    %cst = arith.constant dense<0.000000e+00> : vector<1x512xf32>
    %6 = vector.multi_reduction <add>, %4, %cst [1] : vector<1x8x512xf32> to vector<1x512xf32>
    %7 = vector.shape_cast %6 : vector<1x512xf32> to vector<1x1x512xf32>
    %8 = arith.addf %5, %7 : vector<1x1x512xf32>
    %c0_6 = arith.constant 0 : index
    %c0_7 = arith.constant 0 : index
    %c0_8 = arith.constant 0 : index
    %9 = vector.load %arg3[%c0_6, %c0_7, %c0_8] : memref<1x1x512xf32, #tpu.memory_space<vmem>>, vector<1x1x512xf32>
    tpu.vector_store %arg3[%c0_6, %c0_7, %c0_8], %8 {strides = array<i32>} : memref<1x1x512xf32, #tpu.memory_space<vmem>>, vector<1x1x512xf32>,
    %c0_9 = arith.constant 0 : index
    %c0_10 = arith.constant 0 : index
    %c0_11 = arith.constant 0 : index
    %10 = vector.load %arg4[%c0_9, %c0_10, %c0_11] : memref<1x1x512xf32, #tpu.memory_space<vmem>>, vector<1x1x512xf32>
    %11 = arith.mulf %4, %4 : vector<1x8x512xf32>
    %cst_12 = arith.constant dense<0.000000e+00> : vector<1x512xf32>
    %12 = vector.multi_reduction <add>, %11, %cst_12 [1] : vector<1x8x512xf32> to vector<1x512xf32>
    %13 = vector.shape_cast %12 : vector<1x512xf32> to vector<1x1x512xf32>
    %14 = arith.addf %10, %13 : vector<1x1x512xf32>
    %c0_13 = arith.constant 0 : index
    %c0_14 = arith.constant 0 : index
    %c0_15 = arith.constant 0 : index
    %15 = vector.load %arg4[%c0_13, %c0_14, %c0_15] : memref<1x1x512xf32, #tpu.memory_space<vmem>>, vector<1x1x512xf32>
    tpu.vector_store %arg4[%c0_13, %c0_14, %c0_15], %14 {strides = array<i32>} : memref<1x1x512xf32, #tpu.memory_space<vmem>>, vector<1x1x512xf32>,
    return
  }
  func.func @transform_0(%arg0: i32, %arg1: i32) -> (i32, i32, i32) {
    %c0_i32 = arith.constant 0 : i32
    %c0_i32_0 = arith.constant 0 : i32
    return %arg0, %arg1, %c0_i32 : i32, i32, i32
  }
  func.func @transform_1(%arg0: i32, %arg1: i32) -> (i32, i32, i32) {
    %c0_i32 = arith.constant 0 : i32
    %c0_i32_0 = arith.constant 0 : i32
    %c0_i32_1 = arith.constant 0 : i32
    return %arg0, %c0_i32, %c0_i32_0 : i32, i32, i32
  }
  func.func @transform_2(%arg0: i32, %arg1: i32) -> (i32, i32, i32) {
    %c0_i32 = arith.constant 0 : i32
    %c0_i32_0 = arith.constant 0 : i32
    %c0_i32_1 = arith.constant 0 : i32
    return %arg0, %c0_i32, %c0_i32_0 : i32, i32, i32
  }
}

module attributes {stable_mosaic.version = 11 : i64} {
  func.func @_matmul_kernel(%arg0: i32, %arg1: i32, %arg2: i32, %arg3: memref<32x256xbf16, #tpu.memory_space<vmem>>, %arg4: memref<256x128xbf16, #tpu.memory_space<vmem>>, %arg5: memref<32x128xbf16, #tpu.memory_space<vmem>>, %arg6: memref<32x128xf32, #tpu.memory_space<vmem>>) attributes {dimension_semantics = [#tpu.dimension_semantics<parallel>, #tpu.dimension_semantics<parallel>, #tpu.dimension_semantics<arbitrary>], iteration_bounds = array<i64: 1, 1, 1>, scalar_prefetch = 0 : i64, scratch_operands = 1 : i64, tpu.core_type = #tpu.core_type<tc>, window_params = [{transform_indices = @transform_0, window_bounds = array<i64: 32, 256>}, {transform_indices = @transform_1, window_bounds = array<i64: 256, 128>}, {transform_indices = @transform_2, window_bounds = array<i64: 32, 128>}]} {
    %c0_i32 = arith.constant 0 : i32
    %0 = arith.cmpi eq, %arg2, %c0_i32 : i32
    %1 = arith.extui %0 : i1 to i32
    %c0_i32_0 = arith.constant 0 : i32
    %2 = arith.cmpi ne, %1, %c0_i32_0 : i32
    scf.if %2 {
      %cst_10 = arith.constant 0.000000e+00 : f32
      %12 = vector.broadcast %cst_10 : f32 to vector<32x128xf32>
      %c0_11 = arith.constant 0 : index
      %c0_12 = arith.constant 0 : index
      %13 = vector.load %arg6[%c0_11, %c0_12] : memref<32x128xf32, #tpu.memory_space<vmem>>, vector<32x128xf32>
      tpu.vector_store %arg6[%c0_11, %c0_12], %12 {strides = array<i32>} : memref<32x128xf32, #tpu.memory_space<vmem>>, vector<32x128xf32>,
    } else {
    }
    %c0 = arith.constant 0 : index
    %c0_1 = arith.constant 0 : index
    %3 = vector.load %arg6[%c0, %c0_1] : memref<32x128xf32, #tpu.memory_space<vmem>>, vector<32x128xf32>
    %c0_2 = arith.constant 0 : index
    %c0_3 = arith.constant 0 : index
    %4 = vector.load %arg3[%c0_2, %c0_3] : memref<32x256xbf16, #tpu.memory_space<vmem>>, vector<32x256xbf16>
    %c0_4 = arith.constant 0 : index
    %c0_5 = arith.constant 0 : index
    %5 = vector.load %arg4[%c0_4, %c0_5] : memref<256x128xbf16, #tpu.memory_space<vmem>>, vector<256x128xbf16>
    %cst = arith.constant dense<0.000000e+00> : vector<32x128xf32>
    %6 = tpu.matmul %4, %5, %cst {dimension_numbers = #tpu.dot_dimension_numbers<[1], [0], [0], [1], [0, 0, 1, 1], [], []>} : vector<32x256xbf16>, vector<256x128xbf16>, vector<32x128xf32> -> vector<32x128xf32>
    %7 = arith.addf %3, %6 : vector<32x128xf32>
    %c0_6 = arith.constant 0 : index
    %c0_7 = arith.constant 0 : index
    %8 = vector.load %arg6[%c0_6, %c0_7] : memref<32x128xf32, #tpu.memory_space<vmem>>, vector<32x128xf32>
    tpu.vector_store %arg6[%c0_6, %c0_7], %7 {strides = array<i32>} : memref<32x128xf32, #tpu.memory_space<vmem>>, vector<32x128xf32>,
    %c0_i32_8 = arith.constant 0 : i32
    %9 = arith.cmpi eq, %arg2, %c0_i32_8 : i32
    %10 = arith.extui %9 : i1 to i32
    %c0_i32_9 = arith.constant 0 : i32
    %11 = arith.cmpi ne, %10, %c0_i32_9 : i32
    scf.if %11 {
      %c0_10 = arith.constant 0 : index
      %c0_11 = arith.constant 0 : index
      %12 = vector.load %arg6[%c0_10, %c0_11] : memref<32x128xf32, #tpu.memory_space<vmem>>, vector<32x128xf32>
      %13 = arith.truncf %12 : vector<32x128xf32> to vector<32x128xbf16>
      %c0_12 = arith.constant 0 : index
      %c0_13 = arith.constant 0 : index
      %14 = vector.load %arg5[%c0_12, %c0_13] : memref<32x128xbf16, #tpu.memory_space<vmem>>, vector<32x128xbf16>
      tpu.vector_store %arg5[%c0_12, %c0_13], %13 {strides = array<i32>} : memref<32x128xbf16, #tpu.memory_space<vmem>>, vector<32x128xbf16>,
    } else {
    }
    return
  }
  func.func @transform_0(%arg0: i32, %arg1: i32, %arg2: i32) -> (i32, i32) {
    %c0_i32 = arith.constant 0 : i32
    return %arg0, %arg2 : i32, i32
  }
  func.func @transform_1(%arg0: i32, %arg1: i32, %arg2: i32) -> (i32, i32) {
    %c0_i32 = arith.constant 0 : i32
    return %arg2, %arg1 : i32, i32
  }
  func.func @transform_2(%arg0: i32, %arg1: i32, %arg2: i32) -> (i32, i32) {
    %c0_i32 = arith.constant 0 : i32
    return %arg0, %arg1 : i32, i32
  }
}

module attributes {stable_mosaic.version = 11 : i64} {
  func.func @_matmul_kernel(%arg0: i32, %arg1: i32, %arg2: i32, %arg3: memref<16x384xbf16, #tpu.memory_space<vmem>>, %arg4: memref<384x128xbf16, #tpu.memory_space<vmem>>, %arg5: memref<16x128xbf16, #tpu.memory_space<vmem>>, %arg6: memref<16x128xf32, #tpu.memory_space<vmem>>) attributes {dimension_semantics = [#tpu.dimension_semantics<parallel>, #tpu.dimension_semantics<parallel>, #tpu.dimension_semantics<arbitrary>], iteration_bounds = array<i64: 1, 1, 3>, scalar_prefetch = 0 : i64, scratch_operands = 1 : i64, tpu.core_type = #tpu.core_type<tc>, window_params = [{transform_indices = @transform_0, window_bounds = array<i64: 16, 384>}, {transform_indices = @transform_1, window_bounds = array<i64: 384, 128>}, {transform_indices = @transform_2, window_bounds = array<i64: 16, 128>}]} {
    %c0_i32 = arith.constant 0 : i32
    %0 = arith.cmpi eq, %arg2, %c0_i32 : i32
    %1 = arith.extui %0 : i1 to i32
    %c0_i32_0 = arith.constant 0 : i32
    %2 = arith.cmpi ne, %1, %c0_i32_0 : i32
    scf.if %2 {
      %cst_9 = arith.constant 0.000000e+00 : f32
      %12 = vector.broadcast %cst_9 : f32 to vector<16x128xf32>
      %c0_10 = arith.constant 0 : index
      %c0_11 = arith.constant 0 : index
      %13 = vector.load %arg6[%c0_10, %c0_11] : memref<16x128xf32, #tpu.memory_space<vmem>>, vector<16x128xf32>
      tpu.vector_store %arg6[%c0_10, %c0_11], %12 {strides = array<i32>} : memref<16x128xf32, #tpu.memory_space<vmem>>, vector<16x128xf32>,
    } else {
    }
    %c0 = arith.constant 0 : index
    %c0_1 = arith.constant 0 : index
    %3 = vector.load %arg6[%c0, %c0_1] : memref<16x128xf32, #tpu.memory_space<vmem>>, vector<16x128xf32>
    %c0_2 = arith.constant 0 : index
    %c0_3 = arith.constant 0 : index
    %4 = vector.load %arg3[%c0_2, %c0_3] : memref<16x384xbf16, #tpu.memory_space<vmem>>, vector<16x384xbf16>
    %c0_4 = arith.constant 0 : index
    %c0_5 = arith.constant 0 : index
    %5 = vector.load %arg4[%c0_4, %c0_5] : memref<384x128xbf16, #tpu.memory_space<vmem>>, vector<384x128xbf16>
    %cst = arith.constant dense<0.000000e+00> : vector<16x128xf32>
    %6 = tpu.matmul %4, %5, %cst {dimension_numbers = #tpu.dot_dimension_numbers<[1], [0], [0], [1], [0, 0, 1, 1], [], []>} : vector<16x384xbf16>, vector<384x128xbf16>, vector<16x128xf32> -> vector<16x128xf32>
    %7 = arith.addf %3, %6 : vector<16x128xf32>
    %c0_6 = arith.constant 0 : index
    %c0_7 = arith.constant 0 : index
    %8 = vector.load %arg6[%c0_6, %c0_7] : memref<16x128xf32, #tpu.memory_space<vmem>>, vector<16x128xf32>
    tpu.vector_store %arg6[%c0_6, %c0_7], %7 {strides = array<i32>} : memref<16x128xf32, #tpu.memory_space<vmem>>, vector<16x128xf32>,
    %c2_i32 = arith.constant 2 : i32
    %9 = arith.cmpi eq, %arg2, %c2_i32 : i32
    %10 = arith.extui %9 : i1 to i32
    %c0_i32_8 = arith.constant 0 : i32
    %11 = arith.cmpi ne, %10, %c0_i32_8 : i32
    scf.if %11 {
      %c0_9 = arith.constant 0 : index
      %c0_10 = arith.constant 0 : index
      %12 = vector.load %arg6[%c0_9, %c0_10] : memref<16x128xf32, #tpu.memory_space<vmem>>, vector<16x128xf32>
      %13 = arith.truncf %12 : vector<16x128xf32> to vector<16x128xbf16>
      %c0_11 = arith.constant 0 : index
      %c0_12 = arith.constant 0 : index
      %14 = vector.load %arg5[%c0_11, %c0_12] : memref<16x128xbf16, #tpu.memory_space<vmem>>, vector<16x128xbf16>
      tpu.vector_store %arg5[%c0_11, %c0_12], %13 {strides = array<i32>} : memref<16x128xbf16, #tpu.memory_space<vmem>>, vector<16x128xbf16>,
    } else {
    }
    return
  }
  func.func @transform_0(%arg0: i32, %arg1: i32, %arg2: i32) -> (i32, i32) {
    %c0_i32 = arith.constant 0 : i32
    return %arg0, %arg2 : i32, i32
  }
  func.func @transform_1(%arg0: i32, %arg1: i32, %arg2: i32) -> (i32, i32) {
    %c0_i32 = arith.constant 0 : i32
    return %arg2, %arg1 : i32, i32
  }
  func.func @transform_2(%arg0: i32, %arg1: i32, %arg2: i32) -> (i32, i32) {
    %c0_i32 = arith.constant 0 : i32
    return %arg0, %arg1 : i32, i32
  }
}

module attributes {stable_mosaic.version = 11 : i64} {
  func.func @_gn_stats_kernel(%arg0: i32, %arg1: i32, %arg2: memref<1x8x128xbf16, #tpu.memory_space<vmem>>, %arg3: memref<1x1x128xf32, #tpu.memory_space<vmem>>, %arg4: memref<1x1x128xf32, #tpu.memory_space<vmem>>) attributes {dimension_semantics = [#tpu.dimension_semantics<parallel>, #tpu.dimension_semantics<arbitrary>], iteration_bounds = array<i64: 2, 1>, scalar_prefetch = 0 : i64, scratch_operands = 0 : i64, tpu.core_type = #tpu.core_type<tc>, window_params = [{transform_indices = @transform_0, window_bounds = array<i64: 1, 8, 128>}, {transform_indices = @transform_1, window_bounds = array<i64: 1, 1, 128>}, {transform_indices = @transform_2, window_bounds = array<i64: 1, 1, 128>}]} {
    %c0_i32 = arith.constant 0 : i32
    %0 = arith.cmpi eq, %arg1, %c0_i32 : i32
    %1 = arith.extui %0 : i1 to i32
    %c0_i32_0 = arith.constant 0 : i32
    %2 = arith.cmpi ne, %1, %c0_i32_0 : i32
    scf.if %2 {
      %cst_16 = arith.constant 0.000000e+00 : f32
      %16 = vector.broadcast %cst_16 : f32 to vector<1x1x128xf32>
      %c0_17 = arith.constant 0 : index
      %c0_18 = arith.constant 0 : index
      %c0_19 = arith.constant 0 : index
      %17 = vector.load %arg3[%c0_17, %c0_18, %c0_19] : memref<1x1x128xf32, #tpu.memory_space<vmem>>, vector<1x1x128xf32>
      tpu.vector_store %arg3[%c0_17, %c0_18, %c0_19], %16 {strides = array<i32>} : memref<1x1x128xf32, #tpu.memory_space<vmem>>, vector<1x1x128xf32>,
      %cst_20 = arith.constant 0.000000e+00 : f32
      %18 = vector.broadcast %cst_20 : f32 to vector<1x1x128xf32>
      %c0_21 = arith.constant 0 : index
      %c0_22 = arith.constant 0 : index
      %c0_23 = arith.constant 0 : index
      %19 = vector.load %arg4[%c0_21, %c0_22, %c0_23] : memref<1x1x128xf32, #tpu.memory_space<vmem>>, vector<1x1x128xf32>
      tpu.vector_store %arg4[%c0_21, %c0_22, %c0_23], %18 {strides = array<i32>} : memref<1x1x128xf32, #tpu.memory_space<vmem>>, vector<1x1x128xf32>,
    } else {
    }
    %c0 = arith.constant 0 : index
    %c0_1 = arith.constant 0 : index
    %c0_2 = arith.constant 0 : index
    %3 = vector.load %arg2[%c0, %c0_1, %c0_2] : memref<1x8x128xbf16, #tpu.memory_space<vmem>>, vector<1x8x128xbf16>
    %4 = arith.extf %3 : vector<1x8x128xbf16> to vector<1x8x128xf32>
    %c0_3 = arith.constant 0 : index
    %c0_4 = arith.constant 0 : index
    %c0_5 = arith.constant 0 : index
    %5 = vector.load %arg3[%c0_3, %c0_4, %c0_5] : memref<1x1x128xf32, #tpu.memory_space<vmem>>, vector<1x1x128xf32>
    %cst = arith.constant dense<0.000000e+00> : vector<1x128xf32>
    %6 = vector.multi_reduction <add>, %4, %cst [1] : vector<1x8x128xf32> to vector<1x128xf32>
    %7 = vector.shape_cast %6 : vector<1x128xf32> to vector<1x1x128xf32>
    %8 = arith.addf %5, %7 : vector<1x1x128xf32>
    %c0_6 = arith.constant 0 : index
    %c0_7 = arith.constant 0 : index
    %c0_8 = arith.constant 0 : index
    %9 = vector.load %arg3[%c0_6, %c0_7, %c0_8] : memref<1x1x128xf32, #tpu.memory_space<vmem>>, vector<1x1x128xf32>
    tpu.vector_store %arg3[%c0_6, %c0_7, %c0_8], %8 {strides = array<i32>} : memref<1x1x128xf32, #tpu.memory_space<vmem>>, vector<1x1x128xf32>,
    %c0_9 = arith.constant 0 : index
    %c0_10 = arith.constant 0 : index
    %c0_11 = arith.constant 0 : index
    %10 = vector.load %arg4[%c0_9, %c0_10, %c0_11] : memref<1x1x128xf32, #tpu.memory_space<vmem>>, vector<1x1x128xf32>
    %11 = arith.mulf %4, %4 : vector<1x8x128xf32>
    %cst_12 = arith.constant dense<0.000000e+00> : vector<1x128xf32>
    %12 = vector.multi_reduction <add>, %11, %cst_12 [1] : vector<1x8x128xf32> to vector<1x128xf32>
    %13 = vector.shape_cast %12 : vector<1x128xf32> to vector<1x1x128xf32>
    %14 = arith.addf %10, %13 : vector<1x1x128xf32>
    %c0_13 = arith.constant 0 : index
    %c0_14 = arith.constant 0 : index
    %c0_15 = arith.constant 0 : index
    %15 = vector.load %arg4[%c0_13, %c0_14, %c0_15] : memref<1x1x128xf32, #tpu.memory_space<vmem>>, vector<1x1x128xf32>
    tpu.vector_store %arg4[%c0_13, %c0_14, %c0_15], %14 {strides = array<i32>} : memref<1x1x128xf32, #tpu.memory_space<vmem>>, vector<1x1x128xf32>,
    return
  }
  func.func @transform_0(%arg0: i32, %arg1: i32) -> (i32, i32, i32) {
    %c0_i32 = arith.constant 0 : i32
    %c0_i32_0 = arith.constant 0 : i32
    return %arg0, %arg1, %c0_i32 : i32, i32, i32
  }
  func.func @transform_1(%arg0: i32, %arg1: i32) -> (i32, i32, i32) {
    %c0_i32 = arith.constant 0 : i32
    %c0_i32_0 = arith.constant 0 : i32
    %c0_i32_1 = arith.constant 0 : i32
    return %arg0, %c0_i32, %c0_i32_0 : i32, i32, i32
  }
  func.func @transform_2(%arg0: i32, %arg1: i32) -> (i32, i32, i32) {
    %c0_i32 = arith.constant 0 : i32
    %c0_i32_0 = arith.constant 0 : i32
    %c0_i32_1 = arith.constant 0 : i32
    return %arg0, %c0_i32, %c0_i32_0 : i32, i32, i32
  }
}

module attributes {stable_mosaic.version = 11 : i64} {
  func.func @_affine_kernel(%arg0: i32, %arg1: i32, %arg2: memref<1x8x128xbf16, #tpu.memory_space<vmem>>, %arg3: memref<1x1x128xf32, #tpu.memory_space<vmem>>, %arg4: memref<1x1x128xf32, #tpu.memory_space<vmem>>, %arg5: memref<1x8x128xbf16, #tpu.memory_space<vmem>>) attributes {dimension_semantics = [#tpu.dimension_semantics<parallel>, #tpu.dimension_semantics<parallel>], iteration_bounds = array<i64: 2, 1>, scalar_prefetch = 0 : i64, scratch_operands = 0 : i64, tpu.core_type = #tpu.core_type<tc>, window_params = [{transform_indices = @transform_0, window_bounds = array<i64: 1, 8, 128>}, {transform_indices = @transform_1, window_bounds = array<i64: 1, 1, 128>}, {transform_indices = @transform_2, window_bounds = array<i64: 1, 1, 128>}, {transform_indices = @transform_3, window_bounds = array<i64: 1, 8, 128>}]} {
    %c0 = arith.constant 0 : index
    %c0_0 = arith.constant 0 : index
    %c0_1 = arith.constant 0 : index
    %0 = vector.load %arg2[%c0, %c0_0, %c0_1] : memref<1x8x128xbf16, #tpu.memory_space<vmem>>, vector<1x8x128xbf16>
    %1 = arith.extf %0 : vector<1x8x128xbf16> to vector<1x8x128xf32>
    %c0_2 = arith.constant 0 : index
    %c0_3 = arith.constant 0 : index
    %c0_4 = arith.constant 0 : index
    %2 = vector.load %arg3[%c0_2, %c0_3, %c0_4] : memref<1x1x128xf32, #tpu.memory_space<vmem>>, vector<1x1x128xf32>
    %3 = vector.broadcast %2 : vector<1x1x128xf32> to vector<1x8x128xf32>
    %4 = arith.mulf %1, %3 : vector<1x8x128xf32>
    %c0_5 = arith.constant 0 : index
    %c0_6 = arith.constant 0 : index
    %c0_7 = arith.constant 0 : index
    %5 = vector.load %arg4[%c0_5, %c0_6, %c0_7] : memref<1x1x128xf32, #tpu.memory_space<vmem>>, vector<1x1x128xf32>
    %6 = vector.broadcast %5 : vector<1x1x128xf32> to vector<1x8x128xf32>
    %7 = arith.addf %4, %6 : vector<1x8x128xf32>
    %cst = arith.constant 0.000000e+00 : f32
    %8 = vector.broadcast %cst : f32 to vector<1x8x128xf32>
    %9 = arith.maximumf %7, %8 : vector<1x8x128xf32>
    %10 = arith.truncf %9 : vector<1x8x128xf32> to vector<1x8x128xbf16>
    %c0_8 = arith.constant 0 : index
    %c0_9 = arith.constant 0 : index
    %c0_10 = arith.constant 0 : index
    %11 = vector.load %arg5[%c0_8, %c0_9, %c0_10] : memref<1x8x128xbf16, #tpu.memory_space<vmem>>, vector<1x8x128xbf16>
    tpu.vector_store %arg5[%c0_8, %c0_9, %c0_10], %10 {strides = array<i32>} : memref<1x8x128xbf16, #tpu.memory_space<vmem>>, vector<1x8x128xbf16>,
    return
  }
  func.func @transform_0(%arg0: i32, %arg1: i32) -> (i32, i32, i32) {
    %c0_i32 = arith.constant 0 : i32
    %c0_i32_0 = arith.constant 0 : i32
    return %arg0, %arg1, %c0_i32 : i32, i32, i32
  }
  func.func @transform_1(%arg0: i32, %arg1: i32) -> (i32, i32, i32) {
    %c0_i32 = arith.constant 0 : i32
    %c0_i32_0 = arith.constant 0 : i32
    %c0_i32_1 = arith.constant 0 : i32
    return %arg0, %c0_i32, %c0_i32_0 : i32, i32, i32
  }
  func.func @transform_2(%arg0: i32, %arg1: i32) -> (i32, i32, i32) {
    %c0_i32 = arith.constant 0 : i32
    %c0_i32_0 = arith.constant 0 : i32
    %c0_i32_1 = arith.constant 0 : i32
    return %arg0, %c0_i32, %c0_i32_0 : i32, i32, i32
  }
  func.func @transform_3(%arg0: i32, %arg1: i32) -> (i32, i32, i32) {
    %c0_i32 = arith.constant 0 : i32
    %c0_i32_0 = arith.constant 0 : i32
    return %arg0, %arg1, %c0_i32 : i32, i32, i32
  }
}

module attributes {stable_mosaic.version = 11 : i64} {
  func.func @_matmul_kernel(%arg0: i32, %arg1: i32, %arg2: i32, %arg3: memref<16x128xbf16, #tpu.memory_space<vmem>>, %arg4: memref<128x512xbf16, #tpu.memory_space<vmem>>, %arg5: memref<16x512xbf16, #tpu.memory_space<vmem>>, %arg6: memref<16x512xf32, #tpu.memory_space<vmem>>) attributes {dimension_semantics = [#tpu.dimension_semantics<parallel>, #tpu.dimension_semantics<parallel>, #tpu.dimension_semantics<arbitrary>], iteration_bounds = array<i64: 1, 1, 1>, scalar_prefetch = 0 : i64, scratch_operands = 1 : i64, tpu.core_type = #tpu.core_type<tc>, window_params = [{transform_indices = @transform_0, window_bounds = array<i64: 16, 128>}, {transform_indices = @transform_1, window_bounds = array<i64: 128, 512>}, {transform_indices = @transform_2, window_bounds = array<i64: 16, 512>}]} {
    %c0_i32 = arith.constant 0 : i32
    %0 = arith.cmpi eq, %arg2, %c0_i32 : i32
    %1 = arith.extui %0 : i1 to i32
    %c0_i32_0 = arith.constant 0 : i32
    %2 = arith.cmpi ne, %1, %c0_i32_0 : i32
    scf.if %2 {
      %cst_10 = arith.constant 0.000000e+00 : f32
      %12 = vector.broadcast %cst_10 : f32 to vector<16x512xf32>
      %c0_11 = arith.constant 0 : index
      %c0_12 = arith.constant 0 : index
      %13 = vector.load %arg6[%c0_11, %c0_12] : memref<16x512xf32, #tpu.memory_space<vmem>>, vector<16x512xf32>
      tpu.vector_store %arg6[%c0_11, %c0_12], %12 {strides = array<i32>} : memref<16x512xf32, #tpu.memory_space<vmem>>, vector<16x512xf32>,
    } else {
    }
    %c0 = arith.constant 0 : index
    %c0_1 = arith.constant 0 : index
    %3 = vector.load %arg6[%c0, %c0_1] : memref<16x512xf32, #tpu.memory_space<vmem>>, vector<16x512xf32>
    %c0_2 = arith.constant 0 : index
    %c0_3 = arith.constant 0 : index
    %4 = vector.load %arg3[%c0_2, %c0_3] : memref<16x128xbf16, #tpu.memory_space<vmem>>, vector<16x128xbf16>
    %c0_4 = arith.constant 0 : index
    %c0_5 = arith.constant 0 : index
    %5 = vector.load %arg4[%c0_4, %c0_5] : memref<128x512xbf16, #tpu.memory_space<vmem>>, vector<128x512xbf16>
    %cst = arith.constant dense<0.000000e+00> : vector<16x512xf32>
    %6 = tpu.matmul %4, %5, %cst {dimension_numbers = #tpu.dot_dimension_numbers<[1], [0], [0], [1], [0, 0, 1, 1], [], []>} : vector<16x128xbf16>, vector<128x512xbf16>, vector<16x512xf32> -> vector<16x512xf32>
    %7 = arith.addf %3, %6 : vector<16x512xf32>
    %c0_6 = arith.constant 0 : index
    %c0_7 = arith.constant 0 : index
    %8 = vector.load %arg6[%c0_6, %c0_7] : memref<16x512xf32, #tpu.memory_space<vmem>>, vector<16x512xf32>
    tpu.vector_store %arg6[%c0_6, %c0_7], %7 {strides = array<i32>} : memref<16x512xf32, #tpu.memory_space<vmem>>, vector<16x512xf32>,
    %c0_i32_8 = arith.constant 0 : i32
    %9 = arith.cmpi eq, %arg2, %c0_i32_8 : i32
    %10 = arith.extui %9 : i1 to i32
    %c0_i32_9 = arith.constant 0 : i32
    %11 = arith.cmpi ne, %10, %c0_i32_9 : i32
    scf.if %11 {
      %c0_10 = arith.constant 0 : index
      %c0_11 = arith.constant 0 : index
      %12 = vector.load %arg6[%c0_10, %c0_11] : memref<16x512xf32, #tpu.memory_space<vmem>>, vector<16x512xf32>
      %13 = arith.truncf %12 : vector<16x512xf32> to vector<16x512xbf16>
      %c0_12 = arith.constant 0 : index
      %c0_13 = arith.constant 0 : index
      %14 = vector.load %arg5[%c0_12, %c0_13] : memref<16x512xbf16, #tpu.memory_space<vmem>>, vector<16x512xbf16>
      tpu.vector_store %arg5[%c0_12, %c0_13], %13 {strides = array<i32>} : memref<16x512xbf16, #tpu.memory_space<vmem>>, vector<16x512xbf16>,
    } else {
    }
    return
  }
  func.func @transform_0(%arg0: i32, %arg1: i32, %arg2: i32) -> (i32, i32) {
    %c0_i32 = arith.constant 0 : i32
    return %arg0, %arg2 : i32, i32
  }
  func.func @transform_1(%arg0: i32, %arg1: i32, %arg2: i32) -> (i32, i32) {
    %c0_i32 = arith.constant 0 : i32
    return %arg2, %arg1 : i32, i32
  }
  func.func @transform_2(%arg0: i32, %arg1: i32, %arg2: i32) -> (i32, i32) {
    %c0_i32 = arith.constant 0 : i32
    return %arg0, %arg1 : i32, i32
  }
}

module attributes {stable_mosaic.version = 11 : i64} {
  func.func @_affine_res_kernel(%arg0: i32, %arg1: i32, %arg2: memref<1x8x512xbf16, #tpu.memory_space<vmem>>, %arg3: memref<1x1x512xf32, #tpu.memory_space<vmem>>, %arg4: memref<1x1x512xf32, #tpu.memory_space<vmem>>, %arg5: memref<1x8x512xbf16, #tpu.memory_space<vmem>>, %arg6: memref<1x1x512xf32, #tpu.memory_space<vmem>>, %arg7: memref<1x1x512xf32, #tpu.memory_space<vmem>>, %arg8: memref<1x8x512xbf16, #tpu.memory_space<vmem>>) attributes {dimension_semantics = [#tpu.dimension_semantics<parallel>, #tpu.dimension_semantics<parallel>], iteration_bounds = array<i64: 2, 1>, scalar_prefetch = 0 : i64, scratch_operands = 0 : i64, tpu.core_type = #tpu.core_type<tc>, window_params = [{transform_indices = @transform_0, window_bounds = array<i64: 1, 8, 512>}, {transform_indices = @transform_1, window_bounds = array<i64: 1, 1, 512>}, {transform_indices = @transform_2, window_bounds = array<i64: 1, 1, 512>}, {transform_indices = @transform_3, window_bounds = array<i64: 1, 8, 512>}, {transform_indices = @transform_4, window_bounds = array<i64: 1, 1, 512>}, {transform_indices = @transform_5, window_bounds = array<i64: 1, 1, 512>}, {transform_indices = @transform_6, window_bounds = array<i64: 1, 8, 512>}]} {
    %c0 = arith.constant 0 : index
    %c0_0 = arith.constant 0 : index
    %c0_1 = arith.constant 0 : index
    %0 = vector.load %arg2[%c0, %c0_0, %c0_1] : memref<1x8x512xbf16, #tpu.memory_space<vmem>>, vector<1x8x512xbf16>
    %1 = arith.extf %0 : vector<1x8x512xbf16> to vector<1x8x512xf32>
    %c0_2 = arith.constant 0 : index
    %c0_3 = arith.constant 0 : index
    %c0_4 = arith.constant 0 : index
    %2 = vector.load %arg3[%c0_2, %c0_3, %c0_4] : memref<1x1x512xf32, #tpu.memory_space<vmem>>, vector<1x1x512xf32>
    %3 = vector.broadcast %2 : vector<1x1x512xf32> to vector<1x8x512xf32>
    %4 = arith.mulf %1, %3 : vector<1x8x512xf32>
    %c0_5 = arith.constant 0 : index
    %c0_6 = arith.constant 0 : index
    %c0_7 = arith.constant 0 : index
    %5 = vector.load %arg4[%c0_5, %c0_6, %c0_7] : memref<1x1x512xf32, #tpu.memory_space<vmem>>, vector<1x1x512xf32>
    %6 = vector.broadcast %5 : vector<1x1x512xf32> to vector<1x8x512xf32>
    %7 = arith.addf %4, %6 : vector<1x8x512xf32>
    %c0_8 = arith.constant 0 : index
    %c0_9 = arith.constant 0 : index
    %c0_10 = arith.constant 0 : index
    %8 = vector.load %arg5[%c0_8, %c0_9, %c0_10] : memref<1x8x512xbf16, #tpu.memory_space<vmem>>, vector<1x8x512xbf16>
    %9 = arith.extf %8 : vector<1x8x512xbf16> to vector<1x8x512xf32>
    %c0_11 = arith.constant 0 : index
    %c0_12 = arith.constant 0 : index
    %c0_13 = arith.constant 0 : index
    %10 = vector.load %arg6[%c0_11, %c0_12, %c0_13] : memref<1x1x512xf32, #tpu.memory_space<vmem>>, vector<1x1x512xf32>
    %11 = vector.broadcast %10 : vector<1x1x512xf32> to vector<1x8x512xf32>
    %12 = arith.mulf %9, %11 : vector<1x8x512xf32>
    %c0_14 = arith.constant 0 : index
    %c0_15 = arith.constant 0 : index
    %c0_16 = arith.constant 0 : index
    %13 = vector.load %arg7[%c0_14, %c0_15, %c0_16] : memref<1x1x512xf32, #tpu.memory_space<vmem>>, vector<1x1x512xf32>
    %14 = vector.broadcast %13 : vector<1x1x512xf32> to vector<1x8x512xf32>
    %15 = arith.addf %12, %14 : vector<1x8x512xf32>
    %16 = arith.addf %7, %15 : vector<1x8x512xf32>
    %cst = arith.constant 0.000000e+00 : f32
    %17 = vector.broadcast %cst : f32 to vector<1x8x512xf32>
    %18 = arith.maximumf %16, %17 : vector<1x8x512xf32>
    %19 = arith.truncf %18 : vector<1x8x512xf32> to vector<1x8x512xbf16>
    %c0_17 = arith.constant 0 : index
    %c0_18 = arith.constant 0 : index
    %c0_19 = arith.constant 0 : index
    %20 = vector.load %arg8[%c0_17, %c0_18, %c0_19] : memref<1x8x512xbf16, #tpu.memory_space<vmem>>, vector<1x8x512xbf16>
    tpu.vector_store %arg8[%c0_17, %c0_18, %c0_19], %19 {strides = array<i32>} : memref<1x8x512xbf16, #tpu.memory_space<vmem>>, vector<1x8x512xbf16>,
    return
  }
  func.func @transform_0(%arg0: i32, %arg1: i32) -> (i32, i32, i32) {
    %c0_i32 = arith.constant 0 : i32
    %c0_i32_0 = arith.constant 0 : i32
    return %arg0, %arg1, %c0_i32 : i32, i32, i32
  }
  func.func @transform_1(%arg0: i32, %arg1: i32) -> (i32, i32, i32) {
    %c0_i32 = arith.constant 0 : i32
    %c0_i32_0 = arith.constant 0 : i32
    %c0_i32_1 = arith.constant 0 : i32
    return %arg0, %c0_i32, %c0_i32_0 : i32, i32, i32
  }
  func.func @transform_2(%arg0: i32, %arg1: i32) -> (i32, i32, i32) {
    %c0_i32 = arith.constant 0 : i32
    %c0_i32_0 = arith.constant 0 : i32
    %c0_i32_1 = arith.constant 0 : i32
    return %arg0, %c0_i32, %c0_i32_0 : i32, i32, i32
  }
  func.func @transform_3(%arg0: i32, %arg1: i32) -> (i32, i32, i32) {
    %c0_i32 = arith.constant 0 : i32
    %c0_i32_0 = arith.constant 0 : i32
    return %arg0, %arg1, %c0_i32 : i32, i32, i32
  }
  func.func @transform_4(%arg0: i32, %arg1: i32) -> (i32, i32, i32) {
    %c0_i32 = arith.constant 0 : i32
    %c0_i32_0 = arith.constant 0 : i32
    %c0_i32_1 = arith.constant 0 : i32
    return %arg0, %c0_i32, %c0_i32_0 : i32, i32, i32
  }
  func.func @transform_5(%arg0: i32, %arg1: i32) -> (i32, i32, i32) {
    %c0_i32 = arith.constant 0 : i32
    %c0_i32_0 = arith.constant 0 : i32
    %c0_i32_1 = arith.constant 0 : i32
    return %arg0, %c0_i32, %c0_i32_0 : i32, i32, i32
  }
  func.func @transform_6(%arg0: i32, %arg1: i32) -> (i32, i32, i32) {
    %c0_i32 = arith.constant 0 : i32
    %c0_i32_0 = arith.constant 0 : i32
    return %arg0, %arg1, %c0_i32 : i32, i32, i32
  }
}

</mosaic_0001>

<bundles_post_ra>
// kernel: resnetv2_forward.38
= control target key start
LH: loop header
LB: loop body
LE: loop exit
PB: predicated region body
PF: predicated region fallthrough
CT: control target
= control target key end

     0   :  { %s599_s9 = smov 0   ;;  %s601_s10 = smov 0   ;;  %s663_s0 = inlined_call_operand.vmem [shape: bf16[2,256,128], index: 0, kind: input, shape index: {}]   ;;  %s664_s1 = inlined_call_operand.vmem [shape: f32[2,1,128], index: 1, kind: output, shape index: {0}]   ;;  %s665_s2 = inlined_call_operand.vmem [shape: f32[2,1,128], index: 2, kind: output, shape index: {1}]  }
   0x1   :  { %s603_s11 = smov 0  }
   0x2 LB: > { %s25_s12 = sadd.s32 1, %s577_s10  ;;  %p449_p0 = scmp.ge.s32.totalorder %s581_s11, 1  ;;  %s581_s11 = sphi %s603_s11, %s13_s11   ;;  %s577_s10 = sphi %s601_s10, %s667_s10   ;;  %s573_s9 = sphi %s599_s9, %s666_s9  }
   0x3   : > { %p27_p1 = scmp.ge.s32.totalorder %s25_s12, 2  ;;  %p134_p2 = scmp.lt.s32.totalorder %s581_s11, 3 }
   0x5   : > { %s669_s12 = smov (%p27_p1, %s25_s12), 0  ;;  %p135_p3 = pnand %p449_p0, %p134_p2 }
   0x6   : > { %p162_p4 = scmp.lt.s32.totalorder (!%p135_p3), %s573_s9, 1  ;;  %v583_v0 = vmov (!%p135_p3), 0.0  }
   0x7   : > { %138 = sbr.rel (%p135_p3) target bundleno = 99 (0x63), region = 24 }
   0xe   : > { %s671_s9 = smov (!%p162_p4, %s573_s9), 1 }
   0xf   : > { %s454_s13 = sshll.u32 %s671_s9, 7  ;;  %s620_s16 = scalar_lea.vmem %s664_s1, %s671_s9 }
  0x10   : > { %181 = vst [vmem:[%s620_s16] sm:$0x1] %v583_v0  ;;  %s626_s19 = scalar_lea.vmem %s665_s2, %s671_s9  ;;  %s632_s22 = scalar_lea.vmem %s663_s0, %s454_s13 }
  0x11   : > { %182 = vst [vmem:[%s626_s19] sm:$0x1] %v583_v0  ;;  %v456_v1 = vld [vmem:[%s632_s22] sm:$0xff]   ;;  %v519_v2 = vld [vmem:[%s632_s22 + $0x8] sm:$0xff]   ;;  %v520_v7 = vld [vmem:[%s632_s22 + $0x10] sm:$0xff]  }
  0x12   : > { %v457_v3 = vunpack.c.l.bf16 %v456_v1  ;;  %v458_v4 = vunpack.c.h.bf16 %v456_v1  ;;  %v461_v5 = vunpack.c.l.bf16 %v519_v2  ;;  %v462_v8 = vunpack.c.h.bf16 %v519_v2  ;;  %v521_v12 = vld [vmem:[%s632_s22 + $0x18] sm:$0xff]   ;;  %v522_v20 = vld [vmem:[%s632_s22 + $0x20] sm:$0xff]   ;;  %v523_v29 = vld [vmem:[%s632_s22 + $0x28] sm:$0xff]  }
  0x13   : > { %v465_v10 = vunpack.c.l.bf16 %v520_v7  ;;  %v466_v15 = vunpack.c.h.bf16 %v520_v7  ;;  %v469_v18 = vunpack.c.l.bf16 %v521_v12  ;;  %v470_v23 = vunpack.c.h.bf16 %v521_v12  ;;  %v524_v38 = vld [vmem:[%s632_s22 + $0x30] sm:$0xff]   ;;  %v525_v47 = vld [vmem:[%s632_s22 + $0x38] sm:$0xff]   ;;  %v526_v56 = vld [vmem:[%s632_s22 + $0x40] sm:$0xff]  }
  0x14   : > { %v248_v6 = vadd.f32 %v458_v4, %v457_v3  ;;  %v288_v13 = vmul.f32 %v457_v3, %v457_v3  ;;  %v289_v14 = vmul.f32 %v458_v4, %v458_v4  ;;  %v290_v17 = vmul.f32 %v461_v5, %v461_v5  ;;  %v527_v1 = vld [vmem:[%s632_s22 + $0x48] sm:$0xff]  }
  0x15   : > { %v291_v21 = vmul.f32 %v462_v8, %v462_v8  ;;  %v292_v25 = vmul.f32 %v465_v10, %v465_v10  ;;  %v473_v27 = vunpack.c.l.bf16 %v522_v20  ;;  %v293_v30 = vmul.f32 %v466_v15, %v466_v15 }
  0x16   : > { %v249_v9 = vadd.f32 %v461_v5, %v248_v6  ;;  %v320_v22 = vadd.f32 %v289_v14, %v288_v13  ;;  %v474_v32 = vunpack.c.h.bf16 %v522_v20  ;;  %v294_v34 = vmul.f32 %v469_v18, %v469_v18 }
  0x17   : > { %v477_v36 = vunpack.c.l.bf16 %v523_v29  ;;  %v295_v39 = vmul.f32 %v470_v23, %v470_v23  ;;  %v478_v41 = vunpack.c.h.bf16 %v523_v29  ;;  %v296_v43 = vmul.f32 %v473_v27, %v473_v27 }
  0x18   : > { %v250_v11 = vadd.f32 %v462_v8, %v249_v9  ;;  %v321_v26 = vadd.f32 %v320_v22, %v290_v17  ;;  %v481_v45 = vunpack.c.l.bf16 %v524_v38  ;;  %v297_v48 = vmul.f32 %v474_v32, %v474_v32 }
  0x19   : > { %v482_v50 = vunpack.c.h.bf16 %v524_v38  ;;  %v298_v52 = vmul.f32 %v477_v36, %v477_v36  ;;  %v485_v54 = vunpack.c.l.bf16 %v525_v47  ;;  %v299_v57 = vmul.f32 %v478_v41, %v478_v41 }
  0x1a   : > { %v251_v16 = vadd.f32 %v465_v10, %v250_v11  ;;  %v322_v31 = vadd.f32 %v321_v26, %v291_v21  ;;  %v486_v59 = vunpack.c.h.bf16 %v525_v47  ;;  %v300_v61 = vmul.f32 %v481_v45, %v481_v45  ;;  %v528_v10 = vld [vmem:[%s632_s22 + $0x50] sm:$0xff]  }
  0x1b   : > { %v489_v63 = vunpack.c.l.bf16 %v526_v56  ;;  %v301_v2 = vmul.f32 %v482_v50, %v482_v50  ;;  %v490_v4 = vunpack.c.h.bf16 %v526_v56  ;;  %v302_v6 = vmul.f32 %v485_v54, %v485_v54 }
  0x1c   : > { %v252_v19 = vadd.f32 %v466_v15, %v251_v16  ;;  %v323_v35 = vadd.f32 %v322_v31, %v292_v25  ;;  %v493_v8 = vunpack.c.l.bf16 %v527_v1  ;;  %v303_v11 = vmul.f32 %v486_v59, %v486_v59 }
  0x1d   : > { %v494_v13 = vunpack.c.h.bf16 %v527_v1  ;;  %v304_v15 = vmul.f32 %v489_v63, %v489_v63  ;;  %v497_v17 = vunpack.c.l.bf16 %v528_v10  ;;  %v305_v20 = vmul.f32 %v490_v4, %v490_v4 }
  0x1e   : > { %v253_v24 = vadd.f32 %v469_v18, %v252_v19  ;;  %v324_v40 = vadd.f32 %v323_v35, %v293_v30  ;;  %v529_v19 = vld [vmem:[%s632_s22 + $0x58] sm:$0xff]   ;;  %v498_v22 = vunpack.c.h.bf16 %v528_v10 }
  0x1f   : > { %v501_v26 = vunpack.c.l.bf16 %v529_v19  ;;  %v307_v29 = vmul.f32 %v494_v13, %v494_v13  ;;  %v502_v31 = vunpack.c.h.bf16 %v529_v19 }
  0x20   : > { %v254_v28 = vadd.f32 %v470_v23, %v253_v24  ;;  %v325_v44 = vadd.f32 %v324_v40, %v294_v34  ;;  %v306_v24 = vmul.f32 %v493_v8, %v493_v8  ;;  %v309_v38 = vmul.f32 %v498_v22, %v498_v22 }
  0x21   : > { %v311_v47 = vmul.f32 %v502_v31, %v502_v31 }
  0x22   : > { %v255_v33 = vadd.f32 %v473_v27, %v254_v28  ;;  %v326_v49 = vadd.f32 %v325_v44, %v295_v39  ;;  %v530_v28 = vld [vmem:[%s632_s22 + $0x60] sm:$0xff]  }
  0x23   : > { %v505_v35 = vunpack.c.l.bf16 %v530_v28  ;;  %v506_v40 = vunpack.c.h.bf16 %v530_v28  ;;  %v287_v28 = vld [vmem:[%s626_s19] sm:$0x1] }
  0x24   : > { %v256_v37 = vadd.f32 %v474_v32, %v255_v33  ;;  %v327_v53 = vadd.f32 %v326_v49, %v296_v43  ;;  %v308_v33 = vmul.f32 %v497_v17, %v497_v17 }
  0x25   : > { %v313_v56 = vmul.f32 %v506_v40, %v506_v40 }
  0x26   : > { %v257_v42 = vadd.f32 %v477_v36, %v256_v37  ;;  %v328_v58 = vadd.f32 %v327_v53, %v297_v48  ;;  %v531_v37 = vld [vmem:[%s632_s22 + $0x68] sm:$0xff]  }
  0x27   : > { %v509_v44 = vunpack.c.l.bf16 %v531_v37  ;;  %v510_v49 = vunpack.c.h.bf16 %v531_v37 }
  0x28   : > { %v258_v46 = vadd.f32 %v478_v41, %v257_v42  ;;  %v329_v62 = vadd.f32 %v328_v58, %v298_v52  ;;  %v310_v42 = vmul.f32 %v501_v26, %v501_v26 }
  0x2a   : > { %v259_v51 = vadd.f32 %v481_v45, %v258_v46  ;;  %v330_v3 = vadd.f32 %v329_v62, %v299_v57  ;;  %v532_v46 = vld [vmem:[%s632_s22 + $0x70] sm:$0xff]  }
  0x2b   : > { %v513_v53 = vunpack.c.l.bf16 %v532_v46  ;;  %v514_v58 = vunpack.c.h.bf16 %v532_v46 }
  0x2c   : > { %v260_v55 = vadd.f32 %v482_v50, %v259_v51  ;;  %v331_v7 = vadd.f32 %v330_v3, %v300_v61  ;;  %v312_v51 = vmul.f32 %v505_v35, %v505_v35 }
  0x2e   : > { %v261_v60 = vadd.f32 %v485_v54, %v260_v55  ;;  %v332_v12 = vadd.f32 %v331_v7, %v301_v2  ;;  %v533_v55 = vld [vmem:[%s632_s22 + $0x78] sm:$0xff]   ;;  %v317_v7 = vmul.f32 %v514_v58, %v514_v58 }
  0x2f   : > { %v517_v62 = vunpack.c.l.bf16 %v533_v55  ;;  %v518_v2 = vunpack.c.h.bf16 %v533_v55 }
  0x30   : > { %v262_v0 = vadd.f32 %v486_v59, %v261_v60  ;;  %v333_v16 = vadd.f32 %v332_v12, %v302_v6  ;;  %v314_v60 = vmul.f32 %v509_v44, %v509_v44 }
  0x31   : > { %v318_v10 = vmul.f32 %v517_v62, %v517_v62 }
  0x32   : > { %v263_v5 = vadd.f32 %v489_v63, %v262_v0  ;;  %v334_v21 = vadd.f32 %v333_v16, %v303_v11  ;;  %v315_v0 = vmul.f32 %v510_v49, %v510_v49 }
  0x34   : > { %v264_v9 = vadd.f32 %v490_v4, %v263_v5  ;;  %v335_v25 = vadd.f32 %v334_v21, %v304_v15  ;;  %v316_v4 = vmul.f32 %v513_v53, %v513_v53 }
  0x36   : > { %v265_v14 = vadd.f32 %v493_v8, %v264_v9  ;;  %v336_v30 = vadd.f32 %v335_v25, %v305_v20  ;;  %v247_v20 = vld [vmem:[%s620_s16] sm:$0x1] }
  0x38   : > { %v266_v18 = vadd.f32 %v494_v13, %v265_v14  ;;  %v337_v34 = vadd.f32 %v336_v30, %v306_v24  ;;  %v319_v13 = vmul.f32 %v518_v2, %v518_v2 }
  0x3a   : > { %v267_v23 = vadd.f32 %v497_v17, %v266_v18  ;;  %v338_v39 = vadd.f32 %v337_v34, %v307_v29 }
  0x3c   : > { %v268_v27 = vadd.f32 %v498_v22, %v267_v23  ;;  %v339_v43 = vadd.f32 %v338_v39, %v308_v33 }
  0x3e   : > { %v269_v32 = vadd.f32 %v501_v26, %v268_v27  ;;  %v340_v48 = vadd.f32 %v339_v43, %v309_v38 }
  0x40   : > { %v270_v36 = vadd.f32 %v502_v31, %v269_v32  ;;  %v341_v52 = vadd.f32 %v340_v48, %v310_v42 }
  0x42   : > { %v271_v41 = vadd.f32 %v505_v35, %v270_v36  ;;  %v342_v57 = vadd.f32 %v341_v52, %v311_v47 }
  0x44   : > { %v272_v45 = vadd.f32 %v506_v40, %v271_v41  ;;  %v343_v61 = vadd.f32 %v342_v57, %v312_v51 }
  0x46   : > { %v273_v50 = vadd.f32 %v509_v44, %v272_v45  ;;  %v344_v1 = vadd.f32 %v343_v61, %v313_v56 }
  0x48   : > { %v274_v54 = vadd.f32 %v510_v49, %v273_v50  ;;  %v345_v5 = vadd.f32 %v344_v1, %v314_v60 }
  0x4a   : > { %v275_v59 = vadd.f32 %v513_v53, %v274_v54  ;;  %v346_v8 = vadd.f32 %v345_v5, %v315_v0 }
  0x4c   : > { %v276_v63 = vadd.f32 %v514_v58, %v275_v59  ;;  %v347_v11 = vadd.f32 %v346_v8, %v316_v4 }
  0x4e   : > { %v277_v3 = vadd.f32 %v517_v62, %v276_v63  ;;  %v348_v14 = vadd.f32 %v347_v11, %v317_v7 }
  0x50   : > { %v278_v6 = vadd.f32 %v518_v2, %v277_v3  ;;  %v349_v16 = vadd.f32 %v348_v14, %v318_v10 }
  0x52   : > { %v279_v9 = vrot.slane %v278_v6, 4  ;;  %v350_v18 = vadd.f32 %v349_v16, %v319_v13 }
  0x54   : > { %v280_v12 = vadd.f32 %v279_v9, %v278_v6  ;;  %v351_v21 = vrot.slane %v350_v18, 4 }
  0x56   : > { %v281_v15 = vrot.slane %v280_v12, 2  ;;  %v352_v23 = vadd.f32 %v351_v21, %v350_v18 }
  0x58   : > { %v282_v17 = vadd.f32 %v281_v15, %v280_v12  ;;  %v353_v25 = vrot.slane %v352_v23, 2 }
  0x5a   : > { %v283_v19 = vrot.slane %v282_v17, 1  ;;  %v354_v26 = vadd.f32 %v353_v25, %v352_v23 }
  0x5c   : > { %v284_v22 = vadd.f32 %v283_v19, %v282_v17  ;;  %v355_v27 = vrot.slane %v354_v26, 1 }
  0x5e   : > { %v285_v24 = vadd.f32 %v284_v22, %v247_v20  ;;  %v356_v29 = vadd.f32 %v355_v27, %v354_v26 }
  0x60   : > { %286 = vst [vmem:[%s620_s16] sm:$0x1] %v285_v24  ;;  %v357_v30 = vadd.f32 %v356_v29, %v287_v28 }
  0x62   : > { %358 = vst [vmem:[%s626_s19] sm:$0x1] %v357_v30 }
  0x63 PF: > { %s13_s11 = sadd.s32 1, %s581_s11   ;;  %s666_s9 = smov %s577_s10 }
  0x64   : > { %p10_p5 = scmp.ge.s32.totalorder %s13_s11, 4   ;;  %s667_s10 = smov %s669_s12 }
  0x66   :  { %12 = sbr.rel (!%p10_p5) target bundleno = 2 (0x2), region = 70 }

// kernel: resnetv2_forward.39
= control target key start
LH: loop header
LB: loop body
LE: loop exit
PB: predicated region body
PF: predicated region fallthrough
CT: control target
= control target key end

     0   :  { %s998_s12 = smov 0   ;;  %s1000_s13 = smov 0   ;;  %s1150_s0 = inlined_call_operand.vmem [shape: bf16[2,256,128], index: 0, kind: input, shape index: {}]   ;;  %s1151_s1 = inlined_call_operand.vmem [shape: f32[2,1,128], index: 1, kind: input, shape index: {}]   ;;  %s1152_s2 = inlined_call_operand.vmem [shape: f32[2,1,128], index: 2, kind: input, shape index: {}]   ;;  %s1153_s3 = inlined_call_operand.vmem [shape: bf16[2,256,128], index: 3, kind: output, shape index: {}]  }
   0x1   :  { %s1002_s14 = smov 0  }
   0x2 LB: > { %s25_s15 = sadd.s32 1, %s972_s13  ;;  %p681_p0 = scmp.ge.s32.totalorder %s976_s14, 1  ;;  %s976_s14 = sphi %s1002_s14, %s13_s14   ;;  %s972_s13 = sphi %s1000_s13, %s1155_s13   ;;  %s968_s12 = sphi %s998_s12, %s1154_s12  }
   0x3   : > { %p27_p1 = scmp.ge.s32.totalorder %s25_s15, 2  ;;  %p174_p2 = scmp.lt.s32.totalorder %s976_s14, 3 }
   0x5   : > { %s1157_s15 = smov (%p27_p1, %s25_s15), 0  ;;  %p175_p3 = pnand %p681_p0, %p174_p2 }
   0x6   : > { %p213_p4 = scmp.lt.s32.totalorder (!%p175_p3), %s968_s12, 1 }
   0x7   : > { %178 = sbr.rel (%p175_p3) target bundleno = 60 (0x3c), region = 32 }
   0xe   : > { %s1159_s12 = smov (!%p213_p4, %s968_s12), 1 }
   0xf   : > { %s722_s16 = sshll.u32 %s1159_s12, 7  ;;  %s224_s19 = scalar_lea.vmem %s1151_s1, %s1159_s12 }
  0x10   : > { %s1028_s22 = scalar_lea.vmem %s1150_s0, %s722_s16  ;;  %s227_s25 = scalar_lea.vmem %s1152_s2, %s1159_s12  ;;  %v1035_v1 = vld [vmem:[%s224_s19] ss:$0 sm:$0xff] }
  0x11   : > { %v757_v0 = vld [vmem:[%s1028_s22] sm:$0xff]   ;;  %v900_v2 = vld [vmem:[%s1028_s22 + $0x8] sm:$0xff]   ;;  %v901_v7 = vld [vmem:[%s1028_s22 + $0x10] sm:$0xff]   ;;  %s1065_s28 = scalar_lea.vmem %s1153_s3, %s722_s16 }
  0x12   : > { %v758_v3 = vunpack.c.l.bf16 %v757_v0  ;;  %v759_v4 = vunpack.c.h.bf16 %v757_v0  ;;  %v762_v5 = vunpack.c.l.bf16 %v900_v2  ;;  %v763_v6 = vunpack.c.h.bf16 %v900_v2  ;;  %v902_v8 = vld [vmem:[%s1028_s22 + $0x18] sm:$0xff]   ;;  %v1040_v9 = vld [vmem:[%s227_s25] ss:$0 sm:$0xff]  ;;  %v904_v35 = vld [vmem:[%s1028_s22 + $0x28] sm:$0xff]  }
  0x13   : > { %v766_v10 = vunpack.c.l.bf16 %v901_v7  ;;  %v767_v11 = vunpack.c.h.bf16 %v901_v7  ;;  %v770_v12 = vunpack.c.l.bf16 %v902_v8  ;;  %v771_v13 = vunpack.c.h.bf16 %v902_v8  ;;  %v903_v30 = vld [vmem:[%s1028_s22 + $0x20] sm:$0xff]   ;;  %v905_v40 = vld [vmem:[%s1028_s22 + $0x30] sm:$0xff]   ;;  %v906_v45 = vld [vmem:[%s1028_s22 + $0x38] sm:$0xff]  }
  0x14   : > { %v309_v14 = vmul.f32 %v758_v3, %v1035_v1  ;;  %v310_v15 = vmul.f32 %v759_v4, %v1035_v1  ;;  %v311_v16 = vmul.f32 %v762_v5, %v1035_v1  ;;  %v312_v17 = vmul.f32 %v763_v6, %v1035_v1  ;;  %v907_v3 = vld [vmem:[%s1028_s22 + $0x40] sm:$0xff]  }
  0x15   : > { %v313_v18 = vmul.f32 %v766_v10, %v1035_v1  ;;  %v314_v19 = vmul.f32 %v767_v11, %v1035_v1  ;;  %v315_v20 = vmul.f32 %v770_v12, %v1035_v1  ;;  %v316_v21 = vmul.f32 %v771_v13, %v1035_v1  ;;  %v908_v13 = vld [vmem:[%s1028_s22 + $0x48] sm:$0xff]  }
  0x16   : > { %v348_v22 = vadd.f32 %v1040_v9, %v309_v14  ;;  %v349_v23 = vadd.f32 %v1040_v9, %v310_v15  ;;  %v350_v24 = vadd.f32 %v1040_v9, %v311_v16  ;;  %v351_v25 = vadd.f32 %v1040_v9, %v312_v17 }
  0x17   : > { %v352_v26 = vadd.f32 %v1040_v9, %v313_v18  ;;  %v353_v27 = vadd.f32 %v1040_v9, %v314_v19  ;;  %v354_v28 = vadd.f32 %v1040_v9, %v315_v20  ;;  %v355_v29 = vadd.f32 %v1040_v9, %v316_v21  ;;  %v909_v18 = vld [vmem:[%s1028_s22 + $0x50] sm:$0xff]  }
  0x18   : > { %v380_v31 = vmax.f32 %v348_v22, 0.0  ;;  %v381_v32 = vmax.f32 %v349_v23, 0.0  ;;  %v382_v33 = vmax.f32 %v350_v24, 0.0  ;;  %v383_v34 = vmax.f32 %v351_v25, 0.0  ;;  %v910_v23 = vld [vmem:[%s1028_s22 + $0x58] sm:$0xff]  }
  0x19   : > { %v384_v36 = vmax.f32 %v352_v26, 0.0  ;;  %v385_v37 = vmax.f32 %v353_v27, 0.0  ;;  %v386_v38 = vmax.f32 %v354_v28, 0.0  ;;  %v387_v39 = vmax.f32 %v355_v29, 0.0 }
  0x1a   : > { %v823_v41 = vpack.c.bf16 %v381_v32, %v380_v31  ;;  %v828_v42 = vpack.c.bf16 %v383_v34, %v382_v33  ;;  %v774_v43 = vunpack.c.l.bf16 %v903_v30  ;;  %v775_v44 = vunpack.c.h.bf16 %v903_v30 }
  0x1b   : > { %v833_v46 = vpack.c.bf16 %v385_v37, %v384_v36  ;;  %v838_v47 = vpack.c.bf16 %v387_v39, %v386_v38  ;;  %v778_v48 = vunpack.c.l.bf16 %v904_v35  ;;  %v779_v49 = vunpack.c.h.bf16 %v904_v35 }
  0x1c   : > { %824 = vst [vmem:[%s1065_s28] sm:$0xff] %v823_v41   ;;  %915 = vst [vmem:[%s1065_s28 + $0x8] sm:$0xff] %v828_v42   ;;  %v317_v50 = vmul.f32 %v774_v43, %v1035_v1  ;;  %v318_v51 = vmul.f32 %v775_v44, %v1035_v1  ;;  %v782_v52 = vunpack.c.l.bf16 %v905_v40  ;;  %v783_v53 = vunpack.c.h.bf16 %v905_v40  ;;  %v911_v40 = vld [vmem:[%s1028_s22 + $0x60] sm:$0xff]  }
  0x1d   : > { %916 = vst [vmem:[%s1065_s28 + $0x10] sm:$0xff] %v833_v46   ;;  %917 = vst [vmem:[%s1065_s28 + $0x18] sm:$0xff] %v838_v47   ;;  %v319_v54 = vmul.f32 %v778_v48, %v1035_v1  ;;  %v320_v55 = vmul.f32 %v779_v49, %v1035_v1  ;;  %v786_v56 = vunpack.c.l.bf16 %v906_v45  ;;  %v787_v57 = vunpack.c.h.bf16 %v906_v45 }
  0x1e   : > { %v356_v58 = vadd.f32 %v1040_v9, %v317_v50  ;;  %v357_v59 = vadd.f32 %v1040_v9, %v318_v51  ;;  %v321_v60 = vmul.f32 %v782_v52, %v1035_v1  ;;  %v322_v61 = vmul.f32 %v783_v53, %v1035_v1  ;;  %v912_v53 = vld [vmem:[%s1028_s22 + $0x68] sm:$0xff]  }
  0x1f   : > { %v358_v62 = vadd.f32 %v1040_v9, %v319_v54  ;;  %v359_v63 = vadd.f32 %v1040_v9, %v320_v55  ;;  %v323_v0 = vmul.f32 %v786_v56, %v1035_v1  ;;  %v324_v2 = vmul.f32 %v787_v57, %v1035_v1 }
  0x20   : > { %v388_v4 = vmax.f32 %v356_v58, 0.0  ;;  %v389_v5 = vmax.f32 %v357_v59, 0.0  ;;  %v360_v6 = vadd.f32 %v1040_v9, %v321_v60  ;;  %v361_v7 = vadd.f32 %v1040_v9, %v322_v61  ;;  %v913_v58 = vld [vmem:[%s1028_s22 + $0x70] sm:$0xff]  }
  0x21   : > { %v390_v8 = vmax.f32 %v358_v62, 0.0  ;;  %v391_v10 = vmax.f32 %v359_v63, 0.0  ;;  %v362_v11 = vadd.f32 %v1040_v9, %v323_v0  ;;  %v363_v12 = vadd.f32 %v1040_v9, %v324_v2  ;;  %v914_v63 = vld [vmem:[%s1028_s22 + $0x78] sm:$0xff]  }
  0x22   : > { %v843_v14 = vpack.c.bf16 %v389_v5, %v388_v4  ;;  %v392_v15 = vmax.f32 %v360_v6, 0.0  ;;  %v393_v16 = vmax.f32 %v361_v7, 0.0  ;;  %v790_v17 = vunpack.c.l.bf16 %v907_v3 }
  0x23   : > { %v848_v19 = vpack.c.bf16 %v391_v10, %v390_v8  ;;  %v394_v20 = vmax.f32 %v362_v11, 0.0  ;;  %v395_v21 = vmax.f32 %v363_v12, 0.0  ;;  %v791_v22 = vunpack.c.h.bf16 %v907_v3 }
  0x24   : > { %918 = vst [vmem:[%s1065_s28 + $0x20] sm:$0xff] %v843_v14   ;;  %v853_v24 = vpack.c.bf16 %v393_v16, %v392_v15  ;;  %v325_v25 = vmul.f32 %v790_v17, %v1035_v1  ;;  %v794_v26 = vunpack.c.l.bf16 %v908_v13  ;;  %v795_v27 = vunpack.c.h.bf16 %v908_v13 }
  0x25   : > { %919 = vst [vmem:[%s1065_s28 + $0x28] sm:$0xff] %v848_v19   ;;  %v858_v28 = vpack.c.bf16 %v395_v21, %v394_v20  ;;  %v326_v29 = vmul.f32 %v791_v22, %v1035_v1  ;;  %v798_v30 = vunpack.c.l.bf16 %v909_v18  ;;  %v799_v31 = vunpack.c.h.bf16 %v909_v18 }
  0x26   : > { %920 = vst [vmem:[%s1065_s28 + $0x30] sm:$0xff] %v853_v24   ;;  %v364_v32 = vadd.f32 %v1040_v9, %v325_v25  ;;  %v327_v33 = vmul.f32 %v794_v26, %v1035_v1  ;;  %v328_v34 = vmul.f32 %v795_v27, %v1035_v1  ;;  %v802_v35 = vunpack.c.l.bf16 %v910_v23 }
  0x27   : > { %921 = vst [vmem:[%s1065_s28 + $0x38] sm:$0xff] %v858_v28   ;;  %v365_v36 = vadd.f32 %v1040_v9, %v326_v29  ;;  %v329_v37 = vmul.f32 %v798_v30, %v1035_v1  ;;  %v330_v38 = vmul.f32 %v799_v31, %v1035_v1  ;;  %v803_v39 = vunpack.c.h.bf16 %v910_v23 }
  0x28   : > { %v396_v41 = vmax.f32 %v364_v32, 0.0  ;;  %v366_v42 = vadd.f32 %v1040_v9, %v327_v33  ;;  %v367_v43 = vadd.f32 %v1040_v9, %v328_v34  ;;  %v331_v44 = vmul.f32 %v802_v35, %v1035_v1 }
  0x29   : > { %v397_v45 = vmax.f32 %v365_v36, 0.0  ;;  %v368_v46 = vadd.f32 %v1040_v9, %v329_v37  ;;  %v369_v47 = vadd.f32 %v1040_v9, %v330_v38  ;;  %v332_v48 = vmul.f32 %v803_v39, %v1035_v1 }
  0x2a   : > { %v398_v49 = vmax.f32 %v366_v42, 0.0  ;;  %v399_v50 = vmax.f32 %v367_v43, 0.0  ;;  %v370_v51 = vadd.f32 %v1040_v9, %v331_v44  ;;  %v806_v52 = vunpack.c.l.bf16 %v911_v40 }
  0x2b   : > { %v863_v54 = vpack.c.bf16 %v397_v45, %v396_v41  ;;  %v400_v55 = vmax.f32 %v368_v46, 0.0  ;;  %v401_v56 = vmax.f32 %v369_v47, 0.0  ;;  %v371_v57 = vadd.f32 %v1040_v9, %v332_v48 }
  0x2c   : > { %v868_v59 = vpack.c.bf16 %v399_v50, %v398_v49  ;;  %v402_v60 = vmax.f32 %v370_v51, 0.0  ;;  %v807_v61 = vunpack.c.h.bf16 %v911_v40  ;;  %v333_v62 = vmul.f32 %v806_v52, %v1035_v1 }
  0x2d   : > { %922 = vst [vmem:[%s1065_s28 + $0x40] sm:$0xff] %v863_v54   ;;  %v873_v0 = vpack.c.bf16 %v401_v56, %v400_v55  ;;  %v403_v2 = vmax.f32 %v371_v57, 0.0  ;;  %v810_v3 = vunpack.c.l.bf16 %v912_v53  ;;  %v811_v4 = vunpack.c.h.bf16 %v912_v53 }
  0x2e   : > { %923 = vst [vmem:[%s1065_s28 + $0x48] sm:$0xff] %v868_v59   ;;  %v334_v5 = vmul.f32 %v807_v61, %v1035_v1  ;;  %v372_v6 = vadd.f32 %v1040_v9, %v333_v62  ;;  %v814_v7 = vunpack.c.l.bf16 %v913_v58  ;;  %v815_v8 = vunpack.c.h.bf16 %v913_v58 }
  0x2f   : > { %924 = vst [vmem:[%s1065_s28 + $0x50] sm:$0xff] %v873_v0   ;;  %v878_v10 = vpack.c.bf16 %v403_v2, %v402_v60  ;;  %v335_v11 = vmul.f32 %v810_v3, %v1035_v1  ;;  %v336_v12 = vmul.f32 %v811_v4, %v1035_v1  ;;  %v818_v13 = vunpack.c.l.bf16 %v914_v63 }
  0x30   : > { %v373_v14 = vadd.f32 %v1040_v9, %v334_v5  ;;  %v404_v15 = vmax.f32 %v372_v6, 0.0  ;;  %v337_v16 = vmul.f32 %v814_v7, %v1035_v1  ;;  %v338_v17 = vmul.f32 %v815_v8, %v1035_v1 }
  0x31   : > { %925 = vst [vmem:[%s1065_s28 + $0x58] sm:$0xff] %v878_v10   ;;  %v374_v18 = vadd.f32 %v1040_v9, %v335_v11  ;;  %v375_v19 = vadd.f32 %v1040_v9, %v336_v12  ;;  %v819_v20 = vunpack.c.h.bf16 %v914_v63  ;;  %v339_v21 = vmul.f32 %v818_v13, %v1035_v1 }
  0x32   : > { %v405_v22 = vmax.f32 %v373_v14, 0.0  ;;  %v376_v23 = vadd.f32 %v1040_v9, %v337_v16  ;;  %v377_v24 = vadd.f32 %v1040_v9, %v338_v17 }
  0x33   : > { %v406_v25 = vmax.f32 %v374_v18, 0.0  ;;  %v407_v26 = vmax.f32 %v375_v19, 0.0  ;;  %v340_v27 = vmul.f32 %v819_v20, %v1035_v1  ;;  %v378_v28 = vadd.f32 %v1040_v9, %v339_v21 }
  0x34   : > { %v883_v29 = vpack.c.bf16 %v405_v22, %v404_v15  ;;  %v408_v30 = vmax.f32 %v376_v23, 0.0  ;;  %v409_v31 = vmax.f32 %v377_v24, 0.0 }
  0x35   : > { %v888_v32 = vpack.c.bf16 %v407_v26, %v406_v25  ;;  %v379_v33 = vadd.f32 %v1040_v9, %v340_v27  ;;  %v410_v34 = vmax.f32 %v378_v28, 0.0 }
  0x36   : > { %926 = vst [vmem:[%s1065_s28 + $0x60] sm:$0xff] %v883_v29   ;;  %v893_v35 = vpack.c.bf16 %v409_v31, %v408_v30 }
  0x37   : > { %927 = vst [vmem:[%s1065_s28 + $0x68] sm:$0xff] %v888_v32   ;;  %v411_v36 = vmax.f32 %v379_v33, 0.0 }
  0x38   : > { %928 = vst [vmem:[%s1065_s28 + $0x70] sm:$0xff] %v893_v35  }
  0x39   : > { %v898_v37 = vpack.c.bf16 %v411_v36, %v410_v34 }
  0x3b   : > { %929 = vst [vmem:[%s1065_s28 + $0x78] sm:$0xff] %v898_v37  }
  0x3c PF: > { %s13_s14 = sadd.s32 1, %s976_s14   ;;  %s1154_s12 = smov %s972_s13 }
  0x3d   : > { %p10_p5 = scmp.ge.s32.totalorder %s13_s14, 4   ;;  %s1155_s13 = smov %s1157_s15 }
  0x3f   :  { %12 = sbr.rel (!%p10_p5) target bundleno = 2 (0x2), region = 68 }

// kernel: resnetv2_forward.37
= control target key start
LH: loop header
LB: loop body
LE: loop exit
PB: predicated region body
PF: predicated region fallthrough
CT: control target
= control target key end

     0   :  { %v2008_v0 = vmov 0   ;;  %s2392_s1 = inlined_call_operand.vmem [shape: bf16[256,128], index: 1, kind: input, shape index: {}]   ;;  %s2393_s0 = inlined_call_operand.vmem [shape: bf16[512,256], index: 0, kind: input, shape index: {}]   ;;  %s2394_s2 = inlined_call_operand.vmem [shape: bf16[512,128], index: 2, kind: output, shape index: {}]  }
   0x1   :  { %656 = vmatprep.subr.bf16.mxu0 %v2008_v0  ;;  %1863 = vmatprep.subr.bf16.mxu1 %v2008_v0  ;;  %v1896_v1 = vld [vmem:[%s2392_s1] sm:$0xff]   ;;  %v1897_v2 = vld [vmem:[%s2392_s1 + $0x8] sm:$0xff]   ;;  %v1898_v3 = vld [vmem:[%s2392_s1 + $0x10] sm:$0xff]  }
   0x2   :  { %657 = vmatpush1.bf16.msra.mxu0 %v1896_v1  ;;  %1879 = vmatpush1.bf16.msra.mxu1 %v1896_v1  ;;  %v1899_v4 = vld [vmem:[%s2392_s1 + $0x18] sm:$0xff]   ;;  %v1900_v5 = vld [vmem:[%s2392_s1 + $0x20] sm:$0xff]   ;;  %v1901_v7 = vld [vmem:[%s2392_s1 + $0x28] sm:$0xff]  }
   0x3   :  { %658 = vmatprep.subr.bf16.mxu0 %v2008_v0  ;;  %1864 = vmatprep.subr.bf16.mxu1 %v2008_v0  ;;  %v1914_v6 = vld [vmem:[%s2393_s0 + $0x4] ss:$8 sps:$4 sm:$0xff]   ;;  %v1902_v9 = vld [vmem:[%s2392_s1 + $0x30] sm:$0xff]   ;;  %v1903_v10 = vld [vmem:[%s2392_s1 + $0x38] sm:$0xff]  }
   0x4   :  { %v1917_v8 = vld [vmem:[%s2393_s0 + $0x104] ss:$8 sps:$4 sm:$0xff]   ;;  %688 = vmatprep.mubr.bf16.mxu0 %v1914_v6  ;;  %v1906_v13 = vld [vmem:[%s2392_s1 + $0x50] sm:$0xff]   ;;  %v1907_v14 = vld [vmem:[%s2392_s1 + $0x58] sm:$0xff]  }
   0x5   :  { %816 = vmatprep.mubr.bf16.mxu1 %v1917_v8  ;;  %v1904_v11 = vld [vmem:[%s2392_s1 + $0x40] sm:$0xff]   ;;  %v1905_v12 = vld [vmem:[%s2392_s1 + $0x48] sm:$0xff]   ;;  %v1910_v17 = vld [vmem:[%s2392_s1 + $0x70] sm:$0xff]  }
   0x6   :  { %659 = vmatpush1.bf16.msra.mxu0 %v1897_v2  ;;  %1880 = vmatpush1.bf16.msra.mxu1 %v1897_v2  ;;  %v1908_v15 = vld [vmem:[%s2392_s1 + $0x60] sm:$0xff]   ;;  %v1909_v16 = vld [vmem:[%s2392_s1 + $0x68] sm:$0xff]   ;;  %v1911_v18 = vld [vmem:[%s2392_s1 + $0x78] sm:$0xff]  }
   0x7   :  { %660 = vmatprep.subr.bf16.mxu0 %v2008_v0  ;;  %1865 = vmatprep.subr.bf16.mxu1 %v2008_v0  ;;  %v1912_v19 = vld [vmem:[%s2393_s0] ss:$8 sps:$4 sm:$0xff]   ;;  %v1918_v21 = vld [vmem:[%s2393_s0 + $0x14] ss:$8 sps:$4 sm:$0xff]   ;;  %v1922_v23 = vld [vmem:[%s2393_s0 + $0x10] ss:$8 sps:$4 sm:$0xff]  }
   0x8   :  { %v1915_v20 = vld [vmem:[%s2393_s0 + $0x100] ss:$8 sps:$4 sm:$0xff]   ;;  %v1920_v22 = vld [vmem:[%s2393_s0 + $0x114] ss:$8 sps:$4 sm:$0xff]   ;;  %v1923_v24 = vld [vmem:[%s2393_s0 + $0x110] ss:$8 sps:$4 sm:$0xff]  }
   0x9   :  { %v1924_v25 = vld [vmem:[%s2393_s0 + $0x24] ss:$8 sps:$4 sm:$0xff]   ;;  %v1928_v27 = vld [vmem:[%s2393_s0 + $0x20] ss:$8 sps:$4 sm:$0xff]   ;;  %v1930_v29 = vld [vmem:[%s2393_s0 + $0x34] ss:$8 sps:$4 sm:$0xff]  }
   0xa   :  { %661 = vmatpush1.bf16.msra.mxu0 %v1898_v3  ;;  %1881 = vmatpush1.bf16.msra.mxu1 %v1898_v3  ;;  %v1926_v26 = vld [vmem:[%s2393_s0 + $0x124] ss:$8 sps:$4 sm:$0xff]   ;;  %v1929_v28 = vld [vmem:[%s2393_s0 + $0x120] ss:$8 sps:$4 sm:$0xff]   ;;  %v1932_v30 = vld [vmem:[%s2393_s0 + $0x134] ss:$8 sps:$4 sm:$0xff]  }
   0xb   :  { %662 = vmatprep.subr.bf16.mxu0 %v2008_v0  ;;  %1866 = vmatprep.subr.bf16.mxu1 %v2008_v0  ;;  %v1934_v31 = vld [vmem:[%s2393_s0 + $0x30] ss:$8 sps:$4 sm:$0xff]   ;;  %v1936_v33 = vld [vmem:[%s2393_s0 + $0x44] ss:$8 sps:$4 sm:$0xff]   ;;  %v1940_v35 = vld [vmem:[%s2393_s0 + $0x40] ss:$8 sps:$4 sm:$0xff]  }
   0xc   :  { %v1935_v32 = vld [vmem:[%s2393_s0 + $0x130] ss:$8 sps:$4 sm:$0xff]   ;;  %v1938_v34 = vld [vmem:[%s2393_s0 + $0x144] ss:$8 sps:$4 sm:$0xff]   ;;  %v1941_v36 = vld [vmem:[%s2393_s0 + $0x140] ss:$8 sps:$4 sm:$0xff]  }
   0xd   :  { %v1942_v37 = vld [vmem:[%s2393_s0 + $0x54] ss:$8 sps:$4 sm:$0xff]   ;;  %v1946_v39 = vld [vmem:[%s2393_s0 + $0x50] ss:$8 sps:$4 sm:$0xff]   ;;  %v1948_v41 = vld [vmem:[%s2393_s0 + $0x64] ss:$8 sps:$4 sm:$0xff]  }
   0xe   :  { %663 = vmatpush1.bf16.msra.mxu0 %v1899_v4  ;;  %1882 = vmatpush1.bf16.msra.mxu1 %v1899_v4  ;;  %v1944_v38 = vld [vmem:[%s2393_s0 + $0x154] ss:$8 sps:$4 sm:$0xff]   ;;  %v1947_v40 = vld [vmem:[%s2393_s0 + $0x150] ss:$8 sps:$4 sm:$0xff]   ;;  %v1950_v42 = vld [vmem:[%s2393_s0 + $0x164] ss:$8 sps:$4 sm:$0xff]  }
   0xf   :  { %664 = vmatprep.subr.bf16.mxu0 %v2008_v0  ;;  %1867 = vmatprep.subr.bf16.mxu1 %v2008_v0  ;;  %v1952_v43 = vld [vmem:[%s2393_s0 + $0x60] ss:$8 sps:$4 sm:$0xff]   ;;  %v1954_v45 = vld [vmem:[%s2393_s0 + $0x74] ss:$8 sps:$4 sm:$0xff]   ;;  %v1958_v47 = vld [vmem:[%s2393_s0 + $0x70] ss:$8 sps:$4 sm:$0xff]  }
  0x10   :  { %v1953_v44 = vld [vmem:[%s2393_s0 + $0x160] ss:$8 sps:$4 sm:$0xff]   ;;  %v1956_v46 = vld [vmem:[%s2393_s0 + $0x174] ss:$8 sps:$4 sm:$0xff]   ;;  %v1959_v48 = vld [vmem:[%s2393_s0 + $0x170] ss:$8 sps:$4 sm:$0xff]  }
  0x11   :  { %v1960_v49 = vld [vmem:[%s2393_s0 + $0x84] ss:$8 sps:$4 sm:$0xff]   ;;  %v1964_v51 = vld [vmem:[%s2393_s0 + $0x80] ss:$8 sps:$4 sm:$0xff]   ;;  %v1966_v53 = vld [vmem:[%s2393_s0 + $0x94] ss:$8 sps:$4 sm:$0xff]  }
  0x12   :  { %665 = vmatpush1.bf16.msra.mxu0 %v1900_v5  ;;  %1883 = vmatpush1.bf16.msra.mxu1 %v1900_v5  ;;  %v1962_v50 = vld [vmem:[%s2393_s0 + $0x184] ss:$8 sps:$4 sm:$0xff]   ;;  %v1965_v52 = vld [vmem:[%s2393_s0 + $0x180] ss:$8 sps:$4 sm:$0xff]   ;;  %v1968_v54 = vld [vmem:[%s2393_s0 + $0x194] ss:$8 sps:$4 sm:$0xff]  }
  0x13   :  { %666 = vmatprep.subr.bf16.mxu0 %v2008_v0  ;;  %1868 = vmatprep.subr.bf16.mxu1 %v2008_v0  ;;  %v1970_v55 = vld [vmem:[%s2393_s0 + $0x90] ss:$8 sps:$4 sm:$0xff]   ;;  %v1972_v57 = vld [vmem:[%s2393_s0 + $0xa4] ss:$8 sps:$4 sm:$0xff]   ;;  %v1976_v59 = vld [vmem:[%s2393_s0 + $0xa0] ss:$8 sps:$4 sm:$0xff]  }
  0x14   :  { %v1971_v56 = vld [vmem:[%s2393_s0 + $0x190] ss:$8 sps:$4 sm:$0xff]   ;;  %v1974_v58 = vld [vmem:[%s2393_s0 + $0x1a4] ss:$8 sps:$4 sm:$0xff]   ;;  %v1977_v60 = vld [vmem:[%s2393_s0 + $0x1a0] ss:$8 sps:$4 sm:$0xff]  }
  0x15   :  { %v1978_v61 = vld [vmem:[%s2393_s0 + $0xb4] ss:$8 sps:$4 sm:$0xff]   ;;  %v1982_v63 = vld [vmem:[%s2393_s0 + $0xb0] ss:$8 sps:$4 sm:$0xff]   ;;  %v1984_v1 = vld [vmem:[%s2393_s0 + $0xc4] ss:$8 sps:$4 sm:$0xff]  }
  0x16   :  { %667 = vmatpush1.bf16.msra.mxu0 %v1901_v7  ;;  %1884 = vmatpush1.bf16.msra.mxu1 %v1901_v7  ;;  %v1980_v62 = vld [vmem:[%s2393_s0 + $0x1b4] ss:$8 sps:$4 sm:$0xff]   ;;  %v1986_v2 = vld [vmem:[%s2393_s0 + $0x1c4] ss:$8 sps:$4 sm:$0xff]   ;;  %v1988_v3 = vld [vmem:[%s2393_s0 + $0xc0] ss:$8 sps:$4 sm:$0xff]  }
  0x17   :  { %668 = vmatprep.subr.bf16.mxu0 %v2008_v0  ;;  %1869 = vmatprep.subr.bf16.mxu1 %v2008_v0  ;;  %v1989_v4 = vld [vmem:[%s2393_s0 + $0x1c0] ss:$8 sps:$4 sm:$0xff]   ;;  %v1990_v5 = vld [vmem:[%s2393_s0 + $0xd4] ss:$8 sps:$4 sm:$0xff]   ;;  %v1994_v7 = vld [vmem:[%s2393_s0 + $0xd0] ss:$8 sps:$4 sm:$0xff]  }
  0x18   :  { %v1992_v6 = vld [vmem:[%s2393_s0 + $0x1d4] ss:$8 sps:$4 sm:$0xff]   ;;  %v1995_v8 = vld [vmem:[%s2393_s0 + $0x1d0] ss:$8 sps:$4 sm:$0xff]  }
  0x1a   :  { %669 = vmatpush1.bf16.msra.mxu0 %v1902_v9  ;;  %1885 = vmatpush1.bf16.msra.mxu1 %v1902_v9  ;;  %v1996_v9 = vld [vmem:[%s2393_s0 + $0xe4] ss:$8 sps:$4 sm:$0xff]  }
  0x1b   :  { %670 = vmatprep.subr.bf16.mxu0 %v2008_v0  ;;  %1870 = vmatprep.subr.bf16.mxu1 %v2008_v0 }
  0x1e   :  { %671 = vmatpush1.bf16.msra.mxu0 %v1903_v10  ;;  %1886 = vmatpush1.bf16.msra.mxu1 %v1903_v10  ;;  %v1998_v10 = vld [vmem:[%s2393_s0 + $0x1e4] ss:$8 sps:$4 sm:$0xff]  }
  0x1f   :  { %672 = vmatprep.subr.bf16.mxu0 %v2008_v0  ;;  %1871 = vmatprep.subr.bf16.mxu1 %v2008_v0 }
  0x22   :  { %673 = vmatpush1.bf16.msra.mxu0 %v1904_v11  ;;  %1887 = vmatpush1.bf16.msra.mxu1 %v1904_v11  ;;  %v2000_v11 = vld [vmem:[%s2393_s0 + $0xe0] ss:$8 sps:$4 sm:$0xff]  }
  0x23   :  { %674 = vmatprep.subr.bf16.mxu0 %v2008_v0  ;;  %1872 = vmatprep.subr.bf16.mxu1 %v2008_v0 }
  0x26   :  { %675 = vmatpush1.bf16.msra.mxu0 %v1905_v12  ;;  %1888 = vmatpush1.bf16.msra.mxu1 %v1905_v12  ;;  %v2001_v12 = vld [vmem:[%s2393_s0 + $0x1e0] ss:$8 sps:$4 sm:$0xff]  }
  0x27   :  { %676 = vmatprep.subr.bf16.mxu0 %v2008_v0  ;;  %1873 = vmatprep.subr.bf16.mxu1 %v2008_v0 }
  0x2a   :  { %677 = vmatpush1.bf16.msra.mxu0 %v1906_v13  ;;  %1889 = vmatpush1.bf16.msra.mxu1 %v1906_v13  ;;  %v2002_v13 = vld [vmem:[%s2393_s0 + $0xf4] ss:$8 sps:$4 sm:$0xff]  }
  0x2b   :  { %678 = vmatprep.subr.bf16.mxu0 %v2008_v0  ;;  %1874 = vmatprep.subr.bf16.mxu1 %v2008_v0 }
  0x2e   :  { %679 = vmatpush1.bf16.msra.mxu0 %v1907_v14  ;;  %1890 = vmatpush1.bf16.msra.mxu1 %v1907_v14  ;;  %v2004_v14 = vld [vmem:[%s2393_s0 + $0x1f4] ss:$8 sps:$4 sm:$0xff]  }
  0x2f   :  { %680 = vmatprep.subr.bf16.mxu0 %v2008_v0  ;;  %1875 = vmatprep.subr.bf16.mxu1 %v2008_v0 }
  0x32   :  { %681 = vmatpush1.bf16.msra.mxu0 %v1908_v15  ;;  %1891 = vmatpush1.bf16.msra.mxu1 %v1908_v15  ;;  %v2006_v15 = vld [vmem:[%s2393_s0 + $0xf0] ss:$8 sps:$4 sm:$0xff]  }
  0x33   :  { %682 = vmatprep.subr.bf16.mxu0 %v2008_v0  ;;  %1876 = vmatprep.subr.bf16.mxu1 %v2008_v0 }
  0x36   :  { %683 = vmatpush1.bf16.msra.mxu0 %v1909_v16  ;;  %1892 = vmatpush1.bf16.msra.mxu1 %v1909_v16  ;;  %v2007_v16 = vld [vmem:[%s2393_s0 + $0x1f0] ss:$8 sps:$4 sm:$0xff]  }
  0x37   :  { %684 = vmatprep.subr.bf16.mxu0 %v2008_v0  ;;  %1877 = vmatprep.subr.bf16.mxu1 %v2008_v0 }
  0x3a   :  { %685 = vmatpush1.bf16.msra.mxu0 %v1910_v17  ;;  %1893 = vmatpush1.bf16.msra.mxu1 %v1910_v17 }
  0x3b   :  { %686 = vmatprep.subr.bf16.mxu0 %v2008_v0  ;;  %1878 = vmatprep.subr.bf16.mxu1 %v2008_v0  ;;  %v1983_v0 = vld [vmem:[%s2393_s0 + $0x1b0] ss:$8 sps:$4 sm:$0xff]  }
  0x3e   :  { %687 = vmatpush1.bf16.msra.mxu0 %v1911_v18  ;;  %1894 = vmatpush1.bf16.msra.mxu1 %v1911_v18 }
  0x41   :  { %689 = vmatmul.mubr.bf16.vlgmr.msra.gmra.mrb[0].mxu0 %v1912_v19  ;;  %817 = vmatmul.mubr.bf16.vlgmr.msra.gmra.mrb[0].mxu1 %v1915_v20 }
  0x42   :  { %696 = vmatprep.mubr.bf16.mxu0 %v1918_v21  ;;  %824 = vmatprep.mubr.bf16.mxu1 %v1920_v22 }
  0x49   :  { %697 = vmatmul.mubr.bf16.gmra.mrb[4].mxu0 %v1922_v23  ;;  %825 = vmatmul.mubr.bf16.gmra.mrb[4].mxu1 %v1923_v24 }
  0x4a   :  { %704 = vmatprep.mubr.bf16.mxu0 %v1924_v25  ;;  %832 = vmatprep.mubr.bf16.mxu1 %v1926_v26 }
  0x51   :  { %705 = vmatmul.mubr.bf16.gmra.mrb[8].mxu0 %v1928_v27  ;;  %833 = vmatmul.mubr.bf16.gmra.mrb[8].mxu1 %v1929_v28 }
  0x52   :  { %712 = vmatprep.mubr.bf16.mxu0 %v1930_v29  ;;  %840 = vmatprep.mubr.bf16.mxu1 %v1932_v30 }
  0x59   :  { %713 = vmatmul.mubr.bf16.gmra.mrb[12].mxu0 %v1934_v31  ;;  %841 = vmatmul.mubr.bf16.gmra.mrb[12].mxu1 %v1935_v32 }
  0x5a   :  { %720 = vmatprep.mubr.bf16.mxu0 %v1936_v33  ;;  %848 = vmatprep.mubr.bf16.mxu1 %v1938_v34 }
  0x61   :  { %721 = vmatmul.mubr.bf16.gmra.mrb[16].mxu0 %v1940_v35  ;;  %849 = vmatmul.mubr.bf16.gmra.mrb[16].mxu1 %v1941_v36 }
  0x62   :  { %728 = vmatprep.mubr.bf16.mxu0 %v1942_v37  ;;  %856 = vmatprep.mubr.bf16.mxu1 %v1944_v38 }
  0x69   :  { %729 = vmatmul.mubr.bf16.gmra.mrb[20].mxu0 %v1946_v39  ;;  %857 = vmatmul.mubr.bf16.gmra.mrb[20].mxu1 %v1947_v40 }
  0x6a   :  { %736 = vmatprep.mubr.bf16.mxu0 %v1948_v41  ;;  %864 = vmatprep.mubr.bf16.mxu1 %v1950_v42 }
  0x71   :  { %737 = vmatmul.mubr.bf16.gmra.mrb[24].mxu0 %v1952_v43  ;;  %865 = vmatmul.mubr.bf16.gmra.mrb[24].mxu1 %v1953_v44 }
  0x72   :  { %744 = vmatprep.mubr.bf16.mxu0 %v1954_v45  ;;  %872 = vmatprep.mubr.bf16.mxu1 %v1956_v46 }
  0x79   :  { %745 = vmatmul.mubr.bf16.gmra.mrb[28].mxu0 %v1958_v47  ;;  %873 = vmatmul.mubr.bf16.gmra.mrb[28].mxu1 %v1959_v48 }
  0x7a   :  { %752 = vmatprep.mubr.bf16.mxu0 %v1960_v49  ;;  %880 = vmatprep.mubr.bf16.mxu1 %v1962_v50 }
  0x81   :  { %753 = vmatmul.mubr.bf16.gmra.mrb[32].mxu0 %v1964_v51  ;;  %881 = vmatmul.mubr.bf16.gmra.mrb[32].mxu1 %v1965_v52 }
  0x82   :  { %760 = vmatprep.mubr.bf16.mxu0 %v1966_v53  ;;  %888 = vmatprep.mubr.bf16.mxu1 %v1968_v54 }
  0x89   :  { %761 = vmatmul.mubr.bf16.gmra.mrb[36].mxu0 %v1970_v55  ;;  %889 = vmatmul.mubr.bf16.gmra.mrb[36].mxu1 %v1971_v56 }
  0x8a   :  { %768 = vmatprep.mubr.bf16.mxu0 %v1972_v57  ;;  %896 = vmatprep.mubr.bf16.mxu1 %v1974_v58 }
  0x91   :  { %769 = vmatmul.mubr.bf16.gmra.mrb[40].mxu0 %v1976_v59  ;;  %897 = vmatmul.mubr.bf16.gmra.mrb[40].mxu1 %v1977_v60 }
  0x92   :  { %776 = vmatprep.mubr.bf16.mxu0 %v1978_v61  ;;  %904 = vmatprep.mubr.bf16.mxu1 %v1980_v62 }
  0x99   :  { %777 = vmatmul.mubr.bf16.gmra.mrb[44].mxu0 %v1982_v63  ;;  %905 = vmatmul.mubr.bf16.gmra.mrb[44].mxu1 %v1983_v0 }
  0x9a   :  { %784 = vmatprep.mubr.bf16.mxu0 %v1984_v1  ;;  %912 = vmatprep.mubr.bf16.mxu1 %v1986_v2 }
  0xa1   :  { %785 = vmatmul.mubr.bf16.gmra.mrb[48].mxu0 %v1988_v3  ;;  %913 = vmatmul.mubr.bf16.gmra.mrb[48].mxu1 %v1989_v4 }
  0xa2   :  { %792 = vmatprep.mubr.bf16.mxu0 %v1990_v5  ;;  %920 = vmatprep.mubr.bf16.mxu1 %v1992_v6 }
  0xa9   :  { %793 = vmatmul.mubr.bf16.gmra.mrb[52].mxu0 %v1994_v7  ;;  %921 = vmatmul.mubr.bf16.gmra.mrb[52].mxu1 %v1995_v8 }
  0xaa   :  { %800 = vmatprep.mubr.bf16.mxu0 %v1996_v9  ;;  %928 = vmatprep.mubr.bf16.mxu1 %v1998_v10 }
  0xb1   :  { %801 = vmatmul.mubr.bf16.gmra.mrb[56].mxu0 %v2000_v11  ;;  %929 = vmatmul.mubr.bf16.gmra.mrb[56].mxu1 %v2001_v12 }
  0xb2   :  { %808 = vmatprep.mubr.bf16.mxu0 %v2002_v13  ;;  %936 = vmatprep.mubr.bf16.mxu1 %v2004_v14 }
  0xb9   :  { %809 = vmatmul.mubr.bf16.gmra.mrb[60].mxu0 %v2006_v15  ;;  %937 = vmatmul.mubr.bf16.gmra.mrb[60].mxu1 %v2007_v16 }
 0x114   :  { %v690_v17 = vpop.f32.mrb[0].mxu0  ;;  %v818_v18 = vpop.f32.mrb[0].mxu1 }
 0x115   :  { %v692_v19 = vpop.f32.mrb[1].mxu0  ;;  %v820_v20 = vpop.f32.mrb[1].mxu1 }
 0x116   :  { %v693_v21 = vpop.f32.mrb[2].mxu0  ;;  %v821_v22 = vpop.f32.mrb[2].mxu1 }
 0x117   :  { %v1675_v23 = vpack.c.bf16 %v693_v21, %v690_v17  ;;  %v1755_v24 = vpack.c.bf16 %v821_v22, %v818_v18  ;;  %v695_v25 = vpop.f32.mrb[3].mxu0  ;;  %v823_v26 = vpop.f32.mrb[3].mxu1 }
 0x119   :  { %1676 = vst [vmem:[%s2394_s2] sm:$0xff] %v1675_v23   ;;  %1847 = vst [vmem:[%s2394_s2 + $0x80] sm:$0xff] %v1755_v24  }
 0x11c   :  { %v698_v27 = vpop.f32.mrb[4].mxu0  ;;  %v826_v28 = vpop.f32.mrb[4].mxu1 }
 0x11d   :  { %v700_v29 = vpop.f32.mrb[5].mxu0  ;;  %v828_v30 = vpop.f32.mrb[5].mxu1 }
 0x11e   :  { %v701_v31 = vpop.f32.mrb[6].mxu0  ;;  %v829_v32 = vpop.f32.mrb[6].mxu1 }
 0x11f   :  { %v1680_v33 = vpack.c.bf16 %v701_v31, %v698_v27  ;;  %v1760_v34 = vpack.c.bf16 %v829_v32, %v826_v28  ;;  %v703_v35 = vpop.f32.mrb[7].mxu0  ;;  %v831_v36 = vpop.f32.mrb[7].mxu1 }
 0x121   :  { %1832 = vst [vmem:[%s2394_s2 + $0x8] sm:$0xff] %v1680_v33   ;;  %1848 = vst [vmem:[%s2394_s2 + $0x88] sm:$0xff] %v1760_v34  }
 0x124   :  { %v706_v37 = vpop.f32.mrb[8].mxu0  ;;  %v834_v38 = vpop.f32.mrb[8].mxu1 }
 0x125   :  { %v708_v39 = vpop.f32.mrb[9].mxu0  ;;  %v836_v40 = vpop.f32.mrb[9].mxu1 }
 0x126   :  { %v709_v41 = vpop.f32.mrb[10].mxu0  ;;  %v837_v42 = vpop.f32.mrb[10].mxu1 }
 0x127   :  { %v1685_v43 = vpack.c.bf16 %v709_v41, %v706_v37  ;;  %v1765_v44 = vpack.c.bf16 %v837_v42, %v834_v38  ;;  %v711_v45 = vpop.f32.mrb[11].mxu0  ;;  %v839_v46 = vpop.f32.mrb[11].mxu1 }
 0x129   :  { %1833 = vst [vmem:[%s2394_s2 + $0x10] sm:$0xff] %v1685_v43   ;;  %1849 = vst [vmem:[%s2394_s2 + $0x90] sm:$0xff] %v1765_v44  }
 0x12c   :  { %v714_v47 = vpop.f32.mrb[12].mxu0  ;;  %v842_v48 = vpop.f32.mrb[12].mxu1 }
 0x12d   :  { %v716_v49 = vpop.f32.mrb[13].mxu0  ;;  %v844_v50 = vpop.f32.mrb[13].mxu1 }
 0x12e   :  { %v717_v51 = vpop.f32.mrb[14].mxu0  ;;  %v845_v52 = vpop.f32.mrb[14].mxu1 }
 0x12f   :  { %v1690_v53 = vpack.c.bf16 %v717_v51, %v714_v47  ;;  %v1770_v54 = vpack.c.bf16 %v845_v52, %v842_v48  ;;  %v719_v55 = vpop.f32.mrb[15].mxu0  ;;  %v847_v56 = vpop.f32.mrb[15].mxu1 }
 0x131   :  { %1834 = vst [vmem:[%s2394_s2 + $0x18] sm:$0xff] %v1690_v53   ;;  %1850 = vst [vmem:[%s2394_s2 + $0x98] sm:$0xff] %v1770_v54  }
 0x134   :  { %v722_v57 = vpop.f32.mrb[16].mxu0  ;;  %v850_v58 = vpop.f32.mrb[16].mxu1 }
 0x135   :  { %v724_v59 = vpop.f32.mrb[17].mxu0  ;;  %v852_v60 = vpop.f32.mrb[17].mxu1 }
 0x136   :  { %v725_v61 = vpop.f32.mrb[18].mxu0  ;;  %v853_v62 = vpop.f32.mrb[18].mxu1 }
 0x137   :  { %v1695_v63 = vpack.c.bf16 %v725_v61, %v722_v57  ;;  %v1775_v0 = vpack.c.bf16 %v853_v62, %v850_v58  ;;  %v727_v1 = vpop.f32.mrb[19].mxu0  ;;  %v855_v2 = vpop.f32.mrb[19].mxu1 }
 0x139   :  { %1835 = vst [vmem:[%s2394_s2 + $0x20] sm:$0xff] %v1695_v63   ;;  %1851 = vst [vmem:[%s2394_s2 + $0xa0] sm:$0xff] %v1775_v0  }
 0x13c   :  { %v730_v3 = vpop.f32.mrb[20].mxu0  ;;  %v858_v4 = vpop.f32.mrb[20].mxu1 }
 0x13d   :  { %v732_v5 = vpop.f32.mrb[21].mxu0  ;;  %v860_v6 = vpop.f32.mrb[21].mxu1 }
 0x13e   :  { %v733_v7 = vpop.f32.mrb[22].mxu0  ;;  %v861_v8 = vpop.f32.mrb[22].mxu1 }
 0x13f   :  { %v1700_v9 = vpack.c.bf16 %v733_v7, %v730_v3  ;;  %v1780_v10 = vpack.c.bf16 %v861_v8, %v858_v4  ;;  %v735_v11 = vpop.f32.mrb[23].mxu0  ;;  %v863_v12 = vpop.f32.mrb[23].mxu1 }
 0x141   :  { %1836 = vst [vmem:[%s2394_s2 + $0x28] sm:$0xff] %v1700_v9   ;;  %1852 = vst [vmem:[%s2394_s2 + $0xa8] sm:$0xff] %v1780_v10  }
 0x144   :  { %v738_v13 = vpop.f32.mrb[24].mxu0  ;;  %v866_v14 = vpop.f32.mrb[24].mxu1 }
 0x145   :  { %v740_v15 = vpop.f32.mrb[25].mxu0  ;;  %v868_v16 = vpop.f32.mrb[25].mxu1 }
 0x146   :  { %v741_v17 = vpop.f32.mrb[26].mxu0  ;;  %v869_v18 = vpop.f32.mrb[26].mxu1 }
 0x147   :  { %v1705_v19 = vpack.c.bf16 %v741_v17, %v738_v13  ;;  %v1785_v20 = vpack.c.bf16 %v869_v18, %v866_v14  ;;  %v743_v21 = vpop.f32.mrb[27].mxu0  ;;  %v871_v22 = vpop.f32.mrb[27].mxu1 }
 0x149   :  { %1837 = vst [vmem:[%s2394_s2 + $0x30] sm:$0xff] %v1705_v19   ;;  %1853 = vst [vmem:[%s2394_s2 + $0xb0] sm:$0xff] %v1785_v20  }
 0x14c   :  { %v746_v23 = vpop.f32.mrb[28].mxu0  ;;  %v874_v24 = vpop.f32.mrb[28].mxu1 }
 0x14d   :  { %v748_v25 = vpop.f32.mrb[29].mxu0  ;;  %v876_v26 = vpop.f32.mrb[29].mxu1 }
 0x14e   :  { %v749_v27 = vpop.f32.mrb[30].mxu0  ;;  %v877_v28 = vpop.f32.mrb[30].mxu1 }
 0x14f   :  { %v1710_v29 = vpack.c.bf16 %v749_v27, %v746_v23  ;;  %v1790_v30 = vpack.c.bf16 %v877_v28, %v874_v24  ;;  %v751_v31 = vpop.f32.mrb[31].mxu0  ;;  %v879_v32 = vpop.f32.mrb[31].mxu1 }
 0x151   :  { %1838 = vst [vmem:[%s2394_s2 + $0x38] sm:$0xff] %v1710_v29   ;;  %1854 = vst [vmem:[%s2394_s2 + $0xb8] sm:$0xff] %v1790_v30  }
 0x154   :  { %v754_v33 = vpop.f32.mrb[32].mxu0  ;;  %v882_v34 = vpop.f32.mrb[32].mxu1 }
 0x155   :  { %v756_v35 = vpop.f32.mrb[33].mxu0  ;;  %v884_v36 = vpop.f32.mrb[33].mxu1 }
 0x156   :  { %v757_v37 = vpop.f32.mrb[34].mxu0  ;;  %v885_v38 = vpop.f32.mrb[34].mxu1 }
 0x157   :  { %v1715_v39 = vpack.c.bf16 %v757_v37, %v754_v33  ;;  %v1795_v40 = vpack.c.bf16 %v885_v38, %v882_v34  ;;  %v759_v41 = vpop.f32.mrb[35].mxu0  ;;  %v887_v42 = vpop.f32.mrb[35].mxu1 }
 0x159   :  { %1839 = vst [vmem:[%s2394_s2 + $0x40] sm:$0xff] %v1715_v39   ;;  %1855 = vst [vmem:[%s2394_s2 + $0xc0] sm:$0xff] %v1795_v40  }
 0x15c   :  { %v762_v43 = vpop.f32.mrb[36].mxu0  ;;  %v890_v44 = vpop.f32.mrb[36].mxu1 }
 0x15d   :  { %v764_v45 = vpop.f32.mrb[37].mxu0  ;;  %v892_v46 = vpop.f32.mrb[37].mxu1 }
 0x15e   :  { %v765_v47 = vpop.f32.mrb[38].mxu0  ;;  %v893_v48 = vpop.f32.mrb[38].mxu1 }
 0x15f   :  { %v1720_v49 = vpack.c.bf16 %v765_v47, %v762_v43  ;;  %v1800_v50 = vpack.c.bf16 %v893_v48, %v890_v44  ;;  %v767_v51 = vpop.f32.mrb[39].mxu0  ;;  %v895_v52 = vpop.f32.mrb[39].mxu1 }
 0x161   :  { %1840 = vst [vmem:[%s2394_s2 + $0x48] sm:$0xff] %v1720_v49   ;;  %1856 = vst [vmem:[%s2394_s2 + $0xc8] sm:$0xff] %v1800_v50  }
 0x164   :  { %v770_v53 = vpop.f32.mrb[40].mxu0  ;;  %v898_v54 = vpop.f32.mrb[40].mxu1 }
 0x165   :  { %v772_v55 = vpop.f32.mrb[41].mxu0  ;;  %v900_v56 = vpop.f32.mrb[41].mxu1 }
 0x166   :  { %v773_v57 = vpop.f32.mrb[42].mxu0  ;;  %v901_v58 = vpop.f32.mrb[42].mxu1 }
 0x167   :  { %v1725_v59 = vpack.c.bf16 %v773_v57, %v770_v53  ;;  %v1805_v60 = vpack.c.bf16 %v901_v58, %v898_v54  ;;  %v775_v61 = vpop.f32.mrb[43].mxu0  ;;  %v903_v62 = vpop.f32.mrb[43].mxu1 }
 0x169   :  { %1841 = vst [vmem:[%s2394_s2 + $0x50] sm:$0xff] %v1725_v59   ;;  %1857 = vst [vmem:[%s2394_s2 + $0xd0] sm:$0xff] %v1805_v60  }
 0x16c   :  { %v778_v63 = vpop.f32.mrb[44].mxu0  ;;  %v906_v0 = vpop.f32.mrb[44].mxu1 }
 0x16d   :  { %v780_v1 = vpop.f32.mrb[45].mxu0  ;;  %v908_v2 = vpop.f32.mrb[45].mxu1 }
 0x16e   :  { %v781_v3 = vpop.f32.mrb[46].mxu0  ;;  %v909_v4 = vpop.f32.mrb[46].mxu1 }
 0x16f   :  { %v1730_v5 = vpack.c.bf16 %v781_v3, %v778_v63  ;;  %v1810_v6 = vpack.c.bf16 %v909_v4, %v906_v0  ;;  %v783_v7 = vpop.f32.mrb[47].mxu0  ;;  %v911_v8 = vpop.f32.mrb[47].mxu1 }
 0x171   :  { %1842 = vst [vmem:[%s2394_s2 + $0x58] sm:$0xff] %v1730_v5   ;;  %1858 = vst [vmem:[%s2394_s2 + $0xd8] sm:$0xff] %v1810_v6  }
 0x174   :  { %v786_v9 = vpop.f32.mrb[48].mxu0  ;;  %v914_v10 = vpop.f32.mrb[48].mxu1 }
 0x175   :  { %v788_v11 = vpop.f32.mrb[49].mxu0  ;;  %v916_v12 = vpop.f32.mrb[49].mxu1 }
 0x176   :  { %v789_v13 = vpop.f32.mrb[50].mxu0  ;;  %v917_v14 = vpop.f32.mrb[50].mxu1 }
 0x177   :  { %v1735_v15 = vpack.c.bf16 %v789_v13, %v786_v9  ;;  %v1815_v16 = vpack.c.bf16 %v917_v14, %v914_v10  ;;  %v791_v17 = vpop.f32.mrb[51].mxu0  ;;  %v919_v18 = vpop.f32.mrb[51].mxu1 }
 0x179   :  { %1843 = vst [vmem:[%s2394_s2 + $0x60] sm:$0xff] %v1735_v15   ;;  %1859 = vst [vmem:[%s2394_s2 + $0xe0] sm:$0xff] %v1815_v16  }
 0x17c   :  { %v794_v19 = vpop.f32.mrb[52].mxu0  ;;  %v922_v20 = vpop.f32.mrb[52].mxu1 }
 0x17d   :  { %v796_v21 = vpop.f32.mrb[53].mxu0  ;;  %v924_v22 = vpop.f32.mrb[53].mxu1 }
 0x17e   :  { %v797_v23 = vpop.f32.mrb[54].mxu0  ;;  %v925_v24 = vpop.f32.mrb[54].mxu1 }
 0x17f   :  { %v1740_v25 = vpack.c.bf16 %v797_v23, %v794_v19  ;;  %v1820_v26 = vpack.c.bf16 %v925_v24, %v922_v20  ;;  %v799_v27 = vpop.f32.mrb[55].mxu0  ;;  %v927_v28 = vpop.f32.mrb[55].mxu1 }
 0x181   :  { %1844 = vst [vmem:[%s2394_s2 + $0x68] sm:$0xff] %v1740_v25   ;;  %1860 = vst [vmem:[%s2394_s2 + $0xe8] sm:$0xff] %v1820_v26  }
 0x184   :  { %v802_v29 = vpop.f32.mrb[56].mxu0  ;;  %v930_v30 = vpop.f32.mrb[56].mxu1 }
 0x185   :  { %v804_v31 = vpop.f32.mrb[57].mxu0  ;;  %v932_v32 = vpop.f32.mrb[57].mxu1 }
 0x186   :  { %v805_v33 = vpop.f32.mrb[58].mxu0  ;;  %v933_v34 = vpop.f32.mrb[58].mxu1 }
 0x187   :  { %v1745_v35 = vpack.c.bf16 %v805_v33, %v802_v29  ;;  %v1825_v36 = vpack.c.bf16 %v933_v34, %v930_v30  ;;  %v807_v37 = vpop.f32.mrb[59].mxu0  ;;  %v935_v38 = vpop.f32.mrb[59].mxu1 }
 0x189   :  { %1845 = vst [vmem:[%s2394_s2 + $0x70] sm:$0xff] %v1745_v35   ;;  %1861 = vst [vmem:[%s2394_s2 + $0xf0] sm:$0xff] %v1825_v36  }
 0x18c   :  { %v810_v39 = vpop.f32.mrb[60].mxu0  ;;  %v938_v40 = vpop.f32.mrb[60].mxu1 }
 0x18d   :  { %v812_v41 = vpop.f32.mrb[61].mxu0  ;;  %v940_v42 = vpop.f32.mrb[61].mxu1 }
 0x18e   :  { %v813_v43 = vpop.f32.mrb[62].mxu0  ;;  %v941_v44 = vpop.f32.mrb[62].mxu1 }
 0x18f   :  { %v1750_v45 = vpack.c.bf16 %v813_v43, %v810_v39  ;;  %v1830_v46 = vpack.c.bf16 %v941_v44, %v938_v40  ;;  %v815_v47 = vpop.f32.mrb[63].mxu0  ;;  %v943_v48 = vpop.f32.mrb[63].mxu1 }
 0x191   :  { %1846 = vst [vmem:[%s2394_s2 + $0x78] sm:$0xff] %v1750_v45   ;;  %1862 = vst [vmem:[%s2394_s2 + $0xf8] sm:$0xff] %v1830_v46  }

// kernel: resnetv2_forward.40
= control target key start
LH: loop header
LB: loop body
LE: loop exit
PB: predicated region body
PF: predicated region fallthrough
CT: control target
= control target key end

     0   :  { %s781_s0 = inlined_call_operand.vmem [shape: bf16[9,104,128], index: 0, kind: input, shape index: {}]   ;;  %s782_s1 = inlined_call_operand.vmem [shape: bf16[104,128], index: 1, kind: output, shape index: {}]  }
   0x1   :  { %v8_v0 = vld [vmem:[%s781_s0] sm:$0xf]  ;;  %v9_v1 = vld [vmem:[%s781_s0 + $0x4] sm:$0xf]  ;;  %v254_v2 = vld [vmem:[%s781_s0 + $0x34] sm:$0xf] }
   0x2   :  { %v255_v3 = vld [vmem:[%s781_s0 + $0x38] sm:$0xf]  ;;  %v35_v4 = vmax.bf16 %v254_v2, %v8_v0  ;;  %v267_v5 = vld [vmem:[%s781_s0 + $0x68] sm:$0xf]  ;;  %v268_v6 = vld [vmem:[%s781_s0 + $0x6c] sm:$0xf] }
   0x3   :  { %v36_v7 = vmax.bf16 %v255_v3, %v9_v1  ;;  %v280_v8 = vld [vmem:[%s781_s0 + $0x9c] sm:$0xf]  ;;  %v281_v10 = vld [vmem:[%s781_s0 + $0xa0] sm:$0xf]  ;;  %v293_v12 = vld [vmem:[%s781_s0 + $0xd0] sm:$0xf] }
   0x4   :  { %v62_v9 = vmax.bf16 %v267_v5, %v35_v4  ;;  %v294_v14 = vld [vmem:[%s781_s0 + $0xd4] sm:$0xf]  ;;  %v306_v15 = vld [vmem:[%s781_s0 + $0x104] sm:$0xf]  ;;  %v307_v16 = vld [vmem:[%s781_s0 + $0x108] sm:$0xf] }
   0x5   :  { %v63_v11 = vmax.bf16 %v268_v6, %v36_v7  ;;  %v10_v18 = vld [vmem:[%s781_s0 + $0x8] sm:$0xf]  ;;  %v11_v19 = vld [vmem:[%s781_s0 + $0xc] sm:$0xf]  ;;  %v256_v20 = vld [vmem:[%s781_s0 + $0x3c] sm:$0xf] }
   0x6   :  { %v89_v13 = vmax.bf16 %v280_v8, %v62_v9  ;;  %v257_v22 = vld [vmem:[%s781_s0 + $0x40] sm:$0xf]  ;;  %v37_v23 = vmax.bf16 %v256_v20, %v10_v18  ;;  %v269_v24 = vld [vmem:[%s781_s0 + $0x70] sm:$0xf]  ;;  %v270_v25 = vld [vmem:[%s781_s0 + $0x74] sm:$0xf] }
   0x7   :  { %v90_v17 = vmax.bf16 %v281_v10, %v63_v11  ;;  %v319_v27 = vld [vmem:[%s781_s0 + $0x138] sm:$0xf]  ;;  %v38_v28 = vmax.bf16 %v257_v22, %v11_v19  ;;  %v282_v29 = vld [vmem:[%s781_s0 + $0xa4] sm:$0xf]  ;;  %v320_v31 = vld [vmem:[%s781_s0 + $0x13c] sm:$0xf] }
   0x8   :  { %v116_v21 = vmax.bf16 %v293_v12, %v89_v13  ;;  %v332_v32 = vld [vmem:[%s781_s0 + $0x16c] sm:$0xf]  ;;  %v64_v33 = vmax.bf16 %v269_v24, %v37_v23  ;;  %v283_v34 = vld [vmem:[%s781_s0 + $0xa8] sm:$0xf]  ;;  %v333_v36 = vld [vmem:[%s781_s0 + $0x170] sm:$0xf] }
   0x9   :  { %v117_v26 = vmax.bf16 %v294_v14, %v90_v17  ;;  %v345_v37 = vld [vmem:[%s781_s0 + $0x1a0] sm:$0xf]  ;;  %v65_v38 = vmax.bf16 %v270_v25, %v38_v28  ;;  %v295_v39 = vld [vmem:[%s781_s0 + $0xd8] sm:$0xf]  ;;  %v346_v41 = vld [vmem:[%s781_s0 + $0x1a4] sm:$0xf] }
   0xa   :  { %v143_v30 = vmax.bf16 %v306_v15, %v116_v21  ;;  %v91_v42 = vmax.bf16 %v282_v29, %v64_v33  ;;  %v296_v43 = vld [vmem:[%s781_s0 + $0xdc] sm:$0xf]  ;;  %v308_v44 = vld [vmem:[%s781_s0 + $0x10c] sm:$0xf]  ;;  %v309_v45 = vld [vmem:[%s781_s0 + $0x110] sm:$0xf] }
   0xb   :  { %v144_v35 = vmax.bf16 %v307_v16, %v117_v26  ;;  %v92_v47 = vmax.bf16 %v283_v34, %v65_v38  ;;  %v12_v48 = vld [vmem:[%s781_s0 + $0x10] sm:$0xf]  ;;  %v13_v49 = vld [vmem:[%s781_s0 + $0x14] sm:$0xf]  ;;  %v258_v50 = vld [vmem:[%s781_s0 + $0x44] sm:$0xf] }
   0xc   :  { %v170_v40 = vmax.bf16 %v319_v27, %v143_v30  ;;  %v118_v52 = vmax.bf16 %v295_v39, %v91_v42  ;;  %v259_v53 = vld [vmem:[%s781_s0 + $0x48] sm:$0xf]  ;;  %v39_v54 = vmax.bf16 %v258_v50, %v12_v48  ;;  %v271_v55 = vld [vmem:[%s781_s0 + $0x78] sm:$0xf]  ;;  %v272_v56 = vld [vmem:[%s781_s0 + $0x7c] sm:$0xf] }
   0xd   :  { %v171_v46 = vmax.bf16 %v320_v31, %v144_v35  ;;  %v119_v58 = vmax.bf16 %v296_v43, %v92_v47  ;;  %v321_v59 = vld [vmem:[%s781_s0 + $0x140] sm:$0xf]  ;;  %v40_v60 = vmax.bf16 %v259_v53, %v13_v49  ;;  %v284_v61 = vld [vmem:[%s781_s0 + $0xac] sm:$0xf]  ;;  %v322_v0 = vld [vmem:[%s781_s0 + $0x144] sm:$0xf] }
   0xe   :  { %v197_v51 = vmax.bf16 %v332_v32, %v170_v40  ;;  %v145_v63 = vmax.bf16 %v308_v44, %v118_v52  ;;  %v334_v1 = vld [vmem:[%s781_s0 + $0x174] sm:$0xf]  ;;  %v66_v2 = vmax.bf16 %v271_v55, %v39_v54  ;;  %v285_v3 = vld [vmem:[%s781_s0 + $0xb0] sm:$0xf]  ;;  %v335_v6 = vld [vmem:[%s781_s0 + $0x178] sm:$0xf] }
   0xf   :  { %v198_v57 = vmax.bf16 %v333_v36, %v171_v46  ;;  %v146_v5 = vmax.bf16 %v309_v45, %v119_v58  ;;  %v347_v7 = vld [vmem:[%s781_s0 + $0x1a8] sm:$0xf]  ;;  %v67_v8 = vmax.bf16 %v272_v56, %v40_v60  ;;  %v297_v9 = vld [vmem:[%s781_s0 + $0xe0] sm:$0xf]  ;;  %v348_v11 = vld [vmem:[%s781_s0 + $0x1ac] sm:$0xf] }
  0x10   :  { %v224_v62 = vmax.bf16 %v345_v37, %v197_v51  ;;  %v172_v10 = vmax.bf16 %v321_v59, %v145_v63  ;;  %v93_v12 = vmax.bf16 %v284_v61, %v66_v2  ;;  %v298_v13 = vld [vmem:[%s781_s0 + $0xe4] sm:$0xf]  ;;  %v310_v14 = vld [vmem:[%s781_s0 + $0x114] sm:$0xf]  ;;  %v311_v15 = vld [vmem:[%s781_s0 + $0x118] sm:$0xf] }
  0x11   :  { %v225_v4 = vmax.bf16 %v346_v41, %v198_v57  ;;  %v173_v17 = vmax.bf16 %v322_v0, %v146_v5  ;;  %v94_v18 = vmax.bf16 %v285_v3, %v67_v8  ;;  %v14_v19 = vld [vmem:[%s781_s0 + $0x18] sm:$0xf]  ;;  %v15_v20 = vld [vmem:[%s781_s0 + $0x1c] sm:$0xf]  ;;  %v260_v21 = vld [vmem:[%s781_s0 + $0x4c] sm:$0xf] }
  0x12   :  { %v199_v22 = vmax.bf16 %v334_v1, %v172_v10  ;;  %v120_v23 = vmax.bf16 %v297_v9, %v93_v12  ;;  %v261_v24 = vld [vmem:[%s781_s0 + $0x50] sm:$0xf]  ;;  %v41_v25 = vmax.bf16 %v260_v21, %v14_v19  ;;  %v273_v26 = vld [vmem:[%s781_s0 + $0x80] sm:$0xf]  ;;  %v274_v27 = vld [vmem:[%s781_s0 + $0x84] sm:$0xf] }
  0x13   :  { %v388_v16 = vcombine.low %v224_v62, %v225_v4  ;;  %v200_v28 = vmax.bf16 %v335_v6, %v173_v17  ;;  %v121_v29 = vmax.bf16 %v298_v13, %v94_v18  ;;  %v323_v30 = vld [vmem:[%s781_s0 + $0x148] sm:$0xf]  ;;  %v42_v31 = vmax.bf16 %v261_v24, %v15_v20  ;;  %v286_v32 = vld [vmem:[%s781_s0 + $0xb4] sm:$0xf]  ;;  %v324_v35 = vld [vmem:[%s781_s0 + $0x14c] sm:$0xf] }
  0x14   :  { %v226_v33 = vmax.bf16 %v347_v7, %v199_v22  ;;  %v147_v34 = vmax.bf16 %v310_v14, %v120_v23  ;;  %v336_v36 = vld [vmem:[%s781_s0 + $0x17c] sm:$0xf]  ;;  %v68_v37 = vmax.bf16 %v273_v26, %v41_v25  ;;  %v287_v38 = vld [vmem:[%s781_s0 + $0xb8] sm:$0xf]  ;;  %v337_v41 = vld [vmem:[%s781_s0 + $0x180] sm:$0xf] }
  0x15   :  { %362 = vst [vmem:[%s782_s1] sm:$0xff] %v388_v16   ;;  %v227_v39 = vmax.bf16 %v348_v11, %v200_v28  ;;  %v148_v40 = vmax.bf16 %v311_v15, %v121_v29  ;;  %v349_v42 = vld [vmem:[%s781_s0 + $0x1b0] sm:$0xf]  ;;  %v69_v43 = vmax.bf16 %v274_v27, %v42_v31  ;;  %v299_v44 = vld [vmem:[%s781_s0 + $0xe8] sm:$0xf]  ;;  %v350_v46 = vld [vmem:[%s781_s0 + $0x1b4] sm:$0xf] }
  0x16   :  { %v174_v45 = vmax.bf16 %v323_v30, %v147_v34  ;;  %v95_v47 = vmax.bf16 %v286_v32, %v68_v37  ;;  %v300_v48 = vld [vmem:[%s781_s0 + $0xec] sm:$0xf]  ;;  %v312_v49 = vld [vmem:[%s781_s0 + $0x11c] sm:$0xf]  ;;  %v313_v50 = vld [vmem:[%s781_s0 + $0x120] sm:$0xf] }
  0x17   :  { %v389_v51 = vcombine.low %v226_v33, %v227_v39  ;;  %v175_v52 = vmax.bf16 %v324_v35, %v148_v40  ;;  %v96_v53 = vmax.bf16 %v287_v38, %v69_v43  ;;  %v16_v54 = vld [vmem:[%s781_s0 + $0x20] sm:$0xf]  ;;  %v17_v55 = vld [vmem:[%s781_s0 + $0x24] sm:$0xf]  ;;  %v262_v56 = vld [vmem:[%s781_s0 + $0x54] sm:$0xf] }
  0x18   :  { %v201_v57 = vmax.bf16 %v336_v36, %v174_v45  ;;  %v122_v58 = vmax.bf16 %v299_v44, %v95_v47  ;;  %v263_v59 = vld [vmem:[%s781_s0 + $0x58] sm:$0xf]  ;;  %v43_v60 = vmax.bf16 %v262_v56, %v16_v54  ;;  %v275_v61 = vld [vmem:[%s781_s0 + $0x88] sm:$0xf]  ;;  %v276_v62 = vld [vmem:[%s781_s0 + $0x8c] sm:$0xf] }
  0x19   :  { %390 = vst [vmem:[%s782_s1 + $0x8] sm:$0xff] %v389_v51   ;;  %v202_v63 = vmax.bf16 %v337_v41, %v175_v52  ;;  %v123_v0 = vmax.bf16 %v300_v48, %v96_v53  ;;  %v325_v1 = vld [vmem:[%s781_s0 + $0x150] sm:$0xf]  ;;  %v44_v2 = vmax.bf16 %v263_v59, %v17_v55  ;;  %v288_v3 = vld [vmem:[%s781_s0 + $0xbc] sm:$0xf] }
  0x1a   :  { %v228_v4 = vmax.bf16 %v349_v42, %v201_v57  ;;  %v149_v5 = vmax.bf16 %v312_v49, %v122_v58  ;;  %v326_v6 = vld [vmem:[%s781_s0 + $0x154] sm:$0xf]  ;;  %v338_v7 = vld [vmem:[%s781_s0 + $0x184] sm:$0xf]  ;;  %v70_v8 = vmax.bf16 %v275_v61, %v43_v60  ;;  %v289_v9 = vld [vmem:[%s781_s0 + $0xc0] sm:$0xf] }
  0x1b   :  { %v229_v10 = vmax.bf16 %v350_v46, %v202_v63  ;;  %v150_v11 = vmax.bf16 %v313_v50, %v123_v0  ;;  %v339_v12 = vld [vmem:[%s781_s0 + $0x188] sm:$0xf]  ;;  %v351_v13 = vld [vmem:[%s781_s0 + $0x1b8] sm:$0xf]  ;;  %v71_v14 = vmax.bf16 %v276_v62, %v44_v2  ;;  %v301_v15 = vld [vmem:[%s781_s0 + $0xf0] sm:$0xf] }
  0x1c   :  { %v176_v16 = vmax.bf16 %v325_v1, %v149_v5  ;;  %v352_v17 = vld [vmem:[%s781_s0 + $0x1bc] sm:$0xf]  ;;  %v97_v18 = vmax.bf16 %v288_v3, %v70_v8  ;;  %v302_v19 = vld [vmem:[%s781_s0 + $0xf4] sm:$0xf]  ;;  %v314_v20 = vld [vmem:[%s781_s0 + $0x124] sm:$0xf] }
  0x1d   :  { %v315_v21 = vld [vmem:[%s781_s0 + $0x128] sm:$0xf]  ;;  %v391_v22 = vcombine.low %v228_v4, %v229_v10  ;;  %v177_v23 = vmax.bf16 %v326_v6, %v150_v11  ;;  %v98_v24 = vmax.bf16 %v289_v9, %v71_v14  ;;  %v19_v26 = vld [vmem:[%s781_s0 + $0x2c] sm:$0xf]  ;;  %v264_v27 = vld [vmem:[%s781_s0 + $0x5c] sm:$0xf] }
  0x1e   :  { %v18_v25 = vld [vmem:[%s781_s0 + $0x28] sm:$0xf]  ;;  %v203_v28 = vmax.bf16 %v338_v7, %v176_v16  ;;  %v124_v29 = vmax.bf16 %v301_v15, %v97_v18  ;;  %v265_v30 = vld [vmem:[%s781_s0 + $0x60] sm:$0xf]  ;;  %v277_v32 = vld [vmem:[%s781_s0 + $0x90] sm:$0xf] }
  0x1f   :  { %v45_v31 = vmax.bf16 %v264_v27, %v18_v25  ;;  %v278_v33 = vld [vmem:[%s781_s0 + $0x94] sm:$0xf]  ;;  %392 = vst [vmem:[%s782_s1 + $0x10] sm:$0xff] %v391_v22   ;;  %v204_v34 = vmax.bf16 %v339_v12, %v177_v23  ;;  %v125_v35 = vmax.bf16 %v302_v19, %v98_v24  ;;  %v327_v36 = vld [vmem:[%s781_s0 + $0x158] sm:$0xf]  ;;  %v46_v37 = vmax.bf16 %v265_v30, %v19_v26 }
  0x20   :  { %v290_v38 = vld [vmem:[%s781_s0 + $0xc4] sm:$0xf]  ;;  %v230_v39 = vmax.bf16 %v351_v13, %v203_v28  ;;  %v151_v40 = vmax.bf16 %v314_v20, %v124_v29  ;;  %v328_v41 = vld [vmem:[%s781_s0 + $0x15c] sm:$0xf]  ;;  %v291_v43 = vld [vmem:[%s781_s0 + $0xc8] sm:$0xf] }
  0x21   :  { %v72_v42 = vmax.bf16 %v277_v32, %v45_v31  ;;  %v231_v44 = vmax.bf16 %v352_v17, %v204_v34  ;;  %v152_v45 = vmax.bf16 %v315_v21, %v125_v35  ;;  %v340_v46 = vld [vmem:[%s781_s0 + $0x18c] sm:$0xf]  ;;  %v341_v47 = vld [vmem:[%s781_s0 + $0x190] sm:$0xf]  ;;  %v73_v48 = vmax.bf16 %v278_v33, %v46_v37  ;;  %v303_v49 = vld [vmem:[%s781_s0 + $0xf8] sm:$0xf] }
  0x22   :  { %v178_v50 = vmax.bf16 %v327_v36, %v151_v40  ;;  %v353_v51 = vld [vmem:[%s781_s0 + $0x1c0] sm:$0xf]  ;;  %v304_v53 = vld [vmem:[%s781_s0 + $0xfc] sm:$0xf]  ;;  %v316_v54 = vld [vmem:[%s781_s0 + $0x12c] sm:$0xf] }
  0x23   :  { %v99_v52 = vmax.bf16 %v290_v38, %v72_v42  ;;  %v393_v55 = vcombine.low %v230_v39, %v231_v44  ;;  %v179_v56 = vmax.bf16 %v328_v41, %v152_v45  ;;  %v100_v57 = vmax.bf16 %v291_v43, %v73_v48  ;;  %v20_v58 = vld [vmem:[%s781_s0 + $0x30] sm:$0xf]  ;;  %v266_v59 = vld [vmem:[%s781_s0 + $0x64] sm:$0xf]  ;;  %v279_v60 = vld [vmem:[%s781_s0 + $0x98] sm:$0xf] }
  0x24   :  { %v205_v61 = vmax.bf16 %v340_v46, %v178_v50  ;;  %v354_v62 = vld [vmem:[%s781_s0 + $0x1c4] sm:$0xf]  ;;  %v317_v0 = vld [vmem:[%s781_s0 + $0x130] sm:$0xf]  ;;  %v47_v1 = vmax.bf16 %v266_v59, %v20_v58  ;;  %v329_v4 = vld [vmem:[%s781_s0 + $0x160] sm:$0xf] }
  0x25   :  { %v126_v63 = vmax.bf16 %v303_v49, %v99_v52  ;;  %394 = vst [vmem:[%s782_s1 + $0x18] sm:$0xff] %v393_v55   ;;  %v206_v2 = vmax.bf16 %v341_v47, %v179_v56  ;;  %v127_v3 = vmax.bf16 %v304_v53, %v100_v57  ;;  %v292_v5 = vld [vmem:[%s781_s0 + $0xcc] sm:$0xf]  ;;  %v330_v8 = vld [vmem:[%s781_s0 + $0x164] sm:$0xf] }
  0x26   :  { %v232_v6 = vmax.bf16 %v353_v51, %v205_v61  ;;  %v74_v9 = vmax.bf16 %v279_v60, %v47_v1  ;;  %v342_v12 = vld [vmem:[%s781_s0 + $0x194] sm:$0xf]  ;;  %v305_v13 = vld [vmem:[%s781_s0 + $0x100] sm:$0xf]  ;;  %v343_v15 = vld [vmem:[%s781_s0 + $0x198] sm:$0xf] }
  0x27   :  { %v153_v7 = vmax.bf16 %v316_v54, %v126_v63  ;;  %v233_v10 = vmax.bf16 %v354_v62, %v206_v2  ;;  %v154_v11 = vmax.bf16 %v317_v0, %v127_v3  ;;  %v355_v19 = vld [vmem:[%s781_s0 + $0x1c8] sm:$0xf]  ;;  %v318_v20 = vld [vmem:[%s781_s0 + $0x134] sm:$0xf]  ;;  %v356_v22 = vld [vmem:[%s781_s0 + $0x1cc] sm:$0xf] }
  0x28   :  { %v101_v16 = vmax.bf16 %v292_v5, %v74_v9  ;;  %v331_v25 = vld [vmem:[%s781_s0 + $0x168] sm:$0xf]  ;;  %v344_v29 = vld [vmem:[%s781_s0 + $0x19c] sm:$0xf]  ;;  %v357_v32 = vld [vmem:[%s781_s0 + $0x1d0] sm:$0xf] }
  0x29   :  { %v180_v14 = vmax.bf16 %v329_v4, %v153_v7  ;;  %v395_v17 = vcombine.low %v232_v6, %v233_v10  ;;  %v181_v18 = vmax.bf16 %v330_v8, %v154_v11 }
  0x2a   :  { %v128_v23 = vmax.bf16 %v305_v13, %v101_v16 }
  0x2b   :  { %v207_v21 = vmax.bf16 %v342_v12, %v180_v14  ;;  %396 = vst [vmem:[%s782_s1 + $0x20] sm:$0xff] %v395_v17   ;;  %v208_v24 = vmax.bf16 %v343_v15, %v181_v18 }
  0x2c   :  { %v155_v27 = vmax.bf16 %v318_v20, %v128_v23 }
  0x2d   :  { %v234_v26 = vmax.bf16 %v355_v19, %v207_v21  ;;  %v235_v28 = vmax.bf16 %v356_v22, %v208_v24 }
  0x2e   :  { %v182_v30 = vmax.bf16 %v331_v25, %v155_v27 }
  0x2f   :  { %v397_v31 = vcombine.low %v234_v26, %v235_v28 }
  0x30   :  { %v209_v33 = vmax.bf16 %v344_v29, %v182_v30 }
  0x31   :  { %398 = vst [vmem:[%s782_s1 + $0x28] sm:$0xff] %v397_v31  }
  0x32   :  { %v236_v34 = vmax.bf16 %v357_v32, %v209_v33 }
  0x34   :  { %249 = vst [vmem:[%s782_s1 + $0x30] sm:$0xf] %v236_v34 }

// kernel: resnetv2_forward.41
= control target key start
LH: loop header
LB: loop body
LE: loop exit
PB: predicated region body
PF: predicated region fallthrough
CT: control target
= control target key end

     0   :  { %v548_v0 = vmov 0.0   ;;  %vm549_vm0 = vmmov 0   ;;  %s638_s1 = inlined_call_operand.vmem [shape: bf16[128,128], index: 1, kind: input, shape index: {}]   ;;  %s639_s0 = inlined_call_operand.vmem [shape: bf16[112,128], index: 0, kind: input, shape index: {}]   ;;  %s640_s2 = inlined_call_operand.vmem [shape: bf16[112,128], index: 2, kind: output, shape index: {}]  }
   0x1   :  { %471 = vmatprep.subr.bf16.mxu0 %v548_v0  ;;  %v533_v1 = vld [vmem:[%s638_s1] sm:$0xff]   ;;  %515 = vmatprep.subr.bf16.mxu1 %v548_v0  ;;  %v534_v2 = vld [vmem:[%s638_s1 + $0x8] sm:$0xff]   ;;  %v535_v3 = vld [vmem:[%s638_s1 + $0x10] sm:$0xff]  }
   0x2   :  { %487 = vmatprep.mubr.msk.bf16.mxu0 %vm549_vm0, %v548_v0  ;;  %503 = vmatprep.mubr.msk.bf16.mxu1 %vm549_vm0, %v548_v0  ;;  %v536_v4 = vld [vmem:[%s638_s1 + $0x18] sm:$0xff]   ;;  %v537_v5 = vld [vmem:[%s638_s1 + $0x20] sm:$0xff]   ;;  %v538_v6 = vld [vmem:[%s638_s1 + $0x28] sm:$0xff]  }
   0x3   :  { %472 = vmatpush3.bf16.msra.mxu0 %v533_v1  ;;  %523 = vmatpush3.bf16.msra.mxu1 %v533_v1  ;;  %v539_v7 = vld [vmem:[%s638_s1 + $0x30] sm:$0xff]   ;;  %v540_v8 = vld [vmem:[%s638_s1 + $0x38] sm:$0xff]   ;;  %v541_v9 = vld [vmem:[%s639_s0] sm:$0xff]  }
   0x4   :  { %473 = vmatprep.subr.bf16.mxu0 %v548_v0  ;;  %516 = vmatprep.subr.bf16.mxu1 %v548_v0  ;;  %v542_v10 = vld [vmem:[%s639_s0 + $0x20] sm:$0xff]   ;;  %v543_v11 = vld [vmem:[%s639_s0 + $0x8] sm:$0xff]   ;;  %v545_v13 = vld [vmem:[%s639_s0 + $0x10] sm:$0xff]  }
   0x5   :  { %v544_v12 = vld [vmem:[%s639_s0 + $0x28] sm:$0xff]   ;;  %v546_v14 = vld [vmem:[%s639_s0 + $0x30] sm:$0xff]   ;;  %v547_v15 = vld [vmem:[%s639_s0 + $0x18] sm:$0xff]  }
   0x7   :  { %474 = vmatpush3.bf16.msra.mxu0 %v534_v2  ;;  %524 = vmatpush3.bf16.msra.mxu1 %v534_v2 }
   0x8   :  { %475 = vmatprep.subr.bf16.mxu0 %v548_v0  ;;  %517 = vmatprep.subr.bf16.mxu1 %v548_v0 }
   0xb   :  { %476 = vmatpush3.bf16.msra.mxu0 %v535_v3  ;;  %525 = vmatpush3.bf16.msra.mxu1 %v535_v3 }
   0xc   :  { %477 = vmatprep.subr.bf16.mxu0 %v548_v0  ;;  %518 = vmatprep.subr.bf16.mxu1 %v548_v0 }
   0xf   :  { %478 = vmatpush3.bf16.msra.mxu0 %v536_v4  ;;  %526 = vmatpush3.bf16.msra.mxu1 %v536_v4 }
  0x10   :  { %479 = vmatprep.subr.bf16.mxu0 %v548_v0  ;;  %519 = vmatprep.subr.bf16.mxu1 %v548_v0 }
  0x13   :  { %480 = vmatpush3.bf16.msra.mxu0 %v537_v5  ;;  %527 = vmatpush3.bf16.msra.mxu1 %v537_v5 }
  0x14   :  { %481 = vmatprep.subr.bf16.mxu0 %v548_v0  ;;  %520 = vmatprep.subr.bf16.mxu1 %v548_v0 }
  0x17   :  { %482 = vmatpush3.bf16.msra.mxu0 %v538_v6  ;;  %528 = vmatpush3.bf16.msra.mxu1 %v538_v6 }
  0x18   :  { %483 = vmatprep.subr.bf16.mxu0 %v548_v0  ;;  %521 = vmatprep.subr.bf16.mxu1 %v548_v0 }
  0x1b   :  { %484 = vmatpush3.bf16.msra.mxu0 %v539_v7  ;;  %529 = vmatpush3.bf16.msra.mxu1 %v539_v7 }
  0x1c   :  { %485 = vmatprep.subr.bf16.mxu0 %v548_v0  ;;  %522 = vmatprep.subr.bf16.mxu1 %v548_v0 }
  0x1f   :  { %486 = vmatpush3.bf16.msra.mxu0 %v540_v8  ;;  %530 = vmatpush3.bf16.msra.mxu1 %v540_v8 }
  0x22   :  { %488 = vmatmul.mubr.bf16.vlgmr.msra.gmra.mrb[0].mxu0 %v541_v9  ;;  %504 = vmatmul.mubr.bf16.vlgmr.msra.gmra.mrb[0].mxu1 %v542_v10 }
  0x23   :  { %491 = vmatprep.mubr.msk.bf16.mxu0 %vm549_vm0, %v548_v0  ;;  %507 = vmatprep.mubr.msk.bf16.mxu1 %vm549_vm0, %v548_v0 }
  0x2a   :  { %492 = vmatmul.mubr.bf16.gmra.mrb[4].mxu0 %v543_v11  ;;  %508 = vmatmul.mubr.bf16.gmra.mrb[4].mxu1 %v544_v12 }
  0x2b   :  { %495 = vmatprep.mubr.msk.bf16.mxu0 %vm549_vm0, %v548_v0  ;;  %511 = vmatprep.mubr.msk.bf16.mxu1 %vm549_vm0, %v548_v0 }
  0x32   :  { %496 = vmatmul.mubr.bf16.gmra.mrb[8].mxu0 %v545_v13  ;;  %512 = vmatmul.mubr.bf16.gmra.mrb[8].mxu1 %v546_v14 }
  0x33   :  { %499 = vmatprep.mubr.msk.bf16.mxu0 %vm549_vm0, %v548_v0 }
  0x3a   :  { %500 = vmatmul.mubr.bf16.gmra.mrb[12].mxu0 %v547_v15 }
  0xf5   :  { %v198_v16 = vpop.f32.mrb[0].mxu0  ;;  %v230_v17 = vpop.f32.mrb[0].mxu1 }
  0xf6   :  { %v489_v18 = vpop.f32.mrb[1].mxu0  ;;  %v505_v19 = vpop.f32.mrb[1].mxu1 }
  0xf7   :  { %v201_v20 = vpop.f32.mrb[2].mxu0  ;;  %v233_v21 = vpop.f32.mrb[2].mxu1 }
  0xf8   :  { %v418_v22 = vpack.c.bf16 %v201_v20, %v198_v16  ;;  %v490_v23 = vpop.f32.mrb[3].mxu0  ;;  %v438_v24 = vpack.c.bf16 %v233_v21, %v230_v17  ;;  %v506_v25 = vpop.f32.mrb[3].mxu1 }
  0xfa   :  { %419 = vst [vmem:[%s640_s2] sm:$0xff] %v418_v22   ;;  %453 = vst [vmem:[%s640_s2 + $0x20] sm:$0xff] %v438_v24  }
  0xfd   :  { %v206_v26 = vpop.f32.mrb[4].mxu0  ;;  %v238_v27 = vpop.f32.mrb[4].mxu1 }
  0xfe   :  { %v493_v28 = vpop.f32.mrb[5].mxu0  ;;  %v509_v29 = vpop.f32.mrb[5].mxu1 }
  0xff   :  { %v209_v30 = vpop.f32.mrb[6].mxu0  ;;  %v241_v31 = vpop.f32.mrb[6].mxu1 }
 0x100   :  { %v423_v32 = vpack.c.bf16 %v209_v30, %v206_v26  ;;  %v494_v33 = vpop.f32.mrb[7].mxu0  ;;  %v443_v34 = vpack.c.bf16 %v241_v31, %v238_v27  ;;  %v510_v35 = vpop.f32.mrb[7].mxu1 }
 0x102   :  { %450 = vst [vmem:[%s640_s2 + $0x8] sm:$0xff] %v423_v32   ;;  %454 = vst [vmem:[%s640_s2 + $0x28] sm:$0xff] %v443_v34  }
 0x105   :  { %v214_v36 = vpop.f32.mrb[8].mxu0  ;;  %v246_v37 = vpop.f32.mrb[8].mxu1 }
 0x106   :  { %v497_v38 = vpop.f32.mrb[9].mxu0  ;;  %v513_v39 = vpop.f32.mrb[9].mxu1 }
 0x107   :  { %v217_v40 = vpop.f32.mrb[10].mxu0  ;;  %v249_v41 = vpop.f32.mrb[10].mxu1 }
 0x108   :  { %v428_v42 = vpack.c.bf16 %v217_v40, %v214_v36  ;;  %v498_v43 = vpop.f32.mrb[11].mxu0  ;;  %v448_v44 = vpack.c.bf16 %v249_v41, %v246_v37  ;;  %v514_v45 = vpop.f32.mrb[11].mxu1 }
 0x10a   :  { %451 = vst [vmem:[%s640_s2 + $0x10] sm:$0xff] %v428_v42   ;;  %455 = vst [vmem:[%s640_s2 + $0x30] sm:$0xff] %v448_v44  }
 0x10d   :  { %v222_v46 = vpop.f32.mrb[12].mxu0 }
 0x10e   :  { %v501_v47 = vpop.f32.mrb[13].mxu0 }
 0x10f   :  { %v225_v48 = vpop.f32.mrb[14].mxu0 }
 0x110   :  { %v433_v49 = vpack.c.bf16 %v225_v48, %v222_v46  ;;  %v502_v50 = vpop.f32.mrb[15].mxu0 }
 0x112   :  { %452 = vst [vmem:[%s640_s2 + $0x18] sm:$0xff] %v433_v49  }

// kernel: resnetv2_forward.42
= control target key start
LH: loop header
LB: loop body
LE: loop exit
PB: predicated region body
PF: predicated region fallthrough
CT: control target
= control target key end

     0   :  { %s408_s9 = smov 0   ;;  %s410_s10 = smov 0   ;;  %s454_s0 = inlined_call_operand.vmem [shape: bf16[2,56,128], index: 0, kind: input, shape index: {}]   ;;  %s455_s1 = inlined_call_operand.vmem [shape: f32[2,1,128], index: 1, kind: output, shape index: {0}]   ;;  %s456_s2 = inlined_call_operand.vmem [shape: f32[2,1,128], index: 2, kind: output, shape index: {1}]  }
   0x1   :  { %s412_s11 = smov 0  }
   0x2 LB: > { %s25_s12 = sadd.s32 1, %s386_s10  ;;  %p324_p0 = scmp.ge.s32.totalorder %s390_s11, 1  ;;  %s390_s11 = sphi %s412_s11, %s13_s11   ;;  %s386_s10 = sphi %s410_s10, %s458_s10   ;;  %s382_s9 = sphi %s408_s9, %s457_s9  }
   0x3   : > { %p27_p1 = scmp.ge.s32.totalorder %s25_s12, 2  ;;  %p134_p2 = scmp.lt.s32.totalorder %s390_s11, 3 }
   0x5   : > { %s460_s12 = smov (%p27_p1, %s25_s12), 0  ;;  %p135_p3 = pnand %p324_p0, %p134_p2 }
   0x6   : > { %p162_p4 = scmp.lt.s32.totalorder (!%p135_p3), %s382_s9, 1  ;;  %v392_v0 = vmov (!%p135_p3), 0.0  }
   0x7   : > { %138 = sbr.rel (%p135_p3) target bundleno = 50 (0x32), region = 24 }
   0xe   : > { %s462_s9 = smov (!%p162_p4, %s382_s9), 1 }
   0xf   : > { %s342_s13 = smul.u32 28, %s462_s9  ;;  %s429_s16 = scalar_lea.vmem %s455_s1, %s462_s9 }
  0x10   : > { %181 = vst [vmem:[%s429_s16] sm:$0x1] %v392_v0  ;;  %s435_s19 = scalar_lea.vmem %s456_s2, %s462_s9 }
  0x11   : > { %s169_s22 = scalar_lea.vmem %s454_s0, %s342_s13  ;;  %182 = vst [vmem:[%s435_s19] sm:$0x1] %v392_v0 }
  0x12   : > { %v329_v1 = vld [vmem:[%s169_s22] sm:$0xff]   ;;  %v340_v2 = vld [vmem:[%s169_s22 + $0x8] sm:$0xff]   ;;  %v341_v3 = vld [vmem:[%s169_s22 + $0x10] sm:$0xff]  }
  0x13   : > { %v330_v4 = vunpack.c.l.bf16 %v329_v1  ;;  %v331_v5 = vunpack.c.h.bf16 %v329_v1  ;;  %v334_v6 = vunpack.c.l.bf16 %v340_v2  ;;  %v335_v7 = vunpack.c.h.bf16 %v340_v2  ;;  %v189_v13 = vld [vmem:[%s169_s22 + $0x18] sm:$0xf] }
  0x14   : > { %v338_v8 = vunpack.c.l.bf16 %v341_v3  ;;  %v339_v14 = vunpack.c.h.bf16 %v341_v3  ;;  %v196_v21 = vunpack.c.l.bf16 %v189_v13 }
  0x15   : > { %v198_v9 = vadd.f32 %v331_v5, %v330_v4  ;;  %v213_v10 = vmul.f32 %v330_v4, %v330_v4  ;;  %v214_v11 = vmul.f32 %v331_v5, %v331_v5  ;;  %v215_v12 = vmul.f32 %v334_v6, %v334_v6 }
  0x16   : > { %v216_v16 = vmul.f32 %v335_v7, %v335_v7  ;;  %v217_v19 = vmul.f32 %v338_v8, %v338_v8  ;;  %v218_v23 = vmul.f32 %v339_v14, %v339_v14  ;;  %v219_v26 = vmul.f32 %v196_v21, %v196_v21 }
  0x17   : > { %v199_v15 = vadd.f32 %v334_v6, %v198_v9  ;;  %v220_v17 = vadd.f32 %v214_v11, %v213_v10  ;;  %v197_v40 = vld [vmem:[%s429_s16] sm:$0x1] }
  0x18   : > { %v212_v43 = vld [vmem:[%s435_s19] sm:$0x1] }
  0x19   : > { %v200_v18 = vadd.f32 %v335_v7, %v199_v15  ;;  %v221_v20 = vadd.f32 %v220_v17, %v215_v12 }
  0x1b   : > { %v201_v22 = vadd.f32 %v338_v8, %v200_v18  ;;  %v222_v24 = vadd.f32 %v221_v20, %v216_v16 }
  0x1d   : > { %v202_v25 = vadd.f32 %v339_v14, %v201_v22  ;;  %v223_v27 = vadd.f32 %v222_v24, %v217_v19 }
  0x1f   : > { %v203_v28 = vadd.f32 %v202_v25, %v196_v21  ;;  %v224_v29 = vadd.f32 %v223_v27, %v218_v23 }
  0x21   : > { %v204_v30 = vrot.slane %v203_v28, 4  ;;  %v225_v31 = vadd.f32 %v224_v29, %v219_v26 }
  0x23   : > { %v205_v32 = vadd.f32 %v204_v30, %v203_v28  ;;  %v226_v33 = vrot.slane %v225_v31, 4 }
  0x25   : > { %v206_v34 = vrot.slane %v205_v32, 2  ;;  %v227_v35 = vadd.f32 %v226_v33, %v225_v31 }
  0x27   : > { %v207_v36 = vadd.f32 %v206_v34, %v205_v32  ;;  %v228_v37 = vrot.slane %v227_v35, 2 }
  0x29   : > { %v208_v38 = vrot.slane %v207_v36, 1  ;;  %v229_v39 = vadd.f32 %v228_v37, %v227_v35 }
  0x2b   : > { %v209_v41 = vadd.f32 %v208_v38, %v207_v36  ;;  %v230_v42 = vrot.slane %v229_v39, 1 }
  0x2d   : > { %v210_v44 = vadd.f32 %v209_v41, %v197_v40  ;;  %v231_v45 = vadd.f32 %v230_v42, %v229_v39 }
  0x2f   : > { %211 = vst [vmem:[%s429_s16] sm:$0x1] %v210_v44  ;;  %v232_v46 = vadd.f32 %v231_v45, %v212_v43 }
  0x31   : > { %233 = vst [vmem:[%s435_s19] sm:$0x1] %v232_v46 }
  0x32 PF: > { %s13_s11 = sadd.s32 1, %s390_s11   ;;  %s457_s9 = smov %s386_s10 }
  0x33   : > { %p10_p5 = scmp.ge.s32.totalorder %s13_s11, 4   ;;  %s458_s10 = smov %s460_s12 }
  0x35   :  { %12 = sbr.rel (!%p10_p5) target bundleno = 2 (0x2), region = 70 }

// kernel: resnetv2_forward.45
= control target key start
LH: loop header
LB: loop body
LE: loop exit
PB: predicated region body
PF: predicated region fallthrough
CT: control target
= control target key end

     0   :  { %s553_s12 = smov 0   ;;  %s555_s13 = smov 0   ;;  %s601_s0 = inlined_call_operand.vmem [shape: bf16[2,56,128], index: 0, kind: input, shape index: {}]   ;;  %s602_s1 = inlined_call_operand.vmem [shape: f32[2,1,128], index: 1, kind: input, shape index: {}]   ;;  %s603_s2 = inlined_call_operand.vmem [shape: f32[2,1,128], index: 2, kind: input, shape index: {}]   ;;  %s604_s3 = inlined_call_operand.vmem [shape: bf16[2,56,128], index: 3, kind: output, shape index: {}]  }
   0x1   :  { %s557_s14 = smov 0  }
   0x2 LB: > { %s25_s15 = sadd.s32 1, %s527_s13  ;;  %p432_p0 = scmp.ge.s32.totalorder %s531_s14, 1  ;;  %s531_s14 = sphi %s557_s14, %s13_s14   ;;  %s527_s13 = sphi %s555_s13, %s606_s13   ;;  %s523_s12 = sphi %s553_s12, %s605_s12  }
   0x3   : > { %p27_p1 = scmp.ge.s32.totalorder %s25_s15, 2  ;;  %p174_p2 = scmp.lt.s32.totalorder %s531_s14, 3 }
   0x5   : > { %s608_s15 = smov (%p27_p1, %s25_s15), 0  ;;  %p175_p3 = pnand %p432_p0, %p174_p2 }
   0x6   : > { %p213_p4 = scmp.lt.s32.totalorder (!%p175_p3), %s523_s12, 1 }
   0x7   : > { %178 = sbr.rel (%p175_p3) target bundleno = 31 (0x1f), region = 32 }
   0xe   : > { %s610_s12 = smov (!%p213_p4, %s523_s12), 1 }
   0xf   : > { %s484_s16 = smul.u32 28, %s610_s12  ;;  %s224_s19 = scalar_lea.vmem %s602_s1, %s610_s12 }
  0x10   : > { %s227_s25 = scalar_lea.vmem %s603_s2, %s610_s12  ;;  %v435_v0 = vld [vmem:[%s224_s19] ss:$0 sm:$0xff] }
  0x11   : > { %s220_s22 = scalar_lea.vmem %s601_s0, %s484_s16  ;;  %v436_v9 = vld [vmem:[%s227_s25] ss:$0 sm:$0xff]  ;;  %s236_s28 = scalar_lea.vmem %s604_s3, %s484_s16 }
  0x12   : > { %v454_v1 = vld [vmem:[%s220_s22] sm:$0xff]   ;;  %v480_v2 = vld [vmem:[%s220_s22 + $0x8] sm:$0xff]   ;;  %v481_v3 = vld [vmem:[%s220_s22 + $0x10] sm:$0xff]  }
  0x13   : > { %v455_v4 = vunpack.c.l.bf16 %v454_v1  ;;  %v456_v5 = vunpack.c.h.bf16 %v454_v1  ;;  %v459_v6 = vunpack.c.l.bf16 %v480_v2  ;;  %v460_v7 = vunpack.c.h.bf16 %v480_v2  ;;  %v244_v8 = vld [vmem:[%s220_s22 + $0x18] sm:$0xf] }
  0x14   : > { %v463_v10 = vunpack.c.l.bf16 %v481_v3  ;;  %v464_v11 = vunpack.c.h.bf16 %v481_v3  ;;  %v251_v12 = vunpack.c.l.bf16 %v244_v8 }
  0x15   : > { %v259_v13 = vmul.f32 %v455_v4, %v435_v0  ;;  %v260_v14 = vmul.f32 %v456_v5, %v435_v0  ;;  %v261_v15 = vmul.f32 %v459_v6, %v435_v0  ;;  %v262_v16 = vmul.f32 %v460_v7, %v435_v0 }
  0x16   : > { %v263_v17 = vmul.f32 %v463_v10, %v435_v0  ;;  %v264_v18 = vmul.f32 %v464_v11, %v435_v0  ;;  %v265_v19 = vmul.f32 %v435_v0, %v251_v12 }
  0x17   : > { %v273_v20 = vadd.f32 %v436_v9, %v259_v13  ;;  %v274_v21 = vadd.f32 %v436_v9, %v260_v14  ;;  %v275_v22 = vadd.f32 %v436_v9, %v261_v15  ;;  %v276_v23 = vadd.f32 %v436_v9, %v262_v16 }
  0x18   : > { %v277_v24 = vadd.f32 %v436_v9, %v263_v17  ;;  %v278_v25 = vadd.f32 %v436_v9, %v264_v18  ;;  %v279_v26 = vadd.f32 %v436_v9, %v265_v19 }
  0x19   : > { %v280_v27 = vmax.f32 %v273_v20, 0.0  ;;  %v281_v28 = vmax.f32 %v274_v21, 0.0  ;;  %v282_v29 = vmax.f32 %v275_v22, 0.0  ;;  %v283_v30 = vmax.f32 %v276_v23, 0.0 }
  0x1a   : > { %v284_v31 = vmax.f32 %v277_v24, 0.0  ;;  %v285_v32 = vmax.f32 %v278_v25, 0.0  ;;  %v286_v33 = vmax.f32 %v279_v26, 0.0 }
  0x1b   : > { %v468_v34 = vpack.c.bf16 %v281_v28, %v280_v27  ;;  %v473_v35 = vpack.c.bf16 %v283_v30, %v282_v29 }
  0x1c   : > { %v478_v36 = vpack.c.bf16 %v285_v32, %v284_v31  ;;  %v452_v37 = vpack.c.bf16 %v286_v33, %v286_v33 }
  0x1d   : > { %469 = vst [vmem:[%s236_s28] sm:$0xff] %v468_v34   ;;  %482 = vst [vmem:[%s236_s28 + $0x8] sm:$0xff] %v473_v35  }
  0x1e   : > { %483 = vst [vmem:[%s236_s28 + $0x10] sm:$0xff] %v478_v36   ;;  %322 = vst [vmem:[%s236_s28 + $0x18] sm:$0xf] %v452_v37 }
  0x1f PF: > { %s13_s14 = sadd.s32 1, %s531_s14   ;;  %s605_s12 = smov %s527_s13 }
  0x20   : > { %p10_p5 = scmp.ge.s32.totalorder %s13_s14, 4   ;;  %s606_s13 = smov %s608_s15 }
  0x22   :  { %12 = sbr.rel (!%p10_p5) target bundleno = 2 (0x2), region = 68 }

// kernel: squeeze.46
= control target key start
LH: loop header
LB: loop body
LE: loop exit
PB: predicated region body
PF: predicated region fallthrough
CT: control target
= control target key end

     0   :  { %s354_s8 = smov 116   ;;  %s355_s9 = smov 120   ;;  %vm7_vm0 = vcmask 31744   ;;  %s653_s0 = inlined_call_operand.vmem [shape: f32[2,128], index: 0, kind: input, shape index: {}]   ;;  %s654_s1 = inlined_call_operand.vmem [shape: f32[2,32,4], index: 1, kind: output, shape index: {}]  }
   0x1   :  { %v4_v0 = vld [vmem:[%s653_s0] sm:$0x3]  ;;  %s353_s0 = smov 124   ;;  %s356_s10 = smov 112  }
   0x2   :  { %5 = vst [vmem:[#allocation0] sm:$0x3] %v4_v0  ;;  %s357_s11 = smov 108   ;;  %s358_s12 = smov 104  }
   0x3   :  { %s359_s13 = smov 100   ;;  %s360_s14 = smov 96  }
   0x4   :  { %s361_s15 = smov 92   ;;  %s362_s16 = smov 88  }
   0x5   :  { %s363_s17 = smov 84   ;;  %s364_s18 = smov 80  }
   0x6   :  { %s365_s19 = smov 76   ;;  %s366_s20 = smov 72  }
   0x7   :  { %s367_s21 = smov 68   ;;  %s368_s22 = smov 64  }
   0x8   :  { %s369_s23 = smov 60   ;;  %s370_s24 = smov 56  }
   0x9   :  { %v11_v1 = vld [vmem:[#allocation0] sm:$0x3]   ;;  %s371_s25 = smov 52   ;;  %s372_s26 = smov 48  }
   0xa   :  { %v27_v2 = vld [vmem:[#allocation0] sm:$0x3]   ;;  %12 = vrot.lane.b32.xlu0 %v11_v1, %s353_s0  ;;  %s373_s27 = smov 44   ;;  %s374_s28 = smov 40  }
   0xb   :  { %28 = vrot.lane.b32.xlu1 %v27_v2, %s354_s8  ;;  %v19_v3 = vld [vmem:[#allocation0] sm:$0x3]   ;;  %s375_s29 = smov 36   ;;  %s376_s30 = smov 32  }
   0xc   :  { %v35_v4 = vld [vmem:[#allocation0] sm:$0x3]   ;;  %s377_s6 = smov 28   ;;  %s378_s7 = smov 24  }
   0xd   :  { %v43_v5 = vld [vmem:[#allocation0] sm:$0x3]   ;;  %s379_s0 = smov 20   ;;  %s380_s8 = smov 16  }
   0xe   :  { %20 = vrot.lane.b32.xlu0 %v19_v3, %s355_s9  ;;  %v51_v6 = vld [vmem:[#allocation0] sm:$0x3]   ;;  %s381_s9 = smov 12  }
   0xf   :  { %36 = vrot.lane.b32.xlu1 %v35_v4, %s356_s10  ;;  %v59_v7 = vld [vmem:[#allocation0] sm:$0x3]   ;;  %s382_s10 = smov 8  }
  0x10   :  { %v67_v8 = vld [vmem:[#allocation0] sm:$0x3]  }
  0x11   :  { %v75_v9 = vld [vmem:[#allocation0] sm:$0x3]  }
  0x12   :  { %44 = vrot.lane.b32.xlu0 %v43_v5, %s357_s11  ;;  %v83_v10 = vld [vmem:[#allocation0] sm:$0x3]   ;;  %s383_s11 = smov 4  }
  0x13   :  { %52 = vrot.lane.b32.xlu1 %v51_v6, %s358_s12  ;;  %v91_v11 = vld [vmem:[#allocation0] sm:$0x3]  }
  0x14   :  { %v99_v12 = vld [vmem:[#allocation0] sm:$0x3]  }
  0x15   :  { %v107_v13 = vld [vmem:[#allocation0] sm:$0x3]  }
  0x16   :  { %60 = vrot.lane.b32.xlu0 %v59_v7, %s359_s13  ;;  %v115_v14 = vld [vmem:[#allocation0] sm:$0x3]  }
  0x17   :  { %68 = vrot.lane.b32.xlu1 %v67_v8, %s360_s14  ;;  %v123_v15 = vld [vmem:[#allocation0] sm:$0x3]  }
  0x18   :  { %v131_v16 = vld [vmem:[#allocation0] sm:$0x3]  }
  0x19   :  { %v139_v17 = vld [vmem:[#allocation0] sm:$0x3]  }
  0x1a   :  { %76 = vrot.lane.b32.xlu0 %v75_v9, %s361_s15  ;;  %v147_v18 = vld [vmem:[#allocation0] sm:$0x3]  }
  0x1b   :  { %84 = vrot.lane.b32.xlu1 %v83_v10, %s362_s16  ;;  %v155_v19 = vld [vmem:[#allocation0] sm:$0x3]  }
  0x1c   :  { %v163_v20 = vld [vmem:[#allocation0] sm:$0x3]  }
  0x1d   :  { %v171_v21 = vld [vmem:[#allocation0] sm:$0x3]  }
  0x1e   :  { %92 = vrot.lane.b32.xlu0 %v91_v11, %s363_s17  ;;  %v179_v22 = vld [vmem:[#allocation0] sm:$0x3]  }
  0x1f   :  { %100 = vrot.lane.b32.xlu1 %v99_v12, %s364_s18  ;;  %v187_v23 = vld [vmem:[#allocation0] sm:$0x3]  }
  0x20   :  { %v195_v24 = vld [vmem:[#allocation0] sm:$0x3]  }
  0x21   :  { %v203_v25 = vld [vmem:[#allocation0] sm:$0x3]  }
  0x22   :  { %108 = vrot.lane.b32.xlu0 %v107_v13, %s365_s19  ;;  %v211_v26 = vld [vmem:[#allocation0] sm:$0x3]  }
  0x23   :  { %116 = vrot.lane.b32.xlu1 %v115_v14, %s366_s20  ;;  %v6_v27 = vld [vmem:[#allocation0] sm:$0x3]  }
  0x24   :  { %8 = vst.msk [vmem:[%s654_s1] sm:$0x1] %vm7_vm0, %v6_v27   ;;  %259 = vst.msk [vmem:[%s654_s1 + $0x1f] sm:$0x2] %vm7_vm0, %v6_v27   ;;  %v219_v28 = vld [vmem:[#allocation0] sm:$0x3]  }
  0x25   :  { %v227_v29 = vld [vmem:[#allocation0] sm:$0x3]  }
  0x26   :  { %124 = vrot.lane.b32.xlu0 %v123_v15, %s367_s21  ;;  %v235_v30 = vld [vmem:[#allocation0] sm:$0x3]  }
  0x27   :  { %132 = vrot.lane.b32.xlu1 %v131_v16, %s368_s22  ;;  %v243_v31 = vld [vmem:[#allocation0] sm:$0x3]  }
  0x28   :  { %v251_v32 = vld [vmem:[#allocation0] sm:$0x3]  }
  0x2a   :  { %140 = vrot.lane.b32.xlu0 %v139_v17, %s369_s23 }
  0x2b   :  { %148 = vrot.lane.b32.xlu1 %v147_v18, %s370_s24 }
  0x2e   :  { %156 = vrot.lane.b32.xlu0 %v155_v19, %s371_s25 }
  0x2f   :  { %164 = vrot.lane.b32.xlu1 %v163_v20, %s372_s26 }
  0x32   :  { %172 = vrot.lane.b32.xlu0 %v171_v21, %s373_s27 }
  0x33   :  { %180 = vrot.lane.b32.xlu1 %v179_v22, %s374_s28 }
  0x36   :  { %188 = vrot.lane.b32.xlu0 %v187_v23, %s375_s29 }
  0x37   :  { %196 = vrot.lane.b32.xlu1 %v195_v24, %s376_s30 }
  0x3a   :  { %204 = vrot.lane.b32.xlu0 %v203_v25, %s377_s6 }
  0x3b   :  { %212 = vrot.lane.b32.xlu1 %v211_v26, %s378_s7 }
  0x3e   :  { %220 = vrot.lane.b32.xlu0 %v219_v28, %s379_s0 }
  0x3f   :  { %228 = vrot.lane.b32.xlu1 %v227_v29, %s380_s8 }
  0x42   :  { %236 = vrot.lane.b32.xlu0 %v235_v30, %s381_s9 }
  0x43   :  { %244 = vrot.lane.b32.xlu1 %v243_v31, %s382_s10 }
  0x46   :  { %252 = vrot.lane.b32.xlu0 %v251_v32, %s383_s11 }
  0x7c   :  { %v13_v33 = vpop.permute.xlu0 %12  }
  0x7d   :  { %v29_v34 = vpop.permute.xlu1 %28   ;;  %260 = vst.msk [vmem:[%s654_s1 + $0x1] sm:$0x1] %vm7_vm0, %v13_v33   ;;  %261 = vst.msk [vmem:[%s654_s1 + $0x20] sm:$0x2] %vm7_vm0, %v13_v33  }
  0x7e   :  { %264 = vst.msk [vmem:[%s654_s1 + $0x3] sm:$0x1] %vm7_vm0, %v29_v34   ;;  %265 = vst.msk [vmem:[%s654_s1 + $0x22] sm:$0x2] %vm7_vm0, %v29_v34  }
  0x80   :  { %v21_v35 = vpop.permute.xlu0 %20  }
  0x81   :  { %v37_v36 = vpop.permute.xlu1 %36   ;;  %262 = vst.msk [vmem:[%s654_s1 + $0x2] sm:$0x1] %vm7_vm0, %v21_v35   ;;  %263 = vst.msk [vmem:[%s654_s1 + $0x21] sm:$0x2] %vm7_vm0, %v21_v35  }
  0x82   :  { %266 = vst.msk [vmem:[%s654_s1 + $0x4] sm:$0x1] %vm7_vm0, %v37_v36   ;;  %267 = vst.msk [vmem:[%s654_s1 + $0x23] sm:$0x2] %vm7_vm0, %v37_v36  }
  0x84   :  { %v45_v37 = vpop.permute.xlu0 %44  }
  0x85   :  { %v53_v38 = vpop.permute.xlu1 %52   ;;  %268 = vst.msk [vmem:[%s654_s1 + $0x5] sm:$0x1] %vm7_vm0, %v45_v37   ;;  %269 = vst.msk [vmem:[%s654_s1 + $0x24] sm:$0x2] %vm7_vm0, %v45_v37  }
  0x86   :  { %270 = vst.msk [vmem:[%s654_s1 + $0x6] sm:$0x1] %vm7_vm0, %v53_v38   ;;  %271 = vst.msk [vmem:[%s654_s1 + $0x25] sm:$0x2] %vm7_vm0, %v53_v38  }
  0x88   :  { %v61_v39 = vpop.permute.xlu0 %60  }
  0x89   :  { %v69_v40 = vpop.permute.xlu1 %68   ;;  %272 = vst.msk [vmem:[%s654_s1 + $0x7] sm:$0x1] %vm7_vm0, %v61_v39   ;;  %273 = vst.msk [vmem:[%s654_s1 + $0x26] sm:$0x2] %vm7_vm0, %v61_v39  }
  0x8a   :  { %274 = vst.msk [vmem:[%s654_s1 + $0x8] sm:$0x1] %vm7_vm0, %v69_v40   ;;  %275 = vst.msk [vmem:[%s654_s1 + $0x27] sm:$0x2] %vm7_vm0, %v69_v40  }
  0x8c   :  { %v77_v41 = vpop.permute.xlu0 %76  }
  0x8d   :  { %v85_v42 = vpop.permute.xlu1 %84   ;;  %276 = vst.msk [vmem:[%s654_s1 + $0x9] sm:$0x1] %vm7_vm0, %v77_v41   ;;  %277 = vst.msk [vmem:[%s654_s1 + $0x28] sm:$0x2] %vm7_vm0, %v77_v41  }
  0x8e   :  { %278 = vst.msk [vmem:[%s654_s1 + $0xa] sm:$0x1] %vm7_vm0, %v85_v42   ;;  %279 = vst.msk [vmem:[%s654_s1 + $0x29] sm:$0x2] %vm7_vm0, %v85_v42  }
  0x90   :  { %v93_v43 = vpop.permute.xlu0 %92  }
  0x91   :  { %v101_v44 = vpop.permute.xlu1 %100   ;;  %280 = vst.msk [vmem:[%s654_s1 + $0xb] sm:$0x1] %vm7_vm0, %v93_v43   ;;  %281 = vst.msk [vmem:[%s654_s1 + $0x2a] sm:$0x2] %vm7_vm0, %v93_v43  }
  0x92   :  { %282 = vst.msk [vmem:[%s654_s1 + $0xc] sm:$0x1] %vm7_vm0, %v101_v44   ;;  %283 = vst.msk [vmem:[%s654_s1 + $0x2b] sm:$0x2] %vm7_vm0, %v101_v44  }
  0x94   :  { %v109_v45 = vpop.permute.xlu0 %108  }
  0x95   :  { %v117_v46 = vpop.permute.xlu1 %116   ;;  %284 = vst.msk [vmem:[%s654_s1 + $0xd] sm:$0x1] %vm7_vm0, %v109_v45   ;;  %285 = vst.msk [vmem:[%s654_s1 + $0x2c] sm:$0x2] %vm7_vm0, %v109_v45  }
  0x96   :  { %286 = vst.msk [vmem:[%s654_s1 + $0xe] sm:$0x1] %vm7_vm0, %v117_v46   ;;  %287 = vst.msk [vmem:[%s654_s1 + $0x2d] sm:$0x2] %vm7_vm0, %v117_v46  }
  0x98   :  { %v125_v47 = vpop.permute.xlu0 %124  }
  0x99   :  { %v133_v48 = vpop.permute.xlu1 %132   ;;  %288 = vst.msk [vmem:[%s654_s1 + $0xf] sm:$0x1] %vm7_vm0, %v125_v47   ;;  %289 = vst.msk [vmem:[%s654_s1 + $0x2e] sm:$0x2] %vm7_vm0, %v125_v47  }
  0x9a   :  { %290 = vst.msk [vmem:[%s654_s1 + $0x10] sm:$0x1] %vm7_vm0, %v133_v48   ;;  %291 = vst.msk [vmem:[%s654_s1 + $0x2f] sm:$0x2] %vm7_vm0, %v133_v48  }
  0x9c   :  { %v141_v49 = vpop.permute.xlu0 %140  }
  0x9d   :  { %v149_v50 = vpop.permute.xlu1 %148   ;;  %292 = vst.msk [vmem:[%s654_s1 + $0x11] sm:$0x1] %vm7_vm0, %v141_v49   ;;  %293 = vst.msk [vmem:[%s654_s1 + $0x30] sm:$0x2] %vm7_vm0, %v141_v49  }
  0x9e   :  { %294 = vst.msk [vmem:[%s654_s1 + $0x12] sm:$0x1] %vm7_vm0, %v149_v50   ;;  %295 = vst.msk [vmem:[%s654_s1 + $0x31] sm:$0x2] %vm7_vm0, %v149_v50  }
  0xa0   :  { %v157_v51 = vpop.permute.xlu0 %156  }
  0xa1   :  { %v165_v52 = vpop.permute.xlu1 %164   ;;  %296 = vst.msk [vmem:[%s654_s1 + $0x13] sm:$0x1] %vm7_vm0, %v157_v51   ;;  %297 = vst.msk [vmem:[%s654_s1 + $0x32] sm:$0x2] %vm7_vm0, %v157_v51  }
  0xa2   :  { %298 = vst.msk [vmem:[%s654_s1 + $0x14] sm:$0x1] %vm7_vm0, %v165_v52   ;;  %299 = vst.msk [vmem:[%s654_s1 + $0x33] sm:$0x2] %vm7_vm0, %v165_v52  }
  0xa4   :  { %v173_v53 = vpop.permute.xlu0 %172  }
  0xa5   :  { %v181_v54 = vpop.permute.xlu1 %180   ;;  %300 = vst.msk [vmem:[%s654_s1 + $0x15] sm:$0x1] %vm7_vm0, %v173_v53   ;;  %301 = vst.msk [vmem:[%s654_s1 + $0x34] sm:$0x2] %vm7_vm0, %v173_v53  }
  0xa6   :  { %302 = vst.msk [vmem:[%s654_s1 + $0x16] sm:$0x1] %vm7_vm0, %v181_v54   ;;  %303 = vst.msk [vmem:[%s654_s1 + $0x35] sm:$0x2] %vm7_vm0, %v181_v54  }
  0xa8   :  { %v189_v55 = vpop.permute.xlu0 %188  }
  0xa9   :  { %v197_v56 = vpop.permute.xlu1 %196   ;;  %304 = vst.msk [vmem:[%s654_s1 + $0x17] sm:$0x1] %vm7_vm0, %v189_v55   ;;  %305 = vst.msk [vmem:[%s654_s1 + $0x36] sm:$0x2] %vm7_vm0, %v189_v55  }
  0xaa   :  { %306 = vst.msk [vmem:[%s654_s1 + $0x18] sm:$0x1] %vm7_vm0, %v197_v56   ;;  %307 = vst.msk [vmem:[%s654_s1 + $0x37] sm:$0x2] %vm7_vm0, %v197_v56  }
  0xac   :  { %v205_v57 = vpop.permute.xlu0 %204  }
  0xad   :  { %v213_v58 = vpop.permute.xlu1 %212   ;;  %308 = vst.msk [vmem:[%s654_s1 + $0x19] sm:$0x1] %vm7_vm0, %v205_v57   ;;  %309 = vst.msk [vmem:[%s654_s1 + $0x38] sm:$0x2] %vm7_vm0, %v205_v57  }
  0xae   :  { %310 = vst.msk [vmem:[%s654_s1 + $0x1a] sm:$0x1] %vm7_vm0, %v213_v58   ;;  %311 = vst.msk [vmem:[%s654_s1 + $0x39] sm:$0x2] %vm7_vm0, %v213_v58  }
  0xb0   :  { %v221_v59 = vpop.permute.xlu0 %220  }
  0xb1   :  { %v229_v60 = vpop.permute.xlu1 %228   ;;  %312 = vst.msk [vmem:[%s654_s1 + $0x1b] sm:$0x1] %vm7_vm0, %v221_v59   ;;  %313 = vst.msk [vmem:[%s654_s1 + $0x3a] sm:$0x2] %vm7_vm0, %v221_v59  }
  0xb2   :  { %314 = vst.msk [vmem:[%s654_s1 + $0x1c] sm:$0x1] %vm7_vm0, %v229_v60   ;;  %315 = vst.msk [vmem:[%s654_s1 + $0x3b] sm:$0x2] %vm7_vm0, %v229_v60  }
  0xb4   :  { %v237_v61 = vpop.permute.xlu0 %236  }
  0xb5   :  { %v245_v62 = vpop.permute.xlu1 %244   ;;  %316 = vst.msk [vmem:[%s654_s1 + $0x1d] sm:$0x1] %vm7_vm0, %v237_v61   ;;  %317 = vst.msk [vmem:[%s654_s1 + $0x3c] sm:$0x2] %vm7_vm0, %v237_v61  }
  0xb6   :  { %318 = vst.msk [vmem:[%s654_s1 + $0x1e] sm:$0x1] %vm7_vm0, %v245_v62   ;;  %319 = vst.msk [vmem:[%s654_s1 + $0x3d] sm:$0x2] %vm7_vm0, %v245_v62  }
  0xb8   :  { %v253_v63 = vpop.permute.xlu0 %252  }
  0xb9   :  { %320 = vst.msk [vmem:[%s654_s1 + $0x1f] sm:$0x1] %vm7_vm0, %v253_v63   ;;  %321 = vst.msk [vmem:[%s654_s1 + $0x3e] sm:$0x2] %vm7_vm0, %v253_v63  }

// kernel: resnetv2_forward.51
= control target key start
LH: loop header
LB: loop body
LE: loop exit
PB: predicated region body
PF: predicated region fallthrough
CT: control target
= control target key end

     0   :  { %s815_s21 = smov 0   ;;  %s817_s22 = smov 0   ;;  %s898_s0 = inlined_call_operand.vmem [shape: bf16[2,56,128], index: 0, kind: input, shape index: {}]   ;;  %s899_s1 = inlined_call_operand.vmem [shape: f32[2,1,128], index: 1, kind: input, shape index: {}]   ;;  %s900_s2 = inlined_call_operand.vmem [shape: f32[2,1,128], index: 2, kind: input, shape index: {}]   ;;  %s901_s3 = inlined_call_operand.vmem [shape: bf16[2,56,128], index: 3, kind: input, shape index: {}]   ;;  %s902_s4 = inlined_call_operand.vmem [shape: f32[2,1,128], index: 4, kind: input, shape index: {}]   ;;  %s903_s5 = inlined_call_operand.vmem [shape: f32[2,1,128], index: 5, kind: input, shape index: {}]   ;;  %s904_s6 = inlined_call_operand.vmem [shape: bf16[2,56,128], index: 6, kind: output, shape index: {}]  }
   0x1   :  { %s819_s23 = smov 0  }
   0x2 LB: > { %s28_s24 = sadd.s32 1, %s774_s22  ;;  %p662_p0 = scmp.ge.s32.totalorder %s778_s23, 1  ;;  %s778_s23 = sphi %s819_s23, %s16_s23   ;;  %s774_s22 = sphi %s817_s22, %s906_s22   ;;  %s770_s21 = sphi %s815_s21, %s905_s21  }
   0x3   : > { %p30_p1 = scmp.ge.s32.totalorder %s28_s24, 2  ;;  %p282_p2 = scmp.lt.s32.totalorder %s778_s23, 3 }
   0x5   : > { %s908_s24 = smov (%p30_p1, %s28_s24), 0  ;;  %p283_p3 = pnand %p662_p0, %p282_p2 }
   0x6   : > { %p342_p4 = scmp.lt.s32.totalorder (!%p283_p3), %s770_s21, 1 }
   0x7   : > { %286 = sbr.rel (%p283_p3) target bundleno = 43 (0x2b), region = 44 }
   0xe   : > { %s910_s21 = smov (!%p342_p4, %s770_s21), 1 }
   0xf   : > { %s833_s25 = smul.u32 28, %s910_s21  ;;  %s353_s28 = scalar_lea.vmem %s899_s1, %s910_s21 }
  0x10   : > { %s356_s7 = scalar_lea.vmem %s900_s2, %s910_s21  ;;  %s369_s10 = scalar_lea.vmem %s902_s4, %s910_s21  ;;  %v856_v0 = vld [vmem:[%s353_s28] ss:$0 sm:$0xff] }
  0x11   : > { %s848_s13 = scalar_lea.vmem %s898_s0, %s833_s25  ;;  %s854_s16 = scalar_lea.vmem %s901_s3, %s833_s25  ;;  %v858_v1 = vld [vmem:[%s369_s10] ss:$0 sm:$0xff] }
  0x12   : > { %s372_s19 = scalar_lea.vmem %s903_s5, %s910_s21  ;;  %v687_v2 = vld [vmem:[%s848_s13] sm:$0xff]   ;;  %v725_v4 = vld [vmem:[%s848_s13 + $0x8] sm:$0xff]   ;;  %v726_v24 = vld [vmem:[%s848_s13 + $0x10] sm:$0xff]   ;;  %s381_s26 = scalar_lea.vmem %s904_s6, %s833_s25 }
  0x13   : > { %v699_v3 = vld [vmem:[%s854_s16] sm:$0xff]   ;;  %v688_v5 = vunpack.c.l.bf16 %v687_v2  ;;  %v689_v6 = vunpack.c.h.bf16 %v687_v2  ;;  %v727_v9 = vld [vmem:[%s854_s16 + $0x8] sm:$0xff]   ;;  %v692_v12 = vunpack.c.l.bf16 %v725_v4  ;;  %v693_v13 = vunpack.c.h.bf16 %v725_v4  ;;  %v728_v29 = vld [vmem:[%s854_s16 + $0x10] sm:$0xff]  }
  0x14   : > { %v700_v7 = vunpack.c.l.bf16 %v699_v3  ;;  %v701_v8 = vunpack.c.h.bf16 %v699_v3  ;;  %v667_v10 = vld [vmem:[%s356_s7] ss:$0 sm:$0xff]  ;;  %v704_v14 = vunpack.c.l.bf16 %v727_v9  ;;  %v705_v15 = vunpack.c.h.bf16 %v727_v9  ;;  %v389_v42 = vld [vmem:[%s848_s13 + $0x18] sm:$0xf] }
  0x15   : > { %v669_v11 = vld [vmem:[%s372_s19] ss:$0 sm:$0xff]  ;;  %v404_v16 = vmul.f32 %v688_v5, %v856_v0  ;;  %v405_v17 = vmul.f32 %v689_v6, %v856_v0  ;;  %v406_v20 = vmul.f32 %v692_v12, %v856_v0  ;;  %v407_v21 = vmul.f32 %v693_v13, %v856_v0  ;;  %v431_v47 = vld [vmem:[%s854_s16 + $0x18] sm:$0xf] }
  0x16   : > { %v446_v18 = vmul.f32 %v700_v7, %v858_v1  ;;  %v447_v19 = vmul.f32 %v701_v8, %v858_v1  ;;  %v448_v22 = vmul.f32 %v704_v14, %v858_v1  ;;  %v449_v23 = vmul.f32 %v705_v15, %v858_v1 }
  0x17   : > { %v418_v25 = vadd.f32 %v667_v10, %v404_v16  ;;  %v419_v26 = vadd.f32 %v667_v10, %v405_v17  ;;  %v420_v30 = vadd.f32 %v667_v10, %v406_v20  ;;  %v421_v31 = vadd.f32 %v667_v10, %v407_v21 }
  0x18   : > { %v460_v27 = vadd.f32 %v669_v11, %v446_v18  ;;  %v461_v28 = vadd.f32 %v669_v11, %v447_v19  ;;  %v462_v32 = vadd.f32 %v669_v11, %v448_v22  ;;  %v463_v33 = vadd.f32 %v669_v11, %v449_v23 }
  0x19   : > { %v696_v36 = vunpack.c.l.bf16 %v726_v24  ;;  %v697_v37 = vunpack.c.h.bf16 %v726_v24  ;;  %v708_v40 = vunpack.c.l.bf16 %v728_v29  ;;  %v709_v41 = vunpack.c.h.bf16 %v728_v29 }
  0x1a   : > { %v467_v34 = vadd.f32 %v460_v27, %v418_v25  ;;  %v468_v35 = vadd.f32 %v461_v28, %v419_v26  ;;  %v469_v38 = vadd.f32 %v462_v32, %v420_v30  ;;  %v470_v39 = vadd.f32 %v463_v33, %v421_v31 }
  0x1b   : > { %v408_v45 = vmul.f32 %v696_v36, %v856_v0  ;;  %v409_v46 = vmul.f32 %v697_v37, %v856_v0  ;;  %v450_v50 = vmul.f32 %v708_v40, %v858_v1  ;;  %v451_v51 = vmul.f32 %v709_v41, %v858_v1 }
  0x1c   : > { %v474_v43 = vmax.f32 %v467_v34, 0.0  ;;  %v475_v44 = vmax.f32 %v468_v35, 0.0  ;;  %v476_v48 = vmax.f32 %v469_v38, 0.0  ;;  %v477_v49 = vmax.f32 %v470_v39, 0.0 }
  0x1d   : > { %v422_v53 = vadd.f32 %v667_v10, %v408_v45  ;;  %v423_v54 = vadd.f32 %v667_v10, %v409_v46  ;;  %v396_v55 = vunpack.c.l.bf16 %v389_v42  ;;  %v464_v57 = vadd.f32 %v669_v11, %v450_v50 }
  0x1e   : > { %v713_v52 = vpack.c.bf16 %v475_v44, %v474_v43  ;;  %v718_v56 = vpack.c.bf16 %v477_v49, %v476_v48  ;;  %v465_v58 = vadd.f32 %v669_v11, %v451_v51  ;;  %v438_v59 = vunpack.c.l.bf16 %v431_v47 }
  0x1f   : > { %v410_v60 = vmul.f32 %v856_v0, %v396_v55  ;;  %v471_v61 = vadd.f32 %v464_v57, %v422_v53 }
  0x20   : > { %714 = vst [vmem:[%s381_s26] sm:$0xff] %v713_v52   ;;  %729 = vst [vmem:[%s381_s26 + $0x8] sm:$0xff] %v718_v56   ;;  %v472_v62 = vadd.f32 %v465_v58, %v423_v54  ;;  %v452_v63 = vmul.f32 %v858_v1, %v438_v59 }
  0x21   : > { %v424_v2 = vadd.f32 %v667_v10, %v410_v60  ;;  %v478_v3 = vmax.f32 %v471_v61, 0.0 }
  0x22   : > { %v479_v4 = vmax.f32 %v472_v62, 0.0  ;;  %v466_v5 = vadd.f32 %v669_v11, %v452_v63 }
  0x24   : > { %v723_v6 = vpack.c.bf16 %v479_v4, %v478_v3  ;;  %v473_v7 = vadd.f32 %v466_v5, %v424_v2 }
  0x26   : > { %730 = vst [vmem:[%s381_s26 + $0x10] sm:$0xff] %v723_v6   ;;  %v480_v8 = vmax.f32 %v473_v7, 0.0 }
  0x28   : > { %v685_v9 = vpack.c.bf16 %v480_v8, %v480_v8 }
  0x2a   : > { %516 = vst [vmem:[%s381_s26 + $0x18] sm:$0xf] %v685_v9 }
  0x2b PF: > { %s16_s23 = sadd.s32 1, %s778_s23   ;;  %s905_s21 = smov %s774_s22 }
  0x2c   : > { %p13_p5 = scmp.ge.s32.totalorder %s16_s23, 4   ;;  %s906_s22 = smov %s908_s24 }
  0x2e   :  { %15 = sbr.rel (!%p13_p5) target bundleno = 2 (0x2), region = 89 }

// kernel: resnetv2_forward.46
= control target key start
LH: loop header
LB: loop body
LE: loop exit
PB: predicated region body
PF: predicated region fallthrough
CT: control target
= control target key end

     0   :  { %s1892_s9 = smov 0   ;;  %s2263_s0 = inlined_call_operand.vmem [shape: bf16[2,9,9,128], index: 0, kind: input, shape index: {}]   ;;  %s2264_s1 = inlined_call_operand.vmem [shape: bf16[9,128,128], index: 1, kind: input, shape index: {}]   ;;  %s2265_s2 = inlined_call_operand.vmem [shape: bf16[2,7,7,128], index: 2, kind: output, shape index: {}]  }
   0x1 LB: > { %s1246_s10 = sadd.s32 4294967295, %s1869_s9   ;;  %p1250_p0 = scmp.ge.s32.totalorder %s1869_s9, 1  ;;  %s1869_s9 = sphi %s1892_s9, %s12_s9  }
   0x2   : > { %p112_p1 = scmp.lt.s32.totalorder %s1869_s9, 3 }
   0x4   : > { %p113_p2 = pnand %p1250_p0, %p112_p1 }
   0x5   : > { %p134_p3 = scmp.lt.s32.totalorder (!%p113_p2), %s1246_s10, 1  ;;  %s1910_s19 = smov (!%p113_p2), 0  }
   0x6   : > { %116 = sbr.rel (%p113_p2) target bundleno = 398 (0x18e), region = 28 }
   0xd   : > { %s2267_s10 = smov (!%p134_p3, %s1246_s10), 1 }
   0xe   : > { %s1761_s11 = smul.u32 72, %s2267_s10 }
   0xf   : > { %s1762_s12 = smul.u32 28, %s2267_s10 }
  0x10   : > { %s1903_s15 = scalar_lea.vmem %s2263_s0, %s1761_s11 }
  0x11   : > { %s1908_s18 = scalar_lea.vmem %s2265_s2, %s1762_s12 }
  0x12 LB: >> { %v1781_v0 = vld [vmem:[%s2264_s1 + $0x40] sm:$0xff]   ;;  %v1875_v1 = vmov 0.0   ;;  %v1783_v3 = vld [vmem:[%s2264_s1 + $0x48] sm:$0xff]   ;;  %vm1876_vm0 = vmmov 0   ;;  %v1785_v5 = vld [vmem:[%s2264_s1 + $0x50] sm:$0xff]   ;;  %s1470_s6 = sshll.u32 %s1873_s19, 3  ;;  %s1873_s19 = sphi %s1910_s19, %s150_s19  }
  0x13   : >> { %1552 = vmatprep.subr.bf16.mxu1 %v1875_v1  ;;  %1632 = vmatprep.subr.bf16.mxu0 %v1875_v1  ;;  %v1782_v2 = vld [vmem:[%s2264_s1 + $0x100] sm:$0xff]   ;;  %v1784_v4 = vld [vmem:[%s2264_s1 + $0x108] sm:$0xff]   ;;  %v1786_v6 = vld [vmem:[%s2264_s1 + $0x110] sm:$0xff]   ;;  %s1953_s10 = scalar_lea.vmem %s1903_s15, %s1470_s6  ;;  %vm1170_vm1 = vcmask 1043456   ;;  %vm1171_vm2 = vsmask.f32 3328 }
  0x14   : >> { %1553 = vmatpush3.bf16.msra.mxu1 %v1781_v0  ;;  %1568 = vmatprep.mubr.msk.bf16.mxu1 %vm1876_vm0, %v1875_v1  ;;  %v1787_v7 = vld [vmem:[%s2264_s1 + $0x58] sm:$0xff]   ;;  %v1789_v9 = vld [vmem:[%s2264_s1 + $0x60] sm:$0xff]   ;;  %v1969_v13 = vld [vmem:[%s1953_s10 + $0x8] sm:$0xf] }
  0x15   : >> { %1633 = vmatpush3.bf16.msra.mxu0 %v1782_v2  ;;  %1554 = vmatprep.subr.bf16.mxu1 %v1875_v1  ;;  %v1788_v8 = vld [vmem:[%s2264_s1 + $0x118] sm:$0xff]   ;;  %v1790_v10 = vld [vmem:[%s2264_s1 + $0x120] sm:$0xff]   ;;  %v1791_v14 = vld [vmem:[%s2264_s1 + $0x68] sm:$0xff]   ;;  %v1356_v15 = vcombine.low %v1969_v13, %v1969_v13 }
  0x16   : >> { %1634 = vmatprep.subr.bf16.mxu0 %v1875_v1  ;;  %1648 = vmatprep.mubr.msk.bf16.mxu0 %vm1876_vm0, %v1875_v1  ;;  %v1964_v11 = vld [vmem:[%s1953_s10] sm:$0xf]  ;;  %v1792_v16 = vld [vmem:[%s2264_s1 + $0x128] sm:$0xff]   ;;  %v1793_v18 = vld [vmem:[%s2264_s1 + $0x70] sm:$0xff]  }
  0x17   : >> { %v1271_v12 = vcombine.low %v1964_v11, %v1964_v11  ;;  %v622_v19 = vshll.u32 %v1356_v15, 16  ;;  %v1794_v20 = vld [vmem:[%s2264_s1 + $0x130] sm:$0xff]   ;;  %v1795_v21 = vld [vmem:[%s2264_s1 + $0x78] sm:$0xff]   ;;  %v620_v24 = vshrl.u32 %v1356_v15, 16  ;;  %v1798_v28 = vld [vmem:[%s2264_s1] sm:$0xff]  }
  0x18   : >> { %1555 = vmatpush3.bf16.msra.mxu1 %v1783_v3  ;;  %v1796_v26 = vld [vmem:[%s2264_s1 + $0x138] sm:$0xff]   ;;  %v1800_v30 = vld [vmem:[%s2264_s1 + $0x140] sm:$0xff]   ;;  %v1801_v31 = vld [vmem:[%s2264_s1 + $0x8] sm:$0xff]  }
  0x19   : >> { %1635 = vmatpush3.bf16.msra.mxu0 %v1784_v4  ;;  %1556 = vmatprep.subr.bf16.mxu1 %v1875_v1  ;;  %v195_v17 = vshll.u32 %v1271_v12, 16  ;;  %v193_v22 = vshrl.u32 %v1271_v12, 16  ;;  %v624_v25 = vrot.slane %v622_v19, 1  ;;  %v1802_v32 = vld [vmem:[%s2264_s1 + $0x148] sm:$0xff]   ;;  %v1803_v33 = vld [vmem:[%s2264_s1 + $0x10] sm:$0xff]   ;;  %v1805_v35 = vld [vmem:[%s2264_s1 + $0x18] sm:$0xff]  }
  0x1a   : >> { %1636 = vmatprep.subr.bf16.mxu0 %v1875_v1  ;;  %v1804_v34 = vld [vmem:[%s2264_s1 + $0x150] sm:$0xff]   ;;  %v1806_v36 = vld [vmem:[%s2264_s1 + $0x158] sm:$0xff]   ;;  %v1807_v37 = vld [vmem:[%s2264_s1 + $0x20] sm:$0xff]  }
  0x1b   : >> { %v197_v23 = vrot.slane %v195_v17, 1  ;;  %v625_v29 = vor.u32 %v624_v25, %v620_v24  ;;  %v1808_v38 = vld [vmem:[%s2264_s1 + $0x160] sm:$0xff]   ;;  %v1809_v40 = vld [vmem:[%s2264_s1 + $0x28] sm:$0xff]   ;;  %v1811_v43 = vld [vmem:[%s2264_s1 + $0x30] sm:$0xff]  }
  0x1c   : >> { %1557 = vmatpush3.bf16.msra.mxu1 %v1785_v5  ;;  %v2042_v39 = vld [vmem:[%s1953_s10 + $0x4] sm:$0x1]  ;;  %v1810_v42 = vld [vmem:[%s2264_s1 + $0x168] sm:$0xff]   ;;  %v1812_v44 = vld [vmem:[%s2264_s1 + $0x170] sm:$0xff]  }
  0x1d   : >> { %1637 = vmatpush3.bf16.msra.mxu0 %v1786_v6  ;;  %1558 = vmatprep.subr.bf16.mxu1 %v1875_v1  ;;  %v198_v27 = vor.u32 %v197_v23, %v193_v22  ;;  %v1304_v41 = vcombine.low %v1964_v11, %v2042_v39  ;;  %v1315_v45 = vld [vmem:[%s1953_s10 + $0xc] sm:$0x1]  ;;  %v1813_v46 = vld [vmem:[%s2264_s1 + $0x38] sm:$0xff]   ;;  %v1815_v49 = vld [vmem:[%s2264_s1 + $0x80] sm:$0xff]  }
  0x1e   : >> { %1638 = vmatprep.subr.bf16.mxu0 %v1875_v1  ;;  %v1381_v47 = vcombine.low %v1969_v13, %v1315_v45  ;;  %v1814_v48 = vld [vmem:[%s2264_s1 + $0x178] sm:$0xff]   ;;  %v1817_v51 = vld [vmem:[%s2264_s1 + $0x180] sm:$0xff]   ;;  %v1818_v52 = vld [vmem:[%s2264_s1 + $0x88] sm:$0xff]  }
  0x1f   : >> { %v1819_v53 = vld [vmem:[%s2264_s1 + $0x188] sm:$0xff]   ;;  %v1820_v54 = vld [vmem:[%s2264_s1 + $0x90] sm:$0xff]   ;;  %v1822_v56 = vld [vmem:[%s2264_s1 + $0x98] sm:$0xff]   ;;  %v396_v3 = vrot.slane %v1304_v41, 1 }
  0x20   : >> { %1559 = vmatpush3.bf16.msra.mxu1 %v1787_v7  ;;  %v736_v50 = vrot.slane %v1381_v47, 1  ;;  %v1821_v55 = vld [vmem:[%s2264_s1 + $0x190] sm:$0xff]   ;;  %v1823_v57 = vld [vmem:[%s2264_s1 + $0x198] sm:$0xff]   ;;  %v1824_v58 = vld [vmem:[%s2264_s1 + $0xa0] sm:$0xff]  }
  0x21   : >> { %1639 = vmatpush3.bf16.msra.mxu0 %v1788_v8  ;;  %1560 = vmatprep.subr.bf16.mxu1 %v1875_v1  ;;  %v1825_v59 = vld [vmem:[%s2264_s1 + $0x1a0] sm:$0xff]   ;;  %v1826_v60 = vld [vmem:[%s2264_s1 + $0xa8] sm:$0xff]   ;;  %v1828_v62 = vld [vmem:[%s2264_s1 + $0xb0] sm:$0xff]  }
  0x22   : >> { %1640 = vmatprep.subr.bf16.mxu0 %v1875_v1  ;;  %v1827_v61 = vld [vmem:[%s2264_s1 + $0x1a8] sm:$0xff]   ;;  %v1829_v63 = vld [vmem:[%s2264_s1 + $0x1b0] sm:$0xff]   ;;  %v1830_v0 = vld [vmem:[%s2264_s1 + $0xb8] sm:$0xff]  }
  0x23   : >> { %v1831_v2 = vld [vmem:[%s2264_s1 + $0x1b8] sm:$0xff]   ;;  %v1833_v4 = vld [vmem:[%s2264_s1 + $0xc0] sm:$0xff]   ;;  %v2149_v5 = vld [vmem:[%s1953_s10 + $0x10] sm:$0xf] }
  0x24   : >> { %1561 = vmatpush3.bf16.msra.mxu1 %v1789_v9  ;;  %v1836_v6 = vld [vmem:[%s2264_s1 + $0x1c0] sm:$0xff]   ;;  %v1837_v7 = vld [vmem:[%s2264_s1 + $0xc8] sm:$0xff]   ;;  %v1839_v9 = vld [vmem:[%s2264_s1 + $0xd0] sm:$0xff]  }
  0x25   : >> { %1641 = vmatpush3.bf16.msra.mxu0 %v1790_v10  ;;  %1562 = vmatprep.subr.bf16.mxu1 %v1875_v1  ;;  %v1838_v8 = vld [vmem:[%s2264_s1 + $0x1c8] sm:$0xff]   ;;  %v1840_v10 = vld [vmem:[%s2264_s1 + $0x1d0] sm:$0xff]   ;;  %v1842_v12 = vld [vmem:[%s2264_s1 + $0x1d8] sm:$0xff]  }
  0x26   : >> { %1642 = vmatprep.subr.bf16.mxu0 %v1875_v1  ;;  %v1844_v15 = vld [vmem:[%s2264_s1 + $0x1e0] sm:$0xff]   ;;  %v1845_v17 = vld [vmem:[%s2264_s1 + $0xe8] sm:$0xff]   ;;  %v1849_v24 = vld [vmem:[%s2264_s1 + $0xf8] sm:$0xff]  }
  0x27   : >> { %v1850_v25 = vld [vmem:[%s2264_s1 + $0x1f8] sm:$0xff]   ;;  %vm1172_vm3 = vmand %vm1170_vm1, %vm1171_vm2 }
  0x28   : >> { %1563 = vmatpush3.bf16.msra.mxu1 %v1791_v14  ;;  %v1843_v14 = vld [vmem:[%s2264_s1 + $0xe0] sm:$0xff]  }
  0x29   : >> { %1643 = vmatpush3.bf16.msra.mxu0 %v1792_v16  ;;  %1564 = vmatprep.subr.bf16.mxu1 %v1875_v1  ;;  %v1433_v16 = vcombine.low %v2149_v5, %v2149_v5 }
  0x2a   : >> { %1644 = vmatprep.subr.bf16.mxu0 %v1875_v1 }
  0x2b   : >> { %v962_v19 = vshll.u32 %v1433_v16, 16  ;;  %v960_v22 = vshrl.u32 %v1433_v16, 16 }
  0x2c   : >> { %1565 = vmatpush3.bf16.msra.mxu1 %v1793_v18  ;;  %v1846_v18 = vld [vmem:[%s2264_s1 + $0x1e8] sm:$0xff]  }
  0x2d   : >> { %1645 = vmatpush3.bf16.msra.mxu0 %v1794_v20  ;;  %1566 = vmatprep.subr.bf16.mxu1 %v1875_v1  ;;  %v1847_v20 = vld [vmem:[%s2264_s1 + $0xf0] sm:$0xff]   ;;  %v964_v23 = vrot.slane %v962_v19, 1 }
  0x2e   : >> { %1646 = vmatprep.subr.bf16.mxu0 %v1875_v1 }
  0x30   : >> { %1567 = vmatpush3.bf16.msra.mxu1 %v1795_v21  ;;  %v1848_v21 = vld [vmem:[%s2264_s1 + $0x1f0] sm:$0xff]  }
  0x31   : >> { %1647 = vmatpush3.bf16.msra.mxu0 %v1796_v26  ;;  %1572 = vmatprep.subr.bf16.mxu1 %v1875_v1  ;;  %v965_v26 = vor.u32 %v964_v23, %v960_v22 }
  0x32   : >> { %1652 = vmatprep.subr.bf16.mxu0 %v1875_v1 }
  0x33   : >> { %1569 = vmatmul.mubr.bf16.vlgmr.msra.gmra.mrb[0].mxu1 %v198_v27  ;;  %v1851_v27 = vld [vmem:[%s2264_s1 + $0x200] sm:$0xff]  }
  0x34   : >> { %1573 = vmatpush3.bf16.msra.mxu1 %v1798_v28  ;;  %1649 = vmatmul.mubr.bf16.vlgmr.msra.gmra.mrb[0].mxu0 %v625_v29  ;;  %v1852_v28 = vld [vmem:[%s2264_s1 + $0x208] sm:$0xff]   ;;  %v1853_v29 = vld [vmem:[%s2264_s1 + $0x210] sm:$0xff]  }
  0x35   : >> { %1653 = vmatpush3.bf16.msra.mxu0 %v1800_v30  ;;  %1574 = vmatprep.subr.bf16.mxu1 %v1875_v1  ;;  %v1855_v30 = vld [vmem:[%s2264_s1 + $0x220] sm:$0xff]  }
  0x36   : >> { %1654 = vmatprep.subr.bf16.mxu0 %v1875_v1  ;;  %1588 = vmatprep.mubr.msk.bf16.mxu1 %vm1876_vm0, %v1875_v1 }
  0x37   : >> { %1668 = vmatprep.mubr.msk.bf16.mxu0 %vm1876_vm0, %v1875_v1 }
  0x38   : >> { %1575 = vmatpush3.bf16.msra.mxu1 %v1801_v31  ;;  %v1856_v31 = vld [vmem:[%s2264_s1 + $0x228] sm:$0xff]  }
  0x39   : >> { %1655 = vmatpush3.bf16.msra.mxu0 %v1802_v32  ;;  %1576 = vmatprep.subr.bf16.mxu1 %v1875_v1  ;;  %v1392_v32 = vld [vmem:[%s1953_s10 + $0x14] sm:$0x1]  ;;  %s1467_s10 = sshll.u32 %s1873_s19, 2  ;;  %s150_s19 = sadd.s32 1, %s1873_s19  }
  0x3a   : >> { %1656 = vmatprep.subr.bf16.mxu0 %v1875_v1  ;;  %s1169_s27 = scalar_lea.vmem %s1908_s18, %s1467_s10  ;;  %p147_p4 = scmp.ge.s32.totalorder %s150_s19, 7  }
  0x3c   : >> { %1577 = vmatpush3.bf16.msra.mxu1 %v1803_v33  ;;  %v1857_v33 = vld [vmem:[%s2264_s1 + $0x230] sm:$0xff]  }
  0x3d   : >> { %1657 = vmatpush3.bf16.msra.mxu0 %v1804_v34  ;;  %1578 = vmatprep.subr.bf16.mxu1 %v1875_v1  ;;  %v1458_v34 = vcombine.low %v2149_v5, %v1392_v32 }
  0x3e   : >> { %1658 = vmatprep.subr.bf16.mxu0 %v1875_v1 }
  0x40   : >> { %1579 = vmatpush3.bf16.msra.mxu1 %v1805_v35  ;;  %v1858_v35 = vld [vmem:[%s2264_s1 + $0x238] sm:$0xff]  }
  0x41   : >> { %1659 = vmatpush3.bf16.msra.mxu0 %v1806_v36  ;;  %1580 = vmatprep.subr.bf16.mxu1 %v1875_v1  ;;  %v1076_v36 = vrot.slane %v1458_v34, 1 }
  0x42   : >> { %1660 = vmatprep.subr.bf16.mxu0 %v1875_v1 }
  0x44   : >> { %1581 = vmatpush3.bf16.msra.mxu1 %v1807_v37 }
  0x45   : >> { %1661 = vmatpush3.bf16.msra.mxu0 %v1808_v38  ;;  %1582 = vmatprep.subr.bf16.mxu1 %v1875_v1 }
  0x46   : >> { %1662 = vmatprep.subr.bf16.mxu0 %v1875_v1 }
  0x48   : >> { %1583 = vmatpush3.bf16.msra.mxu1 %v1809_v40 }
  0x49   : >> { %1663 = vmatpush3.bf16.msra.mxu0 %v1810_v42  ;;  %1584 = vmatprep.subr.bf16.mxu1 %v1875_v1 }
  0x4a   : >> { %1664 = vmatprep.subr.bf16.mxu0 %v1875_v1 }
  0x4c   : >> { %1585 = vmatpush3.bf16.msra.mxu1 %v1811_v43 }
  0x4d   : >> { %1665 = vmatpush3.bf16.msra.mxu0 %v1812_v44  ;;  %1586 = vmatprep.subr.bf16.mxu1 %v1875_v1  ;;  %v1173_v44 = vld [vmem:[%s1169_s27] sm:$0xf] }
  0x4e   : >> { %1666 = vmatprep.subr.bf16.mxu0 %v1875_v1 }
  0x50   : >> { %1587 = vmatpush3.bf16.msra.mxu1 %v1813_v46 }
  0x51   : >> { %1667 = vmatpush3.bf16.msra.mxu0 %v1814_v48  ;;  %1592 = vmatprep.subr.bf16.mxu1 %v1875_v1 }
  0x52   : >> { %1672 = vmatprep.subr.bf16.mxu0 %v1875_v1 }
  0x53   : >> { %1589 = vmatmul.mubr.bf16.vlgmr.msra.gmra.mrb[0].mxu1 %v1964_v11  ;;  %v1841_v11 = vld [vmem:[%s2264_s1 + $0xd8] sm:$0xff]  }
  0x54   : >> { %1593 = vmatpush3.bf16.msra.mxu1 %v1815_v49  ;;  %1669 = vmatmul.mubr.bf16.vlgmr.msra.gmra.mrb[0].mxu0 %v736_v50 }
  0x55   : >> { %1673 = vmatpush3.bf16.msra.mxu0 %v1817_v51  ;;  %1594 = vmatprep.subr.bf16.mxu1 %v1875_v1 }
  0x56   : >> { %1674 = vmatprep.subr.bf16.mxu0 %v1875_v1  ;;  %1608 = vmatprep.mubr.msk.bf16.mxu1 %vm1876_vm0, %v1875_v1 }
  0x57   : >> { %1688 = vmatprep.mubr.msk.bf16.mxu0 %vm1876_vm0, %v1875_v1 }
  0x58   : >> { %1595 = vmatpush3.bf16.msra.mxu1 %v1818_v52 }
  0x59   : >> { %1675 = vmatpush3.bf16.msra.mxu0 %v1819_v53  ;;  %1596 = vmatprep.subr.bf16.mxu1 %v1875_v1 }
  0x5a   : >> { %1676 = vmatprep.subr.bf16.mxu0 %v1875_v1 }
  0x5c   : >> { %1597 = vmatpush3.bf16.msra.mxu1 %v1820_v54 }
  0x5d   : >> { %1677 = vmatpush3.bf16.msra.mxu0 %v1821_v55  ;;  %1598 = vmatprep.subr.bf16.mxu1 %v1875_v1 }
  0x5e   : >> { %1678 = vmatprep.subr.bf16.mxu0 %v1875_v1 }
  0x60   : >> { %1599 = vmatpush3.bf16.msra.mxu1 %v1822_v56 }
  0x61   : >> { %1679 = vmatpush3.bf16.msra.mxu0 %v1823_v57  ;;  %1600 = vmatprep.subr.bf16.mxu1 %v1875_v1 }
  0x62   : >> { %1680 = vmatprep.subr.bf16.mxu0 %v1875_v1 }
  0x64   : >> { %1601 = vmatpush3.bf16.msra.mxu1 %v1824_v58 }
  0x65   : >> { %1681 = vmatpush3.bf16.msra.mxu0 %v1825_v59  ;;  %1602 = vmatprep.subr.bf16.mxu1 %v1875_v1 }
  0x66   : >> { %1682 = vmatprep.subr.bf16.mxu0 %v1875_v1 }
  0x68   : >> { %1603 = vmatpush3.bf16.msra.mxu1 %v1826_v60 }
  0x69   : >> { %1683 = vmatpush3.bf16.msra.mxu0 %v1827_v61  ;;  %1604 = vmatprep.subr.bf16.mxu1 %v1875_v1 }
  0x6a   : >> { %1684 = vmatprep.subr.bf16.mxu0 %v1875_v1 }
  0x6c   : >> { %1605 = vmatpush3.bf16.msra.mxu1 %v1828_v62 }
  0x6d   : >> { %1685 = vmatpush3.bf16.msra.mxu0 %v1829_v63  ;;  %1606 = vmatprep.subr.bf16.mxu1 %v1875_v1 }
  0x6e   : >> { %1686 = vmatprep.subr.bf16.mxu0 %v1875_v1 }
  0x70   : >> { %1607 = vmatpush3.bf16.msra.mxu1 %v1830_v0 }
  0x71   : >> { %1687 = vmatpush3.bf16.msra.mxu0 %v1831_v2  ;;  %1612 = vmatprep.subr.bf16.mxu1 %v1875_v1 }
  0x72   : >> { %1692 = vmatprep.subr.bf16.mxu0 %v1875_v1 }
  0x73   : >> { %1609 = vmatmul.mubr.bf16.vlgmr.msra.gmra.mrb[0].mxu1 %v396_v3 }
  0x74   : >> { %1613 = vmatpush3.bf16.msra.mxu1 %v1833_v4  ;;  %1689 = vmatmul.mubr.bf16.vlgmr.msra.gmra.mrb[0].mxu0 %v2149_v5 }
  0x75   : >> { %1693 = vmatpush3.bf16.msra.mxu0 %v1836_v6  ;;  %1614 = vmatprep.subr.bf16.mxu1 %v1875_v1 }
  0x76   : >> { %1694 = vmatprep.subr.bf16.mxu0 %v1875_v1  ;;  %1628 = vmatprep.mubr.msk.bf16.mxu1 %vm1876_vm0, %v1875_v1 }
  0x77   : >> { %1708 = vmatprep.mubr.msk.bf16.mxu0 %vm1876_vm0, %v1875_v1 }
  0x78   : >> { %1615 = vmatpush3.bf16.msra.mxu1 %v1837_v7 }
  0x79   : >> { %1695 = vmatpush3.bf16.msra.mxu0 %v1838_v8  ;;  %1616 = vmatprep.subr.bf16.mxu1 %v1875_v1 }
  0x7a   : >> { %1696 = vmatprep.subr.bf16.mxu0 %v1875_v1 }
  0x7c   : >> { %1617 = vmatpush3.bf16.msra.mxu1 %v1839_v9 }
  0x7d   : >> { %1697 = vmatpush3.bf16.msra.mxu0 %v1840_v10  ;;  %1618 = vmatprep.subr.bf16.mxu1 %v1875_v1 }
  0x7e   : >> { %1698 = vmatprep.subr.bf16.mxu0 %v1875_v1 }
  0x80   : >> { %1619 = vmatpush3.bf16.msra.mxu1 %v1841_v11 }
  0x81   : >> { %1699 = vmatpush3.bf16.msra.mxu0 %v1842_v12  ;;  %1620 = vmatprep.subr.bf16.mxu1 %v1875_v1 }
  0x82   : >> { %1700 = vmatprep.subr.bf16.mxu0 %v1875_v1 }
  0x84   : >> { %1621 = vmatpush3.bf16.msra.mxu1 %v1843_v14 }
  0x85   : >> { %1701 = vmatpush3.bf16.msra.mxu0 %v1844_v15  ;;  %1622 = vmatprep.subr.bf16.mxu1 %v1875_v1 }
  0x86   : >> { %1702 = vmatprep.subr.bf16.mxu0 %v1875_v1 }
  0x88   : >> { %1623 = vmatpush3.bf16.msra.mxu1 %v1845_v17 }
  0x89   : >> { %1703 = vmatpush3.bf16.msra.mxu0 %v1846_v18  ;;  %1624 = vmatprep.subr.bf16.mxu1 %v1875_v1 }
  0x8a   : >> { %1704 = vmatprep.subr.bf16.mxu0 %v1875_v1 }
  0x8c   : >> { %1625 = vmatpush3.bf16.msra.mxu1 %v1847_v20 }
  0x8d   : >> { %1705 = vmatpush3.bf16.msra.mxu0 %v1848_v21  ;;  %1626 = vmatprep.subr.bf16.mxu1 %v1875_v1 }
  0x8e   : >> { %1706 = vmatprep.subr.bf16.mxu0 %v1875_v1 }
  0x90   : >> { %1627 = vmatpush3.bf16.msra.mxu1 %v1849_v24 }
  0x91   : >> { %1707 = vmatpush3.bf16.msra.mxu0 %v1850_v25 }
  0x92   : >> { %1712 = vmatprep.subr.bf16.mxu0 %v1875_v1 }
  0x93   : >> { %1629 = vmatmul.mubr.bf16.vlgmr.msra.gmra.mrb[0].mxu1 %v1969_v13  ;;  %v1854_v13 = vld [vmem:[%s2264_s1 + $0x218] sm:$0xff]  }
  0x94   : >> { %1709 = vmatmul.mubr.bf16.vlgmr.msra.gmra.mrb[0].mxu0 %v965_v26 }
  0x95   : >> { %1713 = vmatpush3.bf16.msra.mxu0 %v1851_v27  ;;  %1728 = vmatprep.mubr.msk.bf16.mxu0 %vm1876_vm0, %v1875_v1 }
  0x96   : >> { %1714 = vmatprep.subr.bf16.mxu0 %v1875_v1 }
  0x99   : >> { %1715 = vmatpush3.bf16.msra.mxu0 %v1852_v28 }
  0x9a   : >> { %1716 = vmatprep.subr.bf16.mxu0 %v1875_v1 }
  0x9d   : >> { %1717 = vmatpush3.bf16.msra.mxu0 %v1853_v29 }
  0x9e   : >> { %1718 = vmatprep.subr.bf16.mxu0 %v1875_v1 }
  0xa1   : >> { %1719 = vmatpush3.bf16.msra.mxu0 %v1854_v13 }
  0xa2   : >> { %1720 = vmatprep.subr.bf16.mxu0 %v1875_v1 }
  0xa5   : >> { %1721 = vmatpush3.bf16.msra.mxu0 %v1855_v30 }
  0xa6   : >> { %1722 = vmatprep.subr.bf16.mxu0 %v1875_v1 }
  0xa9   : >> { %1723 = vmatpush3.bf16.msra.mxu0 %v1856_v31 }
  0xaa   : >> { %1724 = vmatprep.subr.bf16.mxu0 %v1875_v1 }
  0xad   : >> { %1725 = vmatpush3.bf16.msra.mxu0 %v1857_v33 }
  0xae   : >> { %1726 = vmatprep.subr.bf16.mxu0 %v1875_v1 }
  0xb1   : >> { %1727 = vmatpush3.bf16.msra.mxu0 %v1858_v35 }
  0xb4   : >> { %1729 = vmatmul.mubr.bf16.vlgmr.msra.gmra.mrb[0].mxu0 %v1076_v36 }
 0x166   : >> { %v592_v37 = vpop.f32.mrb[0].mxu1 }
 0x167   : >> { %v1630_v38 = vpop.f32.mrb[1].mxu1 }
 0x168   : >> { %v595_v39 = vpop.f32.mrb[2].mxu1 }
 0x169   : >> { %v1631_v40 = vpop.f32.mrb[3].mxu1 }
 0x187   : >> { %v1160_v41 = vpop.f32.mrb[0].mxu0  ;;  %149 = sbr.rel (!%p147_p4) target bundleno = 18 (0x12), region = 77 }
 0x188   : >> { %v1732_v42 = vadd.f32 %v1160_v41, %v592_v37  ;;  %v1730_v43 = vpop.f32.mrb[1].mxu0 }
 0x189   : >> { %v1163_v45 = vpop.f32.mrb[2].mxu0 }
 0x18a   : >> { %v1167_v46 = vpack.c.bf16 %v1732_v42, %v1732_v42  ;;  %v1731_v47 = vpop.f32.mrb[3].mxu0 }
 0x18c   : >> { %v1174_v1 = vsel %vm1172_vm3, %v1167_v46, %v1173_v44 }
 0x18d   : >> { %1175 = vst [vmem:[%s1169_s27] sm:$0xf] %v1174_v1 }
 0x18e PF: > { %s12_s9 = sadd.s32 1, %s1869_s9  }
 0x18f   : > { %p9_p5 = scmp.ge.s32.totalorder %s12_s9, 4  }
 0x191   :  { %11 = sbr.rel (!%p9_p5) target bundleno = 1 (0x1), region = 88 }

// kernel: resnetv2_forward.53
= control target key start
LH: loop header
LB: loop body
LE: loop exit
PB: predicated region body
PF: predicated region fallthrough
CT: control target
= control target key end

     0   :  { %s458_s9 = smov 0   ;;  %s460_s10 = smov 0   ;;  %s516_s0 = inlined_call_operand.vmem [shape: bf16[2,16,256], index: 0, kind: input, shape index: {}]   ;;  %s517_s1 = inlined_call_operand.vmem [shape: f32[2,1,256], index: 1, kind: output, shape index: {0}]   ;;  %s518_s2 = inlined_call_operand.vmem [shape: f32[2,1,256], index: 2, kind: output, shape index: {1}]  }
   0x1   :  { %s462_s11 = smov 0  }
   0x2 LB: > { %s25_s12 = sadd.s32 1, %s435_s10  ;;  %p383_p0 = scmp.ge.s32.totalorder %s439_s11, 1  ;;  %s439_s11 = sphi %s462_s11, %s13_s11   ;;  %s435_s10 = sphi %s460_s10, %s522_s10   ;;  %s431_s9 = sphi %s458_s9, %s521_s9  }
   0x3   : > { %p27_p1 = scmp.ge.s32.totalorder %s25_s12, 2  ;;  %p135_p2 = scmp.lt.s32.totalorder %s439_s11, 3 }
   0x5   : > { %s524_s12 = smov (%p27_p1, %s25_s12), 0  ;;  %p136_p3 = pnand %p383_p0, %p135_p2 }
   0x6   : > { %p166_p4 = scmp.lt.s32.totalorder (!%p136_p3), %s431_s9, 1  ;;  %v188_v0 = vlaneseq (!%p136_p3)  ;;  %v441_v2 = vmov (!%p136_p3), 0.0   ;;  %v442_v21 = vmov (!%p136_p3), 1966171168  }
   0x7   : > { %139 = sbr.rel (%p136_p3) target bundleno = 46 (0x2e), region = 24  ;;  %v219_v22 = vunpack.c.l.s4 (!%p136_p3), %v442_v21 }
   0x8   : > { %vm476_vm0 = vcmp.lt.s32.totalorder (!%p136_p3), %v188_v0, 256  ;;  %v222_v32 = vshrl.u32 (!%p136_p3), %v188_v0, 7 }
   0x9   : > { %v220_v31 = vunpack.c.0.s8 (!%p136_p3), %v219_v22 }
   0xb   : > { %v223_v41 = vsub.s32 (!%p136_p3), %v220_v31, %v222_v32 }
   0xe   : > { %s526_s9 = smov (!%p166_p4, %s431_s9), 1 }
   0xf   : > { %s390_s13 = sshll.u32 %s526_s9, 4  ;;  %s386_s14 = sshll.u32 %s526_s9, 1 }
  0x10   : > { %s174_s17 = scalar_lea.vmem %s516_s0, %s390_s13  ;;  %s486_s20 = scalar_lea.vmem %s517_s1, %s386_s14 }
  0x11   : > { %192 = vst.msk [vmem:[%s486_s20] sm:$0x3] %vm476_vm0, %v441_v2  ;;  %v194_v3 = vld [vmem:[%s174_s17] sm:$0xff]  ;;  %v195_v4 = vld [vmem:[%s174_s17 + $0x8] sm:$0xff]  ;;  %s494_s23 = scalar_lea.vmem %s518_s2, %s386_s14 }
  0x12   : > { %v196_v5 = vunpack.c.l.bf16 %v194_v3  ;;  %v197_v6 = vunpack.c.h.bf16 %v194_v3  ;;  %v198_v7 = vunpack.c.l.bf16 %v195_v4  ;;  %v199_v8 = vunpack.c.h.bf16 %v195_v4  ;;  %193 = vst.msk [vmem:[%s494_s23] sm:$0x3] %vm476_vm0, %v441_v2 }
  0x14   : > { %v201_v9 = vadd.f32 %v198_v7, %v196_v5  ;;  %v208_v10 = vadd.f32 %v199_v8, %v197_v6  ;;  %v240_v11 = vmul.f32 %v196_v5, %v196_v5  ;;  %v241_v12 = vmul.f32 %v197_v6, %v197_v6 }
  0x15   : > { %v242_v13 = vmul.f32 %v198_v7, %v198_v7  ;;  %v243_v14 = vmul.f32 %v199_v8, %v199_v8 }
  0x16   : > { %v202_v15 = vrot.slane %v201_v9, 4  ;;  %v209_v16 = vrot.slane %v208_v10, 4 }
  0x17   : > { %v244_v17 = vadd.f32 %v242_v13, %v240_v11  ;;  %v251_v18 = vadd.f32 %v243_v14, %v241_v12 }
  0x18   : > { %v203_v19 = vadd.f32 %v202_v15, %v201_v9  ;;  %v210_v20 = vadd.f32 %v209_v16, %v208_v10  ;;  %v200_v48 = vld [vmem:[%s486_s20] sm:$0x3] }
  0x19   : > { %v245_v23 = vrot.slane %v244_v17, 4  ;;  %v252_v24 = vrot.slane %v251_v18, 4  ;;  %v239_v53 = vld [vmem:[%s494_s23] sm:$0x3] }
  0x1a   : > { %v204_v25 = vrot.slane %v203_v19, 2  ;;  %v211_v26 = vrot.slane %v210_v20, 2 }
  0x1b   : > { %v246_v27 = vadd.f32 %v245_v23, %v244_v17  ;;  %v253_v28 = vadd.f32 %v252_v24, %v251_v18 }
  0x1c   : > { %v205_v29 = vadd.f32 %v204_v25, %v203_v19  ;;  %v212_v30 = vadd.f32 %v211_v26, %v210_v20 }
  0x1d   : > { %v247_v33 = vrot.slane %v246_v27, 2  ;;  %v254_v34 = vrot.slane %v253_v28, 2 }
  0x1e   : > { %v206_v35 = vrot.slane %v205_v29, 1  ;;  %v213_v36 = vrot.slane %v212_v30, 1 }
  0x1f   : > { %v248_v37 = vadd.f32 %v247_v33, %v246_v27  ;;  %v255_v38 = vadd.f32 %v254_v34, %v253_v28 }
  0x20   : > { %v207_v39 = vadd.f32 %v206_v35, %v205_v29  ;;  %v214_v40 = vadd.f32 %v213_v36, %v212_v30 }
  0x21   : > { %v249_v42 = vrot.slane %v248_v37, 1  ;;  %v256_v43 = vrot.slane %v255_v38, 1 }
  0x22   : > { %v217_v44 = vcombine.low %v207_v39, %v214_v40 }
  0x23   : > { %v250_v45 = vadd.f32 %v249_v42, %v248_v37  ;;  %v257_v46 = vadd.f32 %v256_v43, %v255_v38 }
  0x24   : > { %v224_v47 = vrot.slane %v217_v44, %v223_v41 }
  0x25   : > { %v260_v49 = vcombine.low %v250_v45, %v257_v46 }
  0x26   : > { %v231_v50 = vrot.slane %v224_v47, %v223_v41 }
  0x27   : > { %v267_v51 = vrot.slane %v260_v49, %v223_v41 }
  0x28   : > { %v233_v52 = vadd.f32 %v231_v50, %v200_v48 }
  0x29   : > { %v274_v54 = vrot.slane %v267_v51, %v223_v41 }
  0x2a   : > { %238 = vst.msk [vmem:[%s486_s20] sm:$0x3] %vm476_vm0, %v233_v52 }
  0x2b   : > { %v276_v55 = vadd.f32 %v274_v54, %v239_v53 }
  0x2d   : > { %277 = vst.msk [vmem:[%s494_s23] sm:$0x3] %vm476_vm0, %v276_v55 }
  0x2e PF: > { %s13_s11 = sadd.s32 1, %s439_s11   ;;  %s521_s9 = smov %s435_s10 }
  0x2f   : > { %p10_p5 = scmp.ge.s32.totalorder %s13_s11, 4   ;;  %s522_s10 = smov %s524_s12 }
  0x31   :  { %12 = sbr.rel (!%p10_p5) target bundleno = 2 (0x2), region = 70 }

// kernel: resnetv2_forward.52
= control target key start
LH: loop header
LB: loop body
LE: loop exit
PB: predicated region body
PF: predicated region fallthrough
CT: control target
= control target key end

     0   :  { %v325_v1 = vmov 0   ;;  %s407_s1 = inlined_call_operand.vmem [shape: bf16[128,256], index: 1, kind: input, shape index: {}]   ;;  %s408_s0 = inlined_call_operand.vmem [shape: bf16[32,128], index: 0, kind: input, shape index: {}]   ;;  %s409_s2 = inlined_call_operand.vmem [shape: bf16[32,256], index: 2, kind: output, shape index: {}]  }
   0x1   :  { %v299_v0 = vld [vmem:[%s407_s1 + $0x4] ss:$8 sps:$4 sm:$0xff]   ;;  %176 = vmatprep.mubr.bf16.mxu0 %v325_v1  ;;  %186 = vmatprep.mubr.bf16.mxu1 %v325_v1  ;;  %v301_v2 = vld [vmem:[%s407_s1] ss:$8 sps:$4 sm:$0xff]   ;;  %v302_v3 = vld [vmem:[%s407_s1 + $0x14] ss:$8 sps:$4 sm:$0xff]  }
   0x2   :  { %144 = vmatprep.subr.bf16.mxu0 %v299_v0  ;;  %282 = vmatprep.subr.bf16.mxu1 %v299_v0  ;;  %v304_v4 = vld [vmem:[%s407_s1 + $0x10] ss:$8 sps:$4 sm:$0xff]   ;;  %v305_v5 = vld [vmem:[%s407_s1 + $0x24] ss:$8 sps:$4 sm:$0xff]   ;;  %v307_v6 = vld [vmem:[%s407_s1 + $0x20] ss:$8 sps:$4 sm:$0xff]  }
   0x3   :  { %145 = vmatpush1.bf16.msra.mxu0 %v301_v2  ;;  %290 = vmatpush1.bf16.msra.mxu1 %v301_v2  ;;  %v308_v7 = vld [vmem:[%s407_s1 + $0x34] ss:$8 sps:$4 sm:$0xff]   ;;  %v310_v8 = vld [vmem:[%s407_s1 + $0x30] ss:$8 sps:$4 sm:$0xff]   ;;  %v311_v9 = vld [vmem:[%s407_s1 + $0x44] ss:$8 sps:$4 sm:$0xff]  }
   0x4   :  { %146 = vmatprep.subr.bf16.mxu0 %v302_v3  ;;  %283 = vmatprep.subr.bf16.mxu1 %v302_v3  ;;  %v313_v10 = vld [vmem:[%s407_s1 + $0x40] ss:$8 sps:$4 sm:$0xff]   ;;  %v314_v11 = vld [vmem:[%s407_s1 + $0x54] ss:$8 sps:$4 sm:$0xff]   ;;  %v316_v12 = vld [vmem:[%s407_s1 + $0x50] ss:$8 sps:$4 sm:$0xff]  }
   0x5   :  { %v317_v13 = vld [vmem:[%s407_s1 + $0x64] ss:$8 sps:$4 sm:$0xff]   ;;  %v319_v14 = vld [vmem:[%s407_s1 + $0x60] ss:$8 sps:$4 sm:$0xff]   ;;  %v320_v15 = vld [vmem:[%s407_s1 + $0x74] ss:$8 sps:$4 sm:$0xff]  }
   0x6   :  { %v322_v16 = vld [vmem:[%s407_s1 + $0x70] ss:$8 sps:$4 sm:$0xff]   ;;  %v323_v17 = vld [vmem:[%s408_s0] sm:$0xff]   ;;  %v324_v18 = vld [vmem:[%s408_s0 + $0x8] sm:$0xff]  }
   0x7   :  { %147 = vmatpush1.bf16.msra.mxu0 %v304_v4  ;;  %291 = vmatpush1.bf16.msra.mxu1 %v304_v4 }
   0x8   :  { %148 = vmatprep.subr.bf16.mxu0 %v305_v5  ;;  %284 = vmatprep.subr.bf16.mxu1 %v305_v5 }
   0xb   :  { %149 = vmatpush1.bf16.msra.mxu0 %v307_v6  ;;  %292 = vmatpush1.bf16.msra.mxu1 %v307_v6 }
   0xc   :  { %150 = vmatprep.subr.bf16.mxu0 %v308_v7  ;;  %285 = vmatprep.subr.bf16.mxu1 %v308_v7 }
   0xf   :  { %151 = vmatpush1.bf16.msra.mxu0 %v310_v8  ;;  %293 = vmatpush1.bf16.msra.mxu1 %v310_v8 }
  0x10   :  { %152 = vmatprep.subr.bf16.mxu0 %v311_v9  ;;  %286 = vmatprep.subr.bf16.mxu1 %v311_v9 }
  0x13   :  { %153 = vmatpush1.bf16.msra.mxu0 %v313_v10  ;;  %294 = vmatpush1.bf16.msra.mxu1 %v313_v10 }
  0x14   :  { %154 = vmatprep.subr.bf16.mxu0 %v314_v11  ;;  %287 = vmatprep.subr.bf16.mxu1 %v314_v11 }
  0x17   :  { %155 = vmatpush1.bf16.msra.mxu0 %v316_v12  ;;  %295 = vmatpush1.bf16.msra.mxu1 %v316_v12 }
  0x18   :  { %156 = vmatprep.subr.bf16.mxu0 %v317_v13  ;;  %288 = vmatprep.subr.bf16.mxu1 %v317_v13 }
  0x1b   :  { %157 = vmatpush1.bf16.msra.mxu0 %v319_v14  ;;  %296 = vmatpush1.bf16.msra.mxu1 %v319_v14 }
  0x1c   :  { %158 = vmatprep.subr.bf16.mxu0 %v320_v15  ;;  %289 = vmatprep.subr.bf16.mxu1 %v320_v15 }
  0x1f   :  { %159 = vmatpush1.bf16.msra.mxu0 %v322_v16  ;;  %297 = vmatpush1.bf16.msra.mxu1 %v322_v16 }
  0x22   :  { %177 = vmatmul.mubr.bf16.vlgmr.msra.gmra.mrb[0].mxu0 %v323_v17  ;;  %187 = vmatmul.mubr.bf16.vlgmr.msra.gmra.mrb[0].mxu1 %v324_v18 }
  0xf5   :  { %v178_v19 = vpop.f32.mrb[0].mxu0  ;;  %v188_v20 = vpop.f32.mrb[0].mxu1 }
  0xf6   :  { %v180_v21 = vpop.f32.mrb[1].mxu0  ;;  %v190_v22 = vpop.f32.mrb[1].mxu1 }
  0xf7   :  { %v278_v23 = vpack.c.bf16 %v180_v21, %v178_v19  ;;  %v280_v24 = vpack.c.bf16 %v190_v22, %v188_v20  ;;  %v182_v25 = vpop.f32.mrb[2].mxu0  ;;  %v192_v26 = vpop.f32.mrb[2].mxu1 }
  0xf8   :  { %v184_v27 = vpop.f32.mrb[3].mxu0  ;;  %v194_v28 = vpop.f32.mrb[3].mxu1 }
  0xf9   :  { %248 = vst [vmem:[%s409_s2] sm:$0xff] %v278_v23  ;;  %250 = vst [vmem:[%s409_s2 + $0x10] sm:$0xff] %v280_v24  ;;  %v279_v29 = vpack.c.bf16 %v184_v27, %v182_v25  ;;  %v281_v30 = vpack.c.bf16 %v194_v28, %v192_v26 }
  0xfb   :  { %249 = vst [vmem:[%s409_s2 + $0x8] sm:$0xff] %v279_v29  ;;  %251 = vst [vmem:[%s409_s2 + $0x18] sm:$0xff] %v281_v30 }

// kernel: squeeze.52
= control target key start
LH: loop header
LB: loop body
LE: loop exit
PB: predicated region body
PF: predicated region fallthrough
CT: control target
= control target key end

     0   :  { %s354_s8 = smov 122   ;;  %s355_s9 = smov 124   ;;  %vm7_vm0 = vcmask 15360   ;;  %s653_s0 = inlined_call_operand.vmem [shape: f32[2,64], index: 0, kind: input, shape index: {}]   ;;  %s654_s1 = inlined_call_operand.vmem [shape: f32[2,32,2], index: 1, kind: output, shape index: {}]  }
   0x1   :  { %v4_v0 = vld [vmem:[%s653_s0] sm:$0x3]  ;;  %s353_s0 = smov 126   ;;  %s356_s10 = smov 120  }
   0x2   :  { %5 = vst [vmem:[#allocation0] sm:$0x3] %v4_v0  ;;  %s357_s11 = smov 118   ;;  %s358_s12 = smov 116  }
   0x3   :  { %s359_s13 = smov 114   ;;  %s360_s14 = smov 112  }
   0x4   :  { %s361_s15 = smov 110   ;;  %s362_s16 = smov 108  }
   0x5   :  { %s363_s17 = smov 106   ;;  %s364_s18 = smov 104  }
   0x6   :  { %s365_s19 = smov 102   ;;  %s366_s20 = smov 100  }
   0x7   :  { %s367_s21 = smov 98   ;;  %s368_s22 = smov 96  }
   0x8   :  { %s369_s23 = smov 94   ;;  %s370_s24 = smov 92  }
   0x9   :  { %v11_v1 = vld [vmem:[#allocation0] sm:$0x3]   ;;  %s371_s25 = smov 90   ;;  %s372_s26 = smov 88  }
   0xa   :  { %v27_v2 = vld [vmem:[#allocation0] sm:$0x3]   ;;  %12 = vrot.lane.b32.xlu0 %v11_v1, %s353_s0  ;;  %s373_s27 = smov 86   ;;  %s374_s28 = smov 84  }
   0xb   :  { %28 = vrot.lane.b32.xlu1 %v27_v2, %s354_s8  ;;  %v19_v3 = vld [vmem:[#allocation0] sm:$0x3]   ;;  %s375_s29 = smov 82   ;;  %s376_s30 = smov 80  }
   0xc   :  { %v35_v4 = vld [vmem:[#allocation0] sm:$0x3]   ;;  %s377_s6 = smov 78   ;;  %s378_s7 = smov 76  }
   0xd   :  { %v43_v5 = vld [vmem:[#allocation0] sm:$0x3]   ;;  %s379_s0 = smov 74   ;;  %s380_s8 = smov 72  }
   0xe   :  { %20 = vrot.lane.b32.xlu0 %v19_v3, %s355_s9  ;;  %v51_v6 = vld [vmem:[#allocation0] sm:$0x3]   ;;  %s381_s9 = smov 70  }
   0xf   :  { %36 = vrot.lane.b32.xlu1 %v35_v4, %s356_s10  ;;  %v59_v7 = vld [vmem:[#allocation0] sm:$0x3]   ;;  %s382_s10 = smov 68  }
  0x10   :  { %v67_v8 = vld [vmem:[#allocation0] sm:$0x3]  }
  0x11   :  { %v75_v9 = vld [vmem:[#allocation0] sm:$0x3]  }
  0x12   :  { %44 = vrot.lane.b32.xlu0 %v43_v5, %s357_s11  ;;  %v83_v10 = vld [vmem:[#allocation0] sm:$0x3]   ;;  %s383_s11 = smov 66  }
  0x13   :  { %52 = vrot.lane.b32.xlu1 %v51_v6, %s358_s12  ;;  %v91_v11 = vld [vmem:[#allocation0] sm:$0x3]  }
  0x14   :  { %v99_v12 = vld [vmem:[#allocation0] sm:$0x3]  }
  0x15   :  { %v107_v13 = vld [vmem:[#allocation0] sm:$0x3]  }
  0x16   :  { %60 = vrot.lane.b32.xlu0 %v59_v7, %s359_s13  ;;  %v115_v14 = vld [vmem:[#allocation0] sm:$0x3]  }
  0x17   :  { %68 = vrot.lane.b32.xlu1 %v67_v8, %s360_s14  ;;  %v123_v15 = vld [vmem:[#allocation0] sm:$0x3]  }
  0x18   :  { %v131_v16 = vld [vmem:[#allocation0] sm:$0x3]  }
  0x19   :  { %v139_v17 = vld [vmem:[#allocation0] sm:$0x3]  }
  0x1a   :  { %76 = vrot.lane.b32.xlu0 %v75_v9, %s361_s15  ;;  %v147_v18 = vld [vmem:[#allocation0] sm:$0x3]  }
  0x1b   :  { %84 = vrot.lane.b32.xlu1 %v83_v10, %s362_s16  ;;  %v155_v19 = vld [vmem:[#allocation0] sm:$0x3]  }
  0x1c   :  { %v163_v20 = vld [vmem:[#allocation0] sm:$0x3]  }
  0x1d   :  { %v171_v21 = vld [vmem:[#allocation0] sm:$0x3]  }
  0x1e   :  { %92 = vrot.lane.b32.xlu0 %v91_v11, %s363_s17  ;;  %v179_v22 = vld [vmem:[#allocation0] sm:$0x3]  }
  0x1f   :  { %100 = vrot.lane.b32.xlu1 %v99_v12, %s364_s18  ;;  %v187_v23 = vld [vmem:[#allocation0] sm:$0x3]  }
  0x20   :  { %v195_v24 = vld [vmem:[#allocation0] sm:$0x3]  }
  0x21   :  { %v203_v25 = vld [vmem:[#allocation0] sm:$0x3]  }
  0x22   :  { %108 = vrot.lane.b32.xlu0 %v107_v13, %s365_s19  ;;  %v211_v26 = vld [vmem:[#allocation0] sm:$0x3]  }
  0x23   :  { %116 = vrot.lane.b32.xlu1 %v115_v14, %s366_s20  ;;  %v6_v27 = vld [vmem:[#allocation0] sm:$0x3]  }
  0x24   :  { %8 = vst.msk [vmem:[%s654_s1] sm:$0x1] %vm7_vm0, %v6_v27   ;;  %259 = vst.msk [vmem:[%s654_s1 + $0x1f] sm:$0x2] %vm7_vm0, %v6_v27   ;;  %v219_v28 = vld [vmem:[#allocation0] sm:$0x3]  }
  0x25   :  { %v227_v29 = vld [vmem:[#allocation0] sm:$0x3]  }
  0x26   :  { %124 = vrot.lane.b32.xlu0 %v123_v15, %s367_s21  ;;  %v235_v30 = vld [vmem:[#allocation0] sm:$0x3]  }
  0x27   :  { %132 = vrot.lane.b32.xlu1 %v131_v16, %s368_s22  ;;  %v243_v31 = vld [vmem:[#allocation0] sm:$0x3]  }
  0x28   :  { %v251_v32 = vld [vmem:[#allocation0] sm:$0x3]  }
  0x2a   :  { %140 = vrot.lane.b32.xlu0 %v139_v17, %s369_s23 }
  0x2b   :  { %148 = vrot.lane.b32.xlu1 %v147_v18, %s370_s24 }
  0x2e   :  { %156 = vrot.lane.b32.xlu0 %v155_v19, %s371_s25 }
  0x2f   :  { %164 = vrot.lane.b32.xlu1 %v163_v20, %s372_s26 }
  0x32   :  { %172 = vrot.lane.b32.xlu0 %v171_v21, %s373_s27 }
  0x33   :  { %180 = vrot.lane.b32.xlu1 %v179_v22, %s374_s28 }
  0x36   :  { %188 = vrot.lane.b32.xlu0 %v187_v23, %s375_s29 }
  0x37   :  { %196 = vrot.lane.b32.xlu1 %v195_v24, %s376_s30 }
  0x3a   :  { %204 = vrot.lane.b32.xlu0 %v203_v25, %s377_s6 }
  0x3b   :  { %212 = vrot.lane.b32.xlu1 %v211_v26, %s378_s7 }
  0x3e   :  { %220 = vrot.lane.b32.xlu0 %v219_v28, %s379_s0 }
  0x3f   :  { %228 = vrot.lane.b32.xlu1 %v227_v29, %s380_s8 }
  0x42   :  { %236 = vrot.lane.b32.xlu0 %v235_v30, %s381_s9 }
  0x43   :  { %244 = vrot.lane.b32.xlu1 %v243_v31, %s382_s10 }
  0x46   :  { %252 = vrot.lane.b32.xlu0 %v251_v32, %s383_s11 }
  0x7c   :  { %v13_v33 = vpop.permute.xlu0 %12  }
  0x7d   :  { %v29_v34 = vpop.permute.xlu1 %28   ;;  %260 = vst.msk [vmem:[%s654_s1 + $0x1] sm:$0x1] %vm7_vm0, %v13_v33   ;;  %261 = vst.msk [vmem:[%s654_s1 + $0x20] sm:$0x2] %vm7_vm0, %v13_v33  }
  0x7e   :  { %264 = vst.msk [vmem:[%s654_s1 + $0x3] sm:$0x1] %vm7_vm0, %v29_v34   ;;  %265 = vst.msk [vmem:[%s654_s1 + $0x22] sm:$0x2] %vm7_vm0, %v29_v34  }
  0x80   :  { %v21_v35 = vpop.permute.xlu0 %20  }
  0x81   :  { %v37_v36 = vpop.permute.xlu1 %36   ;;  %262 = vst.msk [vmem:[%s654_s1 + $0x2] sm:$0x1] %vm7_vm0, %v21_v35   ;;  %263 = vst.msk [vmem:[%s654_s1 + $0x21] sm:$0x2] %vm7_vm0, %v21_v35  }
  0x82   :  { %266 = vst.msk [vmem:[%s654_s1 + $0x4] sm:$0x1] %vm7_vm0, %v37_v36   ;;  %267 = vst.msk [vmem:[%s654_s1 + $0x23] sm:$0x2] %vm7_vm0, %v37_v36  }
  0x84   :  { %v45_v37 = vpop.permute.xlu0 %44  }
  0x85   :  { %v53_v38 = vpop.permute.xlu1 %52   ;;  %268 = vst.msk [vmem:[%s654_s1 + $0x5] sm:$0x1] %vm7_vm0, %v45_v37   ;;  %269 = vst.msk [vmem:[%s654_s1 + $0x24] sm:$0x2] %vm7_vm0, %v45_v37  }
  0x86   :  { %270 = vst.msk [vmem:[%s654_s1 + $0x6] sm:$0x1] %vm7_vm0, %v53_v38   ;;  %271 = vst.msk [vmem:[%s654_s1 + $0x25] sm:$0x2] %vm7_vm0, %v53_v38  }
  0x88   :  { %v61_v39 = vpop.permute.xlu0 %60  }
  0x89   :  { %v69_v40 = vpop.permute.xlu1 %68   ;;  %272 = vst.msk [vmem:[%s654_s1 + $0x7] sm:$0x1] %vm7_vm0, %v61_v39   ;;  %273 = vst.msk [vmem:[%s654_s1 + $0x26] sm:$0x2] %vm7_vm0, %v61_v39  }
  0x8a   :  { %274 = vst.msk [vmem:[%s654_s1 + $0x8] sm:$0x1] %vm7_vm0, %v69_v40   ;;  %275 = vst.msk [vmem:[%s654_s1 + $0x27] sm:$0x2] %vm7_vm0, %v69_v40  }
  0x8c   :  { %v77_v41 = vpop.permute.xlu0 %76  }
  0x8d   :  { %v85_v42 = vpop.permute.xlu1 %84   ;;  %276 = vst.msk [vmem:[%s654_s1 + $0x9] sm:$0x1] %vm7_vm0, %v77_v41   ;;  %277 = vst.msk [vmem:[%s654_s1 + $0x28] sm:$0x2] %vm7_vm0, %v77_v41  }
  0x8e   :  { %278 = vst.msk [vmem:[%s654_s1 + $0xa] sm:$0x1] %vm7_vm0, %v85_v42   ;;  %279 = vst.msk [vmem:[%s654_s1 + $0x29] sm:$0x2] %vm7_vm0, %v85_v42  }
  0x90   :  { %v93_v43 = vpop.permute.xlu0 %92  }
  0x91   :  { %v101_v44 = vpop.permute.xlu1 %100   ;;  %280 = vst.msk [vmem:[%s654_s1 + $0xb] sm:$0x1] %vm7_vm0, %v93_v43   ;;  %281 = vst.msk [vmem:[%s654_s1 + $0x2a] sm:$0x2] %vm7_vm0, %v93_v43  }
  0x92   :  { %282 = vst.msk [vmem:[%s654_s1 + $0xc] sm:$0x1] %vm7_vm0, %v101_v44   ;;  %283 = vst.msk [vmem:[%s654_s1 + $0x2b] sm:$0x2] %vm7_vm0, %v101_v44  }
  0x94   :  { %v109_v45 = vpop.permute.xlu0 %108  }
  0x95   :  { %v117_v46 = vpop.permute.xlu1 %116   ;;  %284 = vst.msk [vmem:[%s654_s1 + $0xd] sm:$0x1] %vm7_vm0, %v109_v45   ;;  %285 = vst.msk [vmem:[%s654_s1 + $0x2c] sm:$0x2] %vm7_vm0, %v109_v45  }
  0x96   :  { %286 = vst.msk [vmem:[%s654_s1 + $0xe] sm:$0x1] %vm7_vm0, %v117_v46   ;;  %287 = vst.msk [vmem:[%s654_s1 + $0x2d] sm:$0x2] %vm7_vm0, %v117_v46  }
  0x98   :  { %v125_v47 = vpop.permute.xlu0 %124  }
  0x99   :  { %v133_v48 = vpop.permute.xlu1 %132   ;;  %288 = vst.msk [vmem:[%s654_s1 + $0xf] sm:$0x1] %vm7_vm0, %v125_v47   ;;  %289 = vst.msk [vmem:[%s654_s1 + $0x2e] sm:$0x2] %vm7_vm0, %v125_v47  }
  0x9a   :  { %290 = vst.msk [vmem:[%s654_s1 + $0x10] sm:$0x1] %vm7_vm0, %v133_v48   ;;  %291 = vst.msk [vmem:[%s654_s1 + $0x2f] sm:$0x2] %vm7_vm0, %v133_v48  }
  0x9c   :  { %v141_v49 = vpop.permute.xlu0 %140  }
  0x9d   :  { %v149_v50 = vpop.permute.xlu1 %148   ;;  %292 = vst.msk [vmem:[%s654_s1 + $0x11] sm:$0x1] %vm7_vm0, %v141_v49   ;;  %293 = vst.msk [vmem:[%s654_s1 + $0x30] sm:$0x2] %vm7_vm0, %v141_v49  }
  0x9e   :  { %294 = vst.msk [vmem:[%s654_s1 + $0x12] sm:$0x1] %vm7_vm0, %v149_v50   ;;  %295 = vst.msk [vmem:[%s654_s1 + $0x31] sm:$0x2] %vm7_vm0, %v149_v50  }
  0xa0   :  { %v157_v51 = vpop.permute.xlu0 %156  }
  0xa1   :  { %v165_v52 = vpop.permute.xlu1 %164   ;;  %296 = vst.msk [vmem:[%s654_s1 + $0x13] sm:$0x1] %vm7_vm0, %v157_v51   ;;  %297 = vst.msk [vmem:[%s654_s1 + $0x32] sm:$0x2] %vm7_vm0, %v157_v51  }
  0xa2   :  { %298 = vst.msk [vmem:[%s654_s1 + $0x14] sm:$0x1] %vm7_vm0, %v165_v52   ;;  %299 = vst.msk [vmem:[%s654_s1 + $0x33] sm:$0x2] %vm7_vm0, %v165_v52  }
  0xa4   :  { %v173_v53 = vpop.permute.xlu0 %172  }
  0xa5   :  { %v181_v54 = vpop.permute.xlu1 %180   ;;  %300 = vst.msk [vmem:[%s654_s1 + $0x15] sm:$0x1] %vm7_vm0, %v173_v53   ;;  %301 = vst.msk [vmem:[%s654_s1 + $0x34] sm:$0x2] %vm7_vm0, %v173_v53  }
  0xa6   :  { %302 = vst.msk [vmem:[%s654_s1 + $0x16] sm:$0x1] %vm7_vm0, %v181_v54   ;;  %303 = vst.msk [vmem:[%s654_s1 + $0x35] sm:$0x2] %vm7_vm0, %v181_v54  }
  0xa8   :  { %v189_v55 = vpop.permute.xlu0 %188  }
  0xa9   :  { %v197_v56 = vpop.permute.xlu1 %196   ;;  %304 = vst.msk [vmem:[%s654_s1 + $0x17] sm:$0x1] %vm7_vm0, %v189_v55   ;;  %305 = vst.msk [vmem:[%s654_s1 + $0x36] sm:$0x2] %vm7_vm0, %v189_v55  }
  0xaa   :  { %306 = vst.msk [vmem:[%s654_s1 + $0x18] sm:$0x1] %vm7_vm0, %v197_v56   ;;  %307 = vst.msk [vmem:[%s654_s1 + $0x37] sm:$0x2] %vm7_vm0, %v197_v56  }
  0xac   :  { %v205_v57 = vpop.permute.xlu0 %204  }
  0xad   :  { %v213_v58 = vpop.permute.xlu1 %212   ;;  %308 = vst.msk [vmem:[%s654_s1 + $0x19] sm:$0x1] %vm7_vm0, %v205_v57   ;;  %309 = vst.msk [vmem:[%s654_s1 + $0x38] sm:$0x2] %vm7_vm0, %v205_v57  }
  0xae   :  { %310 = vst.msk [vmem:[%s654_s1 + $0x1a] sm:$0x1] %vm7_vm0, %v213_v58   ;;  %311 = vst.msk [vmem:[%s654_s1 + $0x39] sm:$0x2] %vm7_vm0, %v213_v58  }
  0xb0   :  { %v221_v59 = vpop.permute.xlu0 %220  }
  0xb1   :  { %v229_v60 = vpop.permute.xlu1 %228   ;;  %312 = vst.msk [vmem:[%s654_s1 + $0x1b] sm:$0x1] %vm7_vm0, %v221_v59   ;;  %313 = vst.msk [vmem:[%s654_s1 + $0x3a] sm:$0x2] %vm7_vm0, %v221_v59  }
  0xb2   :  { %314 = vst.msk [vmem:[%s654_s1 + $0x1c] sm:$0x1] %vm7_vm0, %v229_v60   ;;  %315 = vst.msk [vmem:[%s654_s1 + $0x3b] sm:$0x2] %vm7_vm0, %v229_v60  }
  0xb4   :  { %v237_v61 = vpop.permute.xlu0 %236  }
  0xb5   :  { %v245_v62 = vpop.permute.xlu1 %244   ;;  %316 = vst.msk [vmem:[%s654_s1 + $0x1d] sm:$0x1] %vm7_vm0, %v237_v61   ;;  %317 = vst.msk [vmem:[%s654_s1 + $0x3c] sm:$0x2] %vm7_vm0, %v237_v61  }
  0xb6   :  { %318 = vst.msk [vmem:[%s654_s1 + $0x1e] sm:$0x1] %vm7_vm0, %v245_v62   ;;  %319 = vst.msk [vmem:[%s654_s1 + $0x3d] sm:$0x2] %vm7_vm0, %v245_v62  }
  0xb8   :  { %v253_v63 = vpop.permute.xlu0 %252  }
  0xb9   :  { %320 = vst.msk [vmem:[%s654_s1 + $0x1f] sm:$0x1] %vm7_vm0, %v253_v63   ;;  %321 = vst.msk [vmem:[%s654_s1 + $0x3e] sm:$0x2] %vm7_vm0, %v253_v63  }

// kernel: resnetv2_forward.57
= control target key start
LH: loop header
LB: loop body
LE: loop exit
PB: predicated region body
PF: predicated region fallthrough
CT: control target
= control target key end

     0   :  { %s996_s9 = smov 0   ;;  %s998_s10 = smov 0   ;;  %s1103_s0 = inlined_call_operand.vmem [shape: bf16[32,1152], index: 0, kind: input, shape index: {}]   ;;  %s1104_s1 = inlined_call_operand.vmem [shape: bf16[1152,128], index: 1, kind: input, shape index: {}]   ;;  %s1105_s2 = inlined_call_operand.vmem [shape: bf16[32,128], index: 2, kind: output, shape index: {}]  }
   0x1   :  { %s1000_s11 = smov 0   ;;  %s1002_s12 = smov 0  }
   0x2   :  { %s1004_s13 = smov 0  }
   0x3 LB: > { %s24_s14 = sadd.s32 1, %s974_s12  ;;  %p47_p1 = scmp.ne.s32.totalorder %s966_s10, %s962_s9  ;;  %s978_s13 = sphi %s1004_s13, %s12_s13   ;;  %s974_s12 = sphi %s1002_s12, %s1109_s12   ;;  %s970_s11 = sphi %s1000_s11, %s1108_s11   ;;  %s966_s10 = sphi %s998_s10, %s1107_s10   ;;  %s962_s9 = sphi %s996_s9, %s1106_s9  }
   0x4   : > { %p25_p0 = scmp.ge.s32.totalorder %s24_s14, 3  ;;  %p48_p2 = scmp.eq.s32.totalorder %s978_s13, 0 }
   0x5   : > { %s40_s16 = sadd.s32 1, %s966_s10  ;;  %p739_p5 = scmp.ge.s32.totalorder %s978_s13, 3 }
   0x6   : > { %s1111_s14 = smov (%p25_p0, %s24_s14), 0  ;;  %p49_p3 = por %p48_p2, %p47_p1 }
   0x7   : > { %s36_s15 = ssub.s32 %s974_s12, %s1111_s14  ;;  %129 = sbr.rel (%p739_p5) target bundleno = 23 (0x17), region = 16 }
   0x8   : > { %p38_p4 = scmp.eq.s32.totalorder %s36_s15, 0 }
   0xa   : > { %s1031_s17 = scalar_select %p38_p4, %s966_s10, %s40_s16  }
   0xe   : > { %132 = sbr.rel (!%p49_p3) target bundleno = 23 (0x17), region = 20  ;;  %s134_s18 = sand.u32 (%p49_p3), 1, %s966_s10  }
   0xf   : > { %s791_s19 = smul.u32 (%p49_p3), 12, %s974_s12 }
  0x10   : > { %s865_s20 = smul.u32 (%p49_p3), 48, %s134_s18 }
  0x11   : > { %s142_s23 = scalar_lea.vmem (%p49_p3), %s1103_s0, %s791_s19 }
  0x12   : > { %v157_v0 = vld [vmem:[%s142_s23] sm:$0xff] (%p49_p3)  ;;  %v161_v2 = vld [vmem:[%s142_s23 + $0x48] sm:$0xff] (%p49_p3)  ;;  %s136_s24 = scalar_lea.vmem (%p49_p3), [#allocation3], %s865_s20  ;;  %v745_v6 = vld [vmem:[%s142_s23 + $0x50] sm:$0xf] (%p49_p3) }
  0x13   : > { %v159_v1 = vld [vmem:[%s142_s23 + $0x24] sm:$0xff] (%p49_p3)  ;;  %158 = vst [vmem:[%s136_s24] sm:$0xff] (%p49_p3), %v157_v0  ;;  %162 = vst [vmem:[%s136_s24 + $0x18] sm:$0xff] (%p49_p3), %v161_v2  ;;  %v163_v3 = vld [vmem:[%s142_s23 + $0x6c] sm:$0xff] (%p49_p3) }
  0x14   : > { %160 = vst [vmem:[%s136_s24 + $0xc] sm:$0xff] (%p49_p3), %v159_v1  ;;  %v741_v4 = vld [vmem:[%s142_s23 + $0x8] sm:$0xf] (%p49_p3)  ;;  %v743_v5 = vld [vmem:[%s142_s23 + $0x2c] sm:$0xf] (%p49_p3)  ;;  %164 = vst [vmem:[%s136_s24 + $0x24] sm:$0xff] (%p49_p3), %v163_v3 }
  0x15   : > { %742 = vst [vmem:[%s136_s24 + $0x8] sm:$0xf] %v741_v4  ;;  %744 = vst [vmem:[%s136_s24 + $0x14] sm:$0xf] %v743_v5  ;;  %v747_v7 = vld [vmem:[%s142_s23 + $0x74] sm:$0xf] }
  0x16   : > { %746 = vst [vmem:[%s136_s24 + $0x20] sm:$0xf] %v745_v6  ;;  %748 = vst [vmem:[%s136_s24 + $0x2c] sm:$0xf] %v747_v7 }
  0x17 PF: > { %p749_p6 = scmp.ge.s32.totalorder %s978_s13, 1  ;;  %p196_p7 = scmp.lt.s32.totalorder %s978_s13, 4 }
  0x19   : > { %p197_p8 = pnand %p749_p6, %p196_p7 }
  0x1a   : > { %s203_s25 = sand.u32 (!%p197_p8), 1, %s962_s9   ;;  %s237_s26 = smul.u32 (!%p197_p8), 48, %s970_s11 }
  0x1b   : > { %200 = sbr.rel (%p197_p8) target bundleno = 314 (0x13a), region = 50  ;;  %p751_p10 = scmp.ne.s32.totalorder (!%p197_p8), %s970_s11, 0 }
  0x1c   : > { %s866_s27 = smul.u32 (!%p197_p8), 48, %s203_s25  ;;  %p238_p9 = scmp.lt.s32.totalorder (!%p197_p8), %s237_s26, 143 }
  0x1e   : > { %s1048_s4 = scalar_lea.vmem (!%p197_p8), [#allocation3], %s866_s27 }
  0x22   : > { %s1113_s26 = smov (!%p238_p9, %s237_s26), 143  ;;  %259 = sbr.rel (%p751_p10) target bundleno = 41 (0x29), region = 58 }
  0x23   : > { %s750_s28 = sshll.u32 %s1113_s26, 2  ;;  %v980_v8 = vmov (!%p751_p10), 0.0  }
  0x24   : > { %s1046_s3 = scalar_lea.vmem %s1104_s1, %s750_s28  ;;  %260 = vst [vmem:[#allocation2] sm:$0xff] (!%p751_p10), %v980_v8  ;;  %261 = vst [vmem:[#allocation2 + $0x8] sm:$0xff] (!%p751_p10), %v980_v8 }
  0x25   : > { %262 = vst [vmem:[#allocation2 + $0x10] sm:$0xff] (!%p751_p10), %v980_v8  ;;  %263 = vst [vmem:[#allocation2 + $0x18] sm:$0xff] (!%p751_p10), %v980_v8 }
  0x29 PF: > { %v908_v9 = vld [vmem:[%s1046_s3 + $0x40] sm:$0xff]   ;;  %v911_v12 = vld [vmem:[%s1046_s3 + $0x48] sm:$0xff]   ;;  %v914_v15 = vld [vmem:[%s1046_s3 + $0x50] sm:$0xff]   ;;  %p782_p11 = scmp.ne.s32.totalorder %s970_s11, 2 }
  0x2a   : > { %v909_v10 = vld [vmem:[%s1046_s3] sm:$0xff]   ;;  %807 = vmatprep.subr.bf16.mxu0 %v908_v9  ;;  %v912_v13 = vld [vmem:[%s1046_s3 + $0x8] sm:$0xff]   ;;  %v915_v16 = vld [vmem:[%s1046_s3 + $0x10] sm:$0xff]  }
  0x2b   : > { %v910_v11 = vld [vmem:[%s1046_s3 + $0x80] sm:$0xff]   ;;  %808 = vmatpush3.bf16.msra.mxu0 %v909_v10  ;;  %v913_v14 = vld [vmem:[%s1046_s3 + $0x88] sm:$0xff]   ;;  %v916_v17 = vld [vmem:[%s1046_s3 + $0x90] sm:$0xff]  }
  0x2c   : > { %845 = vmatprep.subr.bf16.mxu1 %v910_v11  ;;  %809 = vmatprep.subr.bf16.mxu0 %v911_v12  ;;  %v917_v18 = vld [vmem:[%s1046_s3 + $0x58] sm:$0xff]   ;;  %v920_v21 = vld [vmem:[%s1046_s3 + $0x60] sm:$0xff]   ;;  %v923_v24 = vld [vmem:[%s1046_s3 + $0x68] sm:$0xff]  }
  0x2d   : > { %846 = vmatpush3.bf16.msra.mxu1 %v910_v11  ;;  %v918_v19 = vld [vmem:[%s1046_s3 + $0x18] sm:$0xff]   ;;  %v922_v22 = vld [vmem:[%s1046_s3 + $0xa0] sm:$0xff]   ;;  %v925_v25 = vld [vmem:[%s1046_s3 + $0xa8] sm:$0xff]  }
  0x2e   : > { %847 = vmatprep.subr.bf16.mxu1 %v913_v14  ;;  %v919_v20 = vld [vmem:[%s1046_s3 + $0x98] sm:$0xff]   ;;  %v921_v23 = vld [vmem:[%s1046_s3 + $0x20] sm:$0xff]   ;;  %v924_v26 = vld [vmem:[%s1046_s3 + $0x28] sm:$0xff]  }
  0x2f   : > { %810 = vmatpush3.bf16.msra.mxu0 %v912_v13  ;;  %v926_v27 = vld [vmem:[%s1046_s3 + $0x70] sm:$0xff]   ;;  %v929_v30 = vld [vmem:[%s1046_s3 + $0x78] sm:$0xff]   ;;  %v264_v45 = vld [vmem:[#allocation2] sm:$0xff] }
  0x30   : > { %811 = vmatprep.subr.bf16.mxu0 %v914_v15  ;;  %v927_v28 = vld [vmem:[%s1046_s3 + $0x30] sm:$0xff]   ;;  %v931_v31 = vld [vmem:[%s1046_s3 + $0xb8] sm:$0xff]   ;;  %v265_v50 = vld [vmem:[#allocation2 + $0x8] sm:$0xff] }
  0x31   : > { %848 = vmatpush3.bf16.msra.mxu1 %v913_v14  ;;  %v928_v29 = vld [vmem:[%s1046_s3 + $0xb0] sm:$0xff]   ;;  %v930_v34 = vld [vmem:[%s1046_s3 + $0x38] sm:$0xff]  }
  0x32   : > { %849 = vmatprep.subr.bf16.mxu1 %v916_v17  ;;  %v934_v32 = vld [vmem:[%s1048_s4 + $0x4] ss:$12 sps:$4 sm:$0xff]   ;;  %v935_v33 = vld [vmem:[%s1048_s4 + $0x8] ss:$12 sps:$4 sm:$0xff]   ;;  %v932_v35 = vld [vmem:[%s1048_s4] ss:$12 sps:$4 sm:$0xff]  }
  0x33   : > { %812 = vmatpush3.bf16.msra.mxu0 %v915_v16  ;;  %532 = vmatprep.mubr.bf16.mxu0 %v934_v32  ;;  %v937_v36 = vld [vmem:[%s1048_s4 + $0x1c] ss:$12 sps:$4 sm:$0xff]   ;;  %v936_v37 = vld [vmem:[%s1048_s4 + $0x20] ss:$12 sps:$4 sm:$0xff]   ;;  %v939_v38 = vld [vmem:[%s1048_s4 + $0x18] ss:$12 sps:$4 sm:$0xff]  }
  0x34   : > { %813 = vmatprep.subr.bf16.mxu0 %v917_v18  ;;  %861 = vmatprep.mubr.bf16.mxu1 %v935_v33  ;;  %v266_v59 = vld [vmem:[#allocation2 + $0x10] sm:$0xff]  ;;  %v267_v63 = vld [vmem:[#allocation2 + $0x18] sm:$0xff] }
  0x35   : > { %850 = vmatpush3.bf16.msra.mxu1 %v916_v17 }
  0x36   : > { %851 = vmatprep.subr.bf16.mxu1 %v919_v20 }
  0x37   : > { %814 = vmatpush3.bf16.msra.mxu0 %v918_v19 }
  0x38   : > { %815 = vmatprep.subr.bf16.mxu0 %v920_v21 }
  0x39   : > { %852 = vmatpush3.bf16.msra.mxu1 %v919_v20 }
  0x3a   : > { %853 = vmatprep.subr.bf16.mxu1 %v922_v22 }
  0x3b   : > { %816 = vmatpush3.bf16.msra.mxu0 %v921_v23 }
  0x3c   : > { %817 = vmatprep.subr.bf16.mxu0 %v923_v24 }
  0x3d   : > { %854 = vmatpush3.bf16.msra.mxu1 %v922_v22 }
  0x3e   : > { %855 = vmatprep.subr.bf16.mxu1 %v925_v25 }
  0x3f   : > { %818 = vmatpush3.bf16.msra.mxu0 %v924_v26 }
  0x40   : > { %819 = vmatprep.subr.bf16.mxu0 %v926_v27 }
  0x41   : > { %856 = vmatpush3.bf16.msra.mxu1 %v925_v25 }
  0x42   : > { %857 = vmatprep.subr.bf16.mxu1 %v928_v29 }
  0x43   : > { %820 = vmatpush3.bf16.msra.mxu0 %v927_v28 }
  0x44   : > { %821 = vmatprep.subr.bf16.mxu0 %v929_v30 }
  0x45   : > { %858 = vmatpush3.bf16.msra.mxu1 %v928_v29 }
  0x46   : > { %859 = vmatprep.subr.bf16.mxu1 %v931_v31 }
  0x47   : > { %822 = vmatpush3.bf16.msra.mxu0 %v930_v34 }
  0x49   : > { %860 = vmatpush3.bf16.msra.mxu1 %v931_v31 }
  0x4a   : > { %533 = vmatmul.mubr.bf16.vlgmr.msra.gmra.mrb[0].mxu0 %v932_v35 }
  0x4b   : > { %540 = vmatprep.mubr.bf16.mxu0 %v937_v36 }
  0x4c   : > { %862 = vmatmul.mubr.bf16.vlgmr.msra.gmra.mrb[0].mxu1 %v936_v37 }
  0x52   : > { %541 = vmatmul.mubr.bf16.gmra.mrb[4].mxu0 %v939_v38 }
 0x11d   : > { %v823_v39 = vpop.f32.mrb[0].mxu0 }
 0x11e   : > { %v824_v40 = vpop.f32.mrb[1].mxu0 }
 0x11f   : > { %v825_v41 = vadd.f32 %v824_v40, %v823_v39  ;;  %v826_v42 = vpop.f32.mrb[2].mxu0  ;;  %v863_v43 = vpop.f32.mrb[0].mxu1 }
 0x120   : > { %v827_v44 = vpop.f32.mrb[3].mxu0  ;;  %v583_v46 = vpop.f32.mrb[1].mxu1 }
 0x121   : > { %v828_v47 = vadd.f32 %v827_v44, %v826_v42  ;;  %v584_v48 = vadd.f32 %v825_v41, %v583_v46  ;;  %v864_v49 = vpop.f32.mrb[2].mxu1 }
 0x122   : > { %v586_v51 = vpop.f32.mrb[3].mxu1 }
 0x123   : > { %v598_v52 = vadd.f32 %v584_v48, %v264_v45  ;;  %v587_v53 = vadd.f32 %v828_v47, %v586_v51 }
 0x125   : > { %602 = vst [vmem:[#allocation2] sm:$0xff] %v598_v52  ;;  %v599_v54 = vadd.f32 %v587_v53, %v265_v50  ;;  %v829_v55 = vpop.f32.mrb[4].mxu0 }
 0x126   : > { %v830_v56 = vpop.f32.mrb[5].mxu0 }
 0x127   : > { %603 = vst [vmem:[#allocation2 + $0x8] sm:$0xff] %v599_v54  ;;  %v831_v57 = vadd.f32 %v830_v56, %v829_v55  ;;  %v832_v58 = vpop.f32.mrb[6].mxu0 }
 0x128   : > { %v833_v60 = vpop.f32.mrb[7].mxu0 }
 0x129   : > { %v592_v61 = vadd.f32 %v863_v43, %v831_v57  ;;  %v834_v62 = vadd.f32 %v833_v60, %v832_v58  ;;  %609 = sbr.rel (%p782_p11) target bundleno = 314 (0x13a), region = 62 }
 0x12b   : > { %v600_v0 = vadd.f32 %v592_v61, %v266_v59  ;;  %v595_v1 = vadd.f32 %v864_v49, %v834_v62 }
 0x12c   : > { %v610_v3 = vld [vmem:[#allocation2] sm:$0xff] (!%p782_p11) }
 0x12d   : > { %604 = vst [vmem:[#allocation2 + $0x10] sm:$0xff] %v600_v0  ;;  %v601_v2 = vadd.f32 %v595_v1, %v267_v63 }
 0x12e   : > { %v611_v4 = vld [vmem:[#allocation2 + $0x8] sm:$0xff] (!%p782_p11) }
 0x12f   : > { %605 = vst [vmem:[#allocation2 + $0x18] sm:$0xff] %v601_v2  ;;  %v799_v6 = vpack.c.bf16 (!%p782_p11), %v611_v4, %v610_v3 }
 0x131   : > { %800 = vst [vmem:[%s1105_s2] sm:$0xff] %v799_v6  }
 0x134   : > { %v612_v5 = vld [vmem:[#allocation2 + $0x10] sm:$0xff] }
 0x136   : > { %v613_v7 = vld [vmem:[#allocation2 + $0x18] sm:$0xff] }
 0x137   : > { %v804_v8 = vpack.c.bf16 %v613_v7, %v612_v5 }
 0x139   : > { %806 = vst [vmem:[%s1105_s2 + $0x8] sm:$0xff] %v804_v8  }
 0x13a PF: > { %s12_s13 = sadd.s32 1, %s978_s13   ;;  %s1106_s9 = smov %s966_s10 }
 0x13b   : > { %p9_p12 = scmp.ge.s32.totalorder %s12_s13, 5   ;;  %s1107_s10 = smov %s1031_s17 }
 0x13c   : > { %s1108_s11 = smov %s974_s12  ;;  %s1109_s12 = smov %s1111_s14 }
 0x13d   :  { %11 = sbr.rel (!%p9_p12) target bundleno = 3 (0x3), region = 106 }

// kernel: resnetv2_forward.58
= control target key start
LH: loop header
LB: loop body
LE: loop exit
PB: predicated region body
PF: predicated region fallthrough
CT: control target
= control target key end

     0   :  { %s374_s9 = smov 0   ;;  %s376_s10 = smov 0   ;;  %s410_s0 = inlined_call_operand.vmem [shape: bf16[2,16,128], index: 0, kind: input, shape index: {}]   ;;  %s411_s1 = inlined_call_operand.vmem [shape: f32[2,1,128], index: 1, kind: output, shape index: {0}]   ;;  %s412_s2 = inlined_call_operand.vmem [shape: f32[2,1,128], index: 2, kind: output, shape index: {1}]  }
   0x1   :  { %s378_s11 = smov 0  }
   0x2 LB: > { %s25_s12 = sadd.s32 1, %s352_s10  ;;  %p299_p0 = scmp.ge.s32.totalorder %s356_s11, 1  ;;  %s356_s11 = sphi %s378_s11, %s13_s11   ;;  %s352_s10 = sphi %s376_s10, %s414_s10   ;;  %s348_s9 = sphi %s374_s9, %s413_s9  }
   0x3   : > { %p27_p1 = scmp.ge.s32.totalorder %s25_s12, 2  ;;  %p134_p2 = scmp.lt.s32.totalorder %s356_s11, 3 }
   0x5   : > { %s416_s12 = smov (%p27_p1, %s25_s12), 0  ;;  %p135_p3 = pnand %p299_p0, %p134_p2 }
   0x6   : > { %p162_p4 = scmp.lt.s32.totalorder (!%p135_p3), %s348_s9, 1  ;;  %v358_v0 = vmov (!%p135_p3), 0.0  }
   0x7   : > { %138 = sbr.rel (%p135_p3) target bundleno = 39 (0x27), region = 24 }
   0xe   : > { %s418_s9 = smov (!%p162_p4, %s348_s9), 1 }
   0xf   : > { %s304_s13 = sshll.u32 %s418_s9, 3  ;;  %s173_s16 = scalar_lea.vmem %s411_s1, %s418_s9 }
  0x10   : > { %s169_s19 = scalar_lea.vmem %s410_s0, %s304_s13  ;;  %181 = vst [vmem:[%s173_s16] sm:$0x1] %v358_v0  ;;  %s176_s22 = scalar_lea.vmem %s412_s2, %s418_s9 }
  0x11   : > { %v306_v1 = vld [vmem:[%s169_s19] sm:$0xff]   ;;  %182 = vst [vmem:[%s176_s22] sm:$0x1] %v358_v0 }
  0x12   : > { %v307_v2 = vunpack.c.l.bf16 %v306_v1  ;;  %v308_v3 = vunpack.c.h.bf16 %v306_v1 }
  0x14   : > { %v198_v4 = vmul.f32 %v307_v2, %v307_v2  ;;  %v199_v5 = vmul.f32 %v308_v3, %v308_v3  ;;  %v188_v6 = vadd.f32 %v308_v3, %v307_v2 }
  0x16   : > { %v189_v7 = vrot.slane %v188_v6, 4  ;;  %v200_v8 = vadd.f32 %v199_v5, %v198_v4 }
  0x17   : > { %v187_v17 = vld [vmem:[%s173_s16] sm:$0x1] }
  0x18   : > { %v190_v9 = vadd.f32 %v189_v7, %v188_v6  ;;  %v201_v10 = vrot.slane %v200_v8, 4  ;;  %v197_v20 = vld [vmem:[%s176_s22] sm:$0x1] }
  0x1a   : > { %v191_v11 = vrot.slane %v190_v9, 2  ;;  %v202_v12 = vadd.f32 %v201_v10, %v200_v8 }
  0x1c   : > { %v192_v13 = vadd.f32 %v191_v11, %v190_v9  ;;  %v203_v14 = vrot.slane %v202_v12, 2 }
  0x1e   : > { %v193_v15 = vrot.slane %v192_v13, 1  ;;  %v204_v16 = vadd.f32 %v203_v14, %v202_v12 }
  0x20   : > { %v194_v18 = vadd.f32 %v193_v15, %v192_v13  ;;  %v205_v19 = vrot.slane %v204_v16, 1 }
  0x22   : > { %v195_v21 = vadd.f32 %v194_v18, %v187_v17  ;;  %v206_v22 = vadd.f32 %v205_v19, %v204_v16 }
  0x24   : > { %196 = vst [vmem:[%s173_s16] sm:$0x1] %v195_v21  ;;  %v207_v23 = vadd.f32 %v206_v22, %v197_v20 }
  0x26   : > { %208 = vst [vmem:[%s176_s22] sm:$0x1] %v207_v23 }
  0x27 PF: > { %s13_s11 = sadd.s32 1, %s356_s11   ;;  %s413_s9 = smov %s352_s10 }
  0x28   : > { %p10_p5 = scmp.ge.s32.totalorder %s13_s11, 4   ;;  %s414_s10 = smov %s416_s12 }
  0x2a   :  { %12 = sbr.rel (!%p10_p5) target bundleno = 2 (0x2), region = 70 }

// kernel: squeeze.57
= control target key start
LH: loop header
LB: loop body
LE: loop exit
PB: predicated region body
PF: predicated region fallthrough
CT: control target
= control target key end

     0   :  { %s192_s10 = smov 104   ;;  %s193_s11 = smov 112   ;;  %vm11_vm0 = vcmask 64512   ;;  %s358_s0 = inlined_call_operand.vmem [shape: f32[2,256], index: 0, kind: input, shape index: {}]   ;;  %s359_s1 = inlined_call_operand.vmem [shape: f32[2,32,8], index: 1, kind: output, shape index: {}]  }
   0x1   :  { %v142_v0 = vld [vmem:[%s358_s0 + $0x2] sm:$0x3]  ;;  %v8_v1 = vld [vmem:[%s358_s0] sm:$0x3]  ;;  %s191_s0 = smov 120   ;;  %s194_s12 = smov 96  }
   0x2   :  { %7 = vst [vmem:[#allocation0 + $0x8] sm:$0x3] %v142_v0  ;;  %9 = vst [vmem:[#allocation0] sm:$0x3] %v8_v1  ;;  %s195_s13 = smov 88   ;;  %s196_s14 = smov 80  }
   0x3   :  { %s197_s15 = smov 72   ;;  %s198_s16 = smov 64  }
   0x4   :  { %s199_s25 = smov 56   ;;  %s200_s26 = smov 48  }
   0x5   :  { %s201_s27 = smov 40   ;;  %s202_s28 = smov 32  }
   0x6   :  { %s203_s29 = smov 24   ;;  %s204_s30 = smov 16  }
   0x7   :  { %s205_s2 = smov 8  }
   0x9   :  { %v22_v2 = vld.sshfl [vmem:[#allocation0] sm:$0xff pattern:$0x99999180]  }
   0xa   :  { %23 = vrot.lane.b32.xlu0 %v22_v2, %s191_s0  ;;  %39 = vrot.lane.b32.xlu1 %v22_v2, %s192_s10  ;;  %v10_v3 = vld [vmem:[#allocation0] sm:$0x3]   ;;  %v16_v4 = vld [vmem:[#allocation0 + $0x8] sm:$0x3]  }
   0xb   :  { %12 = vst.msk [vmem:[%s359_s1] sm:$0x1] %vm11_vm0, %v10_v3   ;;  %143 = vst.msk [vmem:[%s359_s1 + $0x1f] sm:$0x2] %vm11_vm0, %v10_v3  }
   0xc   :  { %144 = vst.msk [vmem:[%s359_s1 + $0x10] sm:$0x1] %vm11_vm0, %v16_v4   ;;  %145 = vst.msk [vmem:[%s359_s1 + $0x2f] sm:$0x2] %vm11_vm0, %v16_v4  }
   0xe   :  { %31 = vrot.lane.b32.xlu0 %v22_v2, %s193_s11  ;;  %47 = vrot.lane.b32.xlu1 %v22_v2, %s194_s12 }
  0x12   :  { %55 = vrot.lane.b32.xlu0 %v22_v2, %s195_s13  ;;  %63 = vrot.lane.b32.xlu1 %v22_v2, %s196_s14 }
  0x16   :  { %71 = vrot.lane.b32.xlu0 %v22_v2, %s197_s15  ;;  %79 = vrot.lane.b32.xlu1 %v22_v2, %s198_s16 }
  0x1a   :  { %87 = vrot.lane.b32.xlu0 %v22_v2, %s199_s25  ;;  %95 = vrot.lane.b32.xlu1 %v22_v2, %s200_s26 }
  0x1e   :  { %103 = vrot.lane.b32.xlu0 %v22_v2, %s201_s27  ;;  %111 = vrot.lane.b32.xlu1 %v22_v2, %s202_s28 }
  0x22   :  { %119 = vrot.lane.b32.xlu0 %v22_v2, %s203_s29  ;;  %127 = vrot.lane.b32.xlu1 %v22_v2, %s204_s30 }
  0x26   :  { %135 = vrot.lane.b32.xlu0 %v22_v2, %s205_s2 }
  0x7c   :  { %v24_v5 = vpop.permute.xlu0 %23   ;;  %v40_v6 = vpop.permute.xlu1 %39  }
  0x7d   :  { %146 = vst.msk [vmem:[%s359_s1 + $0x1] ss:$16 sm:$0x3] %vm11_vm0, %v24_v5   ;;  %147 = vst.msk [vmem:[%s359_s1 + $0x1] ss:$16 sm:$0xc] %vm11_vm0, %v24_v5  }
  0x7e   :  { %150 = vst.msk [vmem:[%s359_s1 + $0x3] ss:$16 sm:$0x3] %vm11_vm0, %v40_v6   ;;  %151 = vst.msk [vmem:[%s359_s1 + $0x3] ss:$16 sm:$0xc] %vm11_vm0, %v40_v6  }
  0x80   :  { %v32_v7 = vpop.permute.xlu0 %31   ;;  %v48_v8 = vpop.permute.xlu1 %47  }
  0x81   :  { %148 = vst.msk [vmem:[%s359_s1 + $0x2] ss:$16 sm:$0x3] %vm11_vm0, %v32_v7   ;;  %149 = vst.msk [vmem:[%s359_s1 + $0x2] ss:$16 sm:$0xc] %vm11_vm0, %v32_v7  }
  0x82   :  { %152 = vst.msk [vmem:[%s359_s1 + $0x4] ss:$16 sm:$0x3] %vm11_vm0, %v48_v8   ;;  %153 = vst.msk [vmem:[%s359_s1 + $0x4] ss:$16 sm:$0xc] %vm11_vm0, %v48_v8  }
  0x84   :  { %v56_v9 = vpop.permute.xlu0 %55   ;;  %v64_v10 = vpop.permute.xlu1 %63  }
  0x85   :  { %154 = vst.msk [vmem:[%s359_s1 + $0x5] ss:$16 sm:$0x3] %vm11_vm0, %v56_v9   ;;  %155 = vst.msk [vmem:[%s359_s1 + $0x5] ss:$16 sm:$0xc] %vm11_vm0, %v56_v9  }
  0x86   :  { %156 = vst.msk [vmem:[%s359_s1 + $0x6] ss:$16 sm:$0x3] %vm11_vm0, %v64_v10   ;;  %157 = vst.msk [vmem:[%s359_s1 + $0x6] ss:$16 sm:$0xc] %vm11_vm0, %v64_v10  }
  0x88   :  { %v72_v11 = vpop.permute.xlu0 %71   ;;  %v80_v12 = vpop.permute.xlu1 %79  }
  0x89   :  { %158 = vst.msk [vmem:[%s359_s1 + $0x7] ss:$16 sm:$0x3] %vm11_vm0, %v72_v11   ;;  %159 = vst.msk [vmem:[%s359_s1 + $0x7] ss:$16 sm:$0xc] %vm11_vm0, %v72_v11  }
  0x8a   :  { %160 = vst.msk [vmem:[%s359_s1 + $0x8] ss:$16 sm:$0x3] %vm11_vm0, %v80_v12   ;;  %161 = vst.msk [vmem:[%s359_s1 + $0x8] ss:$16 sm:$0xc] %vm11_vm0, %v80_v12  }
  0x8c   :  { %v88_v13 = vpop.permute.xlu0 %87   ;;  %v96_v14 = vpop.permute.xlu1 %95  }
  0x8d   :  { %162 = vst.msk [vmem:[%s359_s1 + $0x9] ss:$16 sm:$0x3] %vm11_vm0, %v88_v13   ;;  %163 = vst.msk [vmem:[%s359_s1 + $0x9] ss:$16 sm:$0xc] %vm11_vm0, %v88_v13  }
  0x8e   :  { %164 = vst.msk [vmem:[%s359_s1 + $0xa] ss:$16 sm:$0x3] %vm11_vm0, %v96_v14   ;;  %165 = vst.msk [vmem:[%s359_s1 + $0xa] ss:$16 sm:$0xc] %vm11_vm0, %v96_v14  }
  0x90   :  { %v104_v15 = vpop.permute.xlu0 %103   ;;  %v112_v16 = vpop.permute.xlu1 %111  }
  0x91   :  { %166 = vst.msk [vmem:[%s359_s1 + $0xb] ss:$16 sm:$0x3] %vm11_vm0, %v104_v15   ;;  %167 = vst.msk [vmem:[%s359_s1 + $0xb] ss:$16 sm:$0xc] %vm11_vm0, %v104_v15  }
  0x92   :  { %168 = vst.msk [vmem:[%s359_s1 + $0xc] ss:$16 sm:$0x3] %vm11_vm0, %v112_v16   ;;  %169 = vst.msk [vmem:[%s359_s1 + $0xc] ss:$16 sm:$0xc] %vm11_vm0, %v112_v16  }
  0x94   :  { %v120_v17 = vpop.permute.xlu0 %119   ;;  %v128_v18 = vpop.permute.xlu1 %127  }
  0x95   :  { %170 = vst.msk [vmem:[%s359_s1 + $0xd] ss:$16 sm:$0x3] %vm11_vm0, %v120_v17   ;;  %171 = vst.msk [vmem:[%s359_s1 + $0xd] ss:$16 sm:$0xc] %vm11_vm0, %v120_v17  }
  0x96   :  { %172 = vst.msk [vmem:[%s359_s1 + $0xe] ss:$16 sm:$0x3] %vm11_vm0, %v128_v18   ;;  %173 = vst.msk [vmem:[%s359_s1 + $0xe] ss:$16 sm:$0xc] %vm11_vm0, %v128_v18  }
  0x98   :  { %v136_v19 = vpop.permute.xlu0 %135  }
  0x99   :  { %174 = vst.msk [vmem:[%s359_s1 + $0xf] ss:$16 sm:$0x3] %vm11_vm0, %v136_v19   ;;  %175 = vst.msk [vmem:[%s359_s1 + $0xf] ss:$16 sm:$0xc] %vm11_vm0, %v136_v19  }

// kernel: resnetv2_forward.59
= control target key start
LH: loop header
LB: loop body
LE: loop exit
PB: predicated region body
PF: predicated region fallthrough
CT: control target
= control target key end

     0   :  { %s473_s12 = smov 0   ;;  %s475_s13 = smov 0   ;;  %s509_s0 = inlined_call_operand.vmem [shape: bf16[2,16,128], index: 0, kind: input, shape index: {}]   ;;  %s510_s1 = inlined_call_operand.vmem [shape: f32[2,1,128], index: 1, kind: input, shape index: {}]   ;;  %s511_s2 = inlined_call_operand.vmem [shape: f32[2,1,128], index: 2, kind: input, shape index: {}]   ;;  %s512_s3 = inlined_call_operand.vmem [shape: bf16[2,16,128], index: 3, kind: output, shape index: {}]  }
   0x1   :  { %s477_s14 = smov 0  }
   0x2 LB: > { %s25_s15 = sadd.s32 1, %s447_s13  ;;  %p381_p0 = scmp.ge.s32.totalorder %s451_s14, 1  ;;  %s451_s14 = sphi %s477_s14, %s13_s14   ;;  %s447_s13 = sphi %s475_s13, %s514_s13   ;;  %s443_s12 = sphi %s473_s12, %s513_s12  }
   0x3   : > { %p27_p1 = scmp.ge.s32.totalorder %s25_s15, 2  ;;  %p174_p2 = scmp.lt.s32.totalorder %s451_s14, 3 }
   0x5   : > { %s516_s15 = smov (%p27_p1, %s25_s15), 0  ;;  %p175_p3 = pnand %p381_p0, %p174_p2 }
   0x6   : > { %p213_p4 = scmp.lt.s32.totalorder (!%p175_p3), %s443_s12, 1 }
   0x7   : > { %178 = sbr.rel (%p175_p3) target bundleno = 29 (0x1d), region = 32 }
   0xe   : > { %s518_s12 = smov (!%p213_p4, %s443_s12), 1 }
   0xf   : > { %s392_s16 = sshll.u32 %s518_s12, 3  ;;  %s224_s19 = scalar_lea.vmem %s510_s1, %s518_s12 }
  0x10   : > { %s220_s22 = scalar_lea.vmem %s509_s0, %s392_s16  ;;  %s227_s25 = scalar_lea.vmem %s511_s2, %s518_s12  ;;  %v386_v1 = vld [vmem:[%s224_s19] ss:$0 sm:$0xff] }
  0x11   : > { %v397_v0 = vld [vmem:[%s220_s22] sm:$0xff]   ;;  %s236_s28 = scalar_lea.vmem %s512_s3, %s392_s16 }
  0x12   : > { %v398_v2 = vunpack.c.l.bf16 %v397_v0  ;;  %v399_v3 = vunpack.c.h.bf16 %v397_v0  ;;  %v387_v4 = vld [vmem:[%s227_s25] ss:$0 sm:$0xff] }
  0x14   : > { %v249_v5 = vmul.f32 %v398_v2, %v386_v1  ;;  %v250_v6 = vmul.f32 %v399_v3, %v386_v1 }
  0x16   : > { %v258_v7 = vadd.f32 %v387_v4, %v249_v5  ;;  %v259_v8 = vadd.f32 %v387_v4, %v250_v6 }
  0x18   : > { %v260_v9 = vmax.f32 %v258_v7, 0.0  ;;  %v261_v10 = vmax.f32 %v259_v8, 0.0 }
  0x1a   : > { %v403_v11 = vpack.c.bf16 %v261_v10, %v260_v9 }
  0x1c   : > { %404 = vst [vmem:[%s236_s28] sm:$0xff] %v403_v11  }
  0x1d PF: > { %s13_s14 = sadd.s32 1, %s451_s14   ;;  %s513_s12 = smov %s447_s13 }
  0x1e   : > { %p10_p5 = scmp.ge.s32.totalorder %s13_s14, 4   ;;  %s514_s13 = smov %s516_s15 }
  0x20   :  { %12 = sbr.rel (!%p10_p5) target bundleno = 2 (0x2), region = 68 }

// kernel: resnetv2_forward.62
= control target key start
LH: loop header
LB: loop body
LE: loop exit
PB: predicated region body
PF: predicated region fallthrough
CT: control target
= control target key end

     0   :  { %s773_s21 = smov 0   ;;  %s775_s22 = smov 0   ;;  %s826_s0 = inlined_call_operand.vmem [shape: bf16[2,16,256], index: 0, kind: input, shape index: {}]   ;;  %s827_s1 = inlined_call_operand.vmem [shape: f32[2,1,256], index: 1, kind: input, shape index: {}]   ;;  %s828_s2 = inlined_call_operand.vmem [shape: f32[2,1,256], index: 2, kind: input, shape index: {}]   ;;  %s829_s3 = inlined_call_operand.vmem [shape: bf16[2,16,256], index: 3, kind: input, shape index: {}]   ;;  %s830_s4 = inlined_call_operand.vmem [shape: f32[2,1,256], index: 4, kind: input, shape index: {}]   ;;  %s831_s5 = inlined_call_operand.vmem [shape: f32[2,1,256], index: 5, kind: input, shape index: {}]   ;;  %s832_s6 = inlined_call_operand.vmem [shape: bf16[2,16,256], index: 6, kind: output, shape index: {}]  }
   0x1   :  { %s777_s23 = smov 0  }
   0x2 LB: > { %s28_s24 = sadd.s32 1, %s732_s22  ;;  %p670_p0 = scmp.ge.s32.totalorder %s736_s23, 1  ;;  %s736_s23 = sphi %s777_s23, %s16_s23   ;;  %s732_s22 = sphi %s775_s22, %s834_s22   ;;  %s728_s21 = sphi %s773_s21, %s833_s21  }
   0x3   : > { %p30_p1 = scmp.ge.s32.totalorder %s28_s24, 2  ;;  %p288_p2 = scmp.lt.s32.totalorder %s736_s23, 3 }
   0x5   : > { %s836_s24 = smov (%p30_p1, %s28_s24), 0  ;;  %p289_p3 = pnand %p670_p0, %p288_p2 }
   0x6   : > { %p355_p4 = scmp.lt.s32.totalorder (!%p289_p3), %s728_s21, 1  ;;  %v411_v0 = vlaneseq (!%p289_p3) }
   0x7   : > { %292 = sbr.rel (%p289_p3) target bundleno = 36 (0x24), region = 44 }
   0x8   : > { %v412_v1 = vshrl.u32 (!%p289_p3), %v411_v0, 7 }
   0xa   : > { %v413_v2 = vsub.s32 (!%p289_p3), 0, %v412_v1  ;;  %v417_v3 = vsub.s32 (!%p289_p3), 1, %v412_v1 }
   0xe   : > { %s838_s21 = smov (!%p355_p4, %s728_s21), 1 }
   0xf   : > { %s791_s25 = sshll.u32 %s838_s21, 4  ;;  %s673_s26 = sshll.u32 %s838_s21, 1 }
  0x10   : > { %s363_s29 = scalar_lea.vmem %s826_s0, %s791_s25  ;;  %s368_s8 = scalar_lea.vmem %s827_s1, %s673_s26 }
  0x11   : > { %s372_s11 = scalar_lea.vmem %s828_s2, %s673_s26  ;;  %s382_s14 = scalar_lea.vmem %s829_s3, %s791_s25  ;;  %v403_v4 = vld [vmem:[%s363_s29] sm:$0xff]  ;;  %v404_v5 = vld [vmem:[%s363_s29 + $0x8] sm:$0xff] }
  0x12   : > { %v409_v6 = vld [vmem:[%s368_s8] sm:$0x3]  ;;  %s387_s17 = scalar_lea.vmem %s830_s4, %s673_s26  ;;  %s391_s20 = scalar_lea.vmem %s831_s5, %s673_s26  ;;  %v405_v7 = vunpack.c.l.bf16 %v403_v4  ;;  %v406_v8 = vunpack.c.h.bf16 %v403_v4  ;;  %v407_v9 = vunpack.c.l.bf16 %v404_v5  ;;  %v408_v10 = vunpack.c.h.bf16 %v404_v5  ;;  %v442_v13 = vld [vmem:[%s382_s14 + $0x8] sm:$0xff] }
  0x13   : > { %v425_v11 = vld [vmem:[%s372_s11] sm:$0x3]  ;;  %v414_v14 = vrot.slane %v409_v6, %v413_v2  ;;  %v418_v15 = vrot.slane %v409_v6, %v417_v3  ;;  %v445_v22 = vunpack.c.l.bf16 %v442_v13  ;;  %v446_v23 = vunpack.c.h.bf16 %v442_v13  ;;  %s401_s27 = scalar_lea.vmem %s832_s6, %s791_s25 }
  0x14   : > { %v441_v12 = vld [vmem:[%s382_s14] sm:$0xff]  ;;  %v430_v16 = vrot.slane %v425_v11, %v413_v2  ;;  %v434_v17 = vrot.slane %v425_v11, %v417_v3 }
  0x15   : > { %v447_v18 = vld [vmem:[%s387_s17] sm:$0x3]  ;;  %v443_v20 = vunpack.c.l.bf16 %v441_v12  ;;  %v444_v21 = vunpack.c.h.bf16 %v441_v12  ;;  %v421_v24 = vmul.f32 %v414_v14, %v405_v7  ;;  %v422_v25 = vmul.f32 %v418_v15, %v406_v8 }
  0x16   : > { %v463_v19 = vld [vmem:[%s391_s20] sm:$0x3]  ;;  %v452_v26 = vrot.slane %v447_v18, %v413_v2  ;;  %v456_v27 = vrot.slane %v447_v18, %v417_v3  ;;  %v423_v30 = vmul.f32 %v414_v14, %v407_v9  ;;  %v424_v31 = vmul.f32 %v418_v15, %v408_v10 }
  0x17   : > { %v468_v28 = vrot.slane %v463_v19, %v413_v2  ;;  %v472_v29 = vrot.slane %v463_v19, %v417_v3  ;;  %v437_v32 = vadd.f32 %v430_v16, %v421_v24  ;;  %v438_v33 = vadd.f32 %v434_v17, %v422_v25 }
  0x18   : > { %v459_v34 = vmul.f32 %v452_v26, %v443_v20  ;;  %v460_v35 = vmul.f32 %v456_v27, %v444_v21  ;;  %v439_v36 = vadd.f32 %v430_v16, %v423_v30  ;;  %v440_v37 = vadd.f32 %v434_v17, %v424_v31 }
  0x19   : > { %v461_v38 = vmul.f32 %v452_v26, %v445_v22  ;;  %v462_v39 = vmul.f32 %v456_v27, %v446_v23 }
  0x1a   : > { %v475_v40 = vadd.f32 %v468_v28, %v459_v34  ;;  %v476_v41 = vadd.f32 %v472_v29, %v460_v35 }
  0x1b   : > { %v477_v42 = vadd.f32 %v468_v28, %v461_v38  ;;  %v478_v43 = vadd.f32 %v472_v29, %v462_v39 }
  0x1c   : > { %v479_v44 = vadd.f32 %v475_v40, %v437_v32  ;;  %v480_v45 = vadd.f32 %v476_v41, %v438_v33 }
  0x1d   : > { %v481_v46 = vadd.f32 %v477_v42, %v439_v36  ;;  %v482_v47 = vadd.f32 %v478_v43, %v440_v37 }
  0x1e   : > { %v483_v48 = vmax.f32 %v479_v44, 0.0  ;;  %v484_v49 = vmax.f32 %v480_v45, 0.0 }
  0x1f   : > { %v485_v50 = vmax.f32 %v481_v46, 0.0  ;;  %v486_v51 = vmax.f32 %v482_v47, 0.0 }
  0x20   : > { %v688_v52 = vpack.c.bf16 %v484_v49, %v483_v48 }
  0x21   : > { %v689_v53 = vpack.c.bf16 %v486_v51, %v485_v50 }
  0x22   : > { %499 = vst [vmem:[%s401_s27] sm:$0xff] %v688_v52 }
  0x23   : > { %500 = vst [vmem:[%s401_s27 + $0x8] sm:$0xff] %v689_v53 }
  0x24 PF: > { %s16_s23 = sadd.s32 1, %s736_s23   ;;  %s833_s21 = smov %s732_s22 }
  0x25   : > { %p13_p5 = scmp.ge.s32.totalorder %s16_s23, 4   ;;  %s834_s22 = smov %s836_s24 }
  0x27   :  { %15 = sbr.rel (!%p13_p5) target bundleno = 2 (0x2), region = 89 }

// kernel: resnetv2_forward.63
= control target key start
LH: loop header
LB: loop body
LE: loop exit
PB: predicated region body
PF: predicated region fallthrough
CT: control target
= control target key end

     0   :  { %s970_s1 = inlined_call_operand.vmem [shape: bf16[256,512], index: 1, kind: input, shape index: {}]   ;;  %s971_s0 = inlined_call_operand.vmem [shape: bf16[16,256], index: 0, kind: input, shape index: {}]   ;;  %s972_s2 = inlined_call_operand.vmem [shape: bf16[16,512], index: 2, kind: output, shape index: {}]  }
   0x1   :  { %v646_v0 = vld [vmem:[%s970_s1 + $0x4] ss:$16 sps:$4 sm:$0xff]   ;;  %v648_v1 = vld [vmem:[%s970_s1 + $0xc] ss:$16 sps:$4 sm:$0xff]   ;;  %v650_v2 = vld [vmem:[%s970_s1] ss:$16 sps:$4 sm:$0xff]  }
   0x2   :  { %427 = vmatprep.subr.bf16.mxu0 %v646_v0  ;;  %v651_v3 = vld [vmem:[%s970_s1 + $0x8] ss:$16 sps:$4 sm:$0xff]   ;;  %470 = vmatprep.subr.bf16.mxu1 %v648_v1  ;;  %v652_v4 = vld [vmem:[%s970_s1 + $0x24] ss:$16 sps:$4 sm:$0xff]   ;;  %v654_v5 = vld [vmem:[%s970_s1 + $0x2c] ss:$16 sps:$4 sm:$0xff]  }
   0x3   :  { %428 = vmatpush1.bf16.msra.mxu0 %v650_v2  ;;  %471 = vmatpush1.bf16.msra.mxu1 %v651_v3  ;;  %v656_v6 = vld [vmem:[%s970_s1 + $0x20] ss:$16 sps:$4 sm:$0xff]   ;;  %v657_v7 = vld [vmem:[%s970_s1 + $0x28] ss:$16 sps:$4 sm:$0xff]   ;;  %v658_v8 = vld [vmem:[%s970_s1 + $0x44] ss:$16 sps:$4 sm:$0xff]  }
   0x4   :  { %429 = vmatprep.subr.bf16.mxu0 %v652_v4  ;;  %472 = vmatprep.subr.bf16.mxu1 %v654_v5  ;;  %v660_v9 = vld [vmem:[%s970_s1 + $0x4c] ss:$16 sps:$4 sm:$0xff]   ;;  %v662_v10 = vld [vmem:[%s970_s1 + $0x40] ss:$16 sps:$4 sm:$0xff]   ;;  %v663_v11 = vld [vmem:[%s970_s1 + $0x48] ss:$16 sps:$4 sm:$0xff]  }
   0x5   :  { %v664_v12 = vld [vmem:[%s970_s1 + $0x64] ss:$16 sps:$4 sm:$0xff]   ;;  %v666_v13 = vld [vmem:[%s970_s1 + $0x6c] ss:$16 sps:$4 sm:$0xff]   ;;  %v668_v14 = vld [vmem:[%s970_s1 + $0x60] ss:$16 sps:$4 sm:$0xff]  }
   0x6   :  { %v669_v15 = vld [vmem:[%s970_s1 + $0x68] ss:$16 sps:$4 sm:$0xff]   ;;  %v670_v16 = vld [vmem:[%s970_s1 + $0x84] ss:$16 sps:$4 sm:$0xff]   ;;  %v672_v17 = vld [vmem:[%s970_s1 + $0x8c] ss:$16 sps:$4 sm:$0xff]  }
   0x7   :  { %430 = vmatpush1.bf16.msra.mxu0 %v656_v6  ;;  %473 = vmatpush1.bf16.msra.mxu1 %v657_v7  ;;  %v674_v18 = vld [vmem:[%s970_s1 + $0x80] ss:$16 sps:$4 sm:$0xff]   ;;  %v675_v19 = vld [vmem:[%s970_s1 + $0x88] ss:$16 sps:$4 sm:$0xff]   ;;  %v676_v20 = vld [vmem:[%s970_s1 + $0xa4] ss:$16 sps:$4 sm:$0xff]  }
   0x8   :  { %431 = vmatprep.subr.bf16.mxu0 %v658_v8  ;;  %474 = vmatprep.subr.bf16.mxu1 %v660_v9  ;;  %v678_v21 = vld [vmem:[%s970_s1 + $0xac] ss:$16 sps:$4 sm:$0xff]   ;;  %v680_v22 = vld [vmem:[%s970_s1 + $0xa0] ss:$16 sps:$4 sm:$0xff]   ;;  %v681_v23 = vld [vmem:[%s970_s1 + $0xa8] ss:$16 sps:$4 sm:$0xff]  }
   0x9   :  { %v682_v24 = vld [vmem:[%s970_s1 + $0xc4] ss:$16 sps:$4 sm:$0xff]   ;;  %v684_v25 = vld [vmem:[%s970_s1 + $0xcc] ss:$16 sps:$4 sm:$0xff]   ;;  %v686_v26 = vld [vmem:[%s970_s1 + $0xc0] ss:$16 sps:$4 sm:$0xff]  }
   0xa   :  { %v687_v27 = vld [vmem:[%s970_s1 + $0xc8] ss:$16 sps:$4 sm:$0xff]   ;;  %v688_v28 = vld [vmem:[%s970_s1 + $0xe4] ss:$16 sps:$4 sm:$0xff]   ;;  %v690_v29 = vld [vmem:[%s970_s1 + $0xec] ss:$16 sps:$4 sm:$0xff]  }
   0xb   :  { %432 = vmatpush1.bf16.msra.mxu0 %v662_v10  ;;  %475 = vmatpush1.bf16.msra.mxu1 %v663_v11  ;;  %v692_v30 = vld [vmem:[%s970_s1 + $0xe0] ss:$16 sps:$4 sm:$0xff]   ;;  %v693_v31 = vld [vmem:[%s970_s1 + $0xe8] ss:$16 sps:$4 sm:$0xff]   ;;  %v694_v32 = vld [vmem:[%s970_s1 + $0x104] ss:$16 sps:$4 sm:$0xff]  }
   0xc   :  { %433 = vmatprep.subr.bf16.mxu0 %v664_v12  ;;  %476 = vmatprep.subr.bf16.mxu1 %v666_v13  ;;  %v696_v33 = vld [vmem:[%s970_s1 + $0x10c] ss:$16 sps:$4 sm:$0xff]   ;;  %v698_v34 = vld [vmem:[%s970_s1 + $0x100] ss:$16 sps:$4 sm:$0xff]   ;;  %v699_v35 = vld [vmem:[%s970_s1 + $0x108] ss:$16 sps:$4 sm:$0xff]  }
   0xd   :  { %v700_v36 = vld [vmem:[%s970_s1 + $0x124] ss:$16 sps:$4 sm:$0xff]   ;;  %v702_v37 = vld [vmem:[%s970_s1 + $0x12c] ss:$16 sps:$4 sm:$0xff]   ;;  %v704_v38 = vld [vmem:[%s970_s1 + $0x120] ss:$16 sps:$4 sm:$0xff]  }
   0xe   :  { %v705_v39 = vld [vmem:[%s970_s1 + $0x128] ss:$16 sps:$4 sm:$0xff]   ;;  %v706_v40 = vld [vmem:[%s970_s1 + $0x144] ss:$16 sps:$4 sm:$0xff]   ;;  %v708_v41 = vld [vmem:[%s970_s1 + $0x14c] ss:$16 sps:$4 sm:$0xff]  }
   0xf   :  { %434 = vmatpush1.bf16.msra.mxu0 %v668_v14  ;;  %477 = vmatpush1.bf16.msra.mxu1 %v669_v15  ;;  %v710_v42 = vld [vmem:[%s970_s1 + $0x140] ss:$16 sps:$4 sm:$0xff]   ;;  %v711_v43 = vld [vmem:[%s970_s1 + $0x148] ss:$16 sps:$4 sm:$0xff]   ;;  %v712_v44 = vld [vmem:[%s970_s1 + $0x164] ss:$16 sps:$4 sm:$0xff]  }
  0x10   :  { %435 = vmatprep.subr.bf16.mxu0 %v670_v16  ;;  %478 = vmatprep.subr.bf16.mxu1 %v672_v17  ;;  %v714_v45 = vld [vmem:[%s970_s1 + $0x16c] ss:$16 sps:$4 sm:$0xff]   ;;  %v716_v47 = vld [vmem:[%s970_s1 + $0x160] ss:$16 sps:$4 sm:$0xff]   ;;  %v717_v48 = vld [vmem:[%s970_s1 + $0x168] ss:$16 sps:$4 sm:$0xff]  }
  0x11   :  { %v744_v46 = vld [vmem:[%s971_s0 + $0x4] ss:$8 sps:$4 sm:$0xff]   ;;  %v722_v51 = vld [vmem:[%s970_s1 + $0x180] ss:$16 sps:$4 sm:$0xff]   ;;  %v723_v52 = vld [vmem:[%s970_s1 + $0x188] ss:$16 sps:$4 sm:$0xff]  }
  0x12   :  { %v718_v49 = vld [vmem:[%s970_s1 + $0x184] ss:$16 sps:$4 sm:$0xff]   ;;  %v720_v50 = vld [vmem:[%s970_s1 + $0x18c] ss:$16 sps:$4 sm:$0xff]   ;;  %459 = vmatprep.mubr.bf16.mxu0 %v744_v46  ;;  %502 = vmatprep.mubr.bf16.mxu1 %v744_v46  ;;  %v728_v55 = vld [vmem:[%s970_s1 + $0x1a0] ss:$16 sps:$4 sm:$0xff]  }
  0x13   :  { %436 = vmatpush1.bf16.msra.mxu0 %v674_v18  ;;  %479 = vmatpush1.bf16.msra.mxu1 %v675_v19  ;;  %v724_v53 = vld [vmem:[%s970_s1 + $0x1a4] ss:$16 sps:$4 sm:$0xff]   ;;  %v726_v54 = vld [vmem:[%s970_s1 + $0x1ac] ss:$16 sps:$4 sm:$0xff]   ;;  %v729_v56 = vld [vmem:[%s970_s1 + $0x1a8] ss:$16 sps:$4 sm:$0xff]  }
  0x14   :  { %437 = vmatprep.subr.bf16.mxu0 %v676_v20  ;;  %480 = vmatprep.subr.bf16.mxu1 %v678_v21  ;;  %v730_v57 = vld [vmem:[%s970_s1 + $0x1c4] ss:$16 sps:$4 sm:$0xff]   ;;  %v732_v58 = vld [vmem:[%s970_s1 + $0x1cc] ss:$16 sps:$4 sm:$0xff]   ;;  %v734_v59 = vld [vmem:[%s970_s1 + $0x1c0] ss:$16 sps:$4 sm:$0xff]  }
  0x15   :  { %v735_v60 = vld [vmem:[%s970_s1 + $0x1c8] ss:$16 sps:$4 sm:$0xff]   ;;  %v736_v61 = vld [vmem:[%s970_s1 + $0x1e4] ss:$16 sps:$4 sm:$0xff]   ;;  %v738_v62 = vld [vmem:[%s970_s1 + $0x1ec] ss:$16 sps:$4 sm:$0xff]  }
  0x16   :  { %v740_v63 = vld [vmem:[%s970_s1 + $0x1e0] ss:$16 sps:$4 sm:$0xff]   ;;  %v741_v0 = vld [vmem:[%s970_s1 + $0x1e8] ss:$16 sps:$4 sm:$0xff]  }
  0x17   :  { %438 = vmatpush1.bf16.msra.mxu0 %v680_v22  ;;  %481 = vmatpush1.bf16.msra.mxu1 %v681_v23  ;;  %v742_v1 = vld [vmem:[%s971_s0] ss:$8 sps:$4 sm:$0xff]  }
  0x18   :  { %439 = vmatprep.subr.bf16.mxu0 %v682_v24  ;;  %482 = vmatprep.subr.bf16.mxu1 %v684_v25 }
  0x1b   :  { %440 = vmatpush1.bf16.msra.mxu0 %v686_v26  ;;  %483 = vmatpush1.bf16.msra.mxu1 %v687_v27 }
  0x1c   :  { %441 = vmatprep.subr.bf16.mxu0 %v688_v28  ;;  %484 = vmatprep.subr.bf16.mxu1 %v690_v29 }
  0x1f   :  { %442 = vmatpush1.bf16.msra.mxu0 %v692_v30  ;;  %485 = vmatpush1.bf16.msra.mxu1 %v693_v31 }
  0x20   :  { %443 = vmatprep.subr.bf16.mxu0 %v694_v32  ;;  %486 = vmatprep.subr.bf16.mxu1 %v696_v33 }
  0x23   :  { %444 = vmatpush1.bf16.msra.mxu0 %v698_v34  ;;  %487 = vmatpush1.bf16.msra.mxu1 %v699_v35 }
  0x24   :  { %445 = vmatprep.subr.bf16.mxu0 %v700_v36  ;;  %488 = vmatprep.subr.bf16.mxu1 %v702_v37 }
  0x27   :  { %446 = vmatpush1.bf16.msra.mxu0 %v704_v38  ;;  %489 = vmatpush1.bf16.msra.mxu1 %v705_v39 }
  0x28   :  { %447 = vmatprep.subr.bf16.mxu0 %v706_v40  ;;  %490 = vmatprep.subr.bf16.mxu1 %v708_v41 }
  0x2b   :  { %448 = vmatpush1.bf16.msra.mxu0 %v710_v42  ;;  %491 = vmatpush1.bf16.msra.mxu1 %v711_v43 }
  0x2c   :  { %449 = vmatprep.subr.bf16.mxu0 %v712_v44  ;;  %492 = vmatprep.subr.bf16.mxu1 %v714_v45 }
  0x2f   :  { %450 = vmatpush1.bf16.msra.mxu0 %v716_v47  ;;  %493 = vmatpush1.bf16.msra.mxu1 %v717_v48 }
  0x30   :  { %451 = vmatprep.subr.bf16.mxu0 %v718_v49  ;;  %494 = vmatprep.subr.bf16.mxu1 %v720_v50 }
  0x33   :  { %452 = vmatpush1.bf16.msra.mxu0 %v722_v51  ;;  %495 = vmatpush1.bf16.msra.mxu1 %v723_v52 }
  0x34   :  { %453 = vmatprep.subr.bf16.mxu0 %v724_v53  ;;  %496 = vmatprep.subr.bf16.mxu1 %v726_v54 }
  0x37   :  { %454 = vmatpush1.bf16.msra.mxu0 %v728_v55  ;;  %497 = vmatpush1.bf16.msra.mxu1 %v729_v56 }
  0x38   :  { %455 = vmatprep.subr.bf16.mxu0 %v730_v57  ;;  %498 = vmatprep.subr.bf16.mxu1 %v732_v58 }
  0x3b   :  { %456 = vmatpush1.bf16.msra.mxu0 %v734_v59  ;;  %499 = vmatpush1.bf16.msra.mxu1 %v735_v60 }
  0x3c   :  { %457 = vmatprep.subr.bf16.mxu0 %v736_v61  ;;  %500 = vmatprep.subr.bf16.mxu1 %v738_v62 }
  0x3f   :  { %458 = vmatpush1.bf16.msra.mxu0 %v740_v63  ;;  %501 = vmatpush1.bf16.msra.mxu1 %v741_v0 }
  0x42   :  { %460 = vmatmul.mubr.bf16.vlgmr.msra.gmra.mrb[0].mxu0 %v742_v1  ;;  %503 = vmatmul.mubr.bf16.vlgmr.msra.gmra.mrb[0].mxu1 %v742_v1 }
 0x115   :  { %v461_v2 = vpop.f32.mrb[0].mxu0  ;;  %v504_v3 = vpop.f32.mrb[0].mxu1 }
 0x116   :  { %v463_v4 = vpop.f32.mrb[1].mxu0  ;;  %v506_v5 = vpop.f32.mrb[1].mxu1 }
 0x117   :  { %v642_v6 = vpack.c.bf16 %v463_v4, %v461_v2  ;;  %v643_v7 = vpack.c.bf16 %v506_v5, %v504_v3  ;;  %v465_v8 = vpop.f32.mrb[2].mxu0  ;;  %v508_v9 = vpop.f32.mrb[2].mxu1 }
 0x118   :  { %v467_v10 = vpop.f32.mrb[3].mxu0  ;;  %v510_v11 = vpop.f32.mrb[3].mxu1 }
 0x119   :  { %564 = vst [vmem:[%s972_s2] sm:$0xff] %v642_v6  ;;  %565 = vst [vmem:[%s972_s2 + $0x8] sm:$0xff] %v643_v7  ;;  %v644_v12 = vpack.c.bf16 %v467_v10, %v465_v8  ;;  %v645_v13 = vpack.c.bf16 %v510_v11, %v508_v9 }
 0x11b   :  { %566 = vst [vmem:[%s972_s2 + $0x10] sm:$0xff] %v644_v12  ;;  %567 = vst [vmem:[%s972_s2 + $0x18] sm:$0xff] %v645_v13 }

// kernel: resnetv2_forward.64
= control target key start
LH: loop header
LB: loop body
LE: loop exit
PB: predicated region body
PF: predicated region fallthrough
CT: control target
= control target key end

     0   :  { %s495_s9 = smov 0   ;;  %s497_s10 = smov 0   ;;  %s561_s0 = inlined_call_operand.vmem [shape: bf16[2,8,512], index: 0, kind: input, shape index: {}]   ;;  %s562_s1 = inlined_call_operand.vmem [shape: f32[2,1,512], index: 1, kind: output, shape index: {0}]   ;;  %s563_s2 = inlined_call_operand.vmem [shape: f32[2,1,512], index: 2, kind: output, shape index: {1}]  }
   0x1   :  { %s499_s11 = smov 0  }
   0x2 LB: > { %s25_s12 = sadd.s32 1, %s472_s10  ;;  %p420_p0 = scmp.ge.s32.totalorder %s476_s11, 1  ;;  %s476_s11 = sphi %s499_s11, %s13_s11   ;;  %s472_s10 = sphi %s497_s10, %s567_s10   ;;  %s468_s9 = sphi %s495_s9, %s566_s9  }
   0x3   : > { %p27_p1 = scmp.ge.s32.totalorder %s25_s12, 2  ;;  %p133_p2 = scmp.lt.s32.totalorder %s476_s11, 3 }
   0x5   : > { %s569_s12 = smov (%p27_p1, %s25_s12), 0  ;;  %p134_p3 = pnand %p420_p0, %p133_p2 }
   0x6   : > { %p162_p4 = scmp.lt.s32.totalorder (!%p134_p3), %s468_s9, 1  ;;  %v183_v0 = vlaneseq (!%p134_p3)  ;;  %v478_v1 = vmov (!%p134_p3), 1966171168   ;;  %v479_v6 = vmov (!%p134_p3), 0.0  }
   0x7   : > { %137 = sbr.rel (%p134_p3) target bundleno = 46 (0x2e), region = 24  ;;  %v227_v2 = vunpack.c.l.s4 (!%p134_p3), %v478_v1 }
   0x8   : > { %vm513_vm0 = vcmp.lt.s32.totalorder (!%p134_p3), %v183_v0, 512  ;;  %v230_v5 = vshrl.u32 (!%p134_p3), %v183_v0, 7 }
   0x9   : > { %v228_v4 = vunpack.c.0.s8 (!%p134_p3), %v227_v2 }
   0xb   : > { %v536_v13 = vsub.s32 (!%p134_p3), %v228_v4, %v230_v5 }
   0xe   : > { %s571_s9 = smov (!%p162_p4, %s468_s9), 1 }
   0xf   : > { %s427_s13 = sshll.u32 %s571_s9, 4  ;;  %s423_s14 = sshll.u32 %s571_s9, 2 }
  0x10   : > { %s170_s17 = scalar_lea.vmem %s561_s0, %s427_s13  ;;  %s523_s20 = scalar_lea.vmem %s562_s1, %s423_s14 }
  0x11   : > { %187 = vst.msk [vmem:[%s523_s20] sm:$0xf] %vm513_vm0, %v479_v6  ;;  %v189_v7 = vld [vmem:[%s170_s17] sm:$0xff]  ;;  %v190_v8 = vld [vmem:[%s170_s17 + $0x8] sm:$0xff]  ;;  %s531_s23 = scalar_lea.vmem %s563_s2, %s423_s14 }
  0x12   : > { %v191_v9 = vunpack.c.l.bf16 %v189_v7  ;;  %v192_v10 = vunpack.c.h.bf16 %v189_v7  ;;  %v193_v11 = vunpack.c.l.bf16 %v190_v8  ;;  %v194_v12 = vunpack.c.h.bf16 %v190_v8  ;;  %188 = vst.msk [vmem:[%s531_s23] sm:$0xf] %vm513_vm0, %v479_v6 }
  0x14   : > { %v196_v14 = vrot.slane %v191_v9, 4  ;;  %v202_v15 = vrot.slane %v192_v10, 4  ;;  %v208_v16 = vrot.slane %v193_v11, 4  ;;  %v214_v17 = vrot.slane %v194_v12, 4 }
  0x15   : > { %v256_v18 = vmul.f32 %v191_v9, %v191_v9  ;;  %v257_v19 = vmul.f32 %v192_v10, %v192_v10  ;;  %v258_v20 = vmul.f32 %v193_v11, %v193_v11  ;;  %v259_v21 = vmul.f32 %v194_v12, %v194_v12 }
  0x16   : > { %v197_v22 = vadd.f32 %v196_v14, %v191_v9  ;;  %v203_v23 = vadd.f32 %v202_v15, %v192_v10  ;;  %v209_v24 = vadd.f32 %v208_v16, %v193_v11  ;;  %v215_v25 = vadd.f32 %v214_v17, %v194_v12 }
  0x17   : > { %v260_v26 = vrot.slane %v256_v18, 4  ;;  %v266_v27 = vrot.slane %v257_v19, 4  ;;  %v272_v28 = vrot.slane %v258_v20, 4  ;;  %v278_v29 = vrot.slane %v259_v21, 4 }
  0x18   : > { %v198_v30 = vrot.slane %v197_v22, 2  ;;  %v204_v31 = vrot.slane %v203_v23, 2  ;;  %v210_v32 = vrot.slane %v209_v24, 2  ;;  %v216_v33 = vrot.slane %v215_v25, 2  ;;  %v195_v10 = vld [vmem:[%s523_s20] sm:$0xf] }
  0x19   : > { %v261_v34 = vadd.f32 %v260_v26, %v256_v18  ;;  %v267_v35 = vadd.f32 %v266_v27, %v257_v19  ;;  %v273_v36 = vadd.f32 %v272_v28, %v258_v20  ;;  %v279_v37 = vadd.f32 %v278_v29, %v259_v21  ;;  %v255_v17 = vld [vmem:[%s531_s23] sm:$0xf] }
  0x1a   : > { %v199_v38 = vadd.f32 %v198_v30, %v197_v22  ;;  %v205_v39 = vadd.f32 %v204_v31, %v203_v23  ;;  %v211_v40 = vadd.f32 %v210_v32, %v209_v24  ;;  %v217_v41 = vadd.f32 %v216_v33, %v215_v25 }
  0x1b   : > { %v262_v42 = vrot.slane %v261_v34, 2  ;;  %v268_v43 = vrot.slane %v267_v35, 2  ;;  %v274_v44 = vrot.slane %v273_v36, 2  ;;  %v280_v45 = vrot.slane %v279_v37, 2 }
  0x1c   : > { %v200_v46 = vrot.slane %v199_v38, 1  ;;  %v206_v47 = vrot.slane %v205_v39, 1  ;;  %v212_v48 = vrot.slane %v211_v40, 1  ;;  %v218_v49 = vrot.slane %v217_v41, 1 }
  0x1d   : > { %v263_v50 = vadd.f32 %v262_v42, %v261_v34  ;;  %v269_v51 = vadd.f32 %v268_v43, %v267_v35  ;;  %v275_v52 = vadd.f32 %v274_v44, %v273_v36  ;;  %v281_v53 = vadd.f32 %v280_v45, %v279_v37 }
  0x1e   : > { %v201_v54 = vadd.f32 %v200_v46, %v199_v38  ;;  %v207_v55 = vadd.f32 %v206_v47, %v205_v39  ;;  %v213_v56 = vadd.f32 %v212_v48, %v211_v40  ;;  %v219_v57 = vadd.f32 %v218_v49, %v217_v41 }
  0x1f   : > { %v264_v58 = vrot.slane %v263_v50, 1  ;;  %v270_v59 = vrot.slane %v269_v51, 1  ;;  %v276_v60 = vrot.slane %v275_v52, 1  ;;  %v282_v61 = vrot.slane %v281_v53, 1 }
  0x20   : > { %v224_v62 = vcombine.low %v201_v54, %v207_v55  ;;  %v225_v63 = vcombine.low %v213_v56, %v219_v57 }
  0x21   : > { %v265_v0 = vadd.f32 %v264_v58, %v263_v50  ;;  %v271_v1 = vadd.f32 %v270_v59, %v269_v51  ;;  %v277_v2 = vadd.f32 %v276_v60, %v275_v52  ;;  %v283_v4 = vadd.f32 %v282_v61, %v281_v53 }
  0x22   : > { %v232_v5 = vrot.slane %v224_v62, %v536_v13  ;;  %v239_v6 = vrot.slane %v225_v63, %v536_v13 }
  0x23   : > { %v288_v7 = vcombine.low %v265_v0, %v271_v1  ;;  %v289_v8 = vcombine.low %v277_v2, %v283_v4 }
  0x24   : > { %v240_v9 = vcombine.low %v232_v5, %v239_v6 }
  0x25   : > { %v296_v11 = vrot.slane %v288_v7, %v536_v13  ;;  %v303_v12 = vrot.slane %v289_v8, %v536_v13 }
  0x26   : > { %v247_v14 = vrot.slane %v240_v9, %v536_v13 }
  0x27   : > { %v304_v15 = vcombine.low %v296_v11, %v303_v12 }
  0x28   : > { %v249_v16 = vadd.f32 %v247_v14, %v195_v10 }
  0x29   : > { %v311_v18 = vrot.slane %v304_v15, %v536_v13 }
  0x2a   : > { %254 = vst.msk [vmem:[%s523_s20] sm:$0xf] %vm513_vm0, %v249_v16 }
  0x2b   : > { %v313_v19 = vadd.f32 %v311_v18, %v255_v17 }
  0x2d   : > { %314 = vst.msk [vmem:[%s531_s23] sm:$0xf] %vm513_vm0, %v313_v19 }
  0x2e PF: > { %s13_s11 = sadd.s32 1, %s476_s11   ;;  %s566_s9 = smov %s472_s10 }
  0x2f   : > { %p10_p5 = scmp.ge.s32.totalorder %s13_s11, 4   ;;  %s567_s10 = smov %s569_s12 }
  0x31   :  { %12 = sbr.rel (!%p10_p5) target bundleno = 2 (0x2), region = 70 }

// kernel: resnetv2_forward.65
= control target key start
LH: loop header
LB: loop body
LE: loop exit
PB: predicated region body
PF: predicated region fallthrough
CT: control target
= control target key end

     0   :  { %s450_s1 = inlined_call_operand.vmem [shape: bf16[256,128], index: 1, kind: input, shape index: {}]   ;;  %s451_s0 = inlined_call_operand.vmem [shape: bf16[32,256], index: 0, kind: input, shape index: {}]   ;;  %s452_s2 = inlined_call_operand.vmem [shape: bf16[32,128], index: 2, kind: output, shape index: {}]  }
   0x1   :  { %v347_v0 = vld [vmem:[%s450_s1 + $0x40] sm:$0xff]   ;;  %v349_v2 = vld [vmem:[%s450_s1 + $0x48] sm:$0xff]   ;;  %v351_v4 = vld [vmem:[%s450_s1 + $0x50] sm:$0xff]  }
   0x2   :  { %v348_v1 = vld [vmem:[%s450_s1] sm:$0xff]   ;;  %303 = vmatprep.subr.bf16.mxu0 %v347_v0  ;;  %331 = vmatprep.subr.bf16.mxu1 %v347_v0  ;;  %v350_v3 = vld [vmem:[%s450_s1 + $0x8] sm:$0xff]   ;;  %v352_v5 = vld [vmem:[%s450_s1 + $0x10] sm:$0xff]  }
   0x3   :  { %304 = vmatpush3.bf16.msra.mxu0 %v348_v1  ;;  %339 = vmatpush3.bf16.msra.mxu1 %v348_v1  ;;  %v353_v6 = vld [vmem:[%s450_s1 + $0x58] sm:$0xff]   ;;  %v355_v8 = vld [vmem:[%s450_s1 + $0x60] sm:$0xff]   ;;  %v357_v10 = vld [vmem:[%s450_s1 + $0x68] sm:$0xff]  }
   0x4   :  { %305 = vmatprep.subr.bf16.mxu0 %v349_v2  ;;  %332 = vmatprep.subr.bf16.mxu1 %v349_v2  ;;  %v354_v7 = vld [vmem:[%s450_s1 + $0x18] sm:$0xff]   ;;  %v356_v9 = vld [vmem:[%s450_s1 + $0x20] sm:$0xff]   ;;  %v358_v13 = vld [vmem:[%s450_s1 + $0x28] sm:$0xff]  }
   0x5   :  { %v365_v11 = vld [vmem:[%s451_s0 + $0x4] ss:$8 sps:$4 sm:$0xff]   ;;  %v368_v12 = vld [vmem:[%s451_s0 + $0x14] ss:$8 sps:$4 sm:$0xff]   ;;  %v363_v18 = vld [vmem:[%s451_s0] ss:$8 sps:$4 sm:$0xff]  }
   0x6   :  { %v359_v14 = vld [vmem:[%s450_s1 + $0x70] sm:$0xff]   ;;  %208 = vmatprep.mubr.bf16.mxu0 %v365_v11  ;;  %216 = vmatprep.mubr.bf16.mxu1 %v368_v12  ;;  %v361_v16 = vld [vmem:[%s450_s1 + $0x78] sm:$0xff]  }
   0x7   :  { %306 = vmatpush3.bf16.msra.mxu0 %v350_v3  ;;  %340 = vmatpush3.bf16.msra.mxu1 %v350_v3  ;;  %v360_v15 = vld [vmem:[%s450_s1 + $0x30] sm:$0xff]   ;;  %v362_v17 = vld [vmem:[%s450_s1 + $0x38] sm:$0xff]  }
   0x8   :  { %307 = vmatprep.subr.bf16.mxu0 %v351_v4  ;;  %333 = vmatprep.subr.bf16.mxu1 %v351_v4  ;;  %v366_v19 = vld [vmem:[%s451_s0 + $0x10] ss:$8 sps:$4 sm:$0xff]  }
   0xb   :  { %308 = vmatpush3.bf16.msra.mxu0 %v352_v5  ;;  %341 = vmatpush3.bf16.msra.mxu1 %v352_v5 }
   0xc   :  { %309 = vmatprep.subr.bf16.mxu0 %v353_v6  ;;  %334 = vmatprep.subr.bf16.mxu1 %v353_v6 }
   0xf   :  { %310 = vmatpush3.bf16.msra.mxu0 %v354_v7  ;;  %342 = vmatpush3.bf16.msra.mxu1 %v354_v7 }
  0x10   :  { %311 = vmatprep.subr.bf16.mxu0 %v355_v8  ;;  %335 = vmatprep.subr.bf16.mxu1 %v355_v8 }
  0x13   :  { %312 = vmatpush3.bf16.msra.mxu0 %v356_v9  ;;  %343 = vmatpush3.bf16.msra.mxu1 %v356_v9 }
  0x14   :  { %313 = vmatprep.subr.bf16.mxu0 %v357_v10  ;;  %336 = vmatprep.subr.bf16.mxu1 %v357_v10 }
  0x17   :  { %314 = vmatpush3.bf16.msra.mxu0 %v358_v13  ;;  %344 = vmatpush3.bf16.msra.mxu1 %v358_v13 }
  0x18   :  { %315 = vmatprep.subr.bf16.mxu0 %v359_v14  ;;  %337 = vmatprep.subr.bf16.mxu1 %v359_v14 }
  0x1b   :  { %316 = vmatpush3.bf16.msra.mxu0 %v360_v15  ;;  %345 = vmatpush3.bf16.msra.mxu1 %v360_v15 }
  0x1c   :  { %317 = vmatprep.subr.bf16.mxu0 %v361_v16  ;;  %338 = vmatprep.subr.bf16.mxu1 %v361_v16 }
  0x1f   :  { %318 = vmatpush3.bf16.msra.mxu0 %v362_v17  ;;  %346 = vmatpush3.bf16.msra.mxu1 %v362_v17 }
  0x22   :  { %209 = vmatmul.mubr.bf16.vlgmr.msra.gmra.mrb[0].mxu0 %v363_v18  ;;  %217 = vmatmul.mubr.bf16.vlgmr.msra.gmra.mrb[0].mxu1 %v366_v19 }
  0xf5   :  { %v319_v20 = vpop.f32.mrb[0].mxu0  ;;  %v325_v21 = vpop.f32.mrb[0].mxu1 }
  0xf6   :  { %v320_v22 = vpop.f32.mrb[1].mxu0  ;;  %v326_v23 = vpop.f32.mrb[1].mxu1 }
  0xf7   :  { %v321_v24 = vadd.f32 %v320_v22, %v319_v20  ;;  %v327_v25 = vadd.f32 %v326_v23, %v325_v21  ;;  %v322_v26 = vpop.f32.mrb[2].mxu0  ;;  %v328_v27 = vpop.f32.mrb[2].mxu1 }
  0xf8   :  { %v323_v28 = vpop.f32.mrb[3].mxu0  ;;  %v329_v29 = vpop.f32.mrb[3].mxu1 }
  0xf9   :  { %v324_v30 = vadd.f32 %v323_v28, %v322_v26  ;;  %v330_v31 = vadd.f32 %v329_v29, %v328_v27 }
  0xfb   :  { %v295_v32 = vpack.c.bf16 %v324_v30, %v321_v24  ;;  %v300_v33 = vpack.c.bf16 %v330_v31, %v327_v25 }
  0xfd   :  { %296 = vst [vmem:[%s452_s2] sm:$0xff] %v295_v32   ;;  %302 = vst [vmem:[%s452_s2 + $0x8] sm:$0xff] %v300_v33  }

// kernel: resnetv2_forward.68
= control target key start
LH: loop header
LB: loop body
LE: loop exit
PB: predicated region body
PF: predicated region fallthrough
CT: control target
= control target key end

     0   :  { %s908_s9 = smov 0   ;;  %s910_s10 = smov 0   ;;  %s1009_s0 = inlined_call_operand.vmem [shape: bf16[16,1152], index: 0, kind: input, shape index: {}]   ;;  %s1010_s1 = inlined_call_operand.vmem [shape: bf16[1152,128], index: 1, kind: input, shape index: {}]   ;;  %s1011_s2 = inlined_call_operand.vmem [shape: bf16[16,128], index: 2, kind: output, shape index: {}]  }
   0x1   :  { %s912_s11 = smov 0   ;;  %s914_s12 = smov 0  }
   0x2   :  { %s916_s13 = smov 0  }
   0x3 LB: > { %s24_s14 = sadd.s32 1, %s884_s12  ;;  %p47_p1 = scmp.ne.s32.totalorder %s876_s10, %s872_s9  ;;  %s888_s13 = sphi %s916_s13, %s12_s13   ;;  %s884_s12 = sphi %s914_s12, %s1015_s12   ;;  %s880_s11 = sphi %s912_s11, %s1014_s11   ;;  %s876_s10 = sphi %s910_s10, %s1013_s10   ;;  %s872_s9 = sphi %s908_s9, %s1012_s9  }
   0x4   : > { %p25_p0 = scmp.ge.s32.totalorder %s24_s14, 3  ;;  %p48_p2 = scmp.eq.s32.totalorder %s888_s13, 0 }
   0x5   : > { %s40_s16 = sadd.s32 1, %s876_s10  ;;  %p675_p5 = scmp.ge.s32.totalorder %s888_s13, 3 }
   0x6   : > { %s1017_s14 = smov (%p25_p0, %s24_s14), 0  ;;  %p49_p3 = por %p48_p2, %p47_p1 }
   0x7   : > { %s36_s15 = ssub.s32 %s884_s12, %s1017_s14  ;;  %129 = sbr.rel (%p675_p5) target bundleno = 21 (0x15), region = 16 }
   0x8   : > { %p38_p4 = scmp.eq.s32.totalorder %s36_s15, 0 }
   0xa   : > { %s943_s17 = scalar_select %p38_p4, %s876_s10, %s40_s16  }
   0xe   : > { %132 = sbr.rel (!%p49_p3) target bundleno = 21 (0x15), region = 20  ;;  %s134_s18 = sand.u32 (%p49_p3), 1, %s876_s10  }
   0xf   : > { %s718_s19 = smul.u32 (%p49_p3), 12, %s884_s12 }
  0x10   : > { %s777_s20 = smul.u32 (%p49_p3), 24, %s134_s18 }
  0x11   : > { %s142_s23 = scalar_lea.vmem (%p49_p3), %s1009_s0, %s718_s19 }
  0x12   : > { %v157_v0 = vld [vmem:[%s142_s23] sm:$0xff] (%p49_p3)  ;;  %v677_v2 = vld [vmem:[%s142_s23 + $0x8] sm:$0xf] (%p49_p3)  ;;  %s136_s24 = scalar_lea.vmem (%p49_p3), [#allocation3], %s777_s20  ;;  %v679_v3 = vld [vmem:[%s142_s23 + $0x2c] sm:$0xf] (%p49_p3) }
  0x13   : > { %v159_v1 = vld [vmem:[%s142_s23 + $0x24] sm:$0xff] (%p49_p3)  ;;  %158 = vst [vmem:[%s136_s24] sm:$0xff] (%p49_p3), %v157_v0  ;;  %678 = vst [vmem:[%s136_s24 + $0x8] sm:$0xf] (%p49_p3), %v677_v2 }
  0x14   : > { %160 = vst [vmem:[%s136_s24 + $0xc] sm:$0xff] (%p49_p3), %v159_v1  ;;  %680 = vst [vmem:[%s136_s24 + $0x14] sm:$0xf] (%p49_p3), %v679_v3 }
  0x15 PF: > { %p681_p6 = scmp.ge.s32.totalorder %s888_s13, 1  ;;  %p188_p7 = scmp.lt.s32.totalorder %s888_s13, 4 }
  0x17   : > { %p189_p8 = pnand %p681_p6, %p188_p7 }
  0x18   : > { %s195_s25 = sand.u32 (!%p189_p8), 1, %s872_s9   ;;  %s229_s26 = smul.u32 (!%p189_p8), 48, %s880_s11 }
  0x19   : > { %192 = sbr.rel (%p189_p8) target bundleno = 304 (0x130), region = 50  ;;  %p683_p10 = scmp.ne.s32.totalorder (!%p189_p8), %s880_s11, 0 }
  0x1a   : > { %s778_s27 = smul.u32 (!%p189_p8), 24, %s195_s25  ;;  %p230_p9 = scmp.lt.s32.totalorder (!%p189_p8), %s229_s26, 143 }
  0x1c   : > { %s960_s4 = scalar_lea.vmem (!%p189_p8), [#allocation3], %s778_s27 }
  0x20   : > { %s1019_s26 = smov (!%p230_p9, %s229_s26), 143  ;;  %251 = sbr.rel (%p683_p10) target bundleno = 39 (0x27), region = 58 }
  0x21   : > { %s682_s28 = sshll.u32 %s1019_s26, 2  ;;  %v890_v4 = vmov (!%p683_p10), 0.0  }
  0x22   : > { %s958_s3 = scalar_lea.vmem %s1010_s1, %s682_s28  ;;  %252 = vst [vmem:[#allocation2] sm:$0xff] (!%p683_p10), %v890_v4  ;;  %253 = vst [vmem:[#allocation2 + $0x8] sm:$0xff] (!%p683_p10), %v890_v4 }
  0x27 PF: > { %v822_v5 = vld [vmem:[%s958_s3 + $0x40] sm:$0xff]   ;;  %v891_v6 = vmov 0.0   ;;  %vm892_vm0 = vmmov 0   ;;  %v825_v9 = vld [vmem:[%s958_s3 + $0x48] sm:$0xff]   ;;  %v828_v12 = vld [vmem:[%s958_s3 + $0x50] sm:$0xff]   ;;  %p711_p11 = scmp.ne.s32.totalorder %s880_s11, 2 }
  0x28   : > { %757 = vmatprep.subr.bf16.mxu1 %v891_v6  ;;  %v823_v7 = vld [vmem:[%s958_s3] sm:$0xff]   ;;  %726 = vmatprep.subr.bf16.mxu0 %v822_v5  ;;  %v826_v10 = vld [vmem:[%s958_s3 + $0x8] sm:$0xff]   ;;  %v829_v13 = vld [vmem:[%s958_s3 + $0x10] sm:$0xff]  }
  0x29   : > { %v824_v8 = vld [vmem:[%s958_s3 + $0x80] sm:$0xff]   ;;  %773 = vmatprep.mubr.msk.bf16.mxu1 %vm892_vm0, %v891_v6  ;;  %727 = vmatpush3.bf16.msra.mxu0 %v823_v7  ;;  %v827_v11 = vld [vmem:[%s958_s3 + $0x88] sm:$0xff]   ;;  %v830_v14 = vld [vmem:[%s958_s3 + $0x90] sm:$0xff]  }
  0x2a   : > { %758 = vmatpush3.bf16.msra.mxu1 %v824_v8  ;;  %728 = vmatprep.subr.bf16.mxu0 %v825_v9  ;;  %v831_v15 = vld [vmem:[%s958_s3 + $0x58] sm:$0xff]   ;;  %v834_v18 = vld [vmem:[%s958_s3 + $0x60] sm:$0xff]   ;;  %v837_v21 = vld [vmem:[%s958_s3 + $0x68] sm:$0xff]  }
  0x2b   : > { %759 = vmatprep.subr.bf16.mxu1 %v891_v6  ;;  %v832_v16 = vld [vmem:[%s958_s3 + $0x18] sm:$0xff]   ;;  %v835_v19 = vld [vmem:[%s958_s3 + $0x20] sm:$0xff]   ;;  %v838_v22 = vld [vmem:[%s958_s3 + $0x28] sm:$0xff]  }
  0x2c   : > { %v833_v17 = vld [vmem:[%s958_s3 + $0x98] sm:$0xff]   ;;  %v836_v20 = vld [vmem:[%s958_s3 + $0xa0] sm:$0xff]   ;;  %v839_v23 = vld [vmem:[%s958_s3 + $0xa8] sm:$0xff]  }
  0x2d   : > { %729 = vmatpush3.bf16.msra.mxu0 %v826_v10  ;;  %v840_v24 = vld [vmem:[%s958_s3 + $0x70] sm:$0xff]   ;;  %v843_v27 = vld [vmem:[%s958_s3 + $0x78] sm:$0xff]   ;;  %v254_v39 = vld [vmem:[#allocation2] sm:$0xff] }
  0x2e   : > { %760 = vmatpush3.bf16.msra.mxu1 %v827_v11  ;;  %730 = vmatprep.subr.bf16.mxu0 %v828_v12  ;;  %v841_v25 = vld [vmem:[%s958_s3 + $0x30] sm:$0xff]   ;;  %v844_v29 = vld [vmem:[%s958_s3 + $0x38] sm:$0xff]   ;;  %v255_v45 = vld [vmem:[#allocation2 + $0x8] sm:$0xff] }
  0x2f   : > { %761 = vmatprep.subr.bf16.mxu1 %v891_v6  ;;  %v842_v26 = vld [vmem:[%s958_s3 + $0xb0] sm:$0xff]   ;;  %v845_v30 = vld [vmem:[%s958_s3 + $0xb8] sm:$0xff]  }
  0x30   : > { %v848_v28 = vld [vmem:[%s960_s4 + $0x4] ss:$12 sps:$4 sm:$0xff]   ;;  %v846_v31 = vld [vmem:[%s960_s4] ss:$12 sps:$4 sm:$0xff]   ;;  %v849_v32 = vld [vmem:[%s960_s4 + $0x8] ss:$12 sps:$4 sm:$0xff]  }
  0x31   : > { %731 = vmatpush3.bf16.msra.mxu0 %v829_v13  ;;  %500 = vmatprep.mubr.bf16.mxu0 %v848_v28 }
  0x32   : > { %762 = vmatpush3.bf16.msra.mxu1 %v830_v14  ;;  %732 = vmatprep.subr.bf16.mxu0 %v831_v15 }
  0x33   : > { %763 = vmatprep.subr.bf16.mxu1 %v891_v6 }
  0x35   : > { %733 = vmatpush3.bf16.msra.mxu0 %v832_v16 }
  0x36   : > { %764 = vmatpush3.bf16.msra.mxu1 %v833_v17  ;;  %734 = vmatprep.subr.bf16.mxu0 %v834_v18 }
  0x37   : > { %765 = vmatprep.subr.bf16.mxu1 %v891_v6 }
  0x39   : > { %735 = vmatpush3.bf16.msra.mxu0 %v835_v19 }
  0x3a   : > { %766 = vmatpush3.bf16.msra.mxu1 %v836_v20  ;;  %736 = vmatprep.subr.bf16.mxu0 %v837_v21 }
  0x3b   : > { %767 = vmatprep.subr.bf16.mxu1 %v891_v6 }
  0x3d   : > { %737 = vmatpush3.bf16.msra.mxu0 %v838_v22 }
  0x3e   : > { %768 = vmatpush3.bf16.msra.mxu1 %v839_v23  ;;  %738 = vmatprep.subr.bf16.mxu0 %v840_v24 }
  0x3f   : > { %769 = vmatprep.subr.bf16.mxu1 %v891_v6 }
  0x41   : > { %739 = vmatpush3.bf16.msra.mxu0 %v841_v25 }
  0x42   : > { %770 = vmatpush3.bf16.msra.mxu1 %v842_v26  ;;  %740 = vmatprep.subr.bf16.mxu0 %v843_v27 }
  0x43   : > { %771 = vmatprep.subr.bf16.mxu1 %v891_v6 }
  0x45   : > { %741 = vmatpush3.bf16.msra.mxu0 %v844_v29 }
  0x46   : > { %772 = vmatpush3.bf16.msra.mxu1 %v845_v30 }
  0x48   : > { %501 = vmatmul.mubr.bf16.vlgmr.msra.gmra.mrb[0].mxu0 %v846_v31 }
  0x49   : > { %774 = vmatmul.mubr.bf16.vlgmr.msra.gmra.mrb[0].mxu1 %v849_v32 }
 0x11b   : > { %v742_v33 = vpop.f32.mrb[0].mxu0 }
 0x11c   : > { %v543_v34 = vpop.f32.mrb[0].mxu1  ;;  %v743_v35 = vpop.f32.mrb[1].mxu0 }
 0x11d   : > { %v744_v36 = vadd.f32 %v743_v35, %v742_v33  ;;  %v775_v37 = vpop.f32.mrb[1].mxu1  ;;  %v745_v38 = vpop.f32.mrb[2].mxu0 }
 0x11e   : > { %v546_v40 = vpop.f32.mrb[2].mxu1  ;;  %v746_v41 = vpop.f32.mrb[3].mxu0 }
 0x11f   : > { %v544_v42 = vadd.f32 %v744_v36, %v543_v34  ;;  %v747_v43 = vadd.f32 %v746_v41, %v745_v38  ;;  %v776_v44 = vpop.f32.mrb[3].mxu1  ;;  %557 = sbr.rel (%p711_p11) target bundleno = 304 (0x130), region = 62 }
 0x121   : > { %v550_v46 = vadd.f32 %v544_v42, %v254_v39  ;;  %v547_v47 = vadd.f32 %v747_v43, %v546_v40 }
 0x123   : > { %552 = vst [vmem:[#allocation2] sm:$0xff] %v550_v46  ;;  %v551_v48 = vadd.f32 %v547_v47, %v255_v45 }
 0x125   : > { %553 = vst [vmem:[#allocation2 + $0x8] sm:$0xff] %v551_v48 }
 0x12a   : > { %v558_v49 = vld [vmem:[#allocation2] sm:$0xff] }
 0x12c   : > { %v559_v50 = vld [vmem:[#allocation2 + $0x8] sm:$0xff] }
 0x12d   : > { %v724_v51 = vpack.c.bf16 %v559_v50, %v558_v49 }
 0x12f   : > { %725 = vst [vmem:[%s1011_s2] sm:$0xff] %v724_v51  }
 0x130 PF: > { %s12_s13 = sadd.s32 1, %s888_s13   ;;  %s1012_s9 = smov %s876_s10 }
 0x131   : > { %p9_p12 = scmp.ge.s32.totalorder %s12_s13, 5   ;;  %s1013_s10 = smov %s943_s17 }
 0x132   : > { %s1014_s11 = smov %s884_s12  ;;  %s1015_s12 = smov %s1017_s14 }
 0x133   :  { %11 = sbr.rel (!%p9_p12) target bundleno = 3 (0x3), region = 106 }

// kernel: resnetv2_forward.69
= control target key start
LH: loop header
LB: loop body
LE: loop exit
PB: predicated region body
PF: predicated region fallthrough
CT: control target
= control target key end

     0   :  { %s352_s9 = smov 0   ;;  %s354_s10 = smov 0   ;;  %s388_s0 = inlined_call_operand.vmem [shape: bf16[2,8,128], index: 0, kind: input, shape index: {}]   ;;  %s389_s1 = inlined_call_operand.vmem [shape: f32[2,1,128], index: 1, kind: output, shape index: {0}]   ;;  %s390_s2 = inlined_call_operand.vmem [shape: f32[2,1,128], index: 2, kind: output, shape index: {1}]  }
   0x1   :  { %s356_s11 = smov 0  }
   0x2 LB: > { %s25_s12 = sadd.s32 1, %s330_s10  ;;  %p283_p0 = scmp.ge.s32.totalorder %s334_s11, 1  ;;  %s334_s11 = sphi %s356_s11, %s13_s11   ;;  %s330_s10 = sphi %s354_s10, %s392_s10   ;;  %s326_s9 = sphi %s352_s9, %s391_s9  }
   0x3   : > { %p27_p1 = scmp.ge.s32.totalorder %s25_s12, 2  ;;  %p131_p2 = scmp.lt.s32.totalorder %s334_s11, 3 }
   0x5   : > { %s394_s12 = smov (%p27_p1, %s25_s12), 0  ;;  %p132_p3 = pnand %p283_p0, %p131_p2 }
   0x6   : > { %p156_p4 = scmp.lt.s32.totalorder (!%p132_p3), %s326_s9, 1  ;;  %v336_v0 = vmov (!%p132_p3), 0.0  }
   0x7   : > { %135 = sbr.rel (%p132_p3) target bundleno = 37 (0x25), region = 24 }
   0xe   : > { %s396_s9 = smov (!%p156_p4, %s326_s9), 1 }
   0xf   : > { %s284_s13 = sshll.u32 %s396_s9, 2  ;;  %s165_s16 = scalar_lea.vmem %s389_s1, %s396_s9 }
  0x10   : > { %s162_s19 = scalar_lea.vmem %s388_s0, %s284_s13  ;;  %173 = vst [vmem:[%s165_s16] sm:$0x1] %v336_v0  ;;  %s168_s22 = scalar_lea.vmem %s390_s2, %s396_s9 }
  0x11   : > { %v175_v1 = vld [vmem:[%s162_s19] sm:$0xf]  ;;  %174 = vst [vmem:[%s168_s22] sm:$0x1] %v336_v0 }
  0x12   : > { %v176_v2 = vunpack.c.l.bf16 %v175_v1 }
  0x14   : > { %v178_v3 = vrot.slane %v176_v2, 4  ;;  %v187_v4 = vmul.f32 %v176_v2, %v176_v2 }
  0x16   : > { %v179_v5 = vadd.f32 %v178_v3, %v176_v2  ;;  %v188_v6 = vrot.slane %v187_v4, 4 }
  0x17   : > { %v177_v13 = vld [vmem:[%s165_s16] sm:$0x1] }
  0x18   : > { %v180_v7 = vrot.slane %v179_v5, 2  ;;  %v189_v8 = vadd.f32 %v188_v6, %v187_v4  ;;  %v186_v16 = vld [vmem:[%s168_s22] sm:$0x1] }
  0x1a   : > { %v181_v9 = vadd.f32 %v180_v7, %v179_v5  ;;  %v190_v10 = vrot.slane %v189_v8, 2 }
  0x1c   : > { %v182_v11 = vrot.slane %v181_v9, 1  ;;  %v191_v12 = vadd.f32 %v190_v10, %v189_v8 }
  0x1e   : > { %v183_v14 = vadd.f32 %v182_v11, %v181_v9  ;;  %v192_v15 = vrot.slane %v191_v12, 1 }
  0x20   : > { %v184_v17 = vadd.f32 %v183_v14, %v177_v13  ;;  %v193_v18 = vadd.f32 %v192_v15, %v191_v12 }
  0x22   : > { %185 = vst [vmem:[%s165_s16] sm:$0x1] %v184_v17  ;;  %v194_v19 = vadd.f32 %v193_v18, %v186_v16 }
  0x24   : > { %195 = vst [vmem:[%s168_s22] sm:$0x1] %v194_v19 }
  0x25 PF: > { %s13_s11 = sadd.s32 1, %s334_s11   ;;  %s391_s9 = smov %s330_s10 }
  0x26   : > { %p10_p5 = scmp.ge.s32.totalorder %s13_s11, 4   ;;  %s392_s10 = smov %s394_s12 }
  0x28   :  { %12 = sbr.rel (!%p10_p5) target bundleno = 2 (0x2), region = 70 }

// kernel: resnetv2_forward.70
= control target key start
LH: loop header
LB: loop body
LE: loop exit
PB: predicated region body
PF: predicated region fallthrough
CT: control target
= control target key end

     0   :  { %s417_s12 = smov 0   ;;  %s419_s13 = smov 0   ;;  %s449_s0 = inlined_call_operand.vmem [shape: bf16[2,8,128], index: 0, kind: input, shape index: {}]   ;;  %s450_s1 = inlined_call_operand.vmem [shape: f32[2,1,128], index: 1, kind: input, shape index: {}]   ;;  %s451_s2 = inlined_call_operand.vmem [shape: f32[2,1,128], index: 2, kind: input, shape index: {}]   ;;  %s452_s3 = inlined_call_operand.vmem [shape: bf16[2,8,128], index: 3, kind: output, shape index: {}]  }
   0x1   :  { %s421_s14 = smov 0  }
   0x2 LB: > { %s25_s15 = sadd.s32 1, %s391_s13  ;;  %p342_p0 = scmp.ge.s32.totalorder %s395_s14, 1  ;;  %s395_s14 = sphi %s421_s14, %s13_s14   ;;  %s391_s13 = sphi %s419_s13, %s454_s13   ;;  %s387_s12 = sphi %s417_s12, %s453_s12  }
   0x3   : > { %p27_p1 = scmp.ge.s32.totalorder %s25_s15, 2  ;;  %p171_p2 = scmp.lt.s32.totalorder %s395_s14, 3 }
   0x5   : > { %s456_s15 = smov (%p27_p1, %s25_s15), 0  ;;  %p172_p3 = pnand %p342_p0, %p171_p2 }
   0x6   : > { %p205_p4 = scmp.lt.s32.totalorder (!%p172_p3), %s387_s12, 1 }
   0x7   : > { %175 = sbr.rel (%p172_p3) target bundleno = 29 (0x1d), region = 32 }
   0xe   : > { %s458_s12 = smov (!%p205_p4, %s387_s12), 1 }
   0xf   : > { %s343_s16 = sshll.u32 %s458_s12, 2  ;;  %s214_s19 = scalar_lea.vmem %s450_s1, %s458_s12 }
  0x10   : > { %s211_s22 = scalar_lea.vmem %s449_s0, %s343_s16  ;;  %s217_s25 = scalar_lea.vmem %s451_s2, %s458_s12  ;;  %v345_v1 = vld [vmem:[%s214_s19] ss:$0 sm:$0xff] }
  0x11   : > { %v225_v0 = vld [vmem:[%s211_s22] sm:$0xf]  ;;  %s224_s28 = scalar_lea.vmem %s452_s3, %s343_s16 }
  0x12   : > { %v226_v2 = vunpack.c.l.bf16 %v225_v0  ;;  %v346_v3 = vld [vmem:[%s217_s25] ss:$0 sm:$0xff] }
  0x14   : > { %v234_v4 = vmul.f32 %v345_v1, %v226_v2 }
  0x16   : > { %v242_v5 = vadd.f32 %v346_v3, %v234_v4 }
  0x18   : > { %v243_v6 = vmax.f32 %v242_v5, 0.0 }
  0x1a   : > { %v244_v7 = vpack.c.bf16 %v243_v6, %v243_v6 }
  0x1c   : > { %245 = vst [vmem:[%s224_s28] sm:$0xf] %v244_v7 }
  0x1d PF: > { %s13_s14 = sadd.s32 1, %s395_s14   ;;  %s453_s12 = smov %s391_s13 }
  0x1e   : > { %p10_p5 = scmp.ge.s32.totalorder %s13_s14, 4   ;;  %s454_s13 = smov %s456_s15 }
  0x20   :  { %12 = sbr.rel (!%p10_p5) target bundleno = 2 (0x2), region = 68 }

// kernel: squeeze.68
= control target key start
LH: loop header
LB: loop body
LE: loop exit
PB: predicated region body
PF: predicated region fallthrough
CT: control target
= control target key end

     0   :  { %vm49_vm0 = vcmask 1047556   ;;  %s164_s14 = smov 80   ;;  %s165_s15 = smov 96   ;;  %vm21_vm1 = vcmask 130048   ;;  %s287_s0 = inlined_call_operand.vmem [shape: f32[2,512], index: 0, kind: input, shape index: {}]   ;;  %s288_s1 = inlined_call_operand.vmem [shape: f32[2,32,16], index: 1, kind: output, shape index: {}]  }
   0x1   :  { %v132_v0 = vld [vmem:[%s287_s0 + $0x6] sm:$0x3]  ;;  %v133_v1 = vld [vmem:[%s287_s0 + $0x4] sm:$0x3]  ;;  %v134_v2 = vld [vmem:[%s287_s0 + $0x2] sm:$0x3] }
   0x2   :  { %8 = vst [vmem:[#allocation0 + $0x18] sm:$0x3] %v132_v0  ;;  %13 = vst [vmem:[#allocation0 + $0x10] sm:$0x3] %v133_v1  ;;  %v18_v3 = vld [vmem:[%s287_s0] sm:$0x3] }
   0x3   :  { %17 = vst [vmem:[#allocation0 + $0x8] sm:$0x3] %v134_v2  ;;  %19 = vst [vmem:[#allocation0] sm:$0x3] %v18_v3  ;;  %s163_s0 = smov 112   ;;  %s166_s16 = smov 64  }
   0x4   :  { %s167_s4 = smov 48   ;;  %s168_s5 = smov 32  }
   0x5   :  { %s169_s6 = smov 16  }
   0x9   :  { %v33_v24 = vld [vmem:[#allocation0 + $0x10] sm:$0x3]   ;;  %v40_v27 = vld [vmem:[#allocation0 + $0x18] sm:$0x3]  }
   0xa   :  { %v46_v4 = vld [vmem:[#allocation0] ss:$8 sm:$0xf]   ;;  %v48_v5 = vld [vmem:[#allocation0 - $0x1f] ss:$8 sm:$0xf0]  }
   0xb   :  { %v50_v6 = vsel %vm49_vm0, %v48_v5, %v46_v4  ;;  %v70_v7 = vld [vmem:[#allocation0] ss:$8 sm:$0xf]   ;;  %v72_v8 = vld [vmem:[#allocation0 - $0x1f] ss:$8 sm:$0xf0]  }
   0xc   :  { %51 = vrot.lane.b32.xlu0 %v50_v6, %s163_s0  ;;  %v74_v9 = vsel %vm49_vm0, %v72_v8, %v70_v7  ;;  %v58_v10 = vld [vmem:[#allocation0] ss:$8 sm:$0xf]   ;;  %v60_v11 = vld [vmem:[#allocation0 - $0x1f] ss:$8 sm:$0xf0]  }
   0xd   :  { %75 = vrot.lane.b32.xlu1 %v74_v9, %s164_s14  ;;  %v62_v12 = vsel %vm49_vm0, %v60_v11, %v58_v10  ;;  %v82_v13 = vld [vmem:[#allocation0] ss:$8 sm:$0xf]   ;;  %v84_v14 = vld [vmem:[#allocation0 - $0x1f] ss:$8 sm:$0xf0]  }
   0xe   :  { %v86_v15 = vsel %vm49_vm0, %v84_v14, %v82_v13  ;;  %v94_v16 = vld [vmem:[#allocation0] ss:$8 sm:$0xf]   ;;  %v96_v17 = vld [vmem:[#allocation0 - $0x1f] ss:$8 sm:$0xf0]  }
   0xf   :  { %v106_v18 = vld [vmem:[#allocation0] ss:$8 sm:$0xf]   ;;  %v108_v19 = vld [vmem:[#allocation0 - $0x1f] ss:$8 sm:$0xf0]   ;;  %v98_v21 = vsel %vm49_vm0, %v96_v17, %v94_v16 }
  0x10   :  { %63 = vrot.lane.b32.xlu0 %v62_v12, %s165_s15  ;;  %v118_v20 = vld [vmem:[#allocation0] ss:$8 sm:$0xf]   ;;  %v110_v25 = vsel %vm49_vm0, %v108_v19, %v106_v18  ;;  %v120_v26 = vld [vmem:[#allocation0 - $0x1f] ss:$8 sm:$0xf0]  }
  0x11   :  { %87 = vrot.lane.b32.xlu1 %v86_v15, %s166_s16  ;;  %v20_v22 = vld [vmem:[#allocation0] sm:$0x3]   ;;  %v26_v23 = vld [vmem:[#allocation0 + $0x8] sm:$0x3]   ;;  %138 = vst.msk [vmem:[%s288_s1 + $0x10] sm:$0x1] %vm21_vm1, %v33_v24   ;;  %v122_v28 = vsel %vm49_vm0, %v120_v26, %v118_v20 }
  0x12   :  { %22 = vst.msk [vmem:[%s288_s1] sm:$0x1] %vm21_vm1, %v20_v22   ;;  %135 = vst.msk [vmem:[%s288_s1 + $0x1f] sm:$0x2] %vm21_vm1, %v20_v22  }
  0x13   :  { %136 = vst.msk [vmem:[%s288_s1 + $0x8] sm:$0x1] %vm21_vm1, %v26_v23   ;;  %137 = vst.msk [vmem:[%s288_s1 + $0x27] sm:$0x2] %vm21_vm1, %v26_v23  }
  0x14   :  { %139 = vst.msk [vmem:[%s288_s1 + $0x2f] sm:$0x2] %vm21_vm1, %v33_v24   ;;  %140 = vst.msk [vmem:[%s288_s1 + $0x18] sm:$0x1] %vm21_vm1, %v40_v27   ;;  %99 = vrot.lane.b32.xlu0 %v98_v21, %s167_s4 }
  0x15   :  { %141 = vst.msk [vmem:[%s288_s1 + $0x37] sm:$0x2] %vm21_vm1, %v40_v27   ;;  %111 = vrot.lane.b32.xlu1 %v110_v25, %s168_s5 }
  0x18   :  { %123 = vrot.lane.b32.xlu0 %v122_v28, %s169_s6 }
  0x7e   :  { %v52_v29 = vpop.permute.xlu0 %51  }
  0x7f   :  { %142 = vst.msk [vmem:[%s288_s1 + $0x1] ss:$8 sm:$0xf] %vm21_vm1, %v52_v29   ;;  %143 = vst.msk [vmem:[%s288_s1 + $0x1] ss:$8 sm:$0xf0] %vm21_vm1, %v52_v29   ;;  %v76_v30 = vpop.permute.xlu1 %75  }
  0x80   :  { %146 = vst.msk [vmem:[%s288_s1 + $0x3] ss:$8 sm:$0xf] %vm21_vm1, %v76_v30   ;;  %147 = vst.msk [vmem:[%s288_s1 + $0x3] ss:$8 sm:$0xf0] %vm21_vm1, %v76_v30  }
  0x82   :  { %v64_v31 = vpop.permute.xlu0 %63  }
  0x83   :  { %144 = vst.msk [vmem:[%s288_s1 + $0x2] ss:$8 sm:$0xf] %vm21_vm1, %v64_v31   ;;  %145 = vst.msk [vmem:[%s288_s1 + $0x2] ss:$8 sm:$0xf0] %vm21_vm1, %v64_v31   ;;  %v88_v32 = vpop.permute.xlu1 %87  }
  0x84   :  { %148 = vst.msk [vmem:[%s288_s1 + $0x4] ss:$8 sm:$0xf] %vm21_vm1, %v88_v32   ;;  %149 = vst.msk [vmem:[%s288_s1 + $0x4] ss:$8 sm:$0xf0] %vm21_vm1, %v88_v32  }
  0x86   :  { %v100_v33 = vpop.permute.xlu0 %99  }
  0x87   :  { %150 = vst.msk [vmem:[%s288_s1 + $0x5] ss:$8 sm:$0xf] %vm21_vm1, %v100_v33   ;;  %151 = vst.msk [vmem:[%s288_s1 + $0x5] ss:$8 sm:$0xf0] %vm21_vm1, %v100_v33   ;;  %v112_v34 = vpop.permute.xlu1 %111  }
  0x88   :  { %152 = vst.msk [vmem:[%s288_s1 + $0x6] ss:$8 sm:$0xf] %vm21_vm1, %v112_v34   ;;  %153 = vst.msk [vmem:[%s288_s1 + $0x6] ss:$8 sm:$0xf0] %vm21_vm1, %v112_v34  }
  0x8a   :  { %v124_v35 = vpop.permute.xlu0 %123  }
  0x8b   :  { %154 = vst.msk [vmem:[%s288_s1 + $0x7] ss:$8 sm:$0xf] %vm21_vm1, %v124_v35   ;;  %155 = vst.msk [vmem:[%s288_s1 + $0x7] ss:$8 sm:$0xf0] %vm21_vm1, %v124_v35  }

// kernel: resnetv2_forward.71
= control target key start
LH: loop header
LB: loop body
LE: loop exit
PB: predicated region body
PF: predicated region fallthrough
CT: control target
= control target key end

     0   :  { %v468_v1 = vmov 0   ;;  %s595_s1 = inlined_call_operand.vmem [shape: bf16[128,512], index: 1, kind: input, shape index: {}]   ;;  %s596_s0 = inlined_call_operand.vmem [shape: bf16[16,128], index: 0, kind: input, shape index: {}]   ;;  %s597_s2 = inlined_call_operand.vmem [shape: bf16[16,512], index: 2, kind: output, shape index: {}]  }
   0x1   :  { %v419_v0 = vld [vmem:[%s595_s1 + $0x4] ss:$16 sps:$4 sm:$0xff]   ;;  %264 = vmatprep.mubr.bf16.mxu0 %v468_v1  ;;  %307 = vmatprep.mubr.bf16.mxu1 %v468_v1  ;;  %v421_v2 = vld [vmem:[%s595_s1 + $0xc] ss:$16 sps:$4 sm:$0xff]   ;;  %v423_v3 = vld [vmem:[%s595_s1] ss:$16 sps:$4 sm:$0xff]  }
   0x2   :  { %232 = vmatprep.subr.bf16.mxu0 %v419_v0  ;;  %v424_v4 = vld [vmem:[%s595_s1 + $0x8] ss:$16 sps:$4 sm:$0xff]   ;;  %275 = vmatprep.subr.bf16.mxu1 %v421_v2  ;;  %v425_v5 = vld [vmem:[%s595_s1 + $0x24] ss:$16 sps:$4 sm:$0xff]   ;;  %v427_v6 = vld [vmem:[%s595_s1 + $0x2c] ss:$16 sps:$4 sm:$0xff]  }
   0x3   :  { %233 = vmatpush1.bf16.msra.mxu0 %v423_v3  ;;  %276 = vmatpush1.bf16.msra.mxu1 %v424_v4  ;;  %v429_v7 = vld [vmem:[%s595_s1 + $0x20] ss:$16 sps:$4 sm:$0xff]   ;;  %v430_v8 = vld [vmem:[%s595_s1 + $0x28] ss:$16 sps:$4 sm:$0xff]   ;;  %v431_v9 = vld [vmem:[%s595_s1 + $0x44] ss:$16 sps:$4 sm:$0xff]  }
   0x4   :  { %234 = vmatprep.subr.bf16.mxu0 %v425_v5  ;;  %277 = vmatprep.subr.bf16.mxu1 %v427_v6  ;;  %v433_v10 = vld [vmem:[%s595_s1 + $0x4c] ss:$16 sps:$4 sm:$0xff]   ;;  %v435_v11 = vld [vmem:[%s595_s1 + $0x40] ss:$16 sps:$4 sm:$0xff]   ;;  %v436_v12 = vld [vmem:[%s595_s1 + $0x48] ss:$16 sps:$4 sm:$0xff]  }
   0x5   :  { %v437_v13 = vld [vmem:[%s595_s1 + $0x64] ss:$16 sps:$4 sm:$0xff]   ;;  %v439_v14 = vld [vmem:[%s595_s1 + $0x6c] ss:$16 sps:$4 sm:$0xff]   ;;  %v441_v15 = vld [vmem:[%s595_s1 + $0x60] ss:$16 sps:$4 sm:$0xff]  }
   0x6   :  { %v442_v16 = vld [vmem:[%s595_s1 + $0x68] ss:$16 sps:$4 sm:$0xff]   ;;  %v443_v17 = vld [vmem:[%s595_s1 + $0x84] ss:$16 sps:$4 sm:$0xff]   ;;  %v445_v18 = vld [vmem:[%s595_s1 + $0x8c] ss:$16 sps:$4 sm:$0xff]  }
   0x7   :  { %235 = vmatpush1.bf16.msra.mxu0 %v429_v7  ;;  %278 = vmatpush1.bf16.msra.mxu1 %v430_v8  ;;  %v447_v19 = vld [vmem:[%s595_s1 + $0x80] ss:$16 sps:$4 sm:$0xff]   ;;  %v448_v20 = vld [vmem:[%s595_s1 + $0x88] ss:$16 sps:$4 sm:$0xff]   ;;  %v449_v21 = vld [vmem:[%s595_s1 + $0xa4] ss:$16 sps:$4 sm:$0xff]  }
   0x8   :  { %236 = vmatprep.subr.bf16.mxu0 %v431_v9  ;;  %279 = vmatprep.subr.bf16.mxu1 %v433_v10  ;;  %v451_v22 = vld [vmem:[%s595_s1 + $0xac] ss:$16 sps:$4 sm:$0xff]   ;;  %v453_v23 = vld [vmem:[%s595_s1 + $0xa0] ss:$16 sps:$4 sm:$0xff]   ;;  %v454_v24 = vld [vmem:[%s595_s1 + $0xa8] ss:$16 sps:$4 sm:$0xff]  }
   0x9   :  { %v455_v25 = vld [vmem:[%s595_s1 + $0xc4] ss:$16 sps:$4 sm:$0xff]   ;;  %v457_v26 = vld [vmem:[%s595_s1 + $0xcc] ss:$16 sps:$4 sm:$0xff]   ;;  %v459_v27 = vld [vmem:[%s595_s1 + $0xc0] ss:$16 sps:$4 sm:$0xff]  }
   0xa   :  { %v460_v28 = vld [vmem:[%s595_s1 + $0xc8] ss:$16 sps:$4 sm:$0xff]   ;;  %v461_v29 = vld [vmem:[%s595_s1 + $0xe4] ss:$16 sps:$4 sm:$0xff]   ;;  %v463_v30 = vld [vmem:[%s595_s1 + $0xec] ss:$16 sps:$4 sm:$0xff]  }
   0xb   :  { %237 = vmatpush1.bf16.msra.mxu0 %v435_v11  ;;  %280 = vmatpush1.bf16.msra.mxu1 %v436_v12  ;;  %v465_v31 = vld [vmem:[%s595_s1 + $0xe0] ss:$16 sps:$4 sm:$0xff]   ;;  %v466_v32 = vld [vmem:[%s595_s1 + $0xe8] ss:$16 sps:$4 sm:$0xff]  }
   0xc   :  { %238 = vmatprep.subr.bf16.mxu0 %v437_v13  ;;  %281 = vmatprep.subr.bf16.mxu1 %v439_v14  ;;  %v467_v33 = vld [vmem:[%s596_s0] sm:$0xff]  }
   0xf   :  { %239 = vmatpush1.bf16.msra.mxu0 %v441_v15  ;;  %282 = vmatpush1.bf16.msra.mxu1 %v442_v16 }
  0x10   :  { %240 = vmatprep.subr.bf16.mxu0 %v443_v17  ;;  %283 = vmatprep.subr.bf16.mxu1 %v445_v18 }
  0x13   :  { %241 = vmatpush1.bf16.msra.mxu0 %v447_v19  ;;  %284 = vmatpush1.bf16.msra.mxu1 %v448_v20 }
  0x14   :  { %242 = vmatprep.subr.bf16.mxu0 %v449_v21  ;;  %285 = vmatprep.subr.bf16.mxu1 %v451_v22 }
  0x17   :  { %243 = vmatpush1.bf16.msra.mxu0 %v453_v23  ;;  %286 = vmatpush1.bf16.msra.mxu1 %v454_v24 }
  0x18   :  { %244 = vmatprep.subr.bf16.mxu0 %v455_v25  ;;  %287 = vmatprep.subr.bf16.mxu1 %v457_v26 }
  0x1b   :  { %245 = vmatpush1.bf16.msra.mxu0 %v459_v27  ;;  %288 = vmatpush1.bf16.msra.mxu1 %v460_v28 }
  0x1c   :  { %246 = vmatprep.subr.bf16.mxu0 %v461_v29  ;;  %289 = vmatprep.subr.bf16.mxu1 %v463_v30 }
  0x1f   :  { %247 = vmatpush1.bf16.msra.mxu0 %v465_v31  ;;  %290 = vmatpush1.bf16.msra.mxu1 %v466_v32 }
  0x22   :  { %265 = vmatmul.mubr.bf16.vlgmr.msra.gmra.mrb[0].mxu0 %v467_v33  ;;  %308 = vmatmul.mubr.bf16.vlgmr.msra.gmra.mrb[0].mxu1 %v467_v33 }
  0xf5   :  { %v266_v34 = vpop.f32.mrb[0].mxu0  ;;  %v309_v35 = vpop.f32.mrb[0].mxu1 }
  0xf6   :  { %v268_v36 = vpop.f32.mrb[1].mxu0  ;;  %v311_v37 = vpop.f32.mrb[1].mxu1 }
  0xf7   :  { %v414_v38 = vpack.c.bf16 %v268_v36, %v266_v34  ;;  %v415_v39 = vpack.c.bf16 %v311_v37, %v309_v35  ;;  %v270_v40 = vpop.f32.mrb[2].mxu0  ;;  %v313_v41 = vpop.f32.mrb[2].mxu1 }
  0xf8   :  { %v272_v42 = vpop.f32.mrb[3].mxu0  ;;  %v315_v43 = vpop.f32.mrb[3].mxu1 }
  0xf9   :  { %369 = vst [vmem:[%s597_s2] sm:$0xff] %v414_v38  ;;  %370 = vst [vmem:[%s597_s2 + $0x8] sm:$0xff] %v415_v39  ;;  %v416_v44 = vpack.c.bf16 %v272_v42, %v270_v40  ;;  %v417_v45 = vpack.c.bf16 %v315_v43, %v313_v41 }
  0xfb   :  { %371 = vst [vmem:[%s597_s2 + $0x10] sm:$0xff] %v416_v44  ;;  %372 = vst [vmem:[%s597_s2 + $0x18] sm:$0xff] %v417_v45 }

// kernel: resnetv2_forward.73
= control target key start
LH: loop header
LB: loop body
LE: loop exit
PB: predicated region body
PF: predicated region fallthrough
CT: control target
= control target key end

     0   :  { %s800_s21 = smov 0   ;;  %s802_s22 = smov 0   ;;  %s853_s0 = inlined_call_operand.vmem [shape: bf16[2,8,512], index: 0, kind: input, shape index: {}]   ;;  %s854_s1 = inlined_call_operand.vmem [shape: f32[2,1,512], index: 1, kind: input, shape index: {}]   ;;  %s855_s2 = inlined_call_operand.vmem [shape: f32[2,1,512], index: 2, kind: input, shape index: {}]   ;;  %s856_s3 = inlined_call_operand.vmem [shape: bf16[2,8,512], index: 3, kind: input, shape index: {}]   ;;  %s857_s4 = inlined_call_operand.vmem [shape: f32[2,1,512], index: 4, kind: input, shape index: {}]   ;;  %s858_s5 = inlined_call_operand.vmem [shape: f32[2,1,512], index: 5, kind: input, shape index: {}]   ;;  %s859_s6 = inlined_call_operand.vmem [shape: bf16[2,8,512], index: 6, kind: output, shape index: {}]  }
   0x1   :  { %s804_s23 = smov 0  }
   0x2 LB: > { %s28_s24 = sadd.s32 1, %s759_s22  ;;  %p697_p0 = scmp.ge.s32.totalorder %s763_s23, 1  ;;  %s763_s23 = sphi %s804_s23, %s16_s23   ;;  %s759_s22 = sphi %s802_s22, %s861_s22   ;;  %s755_s21 = sphi %s800_s21, %s860_s21  }
   0x3   : > { %p30_p1 = scmp.ge.s32.totalorder %s28_s24, 2  ;;  %p284_p2 = scmp.lt.s32.totalorder %s763_s23, 3 }
   0x5   : > { %s863_s24 = smov (%p30_p1, %s28_s24), 0  ;;  %p285_p3 = pnand %p697_p0, %p284_p2 }
   0x6   : > { %p347_p4 = scmp.lt.s32.totalorder (!%p285_p3), %s755_s21, 1  ;;  %v398_v0 = vlaneseq (!%p285_p3) }
   0x7   : > { %288 = sbr.rel (%p285_p3) target bundleno = 38 (0x26), region = 44 }
   0x8   : > { %v399_v1 = vshrl.u32 (!%p285_p3), %v398_v0, 7 }
   0xa   : > { %v400_v2 = vsub.s32 (!%p285_p3), 0, %v399_v1  ;;  %v404_v3 = vsub.s32 (!%p285_p3), 1, %v399_v1  ;;  %v408_v7 = vsub.s32 (!%p285_p3), 2, %v399_v1  ;;  %v412_v8 = vsub.s32 (!%p285_p3), 3, %v399_v1 }
   0xe   : > { %s865_s21 = smov (!%p347_p4, %s755_s21), 1 }
   0xf   : > { %s818_s25 = sshll.u32 %s865_s21, 4  ;;  %s700_s26 = sshll.u32 %s865_s21, 2 }
  0x10   : > { %s355_s29 = scalar_lea.vmem %s853_s0, %s818_s25  ;;  %s359_s8 = scalar_lea.vmem %s854_s1, %s700_s26 }
  0x11   : > { %s363_s11 = scalar_lea.vmem %s855_s2, %s700_s26  ;;  %s372_s14 = scalar_lea.vmem %s856_s3, %s818_s25  ;;  %v390_v4 = vld [vmem:[%s355_s29] sm:$0xff]  ;;  %v391_v5 = vld [vmem:[%s355_s29 + $0x8] sm:$0xff] }
  0x12   : > { %v396_v6 = vld [vmem:[%s359_s8] sm:$0xf]  ;;  %s376_s17 = scalar_lea.vmem %s857_s4, %s700_s26  ;;  %s380_s20 = scalar_lea.vmem %s858_s5, %s700_s26  ;;  %v392_v9 = vunpack.c.l.bf16 %v390_v4  ;;  %v393_v10 = vunpack.c.h.bf16 %v390_v4  ;;  %v394_v11 = vunpack.c.l.bf16 %v391_v5  ;;  %v395_v12 = vunpack.c.h.bf16 %v391_v5  ;;  %v449_v15 = vld [vmem:[%s372_s14 + $0x8] sm:$0xff] }
  0x13   : > { %v422_v13 = vld [vmem:[%s363_s11] sm:$0xf]  ;;  %v401_v16 = vrot.slane %v396_v6, %v400_v2  ;;  %v405_v17 = vrot.slane %v396_v6, %v404_v3  ;;  %v452_v24 = vunpack.c.l.bf16 %v449_v15  ;;  %v453_v25 = vunpack.c.h.bf16 %v449_v15  ;;  %s389_s27 = scalar_lea.vmem %s859_s6, %s818_s25 }
  0x14   : > { %v448_v14 = vld [vmem:[%s372_s14] sm:$0xff]  ;;  %v427_v18 = vrot.slane %v422_v13, %v400_v2  ;;  %v431_v19 = vrot.slane %v422_v13, %v404_v3  ;;  %v409_v32 = vrot.slane %v396_v6, %v408_v7  ;;  %v413_v33 = vrot.slane %v396_v6, %v412_v8 }
  0x15   : > { %v454_v20 = vld [vmem:[%s376_s17] sm:$0xf]  ;;  %v450_v22 = vunpack.c.l.bf16 %v448_v14  ;;  %v451_v23 = vunpack.c.h.bf16 %v448_v14  ;;  %v418_v26 = vmul.f32 %v401_v16, %v392_v9  ;;  %v419_v27 = vmul.f32 %v405_v17, %v393_v10 }
  0x16   : > { %v480_v21 = vld [vmem:[%s380_s20] sm:$0xf]  ;;  %v459_v28 = vrot.slane %v454_v20, %v400_v2  ;;  %v463_v29 = vrot.slane %v454_v20, %v404_v3  ;;  %v420_v38 = vmul.f32 %v409_v32, %v394_v11  ;;  %v421_v39 = vmul.f32 %v413_v33, %v395_v12 }
  0x17   : > { %v485_v30 = vrot.slane %v480_v21, %v400_v2  ;;  %v489_v31 = vrot.slane %v480_v21, %v404_v3  ;;  %v444_v34 = vadd.f32 %v427_v18, %v418_v26  ;;  %v445_v35 = vadd.f32 %v431_v19, %v419_v27 }
  0x18   : > { %v476_v36 = vmul.f32 %v459_v28, %v450_v22  ;;  %v477_v37 = vmul.f32 %v463_v29, %v451_v23  ;;  %v435_v40 = vrot.slane %v422_v13, %v408_v7  ;;  %v439_v41 = vrot.slane %v422_v13, %v412_v8 }
  0x19   : > { %v467_v44 = vrot.slane %v454_v20, %v408_v7  ;;  %v471_v45 = vrot.slane %v454_v20, %v412_v8  ;;  %v493_v48 = vrot.slane %v480_v21, %v408_v7  ;;  %v497_v49 = vrot.slane %v480_v21, %v412_v8 }
  0x1a   : > { %v502_v42 = vadd.f32 %v485_v30, %v476_v36  ;;  %v503_v43 = vadd.f32 %v489_v31, %v477_v37  ;;  %v446_v46 = vadd.f32 %v435_v40, %v420_v38  ;;  %v447_v47 = vadd.f32 %v439_v41, %v421_v39 }
  0x1b   : > { %v478_v52 = vmul.f32 %v467_v44, %v452_v24  ;;  %v479_v53 = vmul.f32 %v471_v45, %v453_v25 }
  0x1c   : > { %v506_v50 = vadd.f32 %v502_v42, %v444_v34  ;;  %v507_v51 = vadd.f32 %v503_v43, %v445_v35 }
  0x1d   : > { %v504_v56 = vadd.f32 %v493_v48, %v478_v52  ;;  %v505_v57 = vadd.f32 %v497_v49, %v479_v53 }
  0x1e   : > { %v510_v54 = vmax.f32 %v506_v50, 0.0  ;;  %v511_v55 = vmax.f32 %v507_v51, 0.0 }
  0x1f   : > { %v508_v59 = vadd.f32 %v504_v56, %v446_v46  ;;  %v509_v60 = vadd.f32 %v505_v57, %v447_v47 }
  0x20   : > { %v715_v58 = vpack.c.bf16 %v511_v55, %v510_v54 }
  0x21   : > { %v512_v61 = vmax.f32 %v508_v59, 0.0  ;;  %v513_v62 = vmax.f32 %v509_v60, 0.0 }
  0x22   : > { %530 = vst [vmem:[%s389_s27] sm:$0xff] %v715_v58 }
  0x23   : > { %v716_v63 = vpack.c.bf16 %v513_v62, %v512_v61 }
  0x25   : > { %531 = vst [vmem:[%s389_s27 + $0x8] sm:$0xff] %v716_v63 }
  0x26 PF: > { %s16_s23 = sadd.s32 1, %s763_s23   ;;  %s860_s21 = smov %s759_s22 }
  0x27   : > { %p13_p5 = scmp.ge.s32.totalorder %s16_s23, 4   ;;  %s861_s22 = smov %s863_s24 }
  0x29   :  { %15 = sbr.rel (!%p13_p5) target bundleno = 2 (0x2), region = 89 }

</bundles_post_ra>
